<compile_context>
chip_gen: v6e
topology: v6e:2x2x1
jax: 0.10.0
libtpu: 0.0.40
codegen_flags: <defaults>
</compile_context>

<pallas_src>
import numpy as np
import jax
import jax.numpy as jnp
from jax.experimental import pallas as pl
from jax.experimental.pallas import tpu as pltpu

BT = 128  # images per batch tile == one full lane width


# ------------------------------- Pallas kernel ------------------------------

def _lenet_kernel(x_ref, m1_ref, b1_ref, s1_ref, m2_ref, b2_ref, s2_ref,
                  w3_ref, b3_ref, w4_ref, b4_ref,
                  o_ref, p1_ref, u1_ref, p2_ref, u2_ref):
    f32, bf16 = jnp.float32, jnp.bfloat16
    Xb = x_ref[0].astype(bf16)                          # (32, 28*BT), rows 28..31 are zero pad

    # ---- conv1 (1->6, k=5) as ONE GEMM against a banded weight -------------
    # im2col: j-hoisted -> 5 lane-aligned block copies; scratch rows = (j, h)
    for j in range(5):
        p1_ref[j * 32:(j + 1) * 32, :] = Xb[:, j * BT:(j + 24) * BT]
    c1 = jnp.dot(m1_ref[...], p1_ref[...], preferred_element_type=f32) + b1_ref[...]
    c1 = jnp.maximum(c1, 0.0)                           # (144, 24*BT) f32, rows=(co,y), cols=(w,b)

    # ---- maxpool 2x2 #1: W phase = aligned slice+max, H phase = selector ---
    for w in range(12):
        u1_ref[:, w * BT:(w + 1) * BT] = jnp.maximum(
            c1[:, (2 * w) * BT:(2 * w + 1) * BT],
            c1[:, (2 * w + 1) * BT:(2 * w + 2) * BT]).astype(bf16)
    r1 = jnp.dot(s1_ref[...], u1_ref[...], preferred_element_type=f32)   # (160, 12*BT)
    h1 = jnp.maximum(r1[:80, :], r1[80:, :]).astype(bf16)                # (80, 12*BT), rows 72..79 = 0

    # ---- conv2 (6->16, k=5) as ONE GEMM against a banded weight ------------
    for j in range(5):
        p2_ref[j * 80:(j + 1) * 80, :] = h1[:, j * BT:(j + 8) * BT]
    c2 = jnp.dot(m2_ref[...], p2_ref[...], preferred_element_type=f32) + b2_ref[...]
    c2 = jnp.maximum(c2, 0.0)                           # (128, 8*BT) f32, rows=(co,y), cols=(x,b)

    # ---- maxpool 2x2 #2 ------------------------------------------------------
    for w in range(4):
        u2_ref[:, w * BT:(w + 1) * BT] = jnp.maximum(
            c2[:, (2 * w) * BT:(2 * w + 1) * BT],
            c2[:, (2 * w + 1) * BT:(2 * w + 2) * BT]).astype(bf16)
    r2 = jnp.dot(s2_ref[...], u2_ref[...], preferred_element_type=f32)   # (128, 4*BT)
    h2 = jnp.maximum(r2[:64, :], r2[64:, :]).astype(bf16)                # (64, 4*BT), rows=(co,yo)

    # ---- fc1 + tanh: 4 accumulating (120,64)x(64,BT) matmuls, one per x ----
    z1 = b3_ref[...]                                    # (120, 1) f32, broadcasts on lanes
    for xo in range(4):
        z1 = z1 + jnp.dot(w3_ref[xo], h2[:, xo * BT:(xo + 1) * BT],
                          preferred_element_type=f32)
    a1 = jnp.tanh(z1).astype(bf16)                      # (120, BT)

    # ---- fc2 + sigmoid (sigmoid(z) == (tanh(z/2)+1)/2, stable, EUP) --------
    z2 = jnp.dot(w4_ref[...], a1, preferred_element_type=f32) + b4_ref[...]   # (10, BT)
    o_ref[0] = 0.5 * (jnp.tanh(0.5 * z2) + 1.0)


# ------------------------------ host-side glue ------------------------------

def _const_spec(shape):
    zeros = (0,) * len(shape)
    return pl.BlockSpec(shape, lambda i, _z=None: zeros) if False else \
           pl.BlockSpec(shape, lambda i: zeros)


def net_forward(x, packed):
    """x: (B, 1, 28, 28) f32 NCHW -> (B, 10) sigmoid outputs."""
    B = x.shape[0]
    T = pl.cdiv(B, BT)
    Bp = T * BT

    xs = x[:, 0, :, :]                                   # (B, 28, 28)
    xs = jnp.pad(xs, ((0, Bp - B), (0, 4), (0, 0)))      # pad batch to tile; H 28 -> 32 (zeros)
    # X[t, h, w*BT + b] = x[t*BT + b, 0, h, w]   (batch on the lane axis)
    X = xs.reshape(T, BT, 32, 28).transpose(0, 2, 3, 1).reshape(T, 32, 28 * BT)

    consts = packed
    in_specs = [pl.BlockSpec((1, 32, 28 * BT), lambda i: (i, 0, 0))]
    in_specs += [_const_spec(c.shape) for c in consts]

    out = pl.pallas_call(
        _lenet_kernel,
        out_shape=jax.ShapeDtypeStruct((T, 10, BT), jnp.float32),
        grid=(T,),
        in_specs=in_specs,
        out_specs=pl.BlockSpec((1, 10, BT), lambda i: (i, 0, 0)),
        scratch_shapes=[pltpu.VMEM((160, 24 * BT), jnp.bfloat16),   # conv1 im2col (j, h)
                        pltpu.VMEM((144, 12 * BT), jnp.bfloat16),   # pool1 W-phase result
                        pltpu.VMEM((400, 8 * BT), jnp.bfloat16),    # conv2 im2col (j, ci, h)
                        pltpu.VMEM((128, 4 * BT), jnp.bfloat16)],   # pool2 W-phase result
        compiler_params=pltpu.CompilerParams(
            dimension_semantics=("parallel",),
            vmem_limit_bytes=48 * 1024 * 1024),
    )(X, *consts)
    return out.transpose(0, 2, 1).reshape(Bp, 10)[:B]


# ------------------------- parameter init / packing --------------------------

def init_params(key):
    """Deterministic synthetic params with PyTorch shapes."""
    ks = jax.random.split(key, 8)

    def u(k, shape, fan_in):
        bound = 1.0 / float(fan_in) ** 0.5
        return jax.random.uniform(k, shape, jnp.float32, -bound, bound)

    W1 = u(ks[0], (6, 1, 5, 5), 25);   B1 = u(ks[1], (6,), 25)
    W2 = u(ks[2], (16, 6, 5, 5), 150); B2 = u(ks[3], (16,), 150)
    W3 = u(ks[4], (120, 256), 256);    B3 = u(ks[5], (120,), 256)
    W4 = u(ks[6], (10, 120), 120);     B4 = u(ks[7], (10,), 120)
    return (W1, B1, W2, B2, W3, B3, W4, B4)


def pack_params(params):
    """Repack PyTorch-shaped params into kernel constants:
    banded conv weights (spatial row dim rides along), stacked even/odd
    row-pool selectors, per-x-block split FC1 weights.  MXU operands -> bf16."""
    W1, B1, W2, B2, W3, B3, W4, B4 = [np.asarray(p, np.float32) for p in params]

    # conv1 banded weight: rows (co, y) [144], cols (j, h) [5*32=160, h padded]
    M1 = np.zeros((144, 160), np.float32)
    for co in range(6):
        for y in range(24):
            for j in range(5):
                for i in range(5):
                    M1[co * 24 + y, j * 32 + y + i] = W1[co, 0, i, j]
    b1 = np.repeat(B1, 24).reshape(144, 1)

    # conv2 banded weight: rows (co, y) [128], cols (j, ci, h) [5*80=400, padded]
    M2 = np.zeros((128, 400), np.float32)
    for co in range(16):
        for y in range(8):
            for j in range(5):
                for ci in range(6):
                    for i in range(5):
                        M2[co * 8 + y, j * 80 + ci * 12 + y + i] = W2[co, ci, i, j]
    b2 = np.repeat(B2, 8).reshape(128, 1)

    # pool1 row (H) selectors, stacked even/odd (output padded 72 -> 80 rows/half)
    S1 = np.zeros((160, 144), np.float32)
    for co in range(6):
        for ho in range(12):
            S1[co * 12 + ho, co * 24 + 2 * ho] = 1.0
            S1[80 + co * 12 + ho, co * 24 + 2 * ho + 1] = 1.0
    # pool2 row (H) selectors, stacked even/odd
    S2 = np.zeros((128, 128), np.float32)
    for co in range(16):
        for yo in range(4):
            S2[co * 4 + yo, co * 8 + 2 * yo] = 1.0
            S2[64 + co * 4 + yo, co * 8 + 2 * yo + 1] = 1.0

    # fc1 weight split per pooled-map x block: torch flatten order is (co, yo, xo)
    W3s = np.zeros((4, 120, 64), np.float32)
    for xo in range(4):
        for co in range(16):
            for yo in range(4):
                W3s[xo, :, co * 4 + yo] = W3[:, co * 16 + yo * 4 + xo]

    bf = jnp.bfloat16
    return (jnp.asarray(M1, bf), jnp.asarray(b1, jnp.float32), jnp.asarray(S1, bf),
            jnp.asarray(M2, bf), jnp.asarray(b2, jnp.float32), jnp.asarray(S2, bf),
            jnp.asarray(W3s, bf), jnp.asarray(B3.reshape(120, 1), jnp.float32),
            jnp.asarray(W4, bf), jnp.asarray(B4.reshape(10, 1), jnp.float32))


# ------------------------------ pure-JAX reference ---------------------------

def reference_forward(x, params):
    W1, B1, W2, B2, W3, B3, W4, B4 = params
    hi = jax.lax.Precision.HIGHEST

    def conv_relu(v, w, b):
        y = jax.lax.conv_general_dilated(
            v, w, (1, 1), "VALID",
            dimension_numbers=("NCHW", "OIHW", "NCHW"), precision=hi)
        return jnp.maximum(y + b[None, :, None, None], 0.0)

    def pool(v):
        Bn, C, H, W = v.shape
        return v.reshape(Bn, C, H // 2, 2, W // 2, 2).max(axis=(3, 5))

    y = pool(conv_relu(x, W1, B1))
    y = pool(conv_relu(y, W2, B2))
    f = y.reshape(y.shape[0], 16 * 4 * 4)
    h = jnp.tanh(jnp.dot(f, W3.T, precision=hi) + B3)
    z = jnp.dot(h, W4.T, precision=hi) + B4
    return jax.nn.sigmoid(z)


# ----------------------------------- main ------------------------------------

if __name__ == "__main__":
    key = jax.random.PRNGKey(0)
    k_x, k_p = jax.random.split(key)
    x = jax.random.normal(k_x, (2, 1, 28, 28), dtype=jnp.float32)  # NCHW (28x28 per fc1 size)
    params = init_params(k_p)
    packed = pack_params(params)

    fwd = jax.jit(net_forward)
    out = jax.block_until_ready(fwd(x, packed))

    assert out.shape == (2, 10), out.shape
    assert bool(jnp.all(jnp.isfinite(out)))
    assert bool(jnp.all((out >= 0.0) & (out <= 1.0)))  # sigmoid range

    ref = jax.block_until_ready(reference_forward(x, params))
    err = float(jnp.max(jnp.abs(out - ref)))
    assert err < 2e-2, f"mismatch vs reference: {err}"

    print("KERNEL_OK")
</pallas_src>

<mosaic_0001>
module attributes {stable_mosaic.version = 11 : i64} {
  func.func @_lenet_kernel(%arg0: i32, %arg1: memref<1x32x3584xf32, #tpu.memory_space<vmem>>, %arg2: memref<144x160xbf16, #tpu.memory_space<vmem>>, %arg3: memref<144x1xf32, #tpu.memory_space<vmem>>, %arg4: memref<160x144xbf16, #tpu.memory_space<vmem>>, %arg5: memref<128x400xbf16, #tpu.memory_space<vmem>>, %arg6: memref<128x1xf32, #tpu.memory_space<vmem>>, %arg7: memref<128x128xbf16, #tpu.memory_space<vmem>>, %arg8: memref<4x120x64xbf16, #tpu.memory_space<vmem>>, %arg9: memref<120x1xf32, #tpu.memory_space<vmem>>, %arg10: memref<10x120xbf16, #tpu.memory_space<vmem>>, %arg11: memref<10x1xf32, #tpu.memory_space<vmem>>, %arg12: memref<1x10x128xf32, #tpu.memory_space<vmem>>, %arg13: memref<160x3072xbf16, #tpu.memory_space<vmem>>, %arg14: memref<144x1536xbf16, #tpu.memory_space<vmem>>, %arg15: memref<400x1024xbf16, #tpu.memory_space<vmem>>, %arg16: memref<128x512xbf16, #tpu.memory_space<vmem>>) attributes {dimension_semantics = [#tpu.dimension_semantics<parallel>], iteration_bounds = array<i64: 1>, scalar_prefetch = 0 : i64, scratch_operands = 4 : i64, tpu.core_type = #tpu.core_type<tc>, window_params = [{transform_indices = @transform_0, window_bounds = array<i64: 1, 32, 3584>}, {pipeline_mode = #tpu.pipeline_mode<synchronous>, transform_indices = @transform_1, window_bounds = array<i64: 144, 160>}, {pipeline_mode = #tpu.pipeline_mode<synchronous>, transform_indices = @transform_2, window_bounds = array<i64: 144, 1>}, {pipeline_mode = #tpu.pipeline_mode<synchronous>, transform_indices = @transform_3, window_bounds = array<i64: 160, 144>}, {pipeline_mode = #tpu.pipeline_mode<synchronous>, transform_indices = @transform_4, window_bounds = array<i64: 128, 400>}, {pipeline_mode = #tpu.pipeline_mode<synchronous>, transform_indices = @transform_5, window_bounds = array<i64: 128, 1>}, {pipeline_mode = #tpu.pipeline_mode<synchronous>, transform_indices = @transform_6, window_bounds = array<i64: 128, 128>}, {pipeline_mode = #tpu.pipeline_mode<synchronous>, transform_indices = @transform_7, window_bounds = array<i64: 4, 120, 64>}, {pipeline_mode = #tpu.pipeline_mode<synchronous>, transform_indices = @transform_8, window_bounds = array<i64: 120, 1>}, {pipeline_mode = #tpu.pipeline_mode<synchronous>, transform_indices = @transform_9, window_bounds = array<i64: 10, 120>}, {pipeline_mode = #tpu.pipeline_mode<synchronous>, transform_indices = @transform_10, window_bounds = array<i64: 10, 1>}, {transform_indices = @transform_11, window_bounds = array<i64: 1, 10, 128>}]} {
    %c0 = arith.constant 0 : index
    %c0_0 = arith.constant 0 : index
    %c0_1 = arith.constant 0 : index
    %0 = vector.load %arg1[%c0, %c0_0, %c0_1] : memref<1x32x3584xf32, #tpu.memory_space<vmem>>, vector<1x32x3584xf32>
    %1 = vector.shape_cast %0 : vector<1x32x3584xf32> to vector<32x3584xf32>
    %2 = arith.truncf %1 : vector<32x3584xf32> to vector<32x3584xbf16>
    %3 = vector.extract_strided_slice %2 {offsets = [0, 0], sizes = [32, 3072], strides = [1, 1]} : vector<32x3584xbf16> to vector<32x3072xbf16>
    %c0_2 = arith.constant 0 : index
    %c0_3 = arith.constant 0 : index
    %4 = vector.load %arg13[%c0_2, %c0_3] : memref<160x3072xbf16, #tpu.memory_space<vmem>>, vector<32x3072xbf16>
    tpu.vector_store %arg13[%c0_2, %c0_3], %3 {strides = array<i32>} : memref<160x3072xbf16, #tpu.memory_space<vmem>>, vector<32x3072xbf16>,
    %5 = vector.extract_strided_slice %2 {offsets = [0, 128], sizes = [32, 3072], strides = [1, 1]} : vector<32x3584xbf16> to vector<32x3072xbf16>
    %c32 = arith.constant 32 : index
    %c0_4 = arith.constant 0 : index
    %6 = vector.load %arg13[%c32, %c0_4] : memref<160x3072xbf16, #tpu.memory_space<vmem>>, vector<32x3072xbf16>
    tpu.vector_store %arg13[%c32, %c0_4], %5 {strides = array<i32>} : memref<160x3072xbf16, #tpu.memory_space<vmem>>, vector<32x3072xbf16>,
    %7 = vector.extract_strided_slice %2 {offsets = [0, 256], sizes = [32, 3072], strides = [1, 1]} : vector<32x3584xbf16> to vector<32x3072xbf16>
    %c64 = arith.constant 64 : index
    %c0_5 = arith.constant 0 : index
    %8 = vector.load %arg13[%c64, %c0_5] : memref<160x3072xbf16, #tpu.memory_space<vmem>>, vector<32x3072xbf16>
    tpu.vector_store %arg13[%c64, %c0_5], %7 {strides = array<i32>} : memref<160x3072xbf16, #tpu.memory_space<vmem>>, vector<32x3072xbf16>,
    %9 = vector.extract_strided_slice %2 {offsets = [0, 384], sizes = [32, 3072], strides = [1, 1]} : vector<32x3584xbf16> to vector<32x3072xbf16>
    %c96 = arith.constant 96 : index
    %c0_6 = arith.constant 0 : index
    %10 = vector.load %arg13[%c96, %c0_6] : memref<160x3072xbf16, #tpu.memory_space<vmem>>, vector<32x3072xbf16>
    tpu.vector_store %arg13[%c96, %c0_6], %9 {strides = array<i32>} : memref<160x3072xbf16, #tpu.memory_space<vmem>>, vector<32x3072xbf16>,
    %11 = vector.extract_strided_slice %2 {offsets = [0, 512], sizes = [32, 3072], strides = [1, 1]} : vector<32x3584xbf16> to vector<32x3072xbf16>
    %c128 = arith.constant 128 : index
    %c0_7 = arith.constant 0 : index
    %12 = vector.load %arg13[%c128, %c0_7] : memref<160x3072xbf16, #tpu.memory_space<vmem>>, vector<32x3072xbf16>
    tpu.vector_store %arg13[%c128, %c0_7], %11 {strides = array<i32>} : memref<160x3072xbf16, #tpu.memory_space<vmem>>, vector<32x3072xbf16>,
    %c0_8 = arith.constant 0 : index
    %c0_9 = arith.constant 0 : index
    %13 = vector.load %arg2[%c0_8, %c0_9] : memref<144x160xbf16, #tpu.memory_space<vmem>>, vector<144x160xbf16>
    %c0_10 = arith.constant 0 : index
    %c0_11 = arith.constant 0 : index
    %14 = vector.load %arg13[%c0_10, %c0_11] : memref<160x3072xbf16, #tpu.memory_space<vmem>>, vector<160x3072xbf16>
    %cst = arith.constant dense<0.000000e+00> : vector<144x3072xf32>
    %15 = tpu.matmul %13, %14, %cst {dimension_numbers = #tpu.dot_dimension_numbers<[1], [0], [0], [1], [0, 0, 1, 1], [], []>} : vector<144x160xbf16>, vector<160x3072xbf16>, vector<144x3072xf32> -> vector<144x3072xf32>
    %c0_12 = arith.constant 0 : index
    %c0_13 = arith.constant 0 : index
    %16 = vector.load %arg3[%c0_12, %c0_13] : memref<144x1xf32, #tpu.memory_space<vmem>>, vector<144x1xf32>
    %17 = vector.broadcast %16 : vector<144x1xf32> to vector<144x3072xf32>
    %18 = arith.addf %15, %17 : vector<144x3072xf32>
    %cst_14 = arith.constant 0.000000e+00 : f32
    %19 = vector.broadcast %cst_14 : f32 to vector<144x3072xf32>
    %20 = arith.maximumf %18, %19 : vector<144x3072xf32>
    %21 = vector.extract_strided_slice %20 {offsets = [0, 0], sizes = [144, 128], strides = [1, 1]} : vector<144x3072xf32> to vector<144x128xf32>
    %22 = vector.extract_strided_slice %20 {offsets = [0, 128], sizes = [144, 128], strides = [1, 1]} : vector<144x3072xf32> to vector<144x128xf32>
    %23 = arith.maximumf %21, %22 : vector<144x128xf32>
    %24 = arith.truncf %23 : vector<144x128xf32> to vector<144x128xbf16>
    %c0_15 = arith.constant 0 : index
    %c0_16 = arith.constant 0 : index
    %25 = vector.load %arg14[%c0_15, %c0_16] : memref<144x1536xbf16, #tpu.memory_space<vmem>>, vector<144x128xbf16>
    tpu.vector_store %arg14[%c0_15, %c0_16], %24 {strides = array<i32>} : memref<144x1536xbf16, #tpu.memory_space<vmem>>, vector<144x128xbf16>,
    %26 = vector.extract_strided_slice %20 {offsets = [0, 256], sizes = [144, 128], strides = [1, 1]} : vector<144x3072xf32> to vector<144x128xf32>
    %27 = vector.extract_strided_slice %20 {offsets = [0, 384], sizes = [144, 128], strides = [1, 1]} : vector<144x3072xf32> to vector<144x128xf32>
    %28 = arith.maximumf %26, %27 : vector<144x128xf32>
    %29 = arith.truncf %28 : vector<144x128xf32> to vector<144x128xbf16>
    %c0_17 = arith.constant 0 : index
    %c128_18 = arith.constant 128 : index
    %30 = vector.load %arg14[%c0_17, %c128_18] : memref<144x1536xbf16, #tpu.memory_space<vmem>>, vector<144x128xbf16>
    tpu.vector_store %arg14[%c0_17, %c128_18], %29 {strides = array<i32>} : memref<144x1536xbf16, #tpu.memory_space<vmem>>, vector<144x128xbf16>,
    %31 = vector.extract_strided_slice %20 {offsets = [0, 512], sizes = [144, 128], strides = [1, 1]} : vector<144x3072xf32> to vector<144x128xf32>
    %32 = vector.extract_strided_slice %20 {offsets = [0, 640], sizes = [144, 128], strides = [1, 1]} : vector<144x3072xf32> to vector<144x128xf32>
    %33 = arith.maximumf %31, %32 : vector<144x128xf32>
    %34 = arith.truncf %33 : vector<144x128xf32> to vector<144x128xbf16>
    %c0_19 = arith.constant 0 : index
    %c256 = arith.constant 256 : index
    %35 = vector.load %arg14[%c0_19, %c256] : memref<144x1536xbf16, #tpu.memory_space<vmem>>, vector<144x128xbf16>
    tpu.vector_store %arg14[%c0_19, %c256], %34 {strides = array<i32>} : memref<144x1536xbf16, #tpu.memory_space<vmem>>, vector<144x128xbf16>,
    %36 = vector.extract_strided_slice %20 {offsets = [0, 768], sizes = [144, 128], strides = [1, 1]} : vector<144x3072xf32> to vector<144x128xf32>
    %37 = vector.extract_strided_slice %20 {offsets = [0, 896], sizes = [144, 128], strides = [1, 1]} : vector<144x3072xf32> to vector<144x128xf32>
    %38 = arith.maximumf %36, %37 : vector<144x128xf32>
    %39 = arith.truncf %38 : vector<144x128xf32> to vector<144x128xbf16>
    %c0_20 = arith.constant 0 : index
    %c384 = arith.constant 384 : index
    %40 = vector.load %arg14[%c0_20, %c384] : memref<144x1536xbf16, #tpu.memory_space<vmem>>, vector<144x128xbf16>
    tpu.vector_store %arg14[%c0_20, %c384], %39 {strides = array<i32>} : memref<144x1536xbf16, #tpu.memory_space<vmem>>, vector<144x128xbf16>,
    %41 = vector.extract_strided_slice %20 {offsets = [0, 1024], sizes = [144, 128], strides = [1, 1]} : vector<144x3072xf32> to vector<144x128xf32>
    %42 = vector.extract_strided_slice %20 {offsets = [0, 1152], sizes = [144, 128], strides = [1, 1]} : vector<144x3072xf32> to vector<144x128xf32>
    %43 = arith.maximumf %41, %42 : vector<144x128xf32>
    %44 = arith.truncf %43 : vector<144x128xf32> to vector<144x128xbf16>
    %c0_21 = arith.constant 0 : index
    %c512 = arith.constant 512 : index
    %45 = vector.load %arg14[%c0_21, %c512] : memref<144x1536xbf16, #tpu.memory_space<vmem>>, vector<144x128xbf16>
    tpu.vector_store %arg14[%c0_21, %c512], %44 {strides = array<i32>} : memref<144x1536xbf16, #tpu.memory_space<vmem>>, vector<144x128xbf16>,
    %46 = vector.extract_strided_slice %20 {offsets = [0, 1280], sizes = [144, 128], strides = [1, 1]} : vector<144x3072xf32> to vector<144x128xf32>
    %47 = vector.extract_strided_slice %20 {offsets = [0, 1408], sizes = [144, 128], strides = [1, 1]} : vector<144x3072xf32> to vector<144x128xf32>
    %48 = arith.maximumf %46, %47 : vector<144x128xf32>
    %49 = arith.truncf %48 : vector<144x128xf32> to vector<144x128xbf16>
    %c0_22 = arith.constant 0 : index
    %c640 = arith.constant 640 : index
    %50 = vector.load %arg14[%c0_22, %c640] : memref<144x1536xbf16, #tpu.memory_space<vmem>>, vector<144x128xbf16>
    tpu.vector_store %arg14[%c0_22, %c640], %49 {strides = array<i32>} : memref<144x1536xbf16, #tpu.memory_space<vmem>>, vector<144x128xbf16>,
    %51 = vector.extract_strided_slice %20 {offsets = [0, 1536], sizes = [144, 128], strides = [1, 1]} : vector<144x3072xf32> to vector<144x128xf32>
    %52 = vector.extract_strided_slice %20 {offsets = [0, 1664], sizes = [144, 128], strides = [1, 1]} : vector<144x3072xf32> to vector<144x128xf32>
    %53 = arith.maximumf %51, %52 : vector<144x128xf32>
    %54 = arith.truncf %53 : vector<144x128xf32> to vector<144x128xbf16>
    %c0_23 = arith.constant 0 : index
    %c768 = arith.constant 768 : index
    %55 = vector.load %arg14[%c0_23, %c768] : memref<144x1536xbf16, #tpu.memory_space<vmem>>, vector<144x128xbf16>
    tpu.vector_store %arg14[%c0_23, %c768], %54 {strides = array<i32>} : memref<144x1536xbf16, #tpu.memory_space<vmem>>, vector<144x128xbf16>,
    %56 = vector.extract_strided_slice %20 {offsets = [0, 1792], sizes = [144, 128], strides = [1, 1]} : vector<144x3072xf32> to vector<144x128xf32>
    %57 = vector.extract_strided_slice %20 {offsets = [0, 1920], sizes = [144, 128], strides = [1, 1]} : vector<144x3072xf32> to vector<144x128xf32>
    %58 = arith.maximumf %56, %57 : vector<144x128xf32>
    %59 = arith.truncf %58 : vector<144x128xf32> to vector<144x128xbf16>
    %c0_24 = arith.constant 0 : index
    %c896 = arith.constant 896 : index
    %60 = vector.load %arg14[%c0_24, %c896] : memref<144x1536xbf16, #tpu.memory_space<vmem>>, vector<144x128xbf16>
    tpu.vector_store %arg14[%c0_24, %c896], %59 {strides = array<i32>} : memref<144x1536xbf16, #tpu.memory_space<vmem>>, vector<144x128xbf16>,
    %61 = vector.extract_strided_slice %20 {offsets = [0, 2048], sizes = [144, 128], strides = [1, 1]} : vector<144x3072xf32> to vector<144x128xf32>
    %62 = vector.extract_strided_slice %20 {offsets = [0, 2176], sizes = [144, 128], strides = [1, 1]} : vector<144x3072xf32> to vector<144x128xf32>
    %63 = arith.maximumf %61, %62 : vector<144x128xf32>
    %64 = arith.truncf %63 : vector<144x128xf32> to vector<144x128xbf16>
    %c0_25 = arith.constant 0 : index
    %c1024 = arith.constant 1024 : index
    %65 = vector.load %arg14[%c0_25, %c1024] : memref<144x1536xbf16, #tpu.memory_space<vmem>>, vector<144x128xbf16>
    tpu.vector_store %arg14[%c0_25, %c1024], %64 {strides = array<i32>} : memref<144x1536xbf16, #tpu.memory_space<vmem>>, vector<144x128xbf16>,
    %66 = vector.extract_strided_slice %20 {offsets = [0, 2304], sizes = [144, 128], strides = [1, 1]} : vector<144x3072xf32> to vector<144x128xf32>
    %67 = vector.extract_strided_slice %20 {offsets = [0, 2432], sizes = [144, 128], strides = [1, 1]} : vector<144x3072xf32> to vector<144x128xf32>
    %68 = arith.maximumf %66, %67 : vector<144x128xf32>
    %69 = arith.truncf %68 : vector<144x128xf32> to vector<144x128xbf16>
    %c0_26 = arith.constant 0 : index
    %c1152 = arith.constant 1152 : index
    %70 = vector.load %arg14[%c0_26, %c1152] : memref<144x1536xbf16, #tpu.memory_space<vmem>>, vector<144x128xbf16>
    tpu.vector_store %arg14[%c0_26, %c1152], %69 {strides = array<i32>} : memref<144x1536xbf16, #tpu.memory_space<vmem>>, vector<144x128xbf16>,
    %71 = vector.extract_strided_slice %20 {offsets = [0, 2560], sizes = [144, 128], strides = [1, 1]} : vector<144x3072xf32> to vector<144x128xf32>
    %72 = vector.extract_strided_slice %20 {offsets = [0, 2688], sizes = [144, 128], strides = [1, 1]} : vector<144x3072xf32> to vector<144x128xf32>
    %73 = arith.maximumf %71, %72 : vector<144x128xf32>
    %74 = arith.truncf %73 : vector<144x128xf32> to vector<144x128xbf16>
    %c0_27 = arith.constant 0 : index
    %c1280 = arith.constant 1280 : index
    %75 = vector.load %arg14[%c0_27, %c1280] : memref<144x1536xbf16, #tpu.memory_space<vmem>>, vector<144x128xbf16>
    tpu.vector_store %arg14[%c0_27, %c1280], %74 {strides = array<i32>} : memref<144x1536xbf16, #tpu.memory_space<vmem>>, vector<144x128xbf16>,
    %76 = vector.extract_strided_slice %20 {offsets = [0, 2816], sizes = [144, 128], strides = [1, 1]} : vector<144x3072xf32> to vector<144x128xf32>
    %77 = vector.extract_strided_slice %20 {offsets = [0, 2944], sizes = [144, 128], strides = [1, 1]} : vector<144x3072xf32> to vector<144x128xf32>
    %78 = arith.maximumf %76, %77 : vector<144x128xf32>
    %79 = arith.truncf %78 : vector<144x128xf32> to vector<144x128xbf16>
    %c0_28 = arith.constant 0 : index
    %c1408 = arith.constant 1408 : index
    %80 = vector.load %arg14[%c0_28, %c1408] : memref<144x1536xbf16, #tpu.memory_space<vmem>>, vector<144x128xbf16>
    tpu.vector_store %arg14[%c0_28, %c1408], %79 {strides = array<i32>} : memref<144x1536xbf16, #tpu.memory_space<vmem>>, vector<144x128xbf16>,
    %c0_29 = arith.constant 0 : index
    %c0_30 = arith.constant 0 : index
    %81 = vector.load %arg4[%c0_29, %c0_30] : memref<160x144xbf16, #tpu.memory_space<vmem>>, vector<160x144xbf16>
    %c0_31 = arith.constant 0 : index
    %c0_32 = arith.constant 0 : index
    %82 = vector.load %arg14[%c0_31, %c0_32] : memref<144x1536xbf16, #tpu.memory_space<vmem>>, vector<144x1536xbf16>
    %cst_33 = arith.constant dense<0.000000e+00> : vector<160x1536xf32>
    %83 = tpu.matmul %81, %82, %cst_33 {dimension_numbers = #tpu.dot_dimension_numbers<[1], [0], [0], [1], [0, 0, 1, 1], [], []>} : vector<160x144xbf16>, vector<144x1536xbf16>, vector<160x1536xf32> -> vector<160x1536xf32>
    %84 = vector.extract_strided_slice %83 {offsets = [0, 0], sizes = [80, 1536], strides = [1, 1]} : vector<160x1536xf32> to vector<80x1536xf32>
    %85 = vector.extract_strided_slice %83 {offsets = [80, 0], sizes = [80, 1536], strides = [1, 1]} : vector<160x1536xf32> to vector<80x1536xf32>
    %86 = arith.maximumf %84, %85 : vector<80x1536xf32>
    %87 = arith.truncf %86 : vector<80x1536xf32> to vector<80x1536xbf16>
    %88 = vector.extract_strided_slice %87 {offsets = [0, 0], sizes = [80, 1024], strides = [1, 1]} : vector<80x1536xbf16> to vector<80x1024xbf16>
    %c0_34 = arith.constant 0 : index
    %c0_35 = arith.constant 0 : index
    %89 = vector.load %arg15[%c0_34, %c0_35] : memref<400x1024xbf16, #tpu.memory_space<vmem>>, vector<80x1024xbf16>
    tpu.vector_store %arg15[%c0_34, %c0_35], %88 {strides = array<i32>} : memref<400x1024xbf16, #tpu.memory_space<vmem>>, vector<80x1024xbf16>,
    %90 = vector.extract_strided_slice %87 {offsets = [0, 128], sizes = [80, 1024], strides = [1, 1]} : vector<80x1536xbf16> to vector<80x1024xbf16>
    %c80 = arith.constant 80 : index
    %c0_36 = arith.constant 0 : index
    %91 = vector.load %arg15[%c80, %c0_36] : memref<400x1024xbf16, #tpu.memory_space<vmem>>, vector<80x1024xbf16>
    tpu.vector_store %arg15[%c80, %c0_36], %90 {strides = array<i32>} : memref<400x1024xbf16, #tpu.memory_space<vmem>>, vector<80x1024xbf16>,
    %92 = vector.extract_strided_slice %87 {offsets = [0, 256], sizes = [80, 1024], strides = [1, 1]} : vector<80x1536xbf16> to vector<80x1024xbf16>
    %c160 = arith.constant 160 : index
    %c0_37 = arith.constant 0 : index
    %93 = vector.load %arg15[%c160, %c0_37] : memref<400x1024xbf16, #tpu.memory_space<vmem>>, vector<80x1024xbf16>
    tpu.vector_store %arg15[%c160, %c0_37], %92 {strides = array<i32>} : memref<400x1024xbf16, #tpu.memory_space<vmem>>, vector<80x1024xbf16>,
    %94 = vector.extract_strided_slice %87 {offsets = [0, 384], sizes = [80, 1024], strides = [1, 1]} : vector<80x1536xbf16> to vector<80x1024xbf16>
    %c240 = arith.constant 240 : index
    %c0_38 = arith.constant 0 : index
    %95 = vector.load %arg15[%c240, %c0_38] : memref<400x1024xbf16, #tpu.memory_space<vmem>>, vector<80x1024xbf16>
    tpu.vector_store %arg15[%c240, %c0_38], %94 {strides = array<i32>} : memref<400x1024xbf16, #tpu.memory_space<vmem>>, vector<80x1024xbf16>,
    %96 = vector.extract_strided_slice %87 {offsets = [0, 512], sizes = [80, 1024], strides = [1, 1]} : vector<80x1536xbf16> to vector<80x1024xbf16>
    %c320 = arith.constant 320 : index
    %c0_39 = arith.constant 0 : index
    %97 = vector.load %arg15[%c320, %c0_39] : memref<400x1024xbf16, #tpu.memory_space<vmem>>, vector<80x1024xbf16>
    tpu.vector_store %arg15[%c320, %c0_39], %96 {strides = array<i32>} : memref<400x1024xbf16, #tpu.memory_space<vmem>>, vector<80x1024xbf16>,
    %c0_40 = arith.constant 0 : index
    %c0_41 = arith.constant 0 : index
    %98 = vector.load %arg5[%c0_40, %c0_41] : memref<128x400xbf16, #tpu.memory_space<vmem>>, vector<128x400xbf16>
    %c0_42 = arith.constant 0 : index
    %c0_43 = arith.constant 0 : index
    %99 = vector.load %arg15[%c0_42, %c0_43] : memref<400x1024xbf16, #tpu.memory_space<vmem>>, vector<400x1024xbf16>
    %cst_44 = arith.constant dense<0.000000e+00> : vector<128x1024xf32>
    %100 = tpu.matmul %98, %99, %cst_44 {dimension_numbers = #tpu.dot_dimension_numbers<[1], [0], [0], [1], [0, 0, 1, 1], [], []>} : vector<128x400xbf16>, vector<400x1024xbf16>, vector<128x1024xf32> -> vector<128x1024xf32>
    %c0_45 = arith.constant 0 : index
    %c0_46 = arith.constant 0 : index
    %101 = vector.load %arg6[%c0_45, %c0_46] : memref<128x1xf32, #tpu.memory_space<vmem>>, vector<128x1xf32>
    %102 = vector.broadcast %101 : vector<128x1xf32> to vector<128x1024xf32>
    %103 = arith.addf %100, %102 : vector<128x1024xf32>
    %cst_47 = arith.constant 0.000000e+00 : f32
    %104 = vector.broadcast %cst_47 : f32 to vector<128x1024xf32>
    %105 = arith.maximumf %103, %104 : vector<128x1024xf32>
    %106 = vector.extract_strided_slice %105 {offsets = [0, 0], sizes = [128, 128], strides = [1, 1]} : vector<128x1024xf32> to vector<128x128xf32>
    %107 = vector.extract_strided_slice %105 {offsets = [0, 128], sizes = [128, 128], strides = [1, 1]} : vector<128x1024xf32> to vector<128x128xf32>
    %108 = arith.maximumf %106, %107 : vector<128x128xf32>
    %109 = arith.truncf %108 : vector<128x128xf32> to vector<128x128xbf16>
    %c0_48 = arith.constant 0 : index
    %c0_49 = arith.constant 0 : index
    %110 = vector.load %arg16[%c0_48, %c0_49] : memref<128x512xbf16, #tpu.memory_space<vmem>>, vector<128x128xbf16>
    tpu.vector_store %arg16[%c0_48, %c0_49], %109 {strides = array<i32>} : memref<128x512xbf16, #tpu.memory_space<vmem>>, vector<128x128xbf16>,
    %111 = vector.extract_strided_slice %105 {offsets = [0, 256], sizes = [128, 128], strides = [1, 1]} : vector<128x1024xf32> to vector<128x128xf32>
    %112 = vector.extract_strided_slice %105 {offsets = [0, 384], sizes = [128, 128], strides = [1, 1]} : vector<128x1024xf32> to vector<128x128xf32>
    %113 = arith.maximumf %111, %112 : vector<128x128xf32>
    %114 = arith.truncf %113 : vector<128x128xf32> to vector<128x128xbf16>
    %c0_50 = arith.constant 0 : index
    %c128_51 = arith.constant 128 : index
    %115 = vector.load %arg16[%c0_50, %c128_51] : memref<128x512xbf16, #tpu.memory_space<vmem>>, vector<128x128xbf16>
    tpu.vector_store %arg16[%c0_50, %c128_51], %114 {strides = array<i32>} : memref<128x512xbf16, #tpu.memory_space<vmem>>, vector<128x128xbf16>,
    %116 = vector.extract_strided_slice %105 {offsets = [0, 512], sizes = [128, 128], strides = [1, 1]} : vector<128x1024xf32> to vector<128x128xf32>
    %117 = vector.extract_strided_slice %105 {offsets = [0, 640], sizes = [128, 128], strides = [1, 1]} : vector<128x1024xf32> to vector<128x128xf32>
    %118 = arith.maximumf %116, %117 : vector<128x128xf32>
    %119 = arith.truncf %118 : vector<128x128xf32> to vector<128x128xbf16>
    %c0_52 = arith.constant 0 : index
    %c256_53 = arith.constant 256 : index
    %120 = vector.load %arg16[%c0_52, %c256_53] : memref<128x512xbf16, #tpu.memory_space<vmem>>, vector<128x128xbf16>
    tpu.vector_store %arg16[%c0_52, %c256_53], %119 {strides = array<i32>} : memref<128x512xbf16, #tpu.memory_space<vmem>>, vector<128x128xbf16>,
    %121 = vector.extract_strided_slice %105 {offsets = [0, 768], sizes = [128, 128], strides = [1, 1]} : vector<128x1024xf32> to vector<128x128xf32>
    %122 = vector.extract_strided_slice %105 {offsets = [0, 896], sizes = [128, 128], strides = [1, 1]} : vector<128x1024xf32> to vector<128x128xf32>
    %123 = arith.maximumf %121, %122 : vector<128x128xf32>
    %124 = arith.truncf %123 : vector<128x128xf32> to vector<128x128xbf16>
    %c0_54 = arith.constant 0 : index
    %c384_55 = arith.constant 384 : index
    %125 = vector.load %arg16[%c0_54, %c384_55] : memref<128x512xbf16, #tpu.memory_space<vmem>>, vector<128x128xbf16>
    tpu.vector_store %arg16[%c0_54, %c384_55], %124 {strides = array<i32>} : memref<128x512xbf16, #tpu.memory_space<vmem>>, vector<128x128xbf16>,
    %c0_56 = arith.constant 0 : index
    %c0_57 = arith.constant 0 : index
    %126 = vector.load %arg7[%c0_56, %c0_57] : memref<128x128xbf16, #tpu.memory_space<vmem>>, vector<128x128xbf16>
    %c0_58 = arith.constant 0 : index
    %c0_59 = arith.constant 0 : index
    %127 = vector.load %arg16[%c0_58, %c0_59] : memref<128x512xbf16, #tpu.memory_space<vmem>>, vector<128x512xbf16>
    %cst_60 = arith.constant dense<0.000000e+00> : vector<128x512xf32>
    %128 = tpu.matmul %126, %127, %cst_60 {dimension_numbers = #tpu.dot_dimension_numbers<[1], [0], [0], [1], [0, 0, 1, 1], [], []>} : vector<128x128xbf16>, vector<128x512xbf16>, vector<128x512xf32> -> vector<128x512xf32>
    %129 = vector.extract_strided_slice %128 {offsets = [0, 0], sizes = [64, 512], strides = [1, 1]} : vector<128x512xf32> to vector<64x512xf32>
    %130 = vector.extract_strided_slice %128 {offsets = [64, 0], sizes = [64, 512], strides = [1, 1]} : vector<128x512xf32> to vector<64x512xf32>
    %131 = arith.maximumf %129, %130 : vector<64x512xf32>
    %132 = arith.truncf %131 : vector<64x512xf32> to vector<64x512xbf16>
    %c0_61 = arith.constant 0 : index
    %c0_62 = arith.constant 0 : index
    %133 = vector.load %arg9[%c0_61, %c0_62] : memref<120x1xf32, #tpu.memory_space<vmem>>, vector<120x1xf32>
    %c0_63 = arith.constant 0 : index
    %c0_64 = arith.constant 0 : index
    %c0_65 = arith.constant 0 : index
    %134 = vector.load %arg8[%c0_63, %c0_64, %c0_65] : memref<4x120x64xbf16, #tpu.memory_space<vmem>>, vector<1x120x64xbf16>
    %135 = vector.shape_cast %134 : vector<1x120x64xbf16> to vector<120x64xbf16>
    %136 = vector.extract_strided_slice %132 {offsets = [0, 0], sizes = [64, 128], strides = [1, 1]} : vector<64x512xbf16> to vector<64x128xbf16>
    %cst_66 = arith.constant dense<0.000000e+00> : vector<120x128xf32>
    %137 = tpu.matmul %135, %136, %cst_66 {dimension_numbers = #tpu.dot_dimension_numbers<[1], [0], [0], [1], [0, 0, 1, 1], [], []>} : vector<120x64xbf16>, vector<64x128xbf16>, vector<120x128xf32> -> vector<120x128xf32>
    %138 = vector.broadcast %133 : vector<120x1xf32> to vector<120x128xf32>
    %139 = arith.addf %138, %137 : vector<120x128xf32>
    %c1 = arith.constant 1 : index
    %c0_67 = arith.constant 0 : index
    %c0_68 = arith.constant 0 : index
    %140 = vector.load %arg8[%c1, %c0_67, %c0_68] : memref<4x120x64xbf16, #tpu.memory_space<vmem>>, vector<1x120x64xbf16>
    %141 = vector.shape_cast %140 : vector<1x120x64xbf16> to vector<120x64xbf16>
    %142 = vector.extract_strided_slice %132 {offsets = [0, 128], sizes = [64, 128], strides = [1, 1]} : vector<64x512xbf16> to vector<64x128xbf16>
    %cst_69 = arith.constant dense<0.000000e+00> : vector<120x128xf32>
    %143 = tpu.matmul %141, %142, %cst_69 {dimension_numbers = #tpu.dot_dimension_numbers<[1], [0], [0], [1], [0, 0, 1, 1], [], []>} : vector<120x64xbf16>, vector<64x128xbf16>, vector<120x128xf32> -> vector<120x128xf32>
    %144 = arith.addf %139, %143 : vector<120x128xf32>
    %c2 = arith.constant 2 : index
    %c0_70 = arith.constant 0 : index
    %c0_71 = arith.constant 0 : index
    %145 = vector.load %arg8[%c2, %c0_70, %c0_71] : memref<4x120x64xbf16, #tpu.memory_space<vmem>>, vector<1x120x64xbf16>
    %146 = vector.shape_cast %145 : vector<1x120x64xbf16> to vector<120x64xbf16>
    %147 = vector.extract_strided_slice %132 {offsets = [0, 256], sizes = [64, 128], strides = [1, 1]} : vector<64x512xbf16> to vector<64x128xbf16>
    %cst_72 = arith.constant dense<0.000000e+00> : vector<120x128xf32>
    %148 = tpu.matmul %146, %147, %cst_72 {dimension_numbers = #tpu.dot_dimension_numbers<[1], [0], [0], [1], [0, 0, 1, 1], [], []>} : vector<120x64xbf16>, vector<64x128xbf16>, vector<120x128xf32> -> vector<120x128xf32>
    %149 = arith.addf %144, %148 : vector<120x128xf32>
    %c3 = arith.constant 3 : index
    %c0_73 = arith.constant 0 : index
    %c0_74 = arith.constant 0 : index
    %150 = vector.load %arg8[%c3, %c0_73, %c0_74] : memref<4x120x64xbf16, #tpu.memory_space<vmem>>, vector<1x120x64xbf16>
    %151 = vector.shape_cast %150 : vector<1x120x64xbf16> to vector<120x64xbf16>
    %152 = vector.extract_strided_slice %132 {offsets = [0, 384], sizes = [64, 128], strides = [1, 1]} : vector<64x512xbf16> to vector<64x128xbf16>
    %cst_75 = arith.constant dense<0.000000e+00> : vector<120x128xf32>
    %153 = tpu.matmul %151, %152, %cst_75 {dimension_numbers = #tpu.dot_dimension_numbers<[1], [0], [0], [1], [0, 0, 1, 1], [], []>} : vector<120x64xbf16>, vector<64x128xbf16>, vector<120x128xf32> -> vector<120x128xf32>
    %154 = arith.addf %149, %153 : vector<120x128xf32>
    %155 = math.tanh %154 : vector<120x128xf32>
    %156 = arith.truncf %155 : vector<120x128xf32> to vector<120x128xbf16>
    %c0_76 = arith.constant 0 : index
    %c0_77 = arith.constant 0 : index
    %157 = vector.load %arg10[%c0_76, %c0_77] : memref<10x120xbf16, #tpu.memory_space<vmem>>, vector<10x120xbf16>
    %cst_78 = arith.constant dense<0.000000e+00> : vector<10x128xf32>
    %158 = tpu.matmul %157, %156, %cst_78 {dimension_numbers = #tpu.dot_dimension_numbers<[1], [0], [0], [1], [0, 0, 1, 1], [], []>} : vector<10x120xbf16>, vector<120x128xbf16>, vector<10x128xf32> -> vector<10x128xf32>
    %c0_79 = arith.constant 0 : index
    %c0_80 = arith.constant 0 : index
    %159 = vector.load %arg11[%c0_79, %c0_80] : memref<10x1xf32, #tpu.memory_space<vmem>>, vector<10x1xf32>
    %160 = vector.broadcast %159 : vector<10x1xf32> to vector<10x128xf32>
    %161 = arith.addf %158, %160 : vector<10x128xf32>
    %cst_81 = arith.constant 5.000000e-01 : f32
    %162 = vector.broadcast %cst_81 : f32 to vector<10x128xf32>
    %163 = arith.mulf %162, %161 : vector<10x128xf32>
    %164 = math.tanh %163 : vector<10x128xf32>
    %cst_82 = arith.constant 1.000000e+00 : f32
    %165 = vector.broadcast %cst_82 : f32 to vector<10x128xf32>
    %166 = arith.addf %164, %165 : vector<10x128xf32>
    %cst_83 = arith.constant 5.000000e-01 : f32
    %167 = vector.broadcast %cst_83 : f32 to vector<10x128xf32>
    %168 = arith.mulf %167, %166 : vector<10x128xf32>
    %c0_84 = arith.constant 0 : index
    %c0_85 = arith.constant 0 : index
    %c0_86 = arith.constant 0 : index
    %169 = vector.load %arg12[%c0_84, %c0_85, %c0_86] : memref<1x10x128xf32, #tpu.memory_space<vmem>>, vector<1x10x128xf32>
    %170 = vector.shape_cast %169 : vector<1x10x128xf32> to vector<10x128xf32>
    %171 = vector.shape_cast %168 : vector<10x128xf32> to vector<1x10x128xf32>
    tpu.vector_store %arg12[%c0_84, %c0_85, %c0_86], %171 {strides = array<i32>} : memref<1x10x128xf32, #tpu.memory_space<vmem>>, vector<1x10x128xf32>,
    return
  }
  func.func @transform_0(%arg0: i32) -> (i32, i32, i32) {
    %c0_i32 = arith.constant 0 : i32
    %c0_i32_0 = arith.constant 0 : i32
    %c0_i32_1 = arith.constant 0 : i32
    return %arg0, %c0_i32, %c0_i32_0 : i32, i32, i32
  }
  func.func @transform_1(%arg0: i32) -> (i32, i32) {
    %c0_i32 = arith.constant 0 : i32
    %c0_i32_0 = arith.constant 0 : i32
    %c0_i32_1 = arith.constant 0 : i32
    return %c0_i32, %c0_i32_0 : i32, i32
  }
  func.func @transform_2(%arg0: i32) -> (i32, i32) {
    %c0_i32 = arith.constant 0 : i32
    %c0_i32_0 = arith.constant 0 : i32
    %c0_i32_1 = arith.constant 0 : i32
    return %c0_i32, %c0_i32_0 : i32, i32
  }
  func.func @transform_3(%arg0: i32) -> (i32, i32) {
    %c0_i32 = arith.constant 0 : i32
    %c0_i32_0 = arith.constant 0 : i32
    %c0_i32_1 = arith.constant 0 : i32
    return %c0_i32, %c0_i32_0 : i32, i32
  }
  func.func @transform_4(%arg0: i32) -> (i32, i32) {
    %c0_i32 = arith.constant 0 : i32
    %c0_i32_0 = arith.constant 0 : i32
    %c0_i32_1 = arith.constant 0 : i32
    return %c0_i32, %c0_i32_0 : i32, i32
  }
  func.func @transform_5(%arg0: i32) -> (i32, i32) {
    %c0_i32 = arith.constant 0 : i32
    %c0_i32_0 = arith.constant 0 : i32
    %c0_i32_1 = arith.constant 0 : i32
    return %c0_i32, %c0_i32_0 : i32, i32
  }
  func.func @transform_6(%arg0: i32) -> (i32, i32) {
    %c0_i32 = arith.constant 0 : i32
    %c0_i32_0 = arith.constant 0 : i32
    %c0_i32_1 = arith.constant 0 : i32
    return %c0_i32, %c0_i32_0 : i32, i32
  }
  func.func @transform_7(%arg0: i32) -> (i32, i32, i32) {
    %c0_i32 = arith.constant 0 : i32
    %c0_i32_0 = arith.constant 0 : i32
    %c0_i32_1 = arith.constant 0 : i32
    %c0_i32_2 = arith.constant 0 : i32
    return %c0_i32, %c0_i32_0, %c0_i32_1 : i32, i32, i32
  }
  func.func @transform_8(%arg0: i32) -> (i32, i32) {
    %c0_i32 = arith.constant 0 : i32
    %c0_i32_0 = arith.constant 0 : i32
    %c0_i32_1 = arith.constant 0 : i32
    return %c0_i32, %c0_i32_0 : i32, i32
  }
  func.func @transform_9(%arg0: i32) -> (i32, i32) {
    %c0_i32 = arith.constant 0 : i32
    %c0_i32_0 = arith.constant 0 : i32
    %c0_i32_1 = arith.constant 0 : i32
    return %c0_i32, %c0_i32_0 : i32, i32
  }
  func.func @transform_10(%arg0: i32) -> (i32, i32) {
    %c0_i32 = arith.constant 0 : i32
    %c0_i32_0 = arith.constant 0 : i32
    %c0_i32_1 = arith.constant 0 : i32
    return %c0_i32, %c0_i32_0 : i32, i32
  }
  func.func @transform_11(%arg0: i32) -> (i32, i32, i32) {
    %c0_i32 = arith.constant 0 : i32
    %c0_i32_0 = arith.constant 0 : i32
    %c0_i32_1 = arith.constant 0 : i32
    return %arg0, %c0_i32, %c0_i32_0 : i32, i32, i32
  }
}

</mosaic_0001>

<bundles_post_ra>
// kernel: net_forward.1
= control target key start
LH: loop header
LB: loop body
LE: loop exit
PB: predicated region body
PF: predicated region fallthrough
CT: control target
= control target key end

     0   :  { %v19423_v3 = vmov 0   ;;  %vm2478_vm0 = vcmask 261120   ;;  %vm6468_vm1 = vcmask 130048   ;;  %vm11595_vm2 = vcmask 523264   ;;  %s19411_s0 = inlined_call_operand.vmem [shape: f32[1,32,3584], index: 0, kind: input, shape index: {}]   ;;  %s19412_s1 = inlined_call_operand.vmem [shape: bf16[144,160], index: 1, kind: input, shape index: {}]   ;;  %s19413_s2 = inlined_call_operand.vmem [shape: f32[144,1], index: 2, kind: input, shape index: {}]   ;;  %s19414_s5 = inlined_call_operand.vmem [shape: f32[128,1], index: 5, kind: input, shape index: {}]   ;;  %s19415_s8 = inlined_call_operand.vmem [shape: f32[120,1], index: 8, kind: input, shape index: {}]   ;;  %s19416_s10 = inlined_call_operand.vmem [shape: f32[10,1], index: 10, kind: input, shape index: {}]   ;;  %s19417_s3 = inlined_call_operand.vmem [shape: bf16[160,144], index: 3, kind: input, shape index: {}]   ;;  %s19418_s4 = inlined_call_operand.vmem [shape: bf16[128,400], index: 4, kind: input, shape index: {}]   ;;  %s19419_s6 = inlined_call_operand.vmem [shape: bf16[128,128], index: 6, kind: input, shape index: {}]   ;;  %s19420_s7 = inlined_call_operand.vmem [shape: bf16[4,120,64], index: 7, kind: input, shape index: {}]   ;;  %s19421_s9 = inlined_call_operand.vmem [shape: bf16[10,120], index: 9, kind: input, shape index: {}]   ;;  %s19422_s11 = inlined_call_operand.vmem [shape: f32[1,10,128], index: 11, kind: output, shape index: {}]  }
   0x1   :  { %v99_v0 = vld [vmem:[%s19411_s0 + $0x1e0] sm:$0xff]  ;;  %v101_v2 = vld [vmem:[%s19411_s0 + $0x1f0] sm:$0xff]  ;;  %14837 = vset.pattern.permute.xlu0 %v19423_v3  ;;  %14838 = vset.pattern.permute.xlu1 %v19423_v3  ;;  %v98_v6 = vld [vmem:[%s19411_s0 + $0x1d8] sm:$0xff]  ;;  %vm15304_vm3 = vmmov 0   ;;  %vm12419_vm4 = vcmask 1043456   ;;  %vm12415_vm5 = vcmask 982016  }
   0x2   :  { %v127_v1 = vld [vmem:[%s19411_s0 + $0x2c0] sm:$0xff]  ;;  %v129_v5 = vld [vmem:[%s19411_s0 + $0x2d0] sm:$0xff]  ;;  %v126_v7 = vld [vmem:[%s19411_s0 + $0x2b8] sm:$0xff] }
   0x3   :  { %v15376_v4 = vpack.c.bf16 %v127_v1, %v99_v0  ;;  %v15387_v8 = vpack.c.bf16 %v129_v5, %v101_v2  ;;  %v15389_v9 = vpack.c.bf16 %v126_v7, %v98_v6  ;;  %v100_v10 = vld [vmem:[%s19411_s0 + $0x1e8] sm:$0xff]  ;;  %v43_v12 = vld [vmem:[%s19411_s0 + $0x20] sm:$0xff]  ;;  %v45_v15 = vld [vmem:[%s19411_s0 + $0x30] sm:$0xff] }
   0x4   :  { %v128_v11 = vld [vmem:[%s19411_s0 + $0x2c8] sm:$0xff]  ;;  %v71_v14 = vld [vmem:[%s19411_s0 + $0x100] sm:$0xff]  ;;  %v73_v16 = vld [vmem:[%s19411_s0 + $0x110] sm:$0xff] }
   0x5   :  { %2506 = vmatprep.subr.bf16.mxu0 %v15376_v4  ;;  %v15401_v13 = vpack.c.bf16 %v128_v11, %v100_v10  ;;  %2629 = vmatprep.subr.bf16.mxu1 %v15387_v8  ;;  %v15414_v17 = vpack.c.bf16 %v71_v14, %v43_v12  ;;  %v15416_v18 = vpack.c.bf16 %v73_v16, %v45_v15  ;;  %v42_v19 = vld [vmem:[%s19411_s0 + $0x18] sm:$0xff]  ;;  %v44_v21 = vld [vmem:[%s19411_s0 + $0x28] sm:$0xff]  ;;  %v97_v24 = vld [vmem:[%s19411_s0 + $0x1d0] sm:$0xff] }
   0x6   :  { %2507 = vmatpush1.bf16.msra.mxu0 %v15389_v9  ;;  %v70_v20 = vld [vmem:[%s19411_s0 + $0xf8] sm:$0xff]  ;;  %v72_v23 = vld [vmem:[%s19411_s0 + $0x108] sm:$0xff]  ;;  %v125_v25 = vld [vmem:[%s19411_s0 + $0x2b0] sm:$0xff] }
   0x7   :  { %2630 = vmatpush1.bf16.msra.mxu1 %v15401_v13  ;;  %v15428_v22 = vpack.c.bf16 %v70_v20, %v42_v19  ;;  %2508 = vmatprep.subr.bf16.mxu0 %v15414_v17  ;;  %v15441_v26 = vpack.c.bf16 %v72_v23, %v44_v21  ;;  %v14469_v27 = vpack.c.bf16 %v125_v25, %v97_v24  ;;  %v41_v28 = vld [vmem:[%s19411_s0 + $0x10] sm:$0xff]  ;;  %v15456_v30 = vld [vmem:[%s19412_s1 + $0x4] ss:$8 sps:$4 sm:$0xff]   ;;  %v1104_v43 = vld [vmem:[%s19413_s2 + $0x78] sm:$0xff] }
   0x8   :  { %2631 = vmatprep.subr.bf16.mxu1 %v15416_v18  ;;  %v69_v29 = vld [vmem:[%s19411_s0 + $0xf0] sm:$0xff]  ;;  %v96_v32 = vld [vmem:[%s19411_s0 + $0x1c8] sm:$0xff]  ;;  %12844 = vmatprep.mubr.msk.bf16.mxu0 %vm2478_vm0, %v15456_v30  ;;  %v95_v38 = vld [vmem:[%s19411_s0 + $0x1c0] sm:$0xff] }
   0x9   :  { %v14445_v31 = vpack.c.bf16 %v69_v29, %v41_v28  ;;  %v124_v33 = vld [vmem:[%s19411_s0 + $0x2a8] sm:$0xff]  ;;  %12853 = vmatprep.mubr.msk.bf16.mxu1 %vm2478_vm0, %v15456_v30  ;;  %v123_v39 = vld [vmem:[%s19411_s0 + $0x2a0] sm:$0xff]  ;;  %v1103_v40 = vld [vmem:[%s19413_s2 + $0x70] sm:$0xff] }
   0xa   :  { %2509 = vmatpush1.bf16.msra.mxu0 %v15428_v22  ;;  %v14468_v34 = vpack.c.bf16 %v124_v33, %v96_v32  ;;  %v40_v35 = vld [vmem:[%s19411_s0 + $0x8] sm:$0xff]  ;;  %1179 = vperm.xlu0 %14837, %v1103_v40   ;;  %v1101_v41 = vld [vmem:[%s19413_s2 + $0x60] sm:$0xff]  ;;  %v14467_v42 = vpack.c.bf16 %v123_v39, %v95_v38  ;;  %v102_v47 = vld [vmem:[%s19411_s0 + $0x1f8] sm:$0xff] }
   0xb   :  { %2632 = vmatpush1.bf16.msra.mxu1 %v15441_v26  ;;  %2510 = vmatprep.subr.bf16.mxu0 %v15389_v9  ;;  %v68_v36 = vld [vmem:[%s19411_s0 + $0xe8] sm:$0xff]  ;;  %v39_v44 = vld [vmem:[%s19411_s0] sm:$0xff]  ;;  %v130_v48 = vld [vmem:[%s19411_s0 + $0x2d8] sm:$0xff] }
   0xc   :  { %2633 = vmatprep.subr.bf16.mxu1 %v15401_v13  ;;  %v14444_v37 = vpack.c.bf16 %v68_v36, %v40_v35  ;;  %1169 = vperm.xlu1 %14838, %v1101_v41   ;;  %v67_v45 = vld [vmem:[%s19411_s0 + $0xe0] sm:$0xff]  ;;  %v1102_v46 = vld [vmem:[%s19413_s2 + $0x68] sm:$0xff]  ;;  %v1099_v50 = vld [vmem:[%s19413_s2 + $0x50] sm:$0xff]  ;;  %v15520_v52 = vpack.c.bf16 %v130_v48, %v102_v47 }
   0xd   :  { %v14443_v49 = vpack.c.bf16 %v67_v45, %v39_v44  ;;  %v1100_v51 = vld [vmem:[%s19413_s2 + $0x58] sm:$0xff]  ;;  %v1097_v55 = vld [vmem:[%s19413_s2 + $0x40] sm:$0xff]  ;;  %v1098_v56 = vld [vmem:[%s19413_s2 + $0x48] sm:$0xff] }
   0xe   :  { %2511 = vmatpush1.bf16.msra.mxu0 %v14469_v27  ;;  %1184 = vperm.xlu0 %14837, %v1104_v43   ;;  %v46_v53 = vld [vmem:[%s19411_s0 + $0x38] sm:$0xff]  ;;  %v103_v58 = vld [vmem:[%s19411_s0 + $0x200] sm:$0xff]  ;;  %v105_v60 = vld [vmem:[%s19411_s0 + $0x210] sm:$0xff] }
   0xf   :  { %2634 = vmatpush1.bf16.msra.mxu1 %v15376_v4  ;;  %2512 = vmatprep.subr.bf16.mxu0 %v15428_v22  ;;  %v74_v54 = vld [vmem:[%s19411_s0 + $0x118] sm:$0xff]  ;;  %v131_v59 = vld [vmem:[%s19411_s0 + $0x2e0] sm:$0xff]  ;;  %v133_v61 = vld [vmem:[%s19411_s0 + $0x2f0] sm:$0xff] }
  0x10   :  { %2635 = vmatprep.subr.bf16.mxu1 %v15441_v26  ;;  %1174 = vperm.xlu1 %14838, %v1102_v46   ;;  %v15536_v57 = vpack.c.bf16 %v74_v54, %v46_v53  ;;  %v1095_v62 = vld [vmem:[%s19413_s2 + $0x30] sm:$0xff]  ;;  %v15556_v63 = vpack.c.bf16 %v131_v59, %v103_v58  ;;  %v1096_v0 = vld [vmem:[%s19413_s2 + $0x38] sm:$0xff]  ;;  %v15565_v1 = vld [vmem:[%s19412_s1] ss:$8 sps:$4 sm:$0xff]   ;;  %v15572_v5 = vpack.c.bf16 %v133_v61, %v105_v60 }
  0x11   :  { %v15570_v2 = vld [vmem:[%s19412_s1 + $0x14] ss:$8 sps:$4 sm:$0xff]   ;;  %v104_v6 = vld [vmem:[%s19411_s0 + $0x208] sm:$0xff]  ;;  %v75_v10 = vld [vmem:[%s19411_s0 + $0x120] sm:$0xff] }
  0x12   :  { %2513 = vmatpush1.bf16.msra.mxu0 %v14445_v31  ;;  %1159 = vperm.xlu0 %14837, %v1099_v50   ;;  %v132_v7 = vld [vmem:[%s19411_s0 + $0x2e8] sm:$0xff]  ;;  %v49_v11 = vld [vmem:[%s19411_s0 + $0x50] sm:$0xff]  ;;  %v1093_v14 = vld [vmem:[%s19413_s2 + $0x20] sm:$0xff] }
  0x13   :  { %2636 = vmatpush1.bf16.msra.mxu1 %v15414_v17  ;;  %2514 = vmatprep.subr.bf16.mxu0 %v14469_v27  ;;  %v77_v12 = vld [vmem:[%s19411_s0 + $0x130] sm:$0xff]  ;;  %v15599_v15 = vpack.c.bf16 %v132_v7, %v104_v6  ;;  %v48_v20 = vld [vmem:[%s19411_s0 + $0x48] sm:$0xff]  ;;  %v1092_v28 = vld [vmem:[%s19413_s2 + $0x18] sm:$0xff] }
  0x14   :  { %2637 = vmatprep.subr.bf16.mxu1 %v15376_v4  ;;  %1164 = vperm.xlu1 %14838, %v1100_v51   ;;  %v15604_v19 = vpack.c.bf16 %v77_v12, %v49_v11  ;;  %v76_v21 = vld [vmem:[%s19411_s0 + $0x128] sm:$0xff]  ;;  %v1091_v23 = vld [vmem:[%s19413_s2 + $0x10] sm:$0xff]  ;;  %v1089_v29 = vld [vmem:[%s19413_s2] sm:$0xff] }
  0x15   :  { %v15626_v24 = vpack.c.bf16 %v76_v21, %v48_v20  ;;  %v15631_v25 = vld [vmem:[%s19412_s1 + $0x10] ss:$8 sps:$4 sm:$0xff]   ;;  %v15667_v32 = vld [vmem:[%s19412_s1 + $0x34] ss:$8 sps:$4 sm:$0xff]   ;;  %v1090_v33 = vld [vmem:[%s19413_s2 + $0x8] sm:$0xff] }
  0x16   :  { %2515 = vmatpush1.bf16.msra.mxu0 %v14468_v34  ;;  %1149 = vperm.xlu0 %14837, %v1097_v55   ;;  %v15691_v35 = vld [vmem:[%s19412_s1 + $0x30] ss:$8 sps:$4 sm:$0xff]   ;;  %v15697_v36 = vld [vmem:[%s19412_s1 + $0x44] ss:$8 sps:$4 sm:$0xff]   ;;  %v15724_v39 = vld [vmem:[%s19412_s1 + $0x40] ss:$8 sps:$4 sm:$0xff]  }
  0x17   :  { %2638 = vmatpush1.bf16.msra.mxu1 %v15389_v9  ;;  %2516 = vmatprep.subr.bf16.mxu0 %v14445_v31  ;;  %v134_v38 = vld [vmem:[%s19411_s0 + $0x2f8] sm:$0xff]  ;;  %v135_v43 = vld [vmem:[%s19411_s0 + $0x300] sm:$0xff]  ;;  %v108_v55 = vld [vmem:[%s19411_s0 + $0x228] sm:$0xff] }
  0x18   :  { %2639 = vmatprep.subr.bf16.mxu1 %v15414_v17  ;;  %1154 = vperm.xlu1 %14838, %v1098_v56   ;;  %v15732_v41 = vld [vmem:[%s19412_s1 + $0x54] ss:$8 sps:$4 sm:$0xff]   ;;  %v15772_v45 = vld [vmem:[%s19412_s1 + $0x50] ss:$8 sps:$4 sm:$0xff]   ;;  %v15780_v47 = vld [vmem:[%s19412_s1 + $0x64] ss:$8 sps:$4 sm:$0xff]  }
  0x19   :  { %v15795_v48 = vld [vmem:[%s19412_s1 + $0x60] ss:$8 sps:$4 sm:$0xff]   ;;  %v15811_v50 = vld [vmem:[%s19412_s1 + $0x70] ss:$8 sps:$4 sm:$0xff]   ;;  %v15816_v51 = vld [vmem:[%s19412_s1 + $0x84] ss:$8 sps:$4 sm:$0xff]  }
  0x1a   :  { %2517 = vmatpush1.bf16.msra.mxu0 %v14444_v37  ;;  %1139 = vperm.xlu0 %14837, %v1095_v62   ;;  %v15830_v53 = vld [vmem:[%s19412_s1 + $0x80] ss:$8 sps:$4 sm:$0xff]   ;;  %v8324_v56 = vld [vmem:[%s19414_s5 + $0x78] sm:$0xff]  ;;  %v53_v61 = vld [vmem:[%s19411_s0 + $0x70] sm:$0xff] }
  0x1b   :  { %2640 = vmatpush1.bf16.msra.mxu1 %v15428_v22  ;;  %2518 = vmatprep.subr.bf16.mxu0 %v14468_v34  ;;  %v1105_v34 = vld [vmem:[%s19413_s2 + $0x80] sm:$0xff]  ;;  %v136_v58 = vld [vmem:[%s19411_s0 + $0x308] sm:$0xff]  ;;  %v81_v62 = vld [vmem:[%s19411_s0 + $0x150] sm:$0xff] }
  0x1c   :  { %2641 = vmatprep.subr.bf16.mxu1 %v15389_v9  ;;  %v47_v9 = vld [vmem:[%s19411_s0 + $0x40] sm:$0xff]  ;;  %1144 = vperm.xlu1 %14838, %v1096_v0   ;;  %v15865_v0 = vpack.c.bf16 %v136_v58, %v108_v55  ;;  %v8322_v7 = vld [vmem:[%s19414_s5 + $0x68] sm:$0xff]  ;;  %v8320_v20 = vld [vmem:[%s19414_s5 + $0x58] sm:$0xff] }
  0x1d   :  { %v15601_v16 = vpack.c.bf16 %v75_v10, %v47_v9  ;;  %v8321_v54 = vld [vmem:[%s19414_s5 + $0x60] sm:$0xff]  ;;  %v15873_v9 = vpack.c.bf16 %v81_v62, %v53_v61  ;;  %v52_v10 = vld [vmem:[%s19411_s0 + $0x68] sm:$0xff]  ;;  %v8315_v21 = vld [vmem:[%s19414_s5 + $0x30] sm:$0xff] }
  0x1e   :  { %2519 = vmatpush1.bf16.msra.mxu0 %v14467_v42  ;;  %1129 = vperm.xlu0 %14837, %v1093_v14   ;;  %v107_v42 = vld [vmem:[%s19411_s0 + $0x220] sm:$0xff]  ;;  %v80_v11 = vld [vmem:[%s19411_s0 + $0x148] sm:$0xff]  ;;  %v11533_v58 = vld [vmem:[%s19415_s8 + $0x30] sm:$0xff] }
  0x1f   :  { %2642 = vmatpush1.bf16.msra.mxu1 %v14469_v27  ;;  %2520 = vmatprep.subr.bf16.mxu0 %v14444_v37  ;;  %v15637_v27 = vld [vmem:[%s19412_s1 + $0x24] ss:$8 sps:$4 sm:$0xff]   ;;  %v106_v37 = vld [vmem:[%s19411_s0 + $0x218] sm:$0xff]  ;;  %v15767_v44 = vpack.c.bf16 %v135_v43, %v107_v42  ;;  %v15892_v14 = vpack.c.bf16 %v80_v11, %v52_v10  ;;  %v11541_v42 = vld [vmem:[%s19415_s8 + $0x70] sm:$0xff] }
  0x20   :  { %2643 = vmatprep.subr.bf16.mxu1 %v15428_v22  ;;  %v1094_v22 = vld [vmem:[%s19413_s2 + $0x28] sm:$0xff]  ;;  %v15727_v40 = vpack.c.bf16 %v134_v38, %v106_v37  ;;  %v51_v59 = vld [vmem:[%s19411_s0 + $0x60] sm:$0xff]  ;;  %v54_v38 = vld [vmem:[%s19411_s0 + $0x78] sm:$0xff] }
  0x21   :  { %1134 = vperm.xlu1 %14838, %v1094_v22   ;;  %v79_v60 = vld [vmem:[%s19411_s0 + $0x140] sm:$0xff]  ;;  %v8318_v22 = vld [vmem:[%s19414_s5 + $0x48] sm:$0xff]  ;;  %v11530_v61 = vld [vmem:[%s19415_s8 + $0x18] sm:$0xff] }
  0x22   :  { %2521 = vmatpush1.bf16.msra.mxu0 %v14443_v49  ;;  %1119 = vperm.xlu0 %14837, %v1091_v23   ;;  %v15800_v49 = vld [vmem:[%s19412_s1 + $0x74] ss:$8 sps:$4 sm:$0xff]   ;;  %v15867_v6 = vpack.c.bf16 %v79_v60, %v51_v59  ;;  %v8317_v12 = vld [vmem:[%s19414_s5 + $0x40] sm:$0xff]  ;;  %v8310_v43 = vld [vmem:[%s19414_s5 + $0x8] sm:$0xff] }
  0x23   :  { %2644 = vmatpush1.bf16.msra.mxu1 %v14445_v31  ;;  %2534 = vmatprep.subr.bf16.mxu0 %v15401_v13  ;;  %v15661_v31 = vld [vmem:[%s19412_s1 + $0x20] ss:$8 sps:$4 sm:$0xff]   ;;  %v11529_v62 = vld [vmem:[%s19415_s8 + $0x10] sm:$0xff] }
  0x24   :  { %2657 = vmatprep.subr.bf16.mxu1 %v15520_v52  ;;  %v8313_v23 = vld [vmem:[%s19414_s5 + $0x20] sm:$0xff]  ;;  %v11536_v55 = vld [vmem:[%s19415_s8 + $0x48] sm:$0xff] }
  0x25   :  { %1124 = vperm.xlu1 %14838, %v1092_v28   ;;  %v8316_v28 = vld [vmem:[%s19414_s5 + $0x38] sm:$0xff]  ;;  %v11532_v59 = vld [vmem:[%s19415_s8 + $0x28] sm:$0xff]  ;;  %v11531_v60 = vld [vmem:[%s19415_s8 + $0x20] sm:$0xff] }
  0x26   :  { %2535 = vmatpush2.bf16.msra.mxu0 %v15376_v4  ;;  %1109 = vperm.xlu0 %14837, %v1089_v29   ;;  %v110_v29 = vld [vmem:[%s19411_s0 + $0x238] sm:$0xff]  ;;  %v140_v10 = vld [vmem:[%s19411_s0 + $0x328] sm:$0xff] }
  0x27   :  { %2658 = vmatpush2.bf16.msra.mxu1 %v15387_v8  ;;  %2536 = vmatprep.subr.bf16.mxu0 %v15441_v26  ;;  %v11528_v11 = vld [vmem:[%s19415_s8 + $0x8] sm:$0xff] }
  0x28   :  { %2659 = vmatprep.subr.bf16.mxu1 %v15536_v57 }
  0x29   :  { %1114 = vperm.xlu1 %14838, %v1090_v33   ;;  %v138_v33 = vld [vmem:[%s19411_s0 + $0x318] sm:$0xff] }
  0x2a   :  { %2537 = vmatpush2.bf16.msra.mxu0 %v15414_v17  ;;  %1189 = vperm.xlu0 %14837, %v1105_v34   ;;  %v8314_v34 = vld [vmem:[%s19414_s5 + $0x28] sm:$0xff]  ;;  %v15964_v37 = vpack.c.bf16 %v138_v33, %v110_v29 }
  0x2b   :  { %2660 = vmatpush2.bf16.msra.mxu1 %v15416_v18  ;;  %2752 = vmatprep.subr.bf16.mxu0 %v15556_v63  ;;  %v56_v33 = vld [vmem:[%s19411_s0 + $0x88] sm:$0xff] }
  0x2c   :  { %2875 = vmatprep.subr.bf16.mxu1 %v15572_v5 }
  0x2d   :  { %2539 = vmatmul.mubr.bf16.vlgmr.msra.gmra.mxu0 %v15565_v1 }
  0x2e   :  { %2662 = vmatmul.mubr.bf16.vlgmr.msra.gmra.mxu1 %v15565_v1  ;;  %12845 = vmatprep.mubr.msk.bf16.mxu0 %vm2478_vm0, %v15570_v2 }
  0x2f   :  { %12854 = vmatprep.mubr.msk.bf16.mxu1 %vm2478_vm0, %v15570_v2  ;;  %2753 = vmatpush1.bf16.msra.mxu0 %v15520_v52 }
  0x30   :  { %2876 = vmatpush1.bf16.msra.mxu1 %v15599_v15  ;;  %2754 = vmatprep.subr.bf16.mxu0 %v15601_v16 }
  0x31   :  { %2877 = vmatprep.subr.bf16.mxu1 %v15604_v19 }
  0x33   :  { %2755 = vmatpush1.bf16.msra.mxu0 %v15536_v57 }
  0x34   :  { %2878 = vmatpush1.bf16.msra.mxu1 %v15626_v24  ;;  %2756 = vmatprep.subr.bf16.mxu0 %v15520_v52 }
  0x35   :  { %2549 = vmatmul.mubr.bf16.gmra.mxu0 %v15631_v25  ;;  %2879 = vmatprep.subr.bf16.mxu1 %v15599_v15 }
  0x36   :  { %2672 = vmatmul.mubr.bf16.gmra.mxu1 %v15631_v25  ;;  %12846 = vmatprep.mubr.msk.bf16.mxu0 %vm2478_vm0, %v15637_v27 }
  0x37   :  { %12855 = vmatprep.mubr.msk.bf16.mxu1 %vm2478_vm0, %v15637_v27  ;;  %2757 = vmatpush1.bf16.msra.mxu0 %v15387_v8 }
  0x38   :  { %2880 = vmatpush1.bf16.msra.mxu1 %v15556_v63  ;;  %2758 = vmatprep.subr.bf16.mxu0 %v15536_v57 }
  0x39   :  { %2881 = vmatprep.subr.bf16.mxu1 %v15626_v24 }
  0x3b   :  { %2759 = vmatpush1.bf16.msra.mxu0 %v15416_v18 }
  0x3c   :  { %2882 = vmatpush1.bf16.msra.mxu1 %v15601_v16  ;;  %2760 = vmatprep.subr.bf16.mxu0 %v15387_v8 }
  0x3d   :  { %2559 = vmatmul.mubr.bf16.gmra.mxu0 %v15661_v31  ;;  %2883 = vmatprep.subr.bf16.mxu1 %v15556_v63 }
  0x3e   :  { %2682 = vmatmul.mubr.bf16.gmra.mxu1 %v15661_v31  ;;  %12847 = vmatprep.mubr.msk.bf16.mxu0 %vm2478_vm0, %v15667_v32 }
  0x3f   :  { %12856 = vmatprep.mubr.msk.bf16.mxu1 %vm2478_vm0, %v15667_v32  ;;  %2761 = vmatpush1.bf16.msra.mxu0 %v15401_v13 }
  0x40   :  { %2884 = vmatpush1.bf16.msra.mxu1 %v15520_v52  ;;  %2762 = vmatprep.subr.bf16.mxu0 %v15416_v18 }
  0x41   :  { %2885 = vmatprep.subr.bf16.mxu1 %v15601_v16 }
  0x43   :  { %2763 = vmatpush1.bf16.msra.mxu0 %v15441_v26 }
  0x44   :  { %2886 = vmatpush1.bf16.msra.mxu1 %v15536_v57  ;;  %2764 = vmatprep.subr.bf16.mxu0 %v15401_v13  ;;  %v1106_v13 = vld [vmem:[%s19413_s2 + $0x88] sm:$0xff] }
  0x45   :  { %2569 = vmatmul.mubr.bf16.gmra.mxu0 %v15691_v35  ;;  %2887 = vmatprep.subr.bf16.mxu1 %v15520_v52  ;;  %v8323_v52 = vld [vmem:[%s19414_s5 + $0x70] sm:$0xff] }
  0x46   :  { %2692 = vmatmul.mubr.bf16.gmra.mxu1 %v15691_v35  ;;  %12848 = vmatprep.mubr.msk.bf16.mxu0 %vm2478_vm0, %v15697_v36 }
  0x47   :  { %12857 = vmatprep.mubr.msk.bf16.mxu1 %vm2478_vm0, %v15697_v36  ;;  %2765 = vmatpush1.bf16.msra.mxu0 %v15376_v4  ;;  %v50_v4 = vld [vmem:[%s19411_s0 + $0x58] sm:$0xff] }
  0x48   :  { %2888 = vmatpush1.bf16.msra.mxu1 %v15387_v8  ;;  %2766 = vmatprep.subr.bf16.mxu0 %v15441_v26  ;;  %v78_v8 = vld [vmem:[%s19411_s0 + $0x138] sm:$0xff] }
  0x49   :  { %2889 = vmatprep.subr.bf16.mxu1 %v15536_v57  ;;  %1194 = vperm.xlu1 %14838, %v1106_v13   ;;  %v15745_v26 = vpack.c.bf16 %v78_v8, %v50_v4  ;;  %v8319_v57 = vld [vmem:[%s19414_s5 + $0x50] sm:$0xff]  ;;  %v139_v13 = vld [vmem:[%s19411_s0 + $0x320] sm:$0xff]  ;;  %v8312_v4 = vld [vmem:[%s19414_s5 + $0x18] sm:$0xff] }
  0x4a   :  { %8397 = vperm.xlu0 %14837, %v8323_v52   ;;  %v11538_v52 = vld [vmem:[%s19415_s8 + $0x58] sm:$0xff] }
  0x4b   :  { %2767 = vmatpush1.bf16.msra.mxu0 %v15414_v17  ;;  %v109_v17 = vld [vmem:[%s19411_s0 + $0x230] sm:$0xff] }
  0x4c   :  { %2890 = vmatpush1.bf16.msra.mxu1 %v15416_v18  ;;  %2780 = vmatprep.subr.bf16.mxu0 %v15599_v15  ;;  %v137_v18 = vld [vmem:[%s19411_s0 + $0x310] sm:$0xff] }
  0x4d   :  { %2579 = vmatmul.mubr.bf16.gmra.mxu0 %v15724_v39  ;;  %2903 = vmatprep.subr.bf16.mxu1 %v15727_v40  ;;  %v15775_v46 = vpack.c.bf16 %v137_v18, %v109_v17  ;;  %v11540_v17 = vld [vmem:[%s19415_s8 + $0x68] sm:$0xff]  ;;  %v11539_v18 = vld [vmem:[%s19415_s8 + $0x60] sm:$0xff] }
  0x4e   :  { %2702 = vmatmul.mubr.bf16.gmra.mxu1 %v15724_v39  ;;  %12849 = vmatprep.mubr.msk.bf16.mxu0 %vm2478_vm0, %v15732_v41 }
  0x4f   :  { %12858 = vmatprep.mubr.msk.bf16.mxu1 %vm2478_vm0, %v15732_v41  ;;  %2781 = vmatpush2.bf16.msra.mxu0 %v15556_v63 }
  0x50   :  { %2904 = vmatpush2.bf16.msra.mxu1 %v15572_v5  ;;  %2782 = vmatprep.subr.bf16.mxu0 %v15626_v24 }
  0x51   :  { %2905 = vmatprep.subr.bf16.mxu1 %v15745_v26  ;;  %8387 = vperm.xlu0 %14837, %v8321_v54   ;;  %v11537_v54 = vld [vmem:[%s19415_s8 + $0x50] sm:$0xff] }
  0x52   :  { %8402 = vperm.xlu1 %14838, %v8324_v56   ;;  %v11535_v56 = vld [vmem:[%s19415_s8 + $0x40] sm:$0xff] }
  0x53   :  { %2783 = vmatpush2.bf16.msra.mxu0 %v15601_v16 }
  0x54   :  { %2906 = vmatpush2.bf16.msra.mxu1 %v15604_v19  ;;  %2998 = vmatprep.subr.bf16.mxu0 %v15767_v44 }
  0x55   :  { %2589 = vmatmul.mubr.bf16.gmra.mxu0 %v15772_v45  ;;  %3121 = vmatprep.subr.bf16.mxu1 %v15775_v46 }
  0x56   :  { %2712 = vmatmul.mubr.bf16.gmra.mxu1 %v15772_v45  ;;  %12850 = vmatprep.mubr.msk.bf16.mxu0 %vm2478_vm0, %v15780_v47 }
  0x57   :  { %12859 = vmatprep.mubr.msk.bf16.mxu1 %vm2478_vm0, %v15780_v47  ;;  %8377 = vperm.xlu0 %14837, %v8319_v57   ;;  %v11534_v57 = vld [vmem:[%s19415_s8 + $0x38] sm:$0xff] }
  0x58   :  { %8392 = vperm.xlu1 %14838, %v8322_v7   ;;  %v112_v7 = vld [vmem:[%s19411_s0 + $0x248] sm:$0xff] }
  0x5b   :  { %8367 = vperm.xlu0 %14837, %v8317_v12   ;;  %v55_v12 = vld [vmem:[%s19411_s0 + $0x80] sm:$0xff] }
  0x5c   :  { %8382 = vperm.xlu1 %14838, %v8320_v20   ;;  %v11527_v20 = vld [vmem:[%s19415_s8] sm:$0xff] }
  0x5d   :  { %2599 = vmatmul.mubr.bf16.gmra.mxu0 %v15795_v48 }
  0x5e   :  { %2722 = vmatmul.mubr.bf16.gmra.mxu1 %v15795_v48  ;;  %12851 = vmatprep.mubr.msk.bf16.mxu0 %vm2478_vm0, %v15800_v49 }
  0x5f   :  { %12860 = vmatprep.mubr.msk.bf16.mxu1 %vm2478_vm0, %v15800_v49  ;;  %8357 = vperm.xlu0 %14837, %v8315_v21   ;;  %v57_v21 = vld [vmem:[%s19411_s0 + $0x90] sm:$0xff] }
  0x60   :  { %8372 = vperm.xlu1 %14838, %v8318_v22   ;;  %v85_v22 = vld [vmem:[%s19411_s0 + $0x170] sm:$0xff] }
  0x61   :  { %v16109_v29 = vpack.c.bf16 %v85_v22, %v57_v21 }
  0x63   :  { %8347 = vperm.xlu0 %14837, %v8313_v23   ;;  %v16104_v23 = vpack.c.bf16 %v140_v10, %v112_v7 }
  0x64   :  { %8362 = vperm.xlu1 %14838, %v8316_v28  }
  0x65   :  { %2609 = vmatmul.mubr.bf16.gmra.mxu0 %v15811_v50 }
  0x66   :  { %2732 = vmatmul.mubr.bf16.gmra.mxu1 %v15811_v50  ;;  %12852 = vmatprep.mubr.msk.bf16.mxu0 %vm2478_vm0, %v15816_v51 }
  0x67   :  { %12861 = vmatprep.mubr.msk.bf16.mxu1 %vm2478_vm0, %v15816_v51 }
  0x68   :  { %8352 = vperm.xlu1 %14838, %v8314_v34   ;;  %v12399_v34 = vld [vmem:[%s19416_s10 + $0x8] sm:$0x3] }
  0x6c   :  { %8342 = vperm.xlu1 %14838, %v8312_v4  }
  0x6d   :  { %2619 = vmatmul.mubr.bf16.gmra.mxu0 %v15830_v53 }
  0x6e   :  { %2742 = vmatmul.mubr.bf16.gmra.mxu1 %v15830_v53  ;;  %12862 = vmatprep.mubr.msk.bf16.mxu0 %vm2478_vm0, %v15456_v30 }
  0x6f   :  { %12871 = vmatprep.mubr.msk.bf16.mxu1 %vm2478_vm0, %v15456_v30 }
  0x70   :  { %8332 = vperm.xlu1 %14838, %v8310_v43  }
  0x74   :  { %11778 = vperm.xlu1 %14838, %v11539_v18  }
  0x75   :  { %2785 = vmatmul.mubr.bf16.vlgmr.msra.gmra.mxu0 %v15565_v1 }
  0x76   :  { %2908 = vmatmul.mubr.bf16.vlgmr.msra.gmra.mxu1 %v15565_v1  ;;  %12863 = vmatprep.mubr.msk.bf16.mxu0 %vm2478_vm0, %v15570_v2 }
  0x77   :  { %12872 = vmatprep.mubr.msk.bf16.mxu1 %vm2478_vm0, %v15570_v2  ;;  %2999 = vmatpush1.bf16.msra.mxu0 %v15727_v40 }
  0x78   :  { %3122 = vmatpush1.bf16.msra.mxu1 %v15865_v0  ;;  %3000 = vmatprep.subr.bf16.mxu0 %v15867_v6 }
  0x79   :  { %3123 = vmatprep.subr.bf16.mxu1 %v15873_v9  ;;  %11768 = vperm.xlu1 %14838, %v11537_v54  }
  0x7b   :  { %3001 = vmatpush1.bf16.msra.mxu0 %v15745_v26 }
  0x7c   :  { %3124 = vmatpush1.bf16.msra.mxu1 %v15892_v14  ;;  %3002 = vmatprep.subr.bf16.mxu0 %v15727_v40 }
  0x7d   :  { %2795 = vmatmul.mubr.bf16.gmra.mxu0 %v15631_v25  ;;  %3125 = vmatprep.subr.bf16.mxu1 %v15865_v0 }
  0x7e   :  { %2918 = vmatmul.mubr.bf16.gmra.mxu1 %v15631_v25  ;;  %12864 = vmatprep.mubr.msk.bf16.mxu0 %vm2478_vm0, %v15637_v27 }
  0x7f   :  { %12873 = vmatprep.mubr.msk.bf16.mxu1 %vm2478_vm0, %v15637_v27  ;;  %3003 = vmatpush1.bf16.msra.mxu0 %v15572_v5 }
  0x80   :  { %3126 = vmatpush1.bf16.msra.mxu1 %v15767_v44  ;;  %3004 = vmatprep.subr.bf16.mxu0 %v15745_v26 }
  0x81   :  { %3127 = vmatprep.subr.bf16.mxu1 %v15892_v14  ;;  %11758 = vperm.xlu1 %14838, %v11535_v56  }
  0x83   :  { %3005 = vmatpush1.bf16.msra.mxu0 %v15604_v19 }
  0x84   :  { %3128 = vmatpush1.bf16.msra.mxu1 %v15867_v6  ;;  %3006 = vmatprep.subr.bf16.mxu0 %v15572_v5 }
  0x85   :  { %2805 = vmatmul.mubr.bf16.gmra.mxu0 %v15661_v31  ;;  %3129 = vmatprep.subr.bf16.mxu1 %v15767_v44 }
  0x86   :  { %2928 = vmatmul.mubr.bf16.gmra.mxu1 %v15661_v31  ;;  %12865 = vmatprep.mubr.msk.bf16.mxu0 %vm2478_vm0, %v15667_v32 }
  0x87   :  { %12874 = vmatprep.mubr.msk.bf16.mxu1 %vm2478_vm0, %v15667_v32  ;;  %3007 = vmatpush1.bf16.msra.mxu0 %v15599_v15 }
  0x88   :  { %3130 = vmatpush1.bf16.msra.mxu1 %v15727_v40  ;;  %3008 = vmatprep.subr.bf16.mxu0 %v15604_v19 }
  0x89   :  { %3131 = vmatprep.subr.bf16.mxu1 %v15867_v6  ;;  %11748 = vperm.xlu1 %14838, %v11533_v58  }
  0x8b   :  { %3009 = vmatpush1.bf16.msra.mxu0 %v15626_v24 }
  0x8c   :  { %3132 = vmatpush1.bf16.msra.mxu1 %v15745_v26  ;;  %3010 = vmatprep.subr.bf16.mxu0 %v15599_v15  ;;  %v8311_v15 = vld [vmem:[%s19414_s5 + $0x10] sm:$0xff] }
  0x8d   :  { %2815 = vmatmul.mubr.bf16.gmra.mxu0 %v15691_v35  ;;  %3133 = vmatprep.subr.bf16.mxu1 %v15727_v40  ;;  %v8309_v40 = vld [vmem:[%s19414_s5] sm:$0xff] }
  0x8e   :  { %2938 = vmatmul.mubr.bf16.gmra.mxu1 %v15691_v35  ;;  %12866 = vmatprep.mubr.msk.bf16.mxu0 %vm2478_vm0, %v15697_v36 }
  0x8f   :  { %12875 = vmatprep.mubr.msk.bf16.mxu1 %vm2478_vm0, %v15697_v36  ;;  %3011 = vmatpush1.bf16.msra.mxu0 %v15556_v63  ;;  %v82_v63 = vld [vmem:[%s19411_s0 + $0x158] sm:$0xff] }
  0x90   :  { %3134 = vmatpush1.bf16.msra.mxu1 %v15572_v5  ;;  %3012 = vmatprep.subr.bf16.mxu0 %v15626_v24  ;;  %v15977_v5 = vpack.c.bf16 %v82_v63, %v54_v38  ;;  %v111_v24 = vld [vmem:[%s19411_s0 + $0x240] sm:$0xff]  ;;  %v16133_v63 = vpop.permute.xlu0 %1179 }
  0x91   :  { %3135 = vmatprep.subr.bf16.mxu1 %v15745_v26  ;;  %8337 = vperm.xlu0 %14837, %v8311_v15   ;;  %v16005_v8 = vpack.c.bf16 %v139_v13, %v111_v24  ;;  %v84_v15 = vld [vmem:[%s19411_s0 + $0x168] sm:$0xff]  ;;  %v12398_v38 = vld [vmem:[%s19416_s10] sm:$0xff] }
  0x92   :  { %11738 = vperm.xlu1 %14838, %v11531_v60  }
  0x93   :  { %3013 = vmatpush1.bf16.msra.mxu0 %v15601_v16  ;;  %v113_v16 = vld [vmem:[%s19411_s0 + $0x250] sm:$0xff] }
  0x94   :  { %3136 = vmatpush1.bf16.msra.mxu1 %v15604_v19  ;;  %3026 = vmatprep.subr.bf16.mxu0 %v15865_v0  ;;  %v141_v19 = vld [vmem:[%s19411_s0 + $0x330] sm:$0xff]  ;;  %v16148_v24 = vpop.permute.xlu0 %1184 }
  0x95   :  { %2825 = vmatmul.mubr.bf16.gmra.mxu0 %v15724_v39  ;;  %3149 = vmatprep.subr.bf16.mxu1 %v15964_v37  ;;  %v16008_v26 = vpack.c.bf16 %v141_v19, %v113_v16  ;;  %v58_v19 = vld [vmem:[%s19411_s0 + $0x98] sm:$0xff] }
  0x96   :  { %2948 = vmatmul.mubr.bf16.gmra.mxu1 %v15724_v39  ;;  %12867 = vmatprep.mubr.msk.bf16.mxu0 %vm2478_vm0, %v15732_v41 }
  0x97   :  { %12876 = vmatprep.mubr.msk.bf16.mxu1 %vm2478_vm0, %v15732_v41  ;;  %3027 = vmatpush2.bf16.msra.mxu0 %v15767_v44 }
  0x98   :  { %3150 = vmatpush2.bf16.msra.mxu1 %v15775_v46  ;;  %3028 = vmatprep.subr.bf16.mxu0 %v15892_v14 }
  0x99   :  { %3151 = vmatprep.subr.bf16.mxu1 %v15977_v5  ;;  %8327 = vperm.xlu0 %14837, %v8309_v40  }
  0x9a   :  { %11728 = vperm.xlu1 %14838, %v11529_v62  }
  0x9b   :  { %3029 = vmatpush2.bf16.msra.mxu0 %v15867_v6 }
  0x9c   :  { %3152 = vmatpush2.bf16.msra.mxu1 %v15873_v9  ;;  %3244 = vmatprep.subr.bf16.mxu0 %v16005_v8 }
  0x9d   :  { %2835 = vmatmul.mubr.bf16.gmra.mxu0 %v15772_v45  ;;  %3367 = vmatprep.subr.bf16.mxu1 %v16008_v26 }
  0x9e   :  { %2958 = vmatmul.mubr.bf16.gmra.mxu1 %v15772_v45  ;;  %12868 = vmatprep.mubr.msk.bf16.mxu0 %vm2478_vm0, %v15780_v47 }
  0x9f   :  { %12877 = vmatprep.mubr.msk.bf16.mxu1 %vm2478_vm0, %v15780_v47  ;;  %11788 = vperm.xlu0 %14837, %v11541_v42  }
  0xa0   :  { %11718 = vperm.xlu1 %14838, %v11527_v20  }
  0xa3   :  { %11783 = vperm.xlu0 %14837, %v11540_v17  }
  0xa4   :  { %12402 = vperm.xlu1 %14838, %v12398_v38  }
  0xa5   :  { %2845 = vmatmul.mubr.bf16.gmra.mxu0 %v15795_v48 }
  0xa6   :  { %2968 = vmatmul.mubr.bf16.gmra.mxu1 %v15795_v48  ;;  %12869 = vmatprep.mubr.msk.bf16.mxu0 %vm2478_vm0, %v15800_v49 }
  0xa7   :  { %12878 = vmatprep.mubr.msk.bf16.mxu1 %vm2478_vm0, %v15800_v49  ;;  %11773 = vperm.xlu0 %14837, %v11538_v52  }
  0xab   :  { %11763 = vperm.xlu0 %14837, %v11536_v55  }
  0xad   :  { %2855 = vmatmul.mubr.bf16.gmra.mxu0 %v15811_v50 }
  0xae   :  { %2978 = vmatmul.mubr.bf16.gmra.mxu1 %v15811_v50  ;;  %12870 = vmatprep.mubr.msk.bf16.mxu0 %vm2478_vm0, %v15816_v51 }
  0xaf   :  { %12879 = vmatprep.mubr.msk.bf16.mxu1 %vm2478_vm0, %v15816_v51  ;;  %11753 = vperm.xlu0 %14837, %v11534_v57  }
  0xb3   :  { %11743 = vperm.xlu0 %14837, %v11532_v59  }
  0xb5   :  { %2865 = vmatmul.mubr.bf16.gmra.mxu0 %v15830_v53 }
  0xb6   :  { %2988 = vmatmul.mubr.bf16.gmra.mxu1 %v15830_v53  ;;  %12880 = vmatprep.mubr.msk.bf16.mxu0 %vm2478_vm0, %v15456_v30 }
  0xb7   :  { %12889 = vmatprep.mubr.msk.bf16.mxu1 %vm2478_vm0, %v15456_v30  ;;  %11733 = vperm.xlu0 %14837, %v11530_v61   ;;  %v83_v30 = vld [vmem:[%s19411_s0 + $0x160] sm:$0xff] }
  0xb8   :  { %v16106_v28 = vpack.c.bf16 %v83_v30, %v55_v12 }
  0xbb   :  { %11723 = vperm.xlu0 %14837, %v11528_v11  }
  0xbd   :  { %3031 = vmatmul.mubr.bf16.vlgmr.msra.gmra.mxu0 %v15565_v1 }
  0xbe   :  { %3154 = vmatmul.mubr.bf16.vlgmr.msra.gmra.mxu1 %v15565_v1  ;;  %12881 = vmatprep.mubr.msk.bf16.mxu0 %vm2478_vm0, %v15570_v2  ;;  %v16131_v1 = vpack.c.bf16 %v84_v15, %v56_v33 }
  0xbf   :  { %12890 = vmatprep.mubr.msk.bf16.mxu1 %vm2478_vm0, %v15570_v2  ;;  %3245 = vmatpush1.bf16.msra.mxu0 %v15964_v37  ;;  %v16140_v2 = vpop.permute.xlu1 %1169 }
  0xc0   :  { %3368 = vmatpush1.bf16.msra.mxu1 %v16104_v23  ;;  %3246 = vmatprep.subr.bf16.mxu0 %v16106_v28 }
  0xc1   :  { %3369 = vmatprep.subr.bf16.mxu1 %v16109_v29  ;;  %12407 = vperm.xlu0 %14837, %v12399_v34  }
  0xc3   :  { %3247 = vmatpush1.bf16.msra.mxu0 %v15977_v5  ;;  %v16154_v13 = vpop.permute.xlu1 %1174 }
  0xc4   :  { %3370 = vmatpush1.bf16.msra.mxu1 %v16131_v1  ;;  %3248 = vmatprep.subr.bf16.mxu0 %v15964_v37 }
  0xc5   :  { %3041 = vmatmul.mubr.bf16.gmra.mxu0 %v15631_v25  ;;  %3371 = vmatprep.subr.bf16.mxu1 %v16104_v23 }
  0xc6   :  { %3164 = vmatmul.mubr.bf16.gmra.mxu1 %v15631_v25  ;;  %12882 = vmatprep.mubr.msk.bf16.mxu0 %vm2478_vm0, %v15637_v27  ;;  %v16160_v25 = vpop.permute.xlu0 %1159 }
  0xc7   :  { %12891 = vmatprep.mubr.msk.bf16.mxu1 %vm2478_vm0, %v15637_v27  ;;  %3249 = vmatpush1.bf16.msra.mxu0 %v15775_v46  ;;  %v16171_v27 = vpop.permute.xlu1 %1164 }
  0xc8   :  { %3372 = vmatpush1.bf16.msra.mxu1 %v16005_v8  ;;  %3250 = vmatprep.subr.bf16.mxu0 %v15977_v5 }
  0xc9   :  { %3373 = vmatprep.subr.bf16.mxu1 %v16131_v1 }
  0xca   :  { %v16174_v16 = vpop.permute.xlu0 %1149 }
  0xcb   :  { %3251 = vmatpush1.bf16.msra.mxu0 %v15873_v9 }
  0xcc   :  { %3374 = vmatpush1.bf16.msra.mxu1 %v16106_v28  ;;  %3252 = vmatprep.subr.bf16.mxu0 %v15775_v46 }
  0xcd   :  { %3051 = vmatmul.mubr.bf16.gmra.mxu0 %v15661_v31  ;;  %3375 = vmatprep.subr.bf16.mxu1 %v16005_v8 }
  0xce   :  { %3174 = vmatmul.mubr.bf16.gmra.mxu1 %v15661_v31  ;;  %12883 = vmatprep.mubr.msk.bf16.mxu0 %vm2478_vm0, %v15667_v32  ;;  %v114_v31 = vld [vmem:[%s19411_s0 + $0x258] sm:$0xff] }
  0xcf   :  { %12892 = vmatprep.mubr.msk.bf16.mxu1 %vm2478_vm0, %v15667_v32  ;;  %3253 = vmatpush1.bf16.msra.mxu0 %v15865_v0  ;;  %v142_v32 = vld [vmem:[%s19411_s0 + $0x338] sm:$0xff] }
  0xd0   :  { %3376 = vmatpush1.bf16.msra.mxu1 %v15964_v37  ;;  %3254 = vmatprep.subr.bf16.mxu0 %v15873_v9 }
  0xd1   :  { %3377 = vmatprep.subr.bf16.mxu1 %v16106_v28 }
  0xd3   :  { %3255 = vmatpush1.bf16.msra.mxu0 %v15892_v14 }
  0xd4   :  { %3378 = vmatpush1.bf16.msra.mxu1 %v15977_v5  ;;  %3256 = vmatprep.subr.bf16.mxu0 %v15865_v0  ;;  %v16192_v0 = vpop.permute.xlu1 %1154 }
  0xd5   :  { %3061 = vmatmul.mubr.bf16.gmra.mxu0 %v15691_v35  ;;  %3379 = vmatprep.subr.bf16.mxu1 %v15964_v37  ;;  %v16200_v37 = vpack.c.bf16 %v142_v32, %v114_v31 }
  0xd6   :  { %3184 = vmatmul.mubr.bf16.gmra.mxu1 %v15691_v35  ;;  %12884 = vmatprep.mubr.msk.bf16.mxu0 %vm2478_vm0, %v15697_v36  ;;  %v16197_v35 = vpop.permute.xlu0 %1139 }
  0xd7   :  { %12893 = vmatprep.mubr.msk.bf16.mxu1 %vm2478_vm0, %v15697_v36  ;;  %3257 = vmatpush1.bf16.msra.mxu0 %v15767_v44  ;;  %v86_v36 = vld [vmem:[%s19411_s0 + $0x178] sm:$0xff] }
  0xd8   :  { %3380 = vmatpush1.bf16.msra.mxu1 %v15775_v46  ;;  %3258 = vmatprep.subr.bf16.mxu0 %v15892_v14  ;;  %v16212_v44 = vpop.permute.xlu1 %1144  ;;  %v16215_v46 = vpack.c.bf16 %v86_v36, %v58_v19  ;;  %v115_v14 = vld [vmem:[%s19411_s0 + $0x260] sm:$0xff] }
  0xd9   :  { %3381 = vmatprep.subr.bf16.mxu1 %v15977_v5  ;;  %v145_v5 = vld [vmem:[%s19411_s0 + $0x350] sm:$0xff] }
  0xda   :  { %v16234_v40 = vpop.permute.xlu0 %1129 }
  0xdb   :  { %3259 = vmatpush1.bf16.msra.mxu0 %v15867_v6  ;;  %v143_v6 = vld [vmem:[%s19411_s0 + $0x340] sm:$0xff]  ;;  %19491 = vst [vmem:[#allocation6_spill] sm:$0xff] %v16234_v40 }
  0xdc   :  { %3382 = vmatpush1.bf16.msra.mxu1 %v15873_v9  ;;  %3272 = vmatprep.subr.bf16.mxu0 %v16104_v23  ;;  %v117_v9 = vld [vmem:[%s19411_s0 + $0x270] sm:$0xff]  ;;  %v16244_v42 = vpop.permute.xlu1 %1134 }
  0xdd   :  { %3071 = vmatmul.mubr.bf16.gmra.mxu0 %v15724_v39  ;;  %3395 = vmatprep.subr.bf16.mxu1 %v16200_v37  ;;  %v16242_v4 = vpack.c.bf16 %v145_v5, %v117_v9 }
  0xde   :  { %3194 = vmatmul.mubr.bf16.gmra.mxu1 %v15724_v39  ;;  %12885 = vmatprep.mubr.msk.bf16.mxu0 %vm2478_vm0, %v15732_v41  ;;  %v16239_v39 = vpack.c.bf16 %v143_v6, %v115_v14 }
  0xdf   :  { %12894 = vmatprep.mubr.msk.bf16.mxu1 %vm2478_vm0, %v15732_v41  ;;  %3273 = vmatpush2.bf16.msra.mxu0 %v16005_v8  ;;  %v16250_v41 = vpop.permute.xlu0 %1119 }
  0xe0   :  { %3396 = vmatpush2.bf16.msra.mxu1 %v16008_v26  ;;  %3274 = vmatprep.subr.bf16.mxu0 %v16131_v1  ;;  %v16258_v43 = vpop.permute.xlu1 %1124 }
  0xe1   :  { %3397 = vmatprep.subr.bf16.mxu1 %v16215_v46  ;;  %19492 = vst [vmem:[#allocation7_spill] sm:$0xff] %v16258_v43 }
  0xe3   :  { %3275 = vmatpush2.bf16.msra.mxu0 %v16106_v28  ;;  %v16260_v17 = vpop.permute.xlu0 %1109 }
  0xe4   :  { %3398 = vmatpush2.bf16.msra.mxu1 %v16109_v29  ;;  %3490 = vmatprep.subr.bf16.mxu0 %v16239_v39  ;;  %v16268_v56 = vpop.permute.xlu1 %1114 }
  0xe5   :  { %3081 = vmatmul.mubr.bf16.gmra.mxu0 %v15772_v45  ;;  %3613 = vmatprep.subr.bf16.mxu1 %v16242_v4  ;;  %19493 = vst [vmem:[#allocation8_spill] sm:$0xff] %v16268_v56 }
  0xe6   :  { %3204 = vmatmul.mubr.bf16.gmra.mxu1 %v15772_v45  ;;  %12886 = vmatprep.mubr.msk.bf16.mxu0 %vm2478_vm0, %v15780_v47 }
  0xe7   :  { %12895 = vmatprep.mubr.msk.bf16.mxu1 %vm2478_vm0, %v15780_v47 }
  0xed   :  { %v2540_v18 = vpop.f32.mrf.mxu0  ;;  %3091 = vmatmul.mubr.bf16.gmra.mxu0 %v15795_v48 }
  0xee   :  { %v2541_v52 = vadd.f32 %v2540_v18, %v16260_v17  ;;  %v2663_v54 = vpop.f32.mrf.mxu1  ;;  %3214 = vmatmul.mubr.bf16.gmra.mxu1 %v15795_v48  ;;  %12887 = vmatprep.mubr.msk.bf16.mxu0 %vm2478_vm0, %v15800_v49 }
  0xef   :  { %v2664_v45 = vadd.f32 %v2663_v54, %v16260_v17  ;;  %v2542_v55 = vpop.f32.mrf.mxu0  ;;  %12896 = vmatprep.mubr.msk.bf16.mxu1 %vm2478_vm0, %v15800_v49 }
  0xf0   :  { %v2543_v47 = vadd.f32 %v2542_v55, %v16260_v17  ;;  %v2665_v57 = vpop.f32.mrf.mxu1  ;;  %v3982_v61 = vmax.f32 %v2541_v52, 0.0 }
  0xf1   :  { %v3984_v58 = vmax.f32 %v2664_v45, 0.0  ;;  %v2666_v59 = vadd.f32 %v2665_v57, %v16260_v17  ;;  %v2544_v60 = vpop.f32.mrf.mxu0 }
  0xf2   :  { %v3983_v48 = vmax.f32 %v2543_v47, 0.0  ;;  %v2545_v62 = vadd.f32 %v2544_v60, %v16268_v56  ;;  %v2667_v7 = vpop.f32.mrf.mxu1 }
  0xf3   :  { %v3985_v10 = vmax.f32 %v2666_v59, 0.0  ;;  %v2668_v11 = vadd.f32 %v2667_v7, %v16268_v56  ;;  %v2546_v12 = vpop.f32.mrf.mxu0 }
  0xf4   :  { %v4414_v30 = vmax.f32 %v3982_v61, %v3983_v48  ;;  %v2547_v20 = vadd.f32 %v2546_v12, %v16268_v56  ;;  %v2669_v49 = vpop.f32.mrf.mxu1  ;;  %v4006_v38 = vmax.f32 %v2545_v62, 0.0 }
  0xf5   :  { %v4522_v21 = vmax.f32 %v3984_v58, %v3985_v10  ;;  %v4008_v22 = vmax.f32 %v2668_v11, 0.0  ;;  %v2670_v33 = vadd.f32 %v2669_v49, %v16268_v56  ;;  %v2550_v15 = vpop.f32.mrf.mxu0  ;;  %3101 = vmatmul.mubr.bf16.gmra.mxu0 %v15811_v50 }
  0xf6   :  { %v14053_v34 = vpack.c.bf16 %v4414_v30, %v4414_v30  ;;  %v4007_v31 = vmax.f32 %v2547_v20, 0.0  ;;  %v2551_v32 = vadd.f32 %v2550_v15, %v16250_v41  ;;  %v2673_v19 = vpop.f32.mrf.mxu1  ;;  %3224 = vmatmul.mubr.bf16.gmra.mxu1 %v15811_v50  ;;  %12888 = vmatprep.mubr.msk.bf16.mxu0 %vm2478_vm0, %v15816_v51 }
  0xf7   :  { %v14071_v36 = vpack.c.bf16 %v4522_v21, %v4522_v21  ;;  %v4009_v14 = vmax.f32 %v2670_v33, 0.0  ;;  %v2674_v6 = vadd.f32 %v2673_v19, %v16250_v41  ;;  %v2552_v9 = vpop.f32.mrf.mxu0  ;;  %12897 = vmatprep.mubr.msk.bf16.mxu1 %vm2478_vm0, %v15816_v51 }
  0xf8   :  { %4504 = vst [vmem:[#allocation3] sm:$0xf] %v14053_v34  ;;  %v4415_v5 = vmax.f32 %v4006_v38, %v4007_v31  ;;  %v2553_v18 = vadd.f32 %v2552_v9, %v16250_v41  ;;  %v2675_v52 = vpop.f32.mrf.mxu1  ;;  %v4030_v57 = vmax.f32 %v2551_v32, 0.0  ;;  %v16298_v38 = vld [vmem:[%s19412_s1 + $0x4] ss:$8 sps:$4 sm:$0xff]  }
  0xf9   :  { %4612 = vst [vmem:[#allocation3 + $0x4] sm:$0xf] %v14071_v36  ;;  %v4523_v54 = vmax.f32 %v4008_v22, %v4009_v14  ;;  %v4032_v45 = vmax.f32 %v2674_v6, 0.0  ;;  %v2676_v50 = vadd.f32 %v2675_v52, %v16250_v41  ;;  %v2554_v55 = vpop.f32.mrf.mxu0  ;;  %v116_v9 = vld [vmem:[%s19411_s0 + $0x268] sm:$0xff] }
  0xfa   :  { %v14054_v47 = vpack.c.bf16 %v4415_v5, %v4415_v5  ;;  %v4031_v58 = vmax.f32 %v2553_v18, 0.0  ;;  %v2555_v59 = vadd.f32 %v2554_v55, %v16258_v43  ;;  %v2677_v60 = vpop.f32.mrf.mxu1  ;;  %v87_v55 = vld [vmem:[%s19411_s0 + $0x180] sm:$0xff] }
  0xfb   :  { %v14072_v61 = vpack.c.bf16 %v4523_v54, %v4523_v54  ;;  %v4033_v48 = vmax.f32 %v2676_v50, 0.0  ;;  %v2678_v51 = vadd.f32 %v2677_v60, %v16258_v43  ;;  %v2556_v62 = vpop.f32.mrf.mxu0  ;;  %v59_v50 = vld [vmem:[%s19411_s0 + $0xa0] sm:$0xff] }
  0xfc   :  { %4505 = vst [vmem:[#allocation3 + $0x30] sm:$0xf] %v14054_v47  ;;  %v4416_v7 = vmax.f32 %v4030_v57, %v4031_v58  ;;  %v2557_v10 = vadd.f32 %v2556_v62, %v16258_v43  ;;  %v2679_v11 = vpop.f32.mrf.mxu1  ;;  %v4054_v22 = vmax.f32 %v2555_v59, 0.0 }
  0xfd   :  { %4613 = vst [vmem:[#allocation3 + $0x34] sm:$0xf] %v14072_v61  ;;  %v4524_v12 = vmax.f32 %v4032_v45, %v4033_v48  ;;  %v4056_v30 = vmax.f32 %v2678_v51, 0.0  ;;  %v2680_v20 = vadd.f32 %v2679_v11, %v16258_v43  ;;  %v2560_v49 = vpop.f32.mrf.mxu0  ;;  %3111 = vmatmul.mubr.bf16.gmra.mxu0 %v15830_v53  ;;  %v144_v45 = vld [vmem:[%s19411_s0 + $0x348] sm:$0xff]  ;;  %v61_v61 = vld [vmem:[%s19411_s0 + $0xb0] sm:$0xff] }
  0xfe   :  { %v14055_v21 = vpack.c.bf16 %v4416_v7, %v4416_v7  ;;  %v4055_v33 = vmax.f32 %v2557_v10, 0.0  ;;  %v2561_v15 = vadd.f32 %v2560_v49, %v16234_v40  ;;  %v2683_v34 = vpop.f32.mrf.mxu1  ;;  %3234 = vmatmul.mubr.bf16.gmra.mxu1 %v15830_v53  ;;  %12898 = vmatprep.mubr.msk.bf16.mxu0 %vm2478_vm0, %v16298_v38  ;;  %v89_v48 = vld [vmem:[%s19411_s0 + $0x190] sm:$0xff]  ;;  %v16330_v49 = vpack.c.bf16 %v87_v55, %v59_v50 }
  0xff   :  { %v14073_v31 = vpack.c.bf16 %v4524_v12, %v4524_v12  ;;  %v4057_v32 = vmax.f32 %v2680_v20, 0.0  ;;  %v2684_v19 = vadd.f32 %v2683_v34, %v16234_v40  ;;  %v2562_v36 = vpop.f32.mrf.mxu0  ;;  %12907 = vmatprep.mubr.msk.bf16.mxu1 %vm2478_vm0, %v16298_v38  ;;  %v16328_v20 = vpack.c.bf16 %v144_v45, %v116_v9  ;;  %v16336_v34 = vld [vmem:[%s19412_s1] ss:$8 sps:$4 sm:$0xff]  }
 0x100   :  { %4506 = vst [vmem:[#allocation3 + $0x60] sm:$0xf] %v14055_v21  ;;  %v4417_v14 = vmax.f32 %v4054_v22, %v4055_v33  ;;  %v2563_v53 = vadd.f32 %v2562_v36, %v16234_v40  ;;  %v2685_v6 = vpop.f32.mrf.mxu1  ;;  %v4078_v57 = vmax.f32 %v2561_v15, 0.0 }
 0x101   :  { %4614 = vst [vmem:[#allocation3 + $0x64] sm:$0xf] %v14073_v31  ;;  %v4525_v5 = vmax.f32 %v4056_v30, %v4057_v32  ;;  %v4080_v18 = vmax.f32 %v2684_v19, 0.0  ;;  %v2686_v52 = vadd.f32 %v2685_v6, %v16234_v40  ;;  %v2564_v54 = vpop.f32.mrf.mxu0  ;;  %v16339_v31 = vpack.c.bf16 %v89_v48, %v61_v61  ;;  %v60_v32 = vld [vmem:[%s19411_s0 + $0xa8] sm:$0xff] }
 0x102   :  { %v14056_v47 = vpack.c.bf16 %v4417_v14, %v4417_v14  ;;  %v4079_v58 = vmax.f32 %v2563_v53, 0.0  ;;  %v2565_v59 = vadd.f32 %v2564_v54, %v16244_v42  ;;  %v2687_v60 = vpop.f32.mrf.mxu1  ;;  %v88_v19 = vld [vmem:[%s19411_s0 + $0x188] sm:$0xff] }
 0x103   :  { %v14074_v51 = vpack.c.bf16 %v4525_v5, %v4525_v5  ;;  %v4081_v62 = vmax.f32 %v2686_v52, 0.0  ;;  %v2688_v7 = vadd.f32 %v2687_v60, %v16244_v42  ;;  %v2566_v10 = vpop.f32.mrf.mxu0  ;;  %v16352_v5 = vld [vmem:[%s19412_s1 + $0x14] ss:$8 sps:$4 sm:$0xff]  }
 0x104   :  { %4507 = vst [vmem:[#allocation3 + $0x90] sm:$0xf] %v14056_v47  ;;  %v4418_v11 = vmax.f32 %v4078_v57, %v4079_v58  ;;  %v2567_v12 = vadd.f32 %v2566_v10, %v16244_v42  ;;  %v2689_v30 = vpop.f32.mrf.mxu1  ;;  %v4102_v14 = vmax.f32 %v2565_v59, 0.0  ;;  %v16363_v57 = vpack.c.bf16 %v88_v19, %v60_v32 }
 0x105   :  { %4615 = vst [vmem:[#allocation3 + $0x94] sm:$0xf] %v14074_v51  ;;  %v4526_v21 = vmax.f32 %v4080_v18, %v4081_v62  ;;  %v4104_v22 = vmax.f32 %v2688_v7, 0.0  ;;  %v2690_v33 = vadd.f32 %v2689_v30, %v16244_v42  ;;  %v2570_v15 = vpop.f32.mrf.mxu0  ;;  %3277 = vmatmul.mubr.bf16.vlgmr.msra.gmra.mxu0 %v16336_v34 }
 0x106   :  { %v14057_v36 = vpack.c.bf16 %v4418_v11, %v4418_v11  ;;  %v4103_v53 = vmax.f32 %v2567_v12, 0.0  ;;  %v2571_v6 = vadd.f32 %v2570_v15, %v16197_v35  ;;  %v2693_v9 = vpop.f32.mrf.mxu1  ;;  %3400 = vmatmul.mubr.bf16.vlgmr.msra.gmra.mxu1 %v16336_v34  ;;  %12899 = vmatprep.mubr.msk.bf16.mxu0 %vm2478_vm0, %v16352_v5 }
 0x107   :  { %v14075_v18 = vpack.c.bf16 %v4526_v21, %v4526_v21  ;;  %v4105_v52 = vmax.f32 %v2690_v33, 0.0  ;;  %v2694_v54 = vadd.f32 %v2693_v9, %v16197_v35  ;;  %v2572_v45 = vpop.f32.mrf.mxu0  ;;  %12908 = vmatprep.mubr.msk.bf16.mxu1 %vm2478_vm0, %v16352_v5  ;;  %3491 = vmatpush1.bf16.msra.mxu0 %v16200_v37 }
 0x108   :  { %4508 = vst [vmem:[#allocation3 + $0xc0] sm:$0xf] %v14057_v36  ;;  %v4419_v50 = vmax.f32 %v4102_v14, %v4103_v53  ;;  %v2573_v55 = vadd.f32 %v2572_v45, %v16197_v35  ;;  %v2695_v47 = vpop.f32.mrf.mxu1  ;;  %3614 = vmatpush1.bf16.msra.mxu1 %v16328_v20  ;;  %3492 = vmatprep.subr.bf16.mxu0 %v16330_v49  ;;  %v4126_v51 = vmax.f32 %v2571_v6, 0.0  ;;  %v16377_v53 = vld [vmem:[%s19412_s1 + $0x10] ss:$8 sps:$4 sm:$0xff]  }
 0x109   :  { %4616 = vst [vmem:[#allocation3 + $0xc4] sm:$0xf] %v14075_v18  ;;  %v4527_v58 = vmax.f32 %v4104_v22, %v4105_v52  ;;  %v4128_v59 = vmax.f32 %v2694_v54, 0.0  ;;  %v2696_v60 = vadd.f32 %v2695_v47, %v16197_v35  ;;  %v2574_v61 = vpop.f32.mrf.mxu0  ;;  %3615 = vmatprep.subr.bf16.mxu1 %v16339_v31  ;;  %v16386_v45 = vld [vmem:[%s19412_s1 + $0x24] ss:$8 sps:$4 sm:$0xff]  }
 0x10a   :  { %v14058_v48 = vpack.c.bf16 %v4419_v50, %v4419_v50  ;;  %v4127_v62 = vmax.f32 %v2573_v55, 0.0  ;;  %v2575_v7 = vadd.f32 %v2574_v61, %v16212_v44  ;;  %v2697_v10 = vpop.f32.mrf.mxu1 }
 0x10b   :  { %v14076_v11 = vpack.c.bf16 %v4527_v58, %v4527_v58  ;;  %v4129_v12 = vmax.f32 %v2696_v60, 0.0  ;;  %v2698_v30 = vadd.f32 %v2697_v10, %v16212_v44  ;;  %v2576_v21 = vpop.f32.mrf.mxu0  ;;  %3493 = vmatpush1.bf16.msra.mxu0 %v16215_v46 }
 0x10c   :  { %4509 = vst [vmem:[#allocation3 + $0xf0] sm:$0xf] %v14058_v48  ;;  %v4420_v22 = vmax.f32 %v4126_v51, %v4127_v62  ;;  %v2577_v33 = vadd.f32 %v2576_v21, %v16212_v44  ;;  %v2699_v15 = vpop.f32.mrf.mxu1  ;;  %3616 = vmatpush1.bf16.msra.mxu1 %v16363_v57  ;;  %3494 = vmatprep.subr.bf16.mxu0 %v16200_v37  ;;  %v4150_v9 = vmax.f32 %v2575_v7, 0.0 }
 0x10d   :  { %4617 = vst [vmem:[#allocation3 + $0xf4] sm:$0xf] %v14076_v11  ;;  %v4528_v32 = vmax.f32 %v4128_v59, %v4129_v12  ;;  %v4152_v19 = vmax.f32 %v2698_v30, 0.0  ;;  %v2700_v36 = vadd.f32 %v2699_v15, %v16212_v44  ;;  %v2580_v14 = vpop.f32.mrf.mxu0  ;;  %3287 = vmatmul.mubr.bf16.gmra.mxu0 %v16377_v53  ;;  %3617 = vmatprep.subr.bf16.mxu1 %v16328_v20 }
 0x10e   :  { %v14059_v6 = vpack.c.bf16 %v4420_v22, %v4420_v22  ;;  %v4151_v18 = vmax.f32 %v2577_v33, 0.0  ;;  %v2581_v52 = vadd.f32 %v2580_v14, %v16174_v16  ;;  %v2703_v54 = vpop.f32.mrf.mxu1  ;;  %3410 = vmatmul.mubr.bf16.gmra.mxu1 %v16377_v53  ;;  %12900 = vmatprep.mubr.msk.bf16.mxu0 %vm2478_vm0, %v16386_v45 }
 0x10f   :  { %v14077_v50 = vpack.c.bf16 %v4528_v32, %v4528_v32  ;;  %v4153_v55 = vmax.f32 %v2700_v36, 0.0  ;;  %v2704_v47 = vadd.f32 %v2703_v54, %v16174_v16  ;;  %v2582_v58 = vpop.f32.mrf.mxu0  ;;  %12909 = vmatprep.mubr.msk.bf16.mxu1 %vm2478_vm0, %v16386_v45  ;;  %3495 = vmatpush1.bf16.msra.mxu0 %v16008_v26  ;;  %v16409_v54 = vld [vmem:[%s19412_s1 + $0x20] ss:$8 sps:$4 sm:$0xff]  }
 0x110   :  { %4510 = vst [vmem:[#allocation3 + $0x120] sm:$0xf] %v14059_v6  ;;  %v4421_v59 = vmax.f32 %v4150_v9, %v4151_v18  ;;  %v2583_v60 = vadd.f32 %v2582_v58, %v16174_v16  ;;  %v2705_v61 = vpop.f32.mrf.mxu1  ;;  %3618 = vmatpush1.bf16.msra.mxu1 %v16239_v39  ;;  %3496 = vmatprep.subr.bf16.mxu0 %v16215_v46  ;;  %v4174_v11 = vmax.f32 %v2581_v52, 0.0 }
 0x111   :  { %4618 = vst [vmem:[#allocation3 + $0x124] sm:$0xf] %v14077_v50  ;;  %v4529_v48 = vmax.f32 %v4152_v19, %v4153_v55  ;;  %v4176_v51 = vmax.f32 %v2704_v47, 0.0  ;;  %v2706_v62 = vadd.f32 %v2705_v61, %v16174_v16  ;;  %v2584_v7 = vpop.f32.mrf.mxu0  ;;  %3619 = vmatprep.subr.bf16.mxu1 %v16363_v57 }
 0x112   :  { %v14060_v10 = vpack.c.bf16 %v4421_v59, %v4421_v59  ;;  %v4175_v12 = vmax.f32 %v2583_v60, 0.0  ;;  %v2585_v30 = vadd.f32 %v2584_v7, %v16192_v0  ;;  %v2707_v21 = vpop.f32.mrf.mxu1  ;;  %v16418_v60 = vld [vmem:[%s19412_s1 + $0x34] ss:$8 sps:$4 sm:$0xff]  }
 0x113   :  { %v14078_v22 = vpack.c.bf16 %v4529_v48, %v4529_v48  ;;  %v4177_v33 = vmax.f32 %v2706_v62, 0.0  ;;  %v2708_v15 = vadd.f32 %v2707_v21, %v16192_v0  ;;  %v2586_v32 = vpop.f32.mrf.mxu0  ;;  %3497 = vmatpush1.bf16.msra.mxu0 %v16109_v29 }
 0x114   :  { %4511 = vst [vmem:[#allocation3 + $0x150] sm:$0xf] %v14060_v10  ;;  %v4422_v19 = vmax.f32 %v4174_v11, %v4175_v12  ;;  %v2587_v36 = vadd.f32 %v2586_v32, %v16192_v0  ;;  %v2709_v14 = vpop.f32.mrf.mxu1  ;;  %3620 = vmatpush1.bf16.msra.mxu1 %v16330_v49  ;;  %3498 = vmatprep.subr.bf16.mxu0 %v16008_v26  ;;  %v4198_v55 = vmax.f32 %v2585_v30, 0.0 }
 0x115   :  { %4619 = vst [vmem:[#allocation3 + $0x154] sm:$0xf] %v14078_v22  ;;  %v4530_v6 = vmax.f32 %v4176_v51, %v4177_v33  ;;  %v4200_v9 = vmax.f32 %v2708_v15, 0.0  ;;  %v2710_v18 = vadd.f32 %v2709_v14, %v16192_v0  ;;  %v2590_v52 = vpop.f32.mrf.mxu0  ;;  %3297 = vmatmul.mubr.bf16.gmra.mxu0 %v16409_v54  ;;  %3621 = vmatprep.subr.bf16.mxu1 %v16239_v39 }
 0x116   :  { %v14061_v50 = vpack.c.bf16 %v4422_v19, %v4422_v19  ;;  %v4199_v47 = vmax.f32 %v2587_v36, 0.0  ;;  %v2591_v58 = vadd.f32 %v2590_v52, %v16160_v25  ;;  %v2713_v59 = vpop.f32.mrf.mxu1  ;;  %3420 = vmatmul.mubr.bf16.gmra.mxu1 %v16409_v54  ;;  %12901 = vmatprep.mubr.msk.bf16.mxu0 %vm2478_vm0, %v16418_v60 }
 0x117   :  { %v14079_v61 = vpack.c.bf16 %v4530_v6, %v4530_v6  ;;  %v4201_v48 = vmax.f32 %v2710_v18, 0.0  ;;  %v2714_v51 = vadd.f32 %v2713_v59, %v16160_v25  ;;  %v2592_v62 = vpop.f32.mrf.mxu0  ;;  %12910 = vmatprep.mubr.msk.bf16.mxu1 %vm2478_vm0, %v16418_v60  ;;  %3499 = vmatpush1.bf16.msra.mxu0 %v16104_v23 }
 0x118   :  { %4512 = vst [vmem:[#allocation3 + $0x180] sm:$0xf] %v14061_v50  ;;  %v4423_v7 = vmax.f32 %v4198_v55, %v4199_v47  ;;  %v2593_v10 = vadd.f32 %v2592_v62, %v16160_v25  ;;  %v2715_v11 = vpop.f32.mrf.mxu1  ;;  %3622 = vmatpush1.bf16.msra.mxu1 %v16200_v37  ;;  %3500 = vmatprep.subr.bf16.mxu0 %v16109_v29  ;;  %v4222_v15 = vmax.f32 %v2591_v58, 0.0 }
 0x119   :  { %4620 = vst [vmem:[#allocation3 + $0x184] sm:$0xf] %v14079_v61  ;;  %v4531_v12 = vmax.f32 %v4200_v9, %v4201_v48  ;;  %v4224_v30 = vmax.f32 %v2714_v51, 0.0  ;;  %v2716_v21 = vadd.f32 %v2715_v11, %v16160_v25  ;;  %v2594_v22 = vpop.f32.mrf.mxu0  ;;  %3623 = vmatprep.subr.bf16.mxu1 %v16330_v49  ;;  %v16441_v48 = vld [vmem:[%s19412_s1 + $0x30] ss:$8 sps:$4 sm:$0xff]  }
 0x11a   :  { %v14062_v33 = vpack.c.bf16 %v4423_v7, %v4423_v7  ;;  %v4223_v32 = vmax.f32 %v2593_v10, 0.0  ;;  %v2595_v19 = vadd.f32 %v2594_v22, %v16171_v27  ;;  %v2717_v36 = vpop.f32.mrf.mxu1  ;;  %v16450_v11 = vld [vmem:[%s19412_s1 + $0x44] ss:$8 sps:$4 sm:$0xff]  }
 0x11b   :  { %v14080_v14 = vpack.c.bf16 %v4531_v12, %v4531_v12  ;;  %v4225_v6 = vmax.f32 %v2716_v21, 0.0  ;;  %v2718_v18 = vadd.f32 %v2717_v36, %v16171_v27  ;;  %v2596_v52 = vpop.f32.mrf.mxu0  ;;  %3501 = vmatpush1.bf16.msra.mxu0 %v16131_v1  ;;  %v146_v12 = vld [vmem:[%s19411_s0 + $0x358] sm:$0xff] }
 0x11c   :  { %4513 = vst [vmem:[#allocation3 + $0x1b0] sm:$0xf] %v14062_v33  ;;  %v4424_v9 = vmax.f32 %v4222_v15, %v4223_v32  ;;  %v2597_v50 = vadd.f32 %v2596_v52, %v16171_v27  ;;  %v2719_v55 = vpop.f32.mrf.mxu1  ;;  %3624 = vmatpush1.bf16.msra.mxu1 %v16215_v46  ;;  %3502 = vmatprep.subr.bf16.mxu0 %v16104_v23  ;;  %v4246_v62 = vmax.f32 %v2595_v19, 0.0 }
 0x11d   :  { %4621 = vst [vmem:[#allocation3 + $0x1b4] sm:$0xf] %v14080_v14  ;;  %v4532_v47 = vmax.f32 %v4224_v30, %v4225_v6  ;;  %v4248_v58 = vmax.f32 %v2718_v18, 0.0  ;;  %v2720_v59 = vadd.f32 %v2719_v55, %v16171_v27  ;;  %v2600_v61 = vpop.f32.mrf.mxu0  ;;  %3307 = vmatmul.mubr.bf16.gmra.mxu0 %v16441_v48  ;;  %3625 = vmatprep.subr.bf16.mxu1 %v16200_v37  ;;  %v118_v37 = vld [vmem:[%s19411_s0 + $0x278] sm:$0xff] }
 0x11e   :  { %v14063_v51 = vpack.c.bf16 %v4424_v9, %v4424_v9  ;;  %v4247_v7 = vmax.f32 %v2597_v50, 0.0  ;;  %v2601_v23 = vadd.f32 %v2600_v61, %v16140_v2  ;;  %v2723_v10 = vpop.f32.mrf.mxu1  ;;  %3430 = vmatmul.mubr.bf16.gmra.mxu1 %v16441_v48  ;;  %12902 = vmatprep.mubr.msk.bf16.mxu0 %vm2478_vm0, %v16450_v11  ;;  %v16469_v52 = vpack.c.bf16 %v146_v12, %v118_v37 }
 0x11f   :  { %v14081_v30 = vpack.c.bf16 %v4532_v47, %v4532_v47  ;;  %v4249_v21 = vmax.f32 %v2720_v59, 0.0  ;;  %v2724_v22 = vadd.f32 %v2723_v10, %v16140_v2  ;;  %v2602_v33 = vpop.f32.mrf.mxu0  ;;  %12911 = vmatprep.mubr.msk.bf16.mxu1 %vm2478_vm0, %v16450_v11  ;;  %3503 = vmatpush1.bf16.msra.mxu0 %v16005_v8 }
 0x120   :  { %4514 = vst [vmem:[#allocation3 + $0x1e0] sm:$0xf] %v14063_v51  ;;  %v4425_v15 = vmax.f32 %v4246_v62, %v4247_v7  ;;  %v2603_v32 = vadd.f32 %v2602_v33, %v16140_v2  ;;  %v2725_v19 = vpop.f32.mrf.mxu1  ;;  %3626 = vmatpush1.bf16.msra.mxu1 %v16008_v26  ;;  %3504 = vmatprep.subr.bf16.mxu0 %v16131_v1  ;;  %v4270_v9 = vmax.f32 %v2601_v23, 0.0  ;;  %v62_v26 = vld [vmem:[%s19411_s0 + $0xb8] sm:$0xff] }
 0x121   :  { %4622 = vst [vmem:[#allocation3 + $0x1e4] sm:$0xf] %v14081_v30  ;;  %v4533_v36 = vmax.f32 %v4248_v58, %v4249_v21  ;;  %v4272_v14 = vmax.f32 %v2724_v22, 0.0  ;;  %v2726_v6 = vadd.f32 %v2725_v19, %v16140_v2  ;;  %v2604_v18 = vpop.f32.mrf.mxu0  ;;  %3627 = vmatprep.subr.bf16.mxu1 %v16215_v46  ;;  %v90_v1 = vld [vmem:[%s19411_s0 + $0x198] sm:$0xff]  ;;  %v16487_v30 = vld [vmem:[%s19412_s1 + $0x40] ss:$8 sps:$4 sm:$0xff]  }
 0x122   :  { %v14064_v8 = vpack.c.bf16 %v4425_v15, %v4425_v15  ;;  %v4271_v50 = vmax.f32 %v2603_v32, 0.0  ;;  %v2605_v55 = vadd.f32 %v2604_v18, %v16154_v13  ;;  %v2727_v47 = vpop.f32.mrf.mxu1  ;;  %v147_v21 = vld [vmem:[%s19411_s0 + $0x360] sm:$0xff] }
 0x123   :  { %v14082_v58 = vpack.c.bf16 %v4533_v36, %v4533_v36  ;;  %v4273_v59 = vmax.f32 %v2726_v6, 0.0  ;;  %v2728_v46 = vadd.f32 %v2727_v47, %v16154_v13  ;;  %v2606_v61 = vpop.f32.mrf.mxu0  ;;  %3505 = vmatpush1.bf16.msra.mxu0 %v16106_v28  ;;  %v16491_v28 = vpack.c.bf16 %v90_v1, %v62_v26  ;;  %v16504_v36 = vld [vmem:[%s19412_s1 + $0x54] ss:$8 sps:$4 sm:$0xff]  }
 0x124   :  { %4515 = vst [vmem:[#allocation3 + $0x210] sm:$0xf] %v14064_v8  ;;  %v4426_v51 = vmax.f32 %v4270_v9, %v4271_v50  ;;  %v2607_v62 = vadd.f32 %v2606_v61, %v16154_v13  ;;  %v2729_v7 = vpop.f32.mrf.mxu1  ;;  %3628 = vmatpush1.bf16.msra.mxu1 %v16109_v29  ;;  %3518 = vmatprep.subr.bf16.mxu0 %v16328_v20  ;;  %v119_v29 = vld [vmem:[%s19411_s0 + $0x280] sm:$0xff]  ;;  %v4294_v33 = vmax.f32 %v2605_v55, 0.0  ;;  %v149_v6 = vld [vmem:[%s19411_s0 + $0x370] sm:$0xff] }
 0x125   :  { %4623 = vst [vmem:[#allocation3 + $0x214] sm:$0xf] %v14082_v58  ;;  %v4534_v23 = vmax.f32 %v4272_v14, %v4273_v59  ;;  %v4296_v10 = vmax.f32 %v2728_v46, 0.0  ;;  %v2730_v37 = vadd.f32 %v2729_v7, %v16154_v13  ;;  %v2610_v12 = vpop.f32.mrf.mxu0  ;;  %3317 = vmatmul.mubr.bf16.gmra.mxu0 %v16487_v30  ;;  %3641 = vmatprep.subr.bf16.mxu1 %v16469_v52  ;;  %v121_v14 = vld [vmem:[%s19411_s0 + $0x290] sm:$0xff] }
 0x126   :  { %v14065_v22 = vpack.c.bf16 %v4426_v51, %v4426_v51  ;;  %v4295_v15 = vmax.f32 %v2607_v62, 0.0  ;;  %v2611_v32 = vadd.f32 %v2610_v12, %v16133_v63  ;;  %v2733_v19 = vpop.f32.mrf.mxu1  ;;  %3440 = vmatmul.mubr.bf16.gmra.mxu1 %v16487_v30  ;;  %12903 = vmatprep.mubr.msk.bf16.mxu0 %vm2478_vm0, %v16504_v36  ;;  %v16521_v1 = vpack.c.bf16 %v147_v21, %v119_v29 }
 0x127   :  { %v14083_v18 = vpack.c.bf16 %v4534_v23, %v4534_v23  ;;  %v4297_v8 = vmax.f32 %v2730_v37, 0.0  ;;  %v2734_v9 = vadd.f32 %v2733_v19, %v16133_v63  ;;  %v2612_v50 = vpop.f32.mrf.mxu0  ;;  %12912 = vmatprep.mubr.msk.bf16.mxu1 %vm2478_vm0, %v16504_v36  ;;  %3519 = vmatpush2.bf16.msra.mxu0 %v16239_v39  ;;  %v16525_v51 = vpack.c.bf16 %v149_v6, %v121_v14 }
 0x128   :  { %4516 = vst [vmem:[#allocation3 + $0x240] sm:$0xf] %v14065_v22  ;;  %v4427_v55 = vmax.f32 %v4294_v33, %v4295_v15  ;;  %v2613_v47 = vadd.f32 %v2612_v50, %v16133_v63  ;;  %v2735_v26 = vpop.f32.mrf.mxu1  ;;  %3642 = vmatpush2.bf16.msra.mxu1 %v16242_v4  ;;  %3520 = vmatprep.subr.bf16.mxu0 %v16363_v57  ;;  %v4318_v7 = vmax.f32 %v2611_v32, 0.0 }
 0x129   :  { %4624 = vst [vmem:[#allocation3 + $0x244] sm:$0xf] %v14083_v18  ;;  %v4535_v58 = vmax.f32 %v4296_v10, %v4297_v8  ;;  %v4320_v59 = vmax.f32 %v2734_v9, 0.0  ;;  %v2736_v46 = vadd.f32 %v2735_v26, %v16133_v63  ;;  %v2614_v61 = vpop.f32.mrf.mxu0  ;;  %3643 = vmatprep.subr.bf16.mxu1 %v16491_v28  ;;  %v16529_v10 = vpop.permute.xlu0 %1189  ;;  %v16539_v9 = vld [vmem:[%s19412_s1 + $0x50] ss:$8 sps:$4 sm:$0xff]  }
 0x12a   :  { %v14066_v62 = vpack.c.bf16 %v4427_v55, %v4427_v55  ;;  %v4319_v23 = vmax.f32 %v2613_v47, 0.0  ;;  %v2615_v37 = vadd.f32 %v2614_v61, %v16148_v24  ;;  %v2737_v12 = vpop.f32.mrf.mxu1 }
 0x12b   :  { %v14084_v22 = vpack.c.bf16 %v4535_v58, %v4535_v58  ;;  %v4321_v33 = vmax.f32 %v2736_v46, 0.0  ;;  %v2738_v29 = vadd.f32 %v2737_v12, %v16148_v24  ;;  %v2616_v21 = vpop.f32.mrf.mxu0  ;;  %3521 = vmatpush2.bf16.msra.mxu0 %v16330_v49 }
 0x12c   :  { %4517 = vst [vmem:[#allocation3 + $0x270] sm:$0xf] %v14066_v62  ;;  %v4428_v15 = vmax.f32 %v4318_v7, %v4319_v23  ;;  %v2617_v19 = vadd.f32 %v2616_v21, %v16148_v24  ;;  %v2739_v14 = vpop.f32.mrf.mxu1  ;;  %3644 = vmatpush2.bf16.msra.mxu1 %v16339_v31  ;;  %3736 = vmatprep.subr.bf16.mxu0 %v16521_v1  ;;  %v4342_v55 = vmax.f32 %v2615_v37, 0.0  ;;  %v16553_v23 = vpop.permute.xlu1 %1194 }
 0x12d   :  { %4625 = vst [vmem:[#allocation3 + $0x274] sm:$0xf] %v14084_v22  ;;  %v4536_v32 = vmax.f32 %v4320_v59, %v4321_v33  ;;  %v4344_v6 = vmax.f32 %v2738_v29, 0.0  ;;  %v2740_v18 = vadd.f32 %v2739_v14, %v16148_v24  ;;  %v2620_v8 = vpop.f32.mrf.mxu0  ;;  %3327 = vmatmul.mubr.bf16.gmra.mxu0 %v16539_v9  ;;  %3859 = vmatprep.subr.bf16.mxu1 %v16525_v51  ;;  %v16548_v59 = vld [vmem:[%s19412_s1 + $0x64] ss:$8 sps:$4 sm:$0xff]   ;;  %19494 = vst [vmem:[#allocation9_spill] sm:$0xff] %v16553_v23 }
 0x12e   :  { %v14067_v50 = vpack.c.bf16 %v4428_v15, %v4428_v15  ;;  %v4343_v47 = vmax.f32 %v2617_v19, 0.0  ;;  %v2621_v26 = vadd.f32 %v2620_v8, %v16529_v10  ;;  %v2743_v58 = vpop.f32.mrf.mxu1  ;;  %3450 = vmatmul.mubr.bf16.gmra.mxu1 %v16539_v9  ;;  %12904 = vmatprep.mubr.msk.bf16.mxu0 %vm2478_vm0, %v16548_v59 }
 0x12f   :  { %v14085_v46 = vpack.c.bf16 %v4536_v32, %v4536_v32  ;;  %v4345_v61 = vmax.f32 %v2740_v18, 0.0  ;;  %v2744_v62 = vadd.f32 %v2743_v58, %v16529_v10  ;;  %v2622_v7 = vpop.f32.mrf.mxu0  ;;  %12913 = vmatprep.mubr.msk.bf16.mxu1 %vm2478_vm0, %v16548_v59 }
 0x130   :  { %4518 = vst [vmem:[#allocation3 + $0x2a0] sm:$0xf] %v14067_v50  ;;  %v4429_v37 = vmax.f32 %v4342_v55, %v4343_v47  ;;  %v2623_v12 = vadd.f32 %v2622_v7, %v16529_v10  ;;  %v2745_v22 = vpop.f32.mrf.mxu1  ;;  %v4366_v14 = vmax.f32 %v2621_v26, 0.0 }
 0x131   :  { %4626 = vst [vmem:[#allocation3 + $0x2a4] sm:$0xf] %v14085_v46  ;;  %v4537_v33 = vmax.f32 %v4344_v6, %v4345_v61  ;;  %v4368_v29 = vmax.f32 %v2744_v62, 0.0  ;;  %v2746_v21 = vadd.f32 %v2745_v22, %v16529_v10  ;;  %v2624_v15 = vpop.f32.mrf.mxu0 }
 0x132   :  { %v14068_v19 = vpack.c.bf16 %v4429_v37, %v4429_v37  ;;  %v4367_v32 = vmax.f32 %v2623_v12, 0.0  ;;  %v2625_v18 = vadd.f32 %v2624_v15, %v16553_v23  ;;  %v2747_v8 = vpop.f32.mrf.mxu1  ;;  %v16566_v37 = vld [vmem:[%s19412_s1 + $0x60] ss:$8 sps:$4 sm:$0xff]  }
 0x133   :  { %v14086_v58 = vpack.c.bf16 %v4537_v33, %v4537_v33  ;;  %v4369_v3 = vmax.f32 %v2746_v21, 0.0  ;;  %v2748_v50 = vadd.f32 %v2747_v8, %v16553_v23  ;;  %v2626_v55 = vpop.f32.mrf.mxu0  ;;  %19495 = vst [vmem:[#allocation10_spill] sm:$0xff] %v16566_v37 }
 0x134   :  { %4519 = vst [vmem:[#allocation3 + $0x2d0] sm:$0xf] %v14068_v19  ;;  %v4430_v47 = vmax.f32 %v4366_v14, %v4367_v32  ;;  %v2627_v46 = vadd.f32 %v2626_v55, %v16553_v23  ;;  %v2749_v6 = vpop.f32.mrf.mxu1  ;;  %v4390_v22 = vmax.f32 %v2625_v18, 0.0 }
 0x135   :  { %4627 = vst [vmem:[#allocation3 + $0x2d4] sm:$0xf] %v14086_v58  ;;  %v4538_v61 = vmax.f32 %v4368_v29, %v4369_v3  ;;  %v4392_v62 = vmax.f32 %v2748_v50, 0.0  ;;  %v2750_v7 = vadd.f32 %v2749_v6, %v16553_v23  ;;  %v2786_v26 = vpop.f32.mrf.mxu0  ;;  %3337 = vmatmul.mubr.bf16.gmra.mxu0 %v16566_v37  ;;  %v16574_v3 = vld [vmem:[%s19412_s1 + $0x74] ss:$8 sps:$4 sm:$0xff]  }
 0x136   :  { %v14069_v12 = vpack.c.bf16 %v4430_v47, %v4430_v47  ;;  %v4391_v33 = vmax.f32 %v2627_v46, 0.0  ;;  %v2787_v21 = vadd.f32 %v2786_v26, %v16260_v17  ;;  %v2909_v15 = vpop.f32.mrf.mxu1  ;;  %3460 = vmatmul.mubr.bf16.gmra.mxu1 %v16566_v37  ;;  %12905 = vmatprep.mubr.msk.bf16.mxu0 %vm2478_vm0, %v16574_v3 }
 0x137   :  { %v14087_v29 = vpack.c.bf16 %v4538_v61, %v4538_v61  ;;  %v4393_v19 = vmax.f32 %v2750_v7, 0.0  ;;  %v2910_v14 = vadd.f32 %v2909_v15, %v16260_v17  ;;  %v2788_v32 = vpop.f32.mrf.mxu0  ;;  %12914 = vmatprep.mubr.msk.bf16.mxu1 %vm2478_vm0, %v16574_v3 }
 0x138   :  { %4520 = vst [vmem:[#allocation3 + $0x300] sm:$0xf] %v14069_v12  ;;  %v4431_v18 = vmax.f32 %v4390_v22, %v4391_v33  ;;  %v2789_v8 = vadd.f32 %v2788_v32, %v16260_v17  ;;  %v2911_v58 = vpop.f32.mrf.mxu1  ;;  %v3986_v61 = vmax.f32 %v2787_v21, 0.0 }
 0x139   :  { %4628 = vst [vmem:[#allocation3 + $0x304] sm:$0xf] %v14087_v29  ;;  %v4539_v50 = vmax.f32 %v4392_v62, %v4393_v19  ;;  %v3988_v55 = vmax.f32 %v2910_v14, 0.0  ;;  %v2912_v47 = vadd.f32 %v2911_v58, %v16260_v17  ;;  %v2790_v46 = vpop.f32.mrf.mxu0 }
 0x13a   :  { %v14070_v6 = vpack.c.bf16 %v4431_v18, %v4431_v18  ;;  %v3987_v7 = vmax.f32 %v2789_v8, 0.0  ;;  %v2791_v26 = vadd.f32 %v2790_v46, %v16268_v56  ;;  %v2913_v15 = vpop.f32.mrf.mxu1  ;;  %v16590_v18 = vld [vmem:[%s19412_s1 + $0x70] ss:$8 sps:$4 sm:$0xff]  }
 0x13b   :  { %v14088_v37 = vpack.c.bf16 %v4539_v50, %v4539_v50  ;;  %v3989_v23 = vmax.f32 %v2912_v47, 0.0  ;;  %v2914_v12 = vadd.f32 %v2913_v15, %v16268_v56  ;;  %v2792_v22 = vpop.f32.mrf.mxu0  ;;  %19496 = vst [vmem:[#allocation11_spill] sm:$0xff] %v16590_v18 }
 0x13c   :  { %4521 = vst [vmem:[#allocation3 + $0x330] sm:$0xf] %v14070_v6  ;;  %v4630_v33 = vmax.f32 %v3986_v61, %v3987_v7  ;;  %v2793_v29 = vadd.f32 %v2792_v22, %v16268_v56  ;;  %v2915_v62 = vpop.f32.mrf.mxu1  ;;  %v4010_v58 = vmax.f32 %v2791_v26, 0.0 }
 0x13d   :  { %4629 = vst [vmem:[#allocation3 + $0x334] sm:$0xf] %v14088_v37  ;;  %v4738_v19 = vmax.f32 %v3988_v55, %v3989_v23  ;;  %v4012_v14 = vmax.f32 %v2914_v12, 0.0  ;;  %v2916_v32 = vadd.f32 %v2915_v62, %v16268_v56  ;;  %v2796_v21 = vpop.f32.mrf.mxu0  ;;  %3347 = vmatmul.mubr.bf16.gmra.mxu0 %v16590_v18  ;;  %v16598_v23 = vld [vmem:[%s19412_s1 + $0x84] ss:$8 sps:$4 sm:$0xff]  }
 0x13e   :  { %v14089_v8 = vpack.c.bf16 %v4630_v33, %v4630_v33  ;;  %v4011_v50 = vmax.f32 %v2793_v29, 0.0  ;;  %v2797_v47 = vadd.f32 %v2796_v21, %v16250_v41  ;;  %v2919_v46 = vpop.f32.mrf.mxu1  ;;  %3470 = vmatmul.mubr.bf16.gmra.mxu1 %v16590_v18  ;;  %19497 = vst [vmem:[#allocation12_spill] sm:$0xff] %v16598_v23  ;;  %12906 = vmatprep.mubr.msk.bf16.mxu0 %vm2478_vm0, %v16598_v23 }
 0x13f   :  { %v14107_v37 = vpack.c.bf16 %v4738_v19, %v4738_v19  ;;  %v4013_v55 = vmax.f32 %v2916_v32, 0.0  ;;  %v2920_v6 = vadd.f32 %v2919_v46, %v16250_v41  ;;  %v2798_v61 = vpop.f32.mrf.mxu0  ;;  %12915 = vmatprep.mubr.msk.bf16.mxu1 %vm2478_vm0, %v16598_v23 }
 0x140   :  { %4720 = vst [vmem:[#allocation3 + $0x8] sm:$0xf] %v14089_v8  ;;  %v4631_v7 = vmax.f32 %v4010_v58, %v4011_v50  ;;  %v2799_v26 = vadd.f32 %v2798_v61, %v16250_v41  ;;  %v2921_v15 = vpop.f32.mrf.mxu1  ;;  %v4034_v19 = vmax.f32 %v2797_v47, 0.0 }
 0x141   :  { %4828 = vst [vmem:[#allocation3 + $0xc] sm:$0xf] %v14107_v37  ;;  %v4739_v12 = vmax.f32 %v4012_v14, %v4013_v55  ;;  %v4036_v22 = vmax.f32 %v2920_v6, 0.0  ;;  %v2922_v33 = vadd.f32 %v2921_v15, %v16250_v41  ;;  %v2800_v29 = vpop.f32.mrf.mxu0 }
 0x142   :  { %v14090_v62 = vpack.c.bf16 %v4631_v7, %v4631_v7  ;;  %v4035_v32 = vmax.f32 %v2799_v26, 0.0  ;;  %v2801_v21 = vadd.f32 %v2800_v29, %v16258_v43  ;;  %v2923_v46 = vpop.f32.mrf.mxu1  ;;  %v16614_v7 = vld [vmem:[%s19412_s1 + $0x80] ss:$8 sps:$4 sm:$0xff]  }
 0x143   :  { %v14108_v18 = vpack.c.bf16 %v4739_v12, %v4739_v12  ;;  %v4037_v56 = vmax.f32 %v2922_v33, 0.0  ;;  %v2924_v8 = vadd.f32 %v2923_v46, %v16258_v43  ;;  %v2802_v58 = vpop.f32.mrf.mxu0  ;;  %19498 = vst [vmem:[#allocation13_spill] sm:$0xff] %v16614_v7  ;;  %v63_v46 = vld [vmem:[%s19411_s0 + $0xc0] sm:$0xff] }
 0x144   :  { %4721 = vst [vmem:[#allocation3 + $0x38] sm:$0xf] %v14090_v62  ;;  %v4632_v50 = vmax.f32 %v4034_v19, %v4035_v32  ;;  %v2803_v37 = vadd.f32 %v2802_v58, %v16258_v43  ;;  %v2925_v14 = vpop.f32.mrf.mxu1  ;;  %v4058_v15 = vmax.f32 %v2801_v21, 0.0 }
 0x145   :  { %4829 = vst [vmem:[#allocation3 + $0x3c] sm:$0xf] %v14108_v18  ;;  %v4740_v55 = vmax.f32 %v4036_v22, %v4037_v56  ;;  %v4060_v6 = vmax.f32 %v2924_v8, 0.0  ;;  %v2926_v61 = vadd.f32 %v2925_v14, %v16258_v43  ;;  %v2806_v47 = vpop.f32.mrf.mxu0  ;;  %3357 = vmatmul.mubr.bf16.gmra.mxu0 %v16614_v7  ;;  %v91_v8 = vld [vmem:[%s19411_s0 + $0x1a0] sm:$0xff] }
 0x146   :  { %v14091_v26 = vpack.c.bf16 %v4632_v50, %v4632_v50  ;;  %v4059_v12 = vmax.f32 %v2803_v37, 0.0  ;;  %v2807_v33 = vadd.f32 %v2806_v47, %v16234_v40  ;;  %v2929_v29 = vpop.f32.mrf.mxu1  ;;  %3480 = vmatmul.mubr.bf16.gmra.mxu1 %v16614_v7  ;;  %12916 = vmatprep.mubr.msk.bf16.mxu0 %vm2478_vm0, %v16298_v38 }
 0x147   :  { %v14109_v56 = vpack.c.bf16 %v4740_v55, %v4740_v55  ;;  %v4061_v18 = vmax.f32 %v2926_v61, 0.0  ;;  %v2930_v22 = vadd.f32 %v2929_v29, %v16234_v40  ;;  %v2808_v62 = vpop.f32.mrf.mxu0  ;;  %12925 = vmatprep.mubr.msk.bf16.mxu1 %vm2478_vm0, %v16298_v38  ;;  %v120_v38 = vld [vmem:[%s19411_s0 + $0x288] sm:$0xff]  ;;  %v93_v29 = vld [vmem:[%s19411_s0 + $0x1b0] sm:$0xff] }
 0x148   :  { %4722 = vst [vmem:[#allocation3 + $0x68] sm:$0xf] %v14091_v26  ;;  %v4633_v19 = vmax.f32 %v4058_v15, %v4059_v12  ;;  %v2809_v32 = vadd.f32 %v2808_v62, %v16234_v40  ;;  %v2931_v21 = vpop.f32.mrf.mxu1  ;;  %v148_v55 = vld [vmem:[%s19411_s0 + $0x368] sm:$0xff]  ;;  %v4082_v47 = vmax.f32 %v2807_v33, 0.0 }
 0x149   :  { %4830 = vst [vmem:[#allocation3 + $0x6c] sm:$0xf] %v14109_v56  ;;  %v4741_v58 = vmax.f32 %v4060_v6, %v4061_v18  ;;  %v4084_v50 = vmax.f32 %v2930_v22, 0.0  ;;  %v2932_v37 = vadd.f32 %v2931_v21, %v16234_v40  ;;  %v2810_v14 = vpop.f32.mrf.mxu0  ;;  %v65_v6 = vld [vmem:[%s19411_s0 + $0xd0] sm:$0xff]  ;;  %v16646_v21 = vpack.c.bf16 %v91_v8, %v63_v46  ;;  %v64_v46 = vld [vmem:[%s19411_s0 + $0xc8] sm:$0xff] }
 0x14a   :  { %v14092_v61 = vpack.c.bf16 %v4633_v19, %v4633_v19  ;;  %v4083_v26 = vmax.f32 %v2809_v32, 0.0  ;;  %v2811_v15 = vadd.f32 %v2810_v14, %v16244_v42  ;;  %v2933_v12 = vpop.f32.mrf.mxu1  ;;  %v16649_v14 = vpack.c.bf16 %v148_v55, %v120_v38  ;;  %v92_v8 = vld [vmem:[%s19411_s0 + $0x1a8] sm:$0xff] }
 0x14b   :  { %v14110_v56 = vpack.c.bf16 %v4741_v58, %v4741_v58  ;;  %v4085_v18 = vmax.f32 %v2932_v37, 0.0  ;;  %v2934_v22 = vadd.f32 %v2933_v12, %v16244_v42  ;;  %v2812_v62 = vpop.f32.mrf.mxu0  ;;  %v16653_v58 = vpack.c.bf16 %v93_v29, %v65_v6 }
 0x14c   :  { %4723 = vst [vmem:[#allocation3 + $0x98] sm:$0xf] %v14092_v61  ;;  %v4634_v33 = vmax.f32 %v4082_v47, %v4083_v26  ;;  %v2813_v19 = vadd.f32 %v2812_v62, %v16244_v42  ;;  %v2935_v32 = vpop.f32.mrf.mxu1  ;;  %v4106_v38 = vmax.f32 %v2811_v15, 0.0 }
 0x14d   :  { %4831 = vst [vmem:[#allocation3 + $0x9c] sm:$0xf] %v14110_v56  ;;  %v4742_v40 = vmax.f32 %v4084_v50, %v4085_v18  ;;  %v4108_v7 = vmax.f32 %v2934_v22, 0.0  ;;  %v2936_v43 = vadd.f32 %v2935_v32, %v16244_v42  ;;  %v2816_v23 = vpop.f32.mrf.mxu0  ;;  %3523 = vmatmul.mubr.bf16.vlgmr.msra.gmra.mxu0 %v16336_v34 }
 0x14e   :  { %v14093_v37 = vpack.c.bf16 %v4634_v33, %v4634_v33  ;;  %v4107_v55 = vmax.f32 %v2813_v19, 0.0  ;;  %v2817_v50 = vadd.f32 %v2816_v23, %v16197_v35  ;;  %v2939_v61 = vpop.f32.mrf.mxu1  ;;  %3646 = vmatmul.mubr.bf16.vlgmr.msra.gmra.mxu1 %v16336_v34  ;;  %3737 = vmatpush1.bf16.msra.mxu0 %v16469_v52 }
 0x14f   :  { %v14111_v47 = vpack.c.bf16 %v4742_v40, %v4742_v40  ;;  %v4109_v26 = vmax.f32 %v2936_v43, 0.0  ;;  %v2940_v12 = vadd.f32 %v2939_v61, %v16197_v35  ;;  %v2818_v6 = vpop.f32.mrf.mxu0  ;;  %3738 = vmatprep.subr.bf16.mxu0 %v16646_v21  ;;  %12917 = vmatprep.mubr.msk.bf16.mxu0 %vm2478_vm0, %v16352_v5  ;;  %v16672_v40 = vpack.c.bf16 %v92_v8, %v64_v46 }
 0x150   :  { %4724 = vst [vmem:[#allocation3 + $0xc8] sm:$0xf] %v14093_v37  ;;  %v4635_v15 = vmax.f32 %v4106_v38, %v4107_v55  ;;  %v2819_v29 = vadd.f32 %v2818_v6, %v16197_v35  ;;  %v2941_v23 = vpop.f32.mrf.mxu1  ;;  %12926 = vmatprep.mubr.msk.bf16.mxu1 %vm2478_vm0, %v16352_v5  ;;  %3860 = vmatpush1.bf16.msra.mxu1 %v16649_v14  ;;  %v4130_v62 = vmax.f32 %v2817_v50, 0.0 }
 0x151   :  { %4832 = vst [vmem:[#allocation3 + $0xcc] sm:$0xf] %v14111_v47  ;;  %v4743_v43 = vmax.f32 %v4108_v7, %v4109_v26  ;;  %v4132_v34 = vmax.f32 %v2940_v12, 0.0  ;;  %v2942_v56 = vadd.f32 %v2941_v23, %v16197_v35  ;;  %v2820_v18 = vpop.f32.mrf.mxu0  ;;  %3861 = vmatprep.subr.bf16.mxu1 %v16653_v58 }
 0x152   :  { %v14094_v22 = vpack.c.bf16 %v4635_v15, %v4635_v15  ;;  %v4131_v33 = vmax.f32 %v2819_v29, 0.0  ;;  %v2821_v19 = vadd.f32 %v2820_v18, %v16212_v44  ;;  %v2943_v32 = vpop.f32.mrf.mxu1  ;;  %3739 = vmatpush1.bf16.msra.mxu0 %v16491_v28 }
 0x153   :  { %v14112_v5 = vpack.c.bf16 %v4743_v43, %v4743_v43  ;;  %v4133_v37 = vmax.f32 %v2942_v56, 0.0  ;;  %v2944_v46 = vadd.f32 %v2943_v32, %v16212_v44  ;;  %v2822_v8 = vpop.f32.mrf.mxu0  ;;  %3740 = vmatprep.subr.bf16.mxu0 %v16469_v52 }
 0x154   :  { %4725 = vst [vmem:[#allocation3 + $0xf8] sm:$0xf] %v14094_v22  ;;  %v4636_v7 = vmax.f32 %v4130_v62, %v4131_v33  ;;  %v2823_v38 = vadd.f32 %v2822_v8, %v16212_v44  ;;  %v2945_v55 = vpop.f32.mrf.mxu1  ;;  %3862 = vmatpush1.bf16.msra.mxu1 %v16672_v40  ;;  %v4154_v6 = vmax.f32 %v2821_v19, 0.0 }
 0x155   :  { %4833 = vst [vmem:[#allocation3 + $0xfc] sm:$0xf] %v14112_v5  ;;  %v4744_v50 = vmax.f32 %v4132_v34, %v4133_v37  ;;  %v4156_v61 = vmax.f32 %v2944_v46, 0.0  ;;  %v2946_v47 = vadd.f32 %v2945_v55, %v16212_v44  ;;  %v2826_v26 = vpop.f32.mrf.mxu0  ;;  %3533 = vmatmul.mubr.bf16.gmra.mxu0 %v16377_v53  ;;  %3863 = vmatprep.subr.bf16.mxu1 %v16649_v14 }
 0x156   :  { %v14095_v12 = vpack.c.bf16 %v4636_v7, %v4636_v7  ;;  %v4155_v15 = vmax.f32 %v2823_v38, 0.0  ;;  %v2827_v29 = vadd.f32 %v2826_v26, %v16174_v16  ;;  %v2949_v23 = vpop.f32.mrf.mxu1  ;;  %3656 = vmatmul.mubr.bf16.gmra.mxu1 %v16377_v53  ;;  %3741 = vmatpush1.bf16.msra.mxu0 %v16242_v4 }
 0x157   :  { %v14113_v43 = vpack.c.bf16 %v4744_v50, %v4744_v50  ;;  %v4157_v34 = vmax.f32 %v2946_v47, 0.0  ;;  %v2950_v56 = vadd.f32 %v2949_v23, %v16174_v16  ;;  %v2828_v18 = vpop.f32.mrf.mxu0  ;;  %3742 = vmatprep.subr.bf16.mxu0 %v16491_v28  ;;  %12918 = vmatprep.mubr.msk.bf16.mxu0 %vm2478_vm0, %v16386_v45 }
 0x158   :  { %4726 = vst [vmem:[#allocation3 + $0x128] sm:$0xf] %v14095_v12  ;;  %v4637_v22 = vmax.f32 %v4154_v6, %v4155_v15  ;;  %v2829_v62 = vadd.f32 %v2828_v18, %v16174_v16  ;;  %v2951_v33 = vpop.f32.mrf.mxu1  ;;  %12927 = vmatprep.mubr.msk.bf16.mxu1 %vm2478_vm0, %v16386_v45  ;;  %3864 = vmatpush1.bf16.msra.mxu1 %v16521_v1  ;;  %v4178_v46 = vmax.f32 %v2827_v29, 0.0 }
 0x159   :  { %4834 = vst [vmem:[#allocation3 + $0x12c] sm:$0xf] %v14113_v43  ;;  %v4745_v53 = vmax.f32 %v4156_v61, %v4157_v34  ;;  %v4180_v19 = vmax.f32 %v2950_v56, 0.0  ;;  %v2952_v32 = vadd.f32 %v2951_v33, %v16174_v16  ;;  %v2830_v5 = vpop.f32.mrf.mxu0  ;;  %3865 = vmatprep.subr.bf16.mxu1 %v16672_v40 }
 0x15a   :  { %v14096_v37 = vpack.c.bf16 %v4637_v22, %v4637_v22  ;;  %v4179_v8 = vmax.f32 %v2829_v62, 0.0  ;;  %v2831_v7 = vadd.f32 %v2830_v5, %v16192_v0  ;;  %v2953_v38 = vpop.f32.mrf.mxu1  ;;  %3743 = vmatpush1.bf16.msra.mxu0 %v16339_v31 }
 0x15b   :  { %v14114_v55 = vpack.c.bf16 %v4745_v53, %v4745_v53  ;;  %v4181_v45 = vmax.f32 %v2952_v32, 0.0  ;;  %v2954_v50 = vadd.f32 %v2953_v38, %v16192_v0  ;;  %v2832_v47 = vpop.f32.mrf.mxu0  ;;  %3744 = vmatprep.subr.bf16.mxu0 %v16242_v4 }
 0x15c   :  { %4727 = vst [vmem:[#allocation3 + $0x158] sm:$0xf] %v14096_v37  ;;  %v4638_v61 = vmax.f32 %v4178_v46, %v4179_v8  ;;  %v2833_v26 = vadd.f32 %v2832_v47, %v16192_v0  ;;  %v2955_v12 = vpop.f32.mrf.mxu1  ;;  %3866 = vmatpush1.bf16.msra.mxu1 %v16646_v21  ;;  %v4202_v34 = vmax.f32 %v2831_v7, 0.0 }
 0x15d   :  { %4835 = vst [vmem:[#allocation3 + $0x15c] sm:$0xf] %v14114_v55  ;;  %v4746_v6 = vmax.f32 %v4180_v19, %v4181_v45  ;;  %v4204_v15 = vmax.f32 %v2954_v50, 0.0  ;;  %v2956_v29 = vadd.f32 %v2955_v12, %v16192_v0  ;;  %v2836_v23 = vpop.f32.mrf.mxu0  ;;  %3543 = vmatmul.mubr.bf16.gmra.mxu0 %v16409_v54  ;;  %3867 = vmatprep.subr.bf16.mxu1 %v16521_v1 }
 0x15e   :  { %v14097_v43 = vpack.c.bf16 %v4638_v61, %v4638_v61  ;;  %v4203_v56 = vmax.f32 %v2833_v26, 0.0  ;;  %v2837_v18 = vadd.f32 %v2836_v23, %v16160_v25  ;;  %v2959_v22 = vpop.f32.mrf.mxu1  ;;  %3666 = vmatmul.mubr.bf16.gmra.mxu1 %v16409_v54  ;;  %3745 = vmatpush1.bf16.msra.mxu0 %v16328_v20 }
 0x15f   :  { %v14115_v62 = vpack.c.bf16 %v4746_v6, %v4746_v6  ;;  %v4205_v33 = vmax.f32 %v2956_v29, 0.0  ;;  %v2960_v53 = vadd.f32 %v2959_v22, %v16160_v25  ;;  %v2838_v19 = vpop.f32.mrf.mxu0  ;;  %3746 = vmatprep.subr.bf16.mxu0 %v16339_v31  ;;  %12919 = vmatprep.mubr.msk.bf16.mxu0 %vm2478_vm0, %v16418_v60 }
 0x160   :  { %4728 = vst [vmem:[#allocation3 + $0x188] sm:$0xf] %v14097_v43  ;;  %v4639_v32 = vmax.f32 %v4202_v34, %v4203_v56  ;;  %v2839_v5 = vadd.f32 %v2838_v19, %v16160_v25  ;;  %v2961_v37 = vpop.f32.mrf.mxu1  ;;  %12928 = vmatprep.mubr.msk.bf16.mxu1 %vm2478_vm0, %v16418_v60  ;;  %3868 = vmatpush1.bf16.msra.mxu1 %v16469_v52  ;;  %v4226_v55 = vmax.f32 %v2837_v18, 0.0  ;;  %v150_v19 = vld [vmem:[%s19411_s0 + $0x378] sm:$0xff] }
 0x161   :  { %4836 = vst [vmem:[#allocation3 + $0x18c] sm:$0xf] %v14115_v62  ;;  %v4747_v54 = vmax.f32 %v4204_v15, %v4205_v33  ;;  %v4228_v46 = vmax.f32 %v2960_v53, 0.0  ;;  %v2962_v8 = vadd.f32 %v2961_v37, %v16160_v25  ;;  %v2840_v7 = vpop.f32.mrf.mxu0  ;;  %3869 = vmatprep.subr.bf16.mxu1 %v16646_v21  ;;  %v122_v53 = vld [vmem:[%s19411_s0 + $0x298] sm:$0xff] }
 0x162   :  { %v14098_v38 = vpack.c.bf16 %v4639_v32, %v4639_v32  ;;  %v4227_v45 = vmax.f32 %v2839_v5, 0.0  ;;  %v2841_v50 = vadd.f32 %v2840_v7, %v16171_v27  ;;  %v2963_v47 = vpop.f32.mrf.mxu1  ;;  %3747 = vmatpush1.bf16.msra.mxu0 %v16363_v57 }
 0x163   :  { %v14116_v61 = vpack.c.bf16 %v4747_v54, %v4747_v54  ;;  %v4229_v60 = vmax.f32 %v2962_v8, 0.0  ;;  %v2964_v26 = vadd.f32 %v2963_v47, %v16171_v27  ;;  %v2842_v12 = vpop.f32.mrf.mxu0  ;;  %3748 = vmatprep.subr.bf16.mxu0 %v16328_v20 }
 0x164   :  { %4729 = vst [vmem:[#allocation3 + $0x1b8] sm:$0xf] %v14098_v38  ;;  %v4640_v6 = vmax.f32 %v4226_v55, %v4227_v45  ;;  %v2843_v15 = vadd.f32 %v2842_v12, %v16171_v27  ;;  %v2965_v29 = vpop.f32.mrf.mxu1  ;;  %3870 = vmatpush1.bf16.msra.mxu1 %v16491_v28  ;;  %v4250_v22 = vmax.f32 %v2841_v50, 0.0 }
 0x165   :  { %4837 = vst [vmem:[#allocation3 + $0x1bc] sm:$0xf] %v14116_v61  ;;  %v4748_v23 = vmax.f32 %v4228_v46, %v4229_v60  ;;  %v4252_v43 = vmax.f32 %v2964_v26, 0.0  ;;  %v2966_v34 = vadd.f32 %v2965_v29, %v16171_v27  ;;  %v2846_v56 = vpop.f32.mrf.mxu0  ;;  %3553 = vmatmul.mubr.bf16.gmra.mxu0 %v16441_v48  ;;  %3871 = vmatprep.subr.bf16.mxu1 %v16469_v52 }
 0x166   :  { %v14099_v18 = vpack.c.bf16 %v4640_v6, %v4640_v6  ;;  %v4251_v20 = vmax.f32 %v2843_v15, 0.0  ;;  %v2847_v62 = vadd.f32 %v2846_v56, %v16140_v2  ;;  %v2969_v33 = vpop.f32.mrf.mxu1  ;;  %3676 = vmatmul.mubr.bf16.gmra.mxu1 %v16441_v48  ;;  %3749 = vmatpush1.bf16.msra.mxu0 %v16239_v39 }
 0x167   :  { %v14117_v32 = vpack.c.bf16 %v4748_v23, %v4748_v23  ;;  %v4253_v52 = vmax.f32 %v2966_v34, 0.0  ;;  %v2970_v5 = vadd.f32 %v2969_v33, %v16140_v2  ;;  %v2848_v37 = vpop.f32.mrf.mxu0  ;;  %3750 = vmatprep.subr.bf16.mxu0 %v16363_v57  ;;  %12920 = vmatprep.mubr.msk.bf16.mxu0 %vm2478_vm0, %v16450_v11  ;;  %v14550_v57 = vpack.c.bf16 %v150_v19, %v122_v53 }
 0x168   :  { %4730 = vst [vmem:[#allocation3 + $0x1e8] sm:$0xf] %v14099_v18  ;;  %v4641_v39 = vmax.f32 %v4250_v22, %v4251_v20  ;;  %v2849_v48 = vadd.f32 %v2848_v37, %v16140_v2  ;;  %v2971_v54 = vpop.f32.mrf.mxu1  ;;  %12929 = vmatprep.mubr.msk.bf16.mxu1 %vm2478_vm0, %v16450_v11  ;;  %3872 = vmatpush1.bf16.msra.mxu1 %v16242_v4  ;;  %v4274_v45 = vmax.f32 %v2847_v62, 0.0  ;;  %v66_v4 = vld [vmem:[%s19411_s0 + $0xd8] sm:$0xff] }
 0x169   :  { %4838 = vst [vmem:[#allocation3 + $0x1ec] sm:$0xf] %v14117_v32  ;;  %v4749_v46 = vmax.f32 %v4252_v43, %v4253_v52  ;;  %v4276_v8 = vmax.f32 %v2970_v5, 0.0  ;;  %v2972_v7 = vadd.f32 %v2971_v54, %v16140_v2  ;;  %v2850_v38 = vpop.f32.mrf.mxu0  ;;  %3873 = vmatprep.subr.bf16.mxu1 %v16491_v28  ;;  %v94_v11 = vld [vmem:[%s19411_s0 + $0x1b8] sm:$0xff] }
 0x16a   :  { %v14100_v55 = vpack.c.bf16 %v4641_v39, %v4641_v39  ;;  %v4275_v50 = vmax.f32 %v2849_v48, 0.0  ;;  %v2851_v47 = vadd.f32 %v2850_v38, %v16154_v13  ;;  %v2973_v61 = vpop.f32.mrf.mxu1  ;;  %3751 = vmatpush1.bf16.msra.mxu0 %v16330_v49  ;;  %v14548_v56 = vpack.c.bf16 %v94_v11, %v66_v4 }
 0x16b   :  { %v14118_v60 = vpack.c.bf16 %v4749_v46, %v4749_v46  ;;  %v4277_v26 = vmax.f32 %v2972_v7, 0.0  ;;  %v2974_v28 = vadd.f32 %v2973_v61, %v16154_v13  ;;  %v2852_v12 = vpop.f32.mrf.mxu0  ;;  %3764 = vmatprep.subr.bf16.mxu0 %v16649_v14 }
 0x16c   :  { %4731 = vst [vmem:[#allocation3 + $0x218] sm:$0xf] %v14100_v55  ;;  %v4642_v6 = vmax.f32 %v4274_v45, %v4275_v50  ;;  %v2853_v15 = vadd.f32 %v2852_v12, %v16154_v13  ;;  %v2975_v49 = vpop.f32.mrf.mxu1  ;;  %3874 = vmatpush1.bf16.msra.mxu1 %v16339_v31  ;;  %v4298_v22 = vmax.f32 %v2851_v47, 0.0 }
 0x16d   :  { %4839 = vst [vmem:[#allocation3 + $0x21c] sm:$0xf] %v14118_v60  ;;  %v4750_v29 = vmax.f32 %v4276_v8, %v4277_v26  ;;  %v4300_v23 = vmax.f32 %v2974_v28, 0.0  ;;  %v2976_v43 = vadd.f32 %v2975_v49, %v16154_v13  ;;  %v2856_v34 = vpop.f32.mrf.mxu0  ;;  %3563 = vmatmul.mubr.bf16.gmra.mxu0 %v16487_v30  ;;  %3887 = vmatprep.subr.bf16.mxu1 %v14550_v57 }
 0x16e   :  { %v14101_v18 = vpack.c.bf16 %v4642_v6, %v4642_v6  ;;  %v4299_v14 = vmax.f32 %v2853_v15, 0.0  ;;  %v2857_v20 = vadd.f32 %v2856_v34, %v16133_v63  ;;  %v2979_v62 = vpop.f32.mrf.mxu1  ;;  %3686 = vmatmul.mubr.bf16.gmra.mxu1 %v16487_v30  ;;  %3765 = vmatpush2.bf16.msra.mxu0 %v16521_v1 }
 0x16f   :  { %v14119_v31 = vpack.c.bf16 %v4750_v29, %v4750_v29  ;;  %v4301_v33 = vmax.f32 %v2976_v43, 0.0  ;;  %v2980_v53 = vadd.f32 %v2979_v62, %v16133_v63  ;;  %v2858_v19 = vpop.f32.mrf.mxu0  ;;  %3766 = vmatprep.subr.bf16.mxu0 %v16672_v40  ;;  %12921 = vmatprep.mubr.msk.bf16.mxu0 %vm2478_vm0, %v16504_v36  ;;  %v14868_v40 = vld [vmem:[#allocation3 + $0x2a4] ss:$48 sps:$4 sm:$0xff]   ;;  %v19499_v62 = vld [vmem:[#allocation9_spill] sm:$0xff] }
 0x170   :  { %4732 = vst [vmem:[#allocation3 + $0x248] sm:$0xf] %v14101_v18  ;;  %v4643_v32 = vmax.f32 %v4298_v22, %v4299_v14  ;;  %v2859_v52 = vadd.f32 %v2858_v19, %v16133_v63  ;;  %v2981_v5 = vpop.f32.mrf.mxu1  ;;  %12930 = vmatprep.mubr.msk.bf16.mxu1 %vm2478_vm0, %v16504_v36  ;;  %3888 = vmatpush2.bf16.msra.mxu1 %v16525_v51  ;;  %v4322_v54 = vmax.f32 %v2857_v20, 0.0 }
 0x171   :  { %4840 = vst [vmem:[#allocation3 + $0x24c] sm:$0xf] %v14119_v31  ;;  %v4751_v30 = vmax.f32 %v4300_v23, %v4301_v33  ;;  %v4324_v1 = vmax.f32 %v2980_v53, 0.0  ;;  %v2982_v37 = vadd.f32 %v2981_v5, %v16133_v63  ;;  %v2860_v39 = vpop.f32.mrf.mxu0  ;;  %3889 = vmatprep.subr.bf16.mxu1 %v14548_v56 }
 0x172   :  { %v14102_v48 = vpack.c.bf16 %v4643_v32, %v4643_v32  ;;  %v4323_v46 = vmax.f32 %v2859_v52, 0.0  ;;  %v2861_v8 = vadd.f32 %v2860_v39, %v16148_v24  ;;  %v2983_v7 = vpop.f32.mrf.mxu1  ;;  %3767 = vmatpush2.bf16.msra.mxu0 %v16646_v21 }
 0x173   :  { %v14120_v38 = vpack.c.bf16 %v4751_v30, %v4751_v30  ;;  %v4325_v36 = vmax.f32 %v2982_v37, 0.0  ;;  %v2984_v51 = vadd.f32 %v2983_v7, %v16148_v24  ;;  %6499 = vmatprep.subr.bf16.mxu0 %v14868_v40  ;;  %v2862_v57 = vpop.f32.mrf.mxu0 }
 0x174   :  { %4733 = vst [vmem:[#allocation3 + $0x278] sm:$0xf] %v14102_v48  ;;  %v4644_v55 = vmax.f32 %v4322_v54, %v4323_v46  ;;  %v2863_v45 = vadd.f32 %v2862_v57, %v16148_v24  ;;  %v2985_v50 = vpop.f32.mrf.mxu1  ;;  %3890 = vmatpush2.bf16.msra.mxu1 %v16653_v58  ;;  %v4346_v60 = vmax.f32 %v2861_v8, 0.0  ;;  %v19500_v48 = vld [vmem:[#allocation10_spill] sm:$0xff] }
 0x175   :  { %4841 = vst [vmem:[#allocation3 + $0x27c] sm:$0xf] %v14120_v38  ;;  %v4752_v47 = vmax.f32 %v4324_v1, %v4325_v36  ;;  %v4348_v61 = vmax.f32 %v2984_v51, 0.0  ;;  %v2986_v4 = vadd.f32 %v2985_v50, %v16148_v24  ;;  %v2866_v11 = vpop.f32.mrf.mxu0  ;;  %3573 = vmatmul.mubr.bf16.gmra.mxu0 %v16539_v9 }
 0x176   :  { %v14103_v21 = vpack.c.bf16 %v4644_v55, %v4644_v55  ;;  %v4347_v26 = vmax.f32 %v2863_v45, 0.0  ;;  %v2867_v28 = vadd.f32 %v2866_v11, %v16529_v10  ;;  %v2989_v12 = vpop.f32.mrf.mxu1  ;;  %3696 = vmatmul.mubr.bf16.gmra.mxu1 %v16539_v9  ;;  %12922 = vmatprep.mubr.msk.bf16.mxu0 %vm2478_vm0, %v16548_v59 }
 0x177   :  { %v14121_v58 = vpack.c.bf16 %v4752_v47, %v4752_v47  ;;  %v4349_v6 = vmax.f32 %v2986_v4, 0.0  ;;  %v2990_v15 = vadd.f32 %v2989_v12, %v16529_v10  ;;  %v2868_v49 = vpop.f32.mrf.mxu0  ;;  %12931 = vmatprep.mubr.msk.bf16.mxu1 %vm2478_vm0, %v16548_v59  ;;  %v19501_v12 = vld [vmem:[#allocation8_spill] sm:$0xff] }
 0x178   :  { %4734 = vst [vmem:[#allocation3 + $0x2a8] sm:$0xf] %v14103_v21  ;;  %v4645_v29 = vmax.f32 %v4346_v60, %v4347_v26  ;;  %v2869_v23 = vadd.f32 %v2868_v49, %v16529_v10  ;;  %v2991_v43 = vpop.f32.mrf.mxu1  ;;  %v4370_v14 = vmax.f32 %v2867_v28, 0.0 }
 0x179   :  { %4842 = vst [vmem:[#allocation3 + $0x2ac] sm:$0xf] %v14121_v58  ;;  %v4753_v34 = vmax.f32 %v4348_v61, %v4349_v6  ;;  %v4372_v56 = vmax.f32 %v2990_v15, 0.0  ;;  %v2992_v9 = vadd.f32 %v2991_v43, %v16529_v10  ;;  %v2870_v18 = vpop.f32.mrf.mxu0 }
 0x17a   :  { %v14104_v22 = vpack.c.bf16 %v4645_v29, %v4645_v29  ;;  %v4371_v20 = vmax.f32 %v2869_v23, 0.0  ;;  %v2871_v31 = vadd.f32 %v2870_v18, %v19499_v62  ;;  %v2993_v33 = vpop.f32.mrf.mxu1 }
 0x17b   :  { %v14122_v53 = vpack.c.bf16 %v4753_v34, %v4753_v34  ;;  %v4373_v19 = vmax.f32 %v2992_v9, 0.0  ;;  %v2994_v59 = vadd.f32 %v2993_v33, %v19499_v62  ;;  %v2872_v32 = vpop.f32.mrf.mxu0 }
 0x17c   :  { %4735 = vst [vmem:[#allocation3 + $0x2d8] sm:$0xf] %v14104_v22  ;;  %v4646_v52 = vmax.f32 %v4370_v14, %v4371_v20  ;;  %v2873_v5 = vadd.f32 %v2872_v32, %v19499_v62  ;;  %v2995_v30 = vpop.f32.mrf.mxu1  ;;  %v4394_v46 = vmax.f32 %v2871_v31, 0.0  ;;  %v19502_v20 = vld [vmem:[#allocation11_spill] sm:$0xff] }
 0x17d   :  { %4843 = vst [vmem:[#allocation3 + $0x2dc] sm:$0xf] %v14122_v53  ;;  %v4754_v1 = vmax.f32 %v4372_v56, %v4373_v19  ;;  %v4396_v37 = vmax.f32 %v2994_v59, 0.0  ;;  %v2996_v39 = vadd.f32 %v2995_v30, %v19499_v62  ;;  %v3032_v40 = vpop.f32.mrf.mxu0  ;;  %3583 = vmatmul.mubr.bf16.gmra.mxu0 %v19500_v48 }
 0x17e   :  { %v14105_v54 = vpack.c.bf16 %v4646_v52, %v4646_v52  ;;  %v4395_v8 = vmax.f32 %v2873_v5, 0.0  ;;  %v3033_v7 = vadd.f32 %v3032_v40, %v16260_v17  ;;  %v3155_v38 = vpop.f32.mrf.mxu1  ;;  %3706 = vmatmul.mubr.bf16.gmra.mxu1 %v19500_v48  ;;  %12923 = vmatprep.mubr.msk.bf16.mxu0 %vm2478_vm0, %v16574_v3 }
 0x17f   :  { %v14123_v36 = vpack.c.bf16 %v4754_v1, %v4754_v1  ;;  %v4397_v51 = vmax.f32 %v2996_v39, 0.0  ;;  %v3156_v57 = vadd.f32 %v3155_v38, %v16260_v17  ;;  %v3034_v55 = vpop.f32.mrf.mxu0  ;;  %12932 = vmatprep.mubr.msk.bf16.mxu1 %vm2478_vm0, %v16574_v3  ;;  %v19503_v1 = vld [vmem:[#allocation12_spill] sm:$0xff] }
 0x180   :  { %4736 = vst [vmem:[#allocation3 + $0x308] sm:$0xf] %v14105_v54  ;;  %v4647_v45 = vmax.f32 %v4394_v46, %v4395_v8  ;;  %v3035_v50 = vadd.f32 %v3034_v55, %v16260_v17  ;;  %v3157_v47 = vpop.f32.mrf.mxu1  ;;  %v3990_v26 = vmax.f32 %v3033_v7, 0.0 }
 0x181   :  { %4844 = vst [vmem:[#allocation3 + $0x30c] sm:$0xf] %v14123_v36  ;;  %v4755_v61 = vmax.f32 %v4396_v37, %v4397_v51  ;;  %v3992_v4 = vmax.f32 %v3156_v57, 0.0  ;;  %v3158_v11 = vadd.f32 %v3157_v47, %v16260_v17  ;;  %v3036_v21 = vpop.f32.mrf.mxu0  ;;  %v19504_v51 = vld [vmem:[#allocation7_spill] sm:$0xff] }
 0x182   :  { %v14106_v60 = vpack.c.bf16 %v4647_v45, %v4647_v45  ;;  %v3991_v28 = vmax.f32 %v3035_v50, 0.0  ;;  %v3037_v58 = vadd.f32 %v3036_v21, %v19501_v12  ;;  %v3159_v6 = vpop.f32.mrf.mxu1 }
 0x183   :  { %v14124_v15 = vpack.c.bf16 %v4755_v61, %v4755_v61  ;;  %v3993_v49 = vmax.f32 %v3158_v11, 0.0  ;;  %v3160_v3 = vadd.f32 %v3159_v6, %v19501_v12  ;;  %v3038_v29 = vpop.f32.mrf.mxu0  ;;  %v19505_v6 = vld [vmem:[#allocation13_spill] sm:$0xff] }
 0x184   :  { %4737 = vst [vmem:[#allocation3 + $0x338] sm:$0xf] %v14106_v60  ;;  %v4846_v23 = vmax.f32 %v3990_v26, %v3991_v28  ;;  %v3039_v43 = vadd.f32 %v3038_v29, %v19501_v12  ;;  %v3161_v34 = vpop.f32.mrf.mxu1  ;;  %v14871_v56 = vld [vmem:[#allocation3 + $0x2ac] ss:$48 sps:$4 sm:$0xff]   ;;  %v4014_v33 = vmax.f32 %v3037_v58, 0.0  ;;  %v19506_v29 = vld [vmem:[#allocation6_spill] sm:$0xff] }
 0x185   :  { %4845 = vst [vmem:[#allocation3 + $0x33c] sm:$0xf] %v14124_v15  ;;  %v4954_v9 = vmax.f32 %v3992_v4, %v3993_v49  ;;  %v4016_v18 = vmax.f32 %v3160_v3, 0.0  ;;  %v3162_v22 = vadd.f32 %v3161_v34, %v19501_v12  ;;  %v3042_v14 = vpop.f32.mrf.mxu0  ;;  %3593 = vmatmul.mubr.bf16.gmra.mxu0 %v19502_v20  ;;  %6632 = vmatprep.subr.bf16.mxu1 %v14871_v56  ;;  %v15247_v34 = vld [vmem:[%s19412_s1 + $0x4] ss:$8 sps:$4 sm:$0xff]  }
 0x186   :  { %v14125_v31 = vpack.c.bf16 %v4846_v23, %v4846_v23  ;;  %v4015_v53 = vmax.f32 %v3039_v43, 0.0  ;;  %v3043_v19 = vadd.f32 %v3042_v14, %v16250_v41  ;;  %v3165_v59 = vpop.f32.mrf.mxu1  ;;  %3716 = vmatmul.mubr.bf16.gmra.mxu1 %v19502_v20  ;;  %12924 = vmatprep.mubr.msk.bf16.mxu0 %vm2478_vm0, %v19503_v1 }
 0x187   :  { %v14143_v32 = vpack.c.bf16 %v4954_v9, %v4954_v9  ;;  %v4017_v52 = vmax.f32 %v3162_v22, 0.0  ;;  %v3166_v5 = vadd.f32 %v3165_v59, %v16250_v41  ;;  %v3044_v30 = vpop.f32.mrf.mxu0  ;;  %12933 = vmatprep.mubr.msk.bf16.mxu1 %vm2478_vm0, %v19503_v1 }
 0x188   :  { %4936 = vst [vmem:[#allocation3 + $0x10] sm:$0xf] %v14125_v31  ;;  %v4847_v37 = vmax.f32 %v4014_v33, %v4015_v53  ;;  %v3045_v39 = vadd.f32 %v3044_v30, %v16250_v41  ;;  %v3167_v40 = vpop.f32.mrf.mxu1  ;;  %v4038_v38 = vmax.f32 %v3043_v19, 0.0 }
 0x189   :  { %5044 = vst [vmem:[#allocation3 + $0x14] sm:$0xf] %v14143_v32  ;;  %v4955_v48 = vmax.f32 %v4016_v18, %v4017_v52  ;;  %v4040_v54 = vmax.f32 %v3166_v5, 0.0  ;;  %v3168_v46 = vadd.f32 %v3167_v40, %v16250_v41  ;;  %v3046_v8 = vpop.f32.mrf.mxu0 }
 0x18a   :  { %v14126_v7 = vpack.c.bf16 %v4847_v37, %v4847_v37  ;;  %v4039_v36 = vmax.f32 %v3045_v39, 0.0  ;;  %v3047_v57 = vadd.f32 %v3046_v8, %v19504_v51  ;;  %v3169_v55 = vpop.f32.mrf.mxu1 }
 0x18b   :  { %v14144_v45 = vpack.c.bf16 %v4955_v48, %v4955_v48  ;;  %v4041_v50 = vmax.f32 %v3168_v46, 0.0  ;;  %v3170_v47 = vadd.f32 %v3169_v55, %v19504_v51  ;;  %v3048_v61 = vpop.f32.mrf.mxu0 }
 0x18c   :  { %4937 = vst [vmem:[#allocation3 + $0x40] sm:$0xf] %v14126_v7  ;;  %v4848_v4 = vmax.f32 %v4038_v38, %v4039_v36  ;;  %v3049_v11 = vadd.f32 %v3048_v61, %v19504_v51  ;;  %v3171_v21 = vpop.f32.mrf.mxu1  ;;  %v4062_v49 = vmax.f32 %v3047_v57, 0.0  ;;  %v14869_v38 = vld [vmem:[#allocation3 + $0x2a8] ss:$48 sps:$4 sm:$0xff]  }
 0x18d   :  { %5045 = vst [vmem:[#allocation3 + $0x44] sm:$0xf] %v14144_v45  ;;  %v4956_v60 = vmax.f32 %v4040_v54, %v4041_v50  ;;  %v4064_v26 = vmax.f32 %v3170_v47, 0.0  ;;  %v3172_v28 = vadd.f32 %v3171_v21, %v19504_v51  ;;  %v3052_v58 = vpop.f32.mrf.mxu0  ;;  %3603 = vmatmul.mubr.bf16.gmra.mxu0 %v19505_v6  ;;  %v14866_v54 = vld [vmem:[#allocation3 + $0x2a0] ss:$48 sps:$4 sm:$0xff]  }
 0x18e   :  { %v14127_v15 = vpack.c.bf16 %v4848_v4, %v4848_v4  ;;  %v4063_v3 = vmax.f32 %v3049_v11, 0.0  ;;  %v3053_v23 = vadd.f32 %v3052_v58, %v19506_v29  ;;  %v3175_v43 = vpop.f32.mrf.mxu1  ;;  %3726 = vmatmul.mubr.bf16.gmra.mxu1 %v19505_v6  ;;  %12934 = vmatprep.mubr.msk.bf16.mxu0 %vm2478_vm0, %v15247_v34  ;;  %v15248_v50 = vld [vmem:[%s19412_s1] ss:$8 sps:$4 sm:$0xff]   ;;  %v14874_v47 = vld [vmem:[#allocation3 + $0x244] ss:$48 sps:$4 sm:$0xff]  }
 0x18f   :  { %v14145_v56 = vpack.c.bf16 %v4956_v60, %v4956_v60  ;;  %v4065_v9 = vmax.f32 %v3172_v28, 0.0  ;;  %v3176_v18 = vadd.f32 %v3175_v43, %v19506_v29  ;;  %v3054_v22 = vpop.f32.mrf.mxu0  ;;  %12943 = vmatprep.mubr.msk.bf16.mxu1 %vm2478_vm0, %v15247_v34  ;;  %v15249_v34 = vld [vmem:[%s19412_s1 + $0x14] ss:$8 sps:$4 sm:$0xff]  }
 0x190   :  { %4938 = vst [vmem:[#allocation3 + $0x70] sm:$0xf] %v14127_v15  ;;  %v4849_v14 = vmax.f32 %v4062_v49, %v4063_v3  ;;  %v3055_v20 = vadd.f32 %v3054_v22, %v19506_v29  ;;  %v3177_v31 = vpop.f32.mrf.mxu1  ;;  %v4086_v52 = vmax.f32 %v3053_v23, 0.0  ;;  %v14872_v3 = vld [vmem:[#allocation3 + $0x240] ss:$48 sps:$4 sm:$0xff]  }
 0x191   :  { %5046 = vst [vmem:[#allocation3 + $0x74] sm:$0xf] %v14145_v56  ;;  %v4957_v33 = vmax.f32 %v4064_v26, %v4065_v9  ;;  %v4088_v53 = vmax.f32 %v3176_v18, 0.0  ;;  %v3178_v19 = vadd.f32 %v3177_v31, %v19506_v29  ;;  %v3056_v59 = vpop.f32.mrf.mxu0  ;;  %v14877_v26 = vld [vmem:[#allocation3 + $0x24c] ss:$48 sps:$4 sm:$0xff]  }
 0x192   :  { %v14128_v32 = vpack.c.bf16 %v4849_v14, %v4849_v14  ;;  %v4087_v5 = vmax.f32 %v3055_v20, 0.0  ;;  %v3057_v30 = vadd.f32 %v3056_v59, %v16244_v42  ;;  %v3179_v1 = vpop.f32.mrf.mxu1  ;;  %v14875_v18 = vld [vmem:[#allocation3 + $0x248] ss:$48 sps:$4 sm:$0xff]   ;;  %v14880_v20 = vld [vmem:[#allocation3 + $0x1e4] ss:$48 sps:$4 sm:$0xff]  }
 0x193   :  { %v14146_v37 = vpack.c.bf16 %v4957_v33, %v4957_v33  ;;  %v4089_v39 = vmax.f32 %v3178_v19, 0.0  ;;  %v3180_v40 = vadd.f32 %v3179_v1, %v16244_v42  ;;  %v3058_v48 = vpop.f32.mrf.mxu0 }
 0x194   :  { %4939 = vst [vmem:[#allocation3 + $0xa0] sm:$0xf] %v14128_v32  ;;  %v4850_v46 = vmax.f32 %v4086_v52, %v4087_v5  ;;  %v3059_v8 = vadd.f32 %v3058_v48, %v16244_v42  ;;  %v3181_v7 = vpop.f32.mrf.mxu1  ;;  %v4110_v4 = vmax.f32 %v3057_v30, 0.0  ;;  %v14883_v32 = vld [vmem:[#allocation3 + $0x1ec] ss:$48 sps:$4 sm:$0xff]  }
 0x195   :  { %5047 = vst [vmem:[#allocation3 + $0xa4] sm:$0xf] %v14146_v37  ;;  %v4958_v36 = vmax.f32 %v4088_v53, %v4089_v39  ;;  %v4112_v57 = vmax.f32 %v3180_v40, 0.0  ;;  %v3182_v55 = vadd.f32 %v3181_v7, %v16244_v42  ;;  %v3062_v45 = vpop.f32.mrf.mxu0  ;;  %3769 = vmatmul.mubr.bf16.vlgmr.msra.gmra.mxu0 %v15248_v50  ;;  %v14878_v39 = vld [vmem:[#allocation3 + $0x1e0] ss:$48 sps:$4 sm:$0xff]  }
 0x196   :  { %v14129_v61 = vpack.c.bf16 %v4850_v46, %v4850_v46  ;;  %v4111_v11 = vmax.f32 %v3059_v8, 0.0  ;;  %v3063_v21 = vadd.f32 %v3062_v45, %v16197_v35  ;;  %v3185_v60 = vpop.f32.mrf.mxu1  ;;  %3892 = vmatmul.mubr.bf16.vlgmr.msra.gmra.mxu1 %v15248_v50  ;;  %6500 = vmatpush1.bf16.msra.mxu0 %v14866_v54  ;;  %v14881_v8 = vld [vmem:[#allocation3 + $0x1e8] ss:$48 sps:$4 sm:$0xff]  }
 0x197   :  { %v14147_v28 = vpack.c.bf16 %v4958_v36, %v4958_v36  ;;  %v4113_v58 = vmax.f32 %v3182_v55, 0.0  ;;  %v3186_v6 = vadd.f32 %v3185_v60, %v16197_v35  ;;  %6633 = vmatpush1.bf16.msra.mxu1 %v14869_v38  ;;  %6501 = vmatprep.subr.bf16.mxu0 %v14874_v47  ;;  %v3064_v15 = vpop.f32.mrf.mxu0  ;;  %v15250_v36 = vld [vmem:[%s19412_s1 + $0x10] ss:$8 sps:$4 sm:$0xff]  }
 0x198   :  { %4940 = vst [vmem:[#allocation3 + $0xd0] sm:$0xf] %v14129_v61  ;;  %v4851_v49 = vmax.f32 %v4110_v4, %v4111_v11  ;;  %6634 = vmatprep.subr.bf16.mxu1 %v14877_v26  ;;  %v3065_v23 = vadd.f32 %v3064_v15, %v16197_v35  ;;  %v3187_v43 = vpop.f32.mrf.mxu1  ;;  %12935 = vmatprep.mubr.msk.bf16.mxu0 %vm2478_vm0, %v15249_v34  ;;  %v4134_v33 = vmax.f32 %v3063_v21, 0.0  ;;  %v14889_v4 = vld [vmem:[#allocation3 + $0x18c] ss:$48 sps:$4 sm:$0xff]  }
 0x199   :  { %5048 = vst [vmem:[#allocation3 + $0xd4] sm:$0xf] %v14147_v28  ;;  %v4959_v56 = vmax.f32 %v4112_v57, %v4113_v58  ;;  %v4136_v9 = vmax.f32 %v3186_v6, 0.0  ;;  %v3188_v22 = vadd.f32 %v3187_v43, %v16197_v35  ;;  %v3066_v14 = vpop.f32.mrf.mxu0  ;;  %12944 = vmatprep.mubr.msk.bf16.mxu1 %vm2478_vm0, %v15249_v34  ;;  %v14886_v57 = vld [vmem:[#allocation3 + $0x184] ss:$48 sps:$4 sm:$0xff]  }
 0x19a   :  { %v14130_v31 = vpack.c.bf16 %v4851_v49, %v4851_v49  ;;  %v4135_v53 = vmax.f32 %v3065_v23, 0.0  ;;  %v3067_v19 = vadd.f32 %v3066_v14, %v16212_v44  ;;  %v3189_v59 = vpop.f32.mrf.mxu1  ;;  %6502 = vmatpush1.bf16.msra.mxu0 %v14872_v3  ;;  %v14884_v58 = vld [vmem:[#allocation3 + $0x180] ss:$48 sps:$4 sm:$0xff]   ;;  %v15251_v49 = vld [vmem:[%s19412_s1 + $0x24] ss:$8 sps:$4 sm:$0xff]  }
 0x19b   :  { %v14148_v52 = vpack.c.bf16 %v4959_v56, %v4959_v56  ;;  %v4137_v5 = vmax.f32 %v3188_v22, 0.0  ;;  %v3190_v30 = vadd.f32 %v3189_v59, %v16212_v44  ;;  %6635 = vmatpush1.bf16.msra.mxu1 %v14875_v18  ;;  %6503 = vmatprep.subr.bf16.mxu0 %v14880_v20  ;;  %v3068_v1 = vpop.f32.mrf.mxu0  ;;  %v14887_v43 = vld [vmem:[#allocation3 + $0x188] ss:$48 sps:$4 sm:$0xff]  }
 0x19c   :  { %4941 = vst [vmem:[#allocation3 + $0x100] sm:$0xf] %v14130_v31  ;;  %v4852_v37 = vmax.f32 %v4134_v33, %v4135_v53  ;;  %6636 = vmatprep.subr.bf16.mxu1 %v14883_v32  ;;  %v3069_v40 = vadd.f32 %v3068_v1, %v16212_v44  ;;  %v3191_v48 = vpop.f32.mrf.mxu1  ;;  %v4158_v45 = vmax.f32 %v3067_v19, 0.0  ;;  %v14895_v33 = vld [vmem:[#allocation3 + $0x12c] ss:$48 sps:$4 sm:$0xff]  }
 0x19d   :  { %5049 = vst [vmem:[#allocation3 + $0x104] sm:$0xf] %v14148_v52  ;;  %v4960_v54 = vmax.f32 %v4136_v9, %v4137_v5  ;;  %v4160_v46 = vmax.f32 %v3190_v30, 0.0  ;;  %v3192_v7 = vadd.f32 %v3191_v48, %v16212_v44  ;;  %v3072_v38 = vpop.f32.mrf.mxu0  ;;  %3779 = vmatmul.mubr.bf16.gmra.mxu0 %v15250_v36  ;;  %v14892_v9 = vld [vmem:[#allocation3 + $0x124] ss:$48 sps:$4 sm:$0xff]  }
 0x19e   :  { %v14131_v55 = vpack.c.bf16 %v4852_v37, %v4852_v37  ;;  %v4159_v50 = vmax.f32 %v3069_v40, 0.0  ;;  %v3073_v47 = vadd.f32 %v3072_v38, %v16174_v16  ;;  %v3195_v61 = vpop.f32.mrf.mxu1  ;;  %3902 = vmatmul.mubr.bf16.gmra.mxu1 %v15250_v36  ;;  %6504 = vmatpush1.bf16.msra.mxu0 %v14878_v39  ;;  %v14890_v5 = vld [vmem:[#allocation3 + $0x120] ss:$48 sps:$4 sm:$0xff]   ;;  %v14893_v40 = vld [vmem:[#allocation3 + $0x128] ss:$48 sps:$4 sm:$0xff]  }
 0x19f   :  { %v14149_v11 = vpack.c.bf16 %v4960_v54, %v4960_v54  ;;  %v4161_v21 = vmax.f32 %v3192_v7, 0.0  ;;  %v3196_v60 = vadd.f32 %v3195_v61, %v16174_v16  ;;  %6637 = vmatpush1.bf16.msra.mxu1 %v14881_v8  ;;  %6505 = vmatprep.subr.bf16.mxu0 %v14886_v57  ;;  %v3074_v26 = vpop.f32.mrf.mxu0  ;;  %v14898_v8 = vld [vmem:[#allocation3 + $0xc4] ss:$48 sps:$4 sm:$0xff]  }
 0x1a0   :  { %4942 = vst [vmem:[#allocation3 + $0x130] sm:$0xf] %v14131_v55  ;;  %v4853_v28 = vmax.f32 %v4158_v45, %v4159_v50  ;;  %6638 = vmatprep.subr.bf16.mxu1 %v14889_v4  ;;  %v3075_v6 = vadd.f32 %v3074_v26, %v16174_v16  ;;  %v3197_v15 = vpop.f32.mrf.mxu1  ;;  %12936 = vmatprep.mubr.msk.bf16.mxu0 %vm2478_vm0, %v15251_v49  ;;  %v4182_v22 = vmax.f32 %v3073_v47, 0.0  ;;  %v14901_v45 = vld [vmem:[#allocation3 + $0xcc] ss:$48 sps:$4 sm:$0xff]  }
 0x1a1   :  { %5050 = vst [vmem:[#allocation3 + $0x134] sm:$0xf] %v14149_v11  ;;  %v4961_v3 = vmax.f32 %v4160_v46, %v4161_v21  ;;  %v4184_v23 = vmax.f32 %v3196_v60, 0.0  ;;  %v3198_v34 = vadd.f32 %v3197_v15, %v16174_v16  ;;  %v3076_v56 = vpop.f32.mrf.mxu0  ;;  %12945 = vmatprep.mubr.msk.bf16.mxu1 %vm2478_vm0, %v15251_v49  ;;  %v15252_v46 = vld [vmem:[%s19412_s1 + $0x20] ss:$8 sps:$4 sm:$0xff]  }
 0x1a2   :  { %v14132_v18 = vpack.c.bf16 %v4853_v28, %v4853_v28  ;;  %v4183_v14 = vmax.f32 %v3075_v6, 0.0  ;;  %v3077_v20 = vadd.f32 %v3076_v56, %v16192_v0  ;;  %v3199_v31 = vpop.f32.mrf.mxu1  ;;  %6506 = vmatpush1.bf16.msra.mxu0 %v14884_v58  ;;  %v14896_v21 = vld [vmem:[#allocation3 + $0xc0] ss:$48 sps:$4 sm:$0xff]   ;;  %v15253_v28 = vld [vmem:[%s19412_s1 + $0x34] ss:$8 sps:$4 sm:$0xff]  }
 0x1a3   :  { %v14150_v53 = vpack.c.bf16 %v4961_v3, %v4961_v3  ;;  %v4185_v19 = vmax.f32 %v3198_v34, 0.0  ;;  %v3200_v59 = vadd.f32 %v3199_v31, %v16192_v0  ;;  %6639 = vmatpush1.bf16.msra.mxu1 %v14887_v43  ;;  %6507 = vmatprep.subr.bf16.mxu0 %v14892_v9  ;;  %v3078_v32 = vpop.f32.mrf.mxu0  ;;  %v14899_v6 = vld [vmem:[#allocation3 + $0xc8] ss:$48 sps:$4 sm:$0xff]   ;;  %v14904_v3 = vld [vmem:[#allocation3 + $0x64] ss:$48 sps:$4 sm:$0xff]  }
 0x1a4   :  { %4943 = vst [vmem:[#allocation3 + $0x160] sm:$0xf] %v14132_v18  ;;  %v4854_v52 = vmax.f32 %v4182_v22, %v4183_v14  ;;  %6640 = vmatprep.subr.bf16.mxu1 %v14895_v33  ;;  %v3079_v30 = vadd.f32 %v3078_v32, %v16192_v0  ;;  %v3201_v1 = vpop.f32.mrf.mxu1  ;;  %v4206_v38 = vmax.f32 %v3077_v20, 0.0  ;;  %v14907_v18 = vld [vmem:[#allocation3 + $0x6c] ss:$48 sps:$4 sm:$0xff]  }
 0x1a5   :  { %5051 = vst [vmem:[#allocation3 + $0x164] sm:$0xf] %v14150_v53  ;;  %v4962_v37 = vmax.f32 %v4184_v23, %v4185_v19  ;;  %v4208_v39 = vmax.f32 %v3200_v59, 0.0  ;;  %v3202_v48 = vadd.f32 %v3201_v1, %v16192_v0  ;;  %v3082_v54 = vpop.f32.mrf.mxu0  ;;  %3789 = vmatmul.mubr.bf16.gmra.mxu0 %v15252_v46  ;;  %v14902_v19 = vld [vmem:[#allocation3 + $0x60] ss:$48 sps:$4 sm:$0xff]  }
 0x1a6   :  { %v14133_v7 = vpack.c.bf16 %v4854_v52, %v4854_v52  ;;  %v4207_v36 = vmax.f32 %v3079_v30, 0.0  ;;  %v3083_v57 = vadd.f32 %v3082_v54, %v16160_v25  ;;  %v3205_v55 = vpop.f32.mrf.mxu1  ;;  %3912 = vmatmul.mubr.bf16.gmra.mxu1 %v15252_v46  ;;  %6508 = vmatpush1.bf16.msra.mxu0 %v14890_v5  ;;  %v14905_v5 = vld [vmem:[#allocation3 + $0x68] ss:$48 sps:$4 sm:$0xff]  }
 0x1a7   :  { %v14151_v50 = vpack.c.bf16 %v4962_v37, %v4962_v37  ;;  %v4209_v47 = vmax.f32 %v3202_v48, 0.0  ;;  %v3206_v61 = vadd.f32 %v3205_v55, %v16160_v25  ;;  %6641 = vmatpush1.bf16.msra.mxu1 %v14893_v40  ;;  %6509 = vmatprep.subr.bf16.mxu0 %v14898_v8  ;;  %v3084_v4 = vpop.f32.mrf.mxu0  ;;  %v15254_v37 = vld [vmem:[%s19412_s1 + $0x30] ss:$8 sps:$4 sm:$0xff]  }
 0x1a8   :  { %4944 = vst [vmem:[#allocation3 + $0x190] sm:$0xf] %v14133_v7  ;;  %v4855_v11 = vmax.f32 %v4206_v38, %v4207_v36  ;;  %6642 = vmatprep.subr.bf16.mxu1 %v14901_v45  ;;  %v3085_v60 = vadd.f32 %v3084_v4, %v16160_v25  ;;  %v3207_v26 = vpop.f32.mrf.mxu1  ;;  %12937 = vmatprep.mubr.msk.bf16.mxu0 %vm2478_vm0, %v15253_v28  ;;  %v4230_v43 = vmax.f32 %v3083_v57, 0.0  ;;  %v14913_v7 = vld [vmem:[#allocation3 + $0xc] ss:$48 sps:$4 sm:$0xff]  }
 0x1a9   :  { %5052 = vst [vmem:[#allocation3 + $0x194] sm:$0xf] %v14151_v50  ;;  %v4963_v58 = vmax.f32 %v4208_v39, %v4209_v47  ;;  %v3208_v15 = vadd.f32 %v3207_v26, %v16160_v25  ;;  %v3086_v49 = vpop.f32.mrf.mxu0  ;;  %12946 = vmatprep.mubr.msk.bf16.mxu1 %vm2478_vm0, %v15253_v28  ;;  %v4232_v14 = vmax.f32 %v3206_v61, 0.0  ;;  %v14910_v39 = vld [vmem:[#allocation3 + $0x4] ss:$48 sps:$4 sm:$0xff]  }
 0x1aa   :  { %v14134_v23 = vpack.c.bf16 %v4855_v11, %v4855_v11  ;;  %v4231_v34 = vmax.f32 %v3085_v60, 0.0  ;;  %v3087_v56 = vadd.f32 %v3086_v49, %v16171_v27  ;;  %v3209_v9 = vpop.f32.mrf.mxu1  ;;  %6510 = vmatpush1.bf16.msra.mxu0 %v14896_v21  ;;  %v14908_v47 = vld [vmem:[#allocation3] ss:$48 sps:$4 sm:$0xff]   ;;  %v15255_v11 = vld [vmem:[%s19412_s1 + $0x44] ss:$8 sps:$4 sm:$0xff]  }
 0x1ab   :  { %v14152_v22 = vpack.c.bf16 %v4963_v58, %v4963_v58  ;;  %v4233_v20 = vmax.f32 %v3208_v15, 0.0  ;;  %v3210_v31 = vadd.f32 %v3209_v9, %v16171_v27  ;;  %6643 = vmatpush1.bf16.msra.mxu1 %v14899_v6  ;;  %6511 = vmatprep.subr.bf16.mxu0 %v14904_v3  ;;  %v3088_v33 = vpop.f32.mrf.mxu0  ;;  %v14911_v60 = vld [vmem:[#allocation3 + $0x8] ss:$48 sps:$4 sm:$0xff]   ;;  %v14916_v58 = vld [vmem:[#allocation3 + $0x304] ss:$48 sps:$4 sm:$0xff]  }
 0x1ac   :  { %4945 = vst [vmem:[#allocation3 + $0x1c0] sm:$0xf] %v14134_v23  ;;  %v4856_v53 = vmax.f32 %v4230_v43, %v4231_v34  ;;  %6644 = vmatprep.subr.bf16.mxu1 %v14907_v18  ;;  %v3089_v59 = vadd.f32 %v3088_v33, %v16171_v27  ;;  %v3211_v32 = vpop.f32.mrf.mxu1  ;;  %v4254_v48 = vmax.f32 %v3087_v56, 0.0  ;;  %v14919_v43 = vld [vmem:[#allocation3 + $0x30c] ss:$48 sps:$4 sm:$0xff]  }
 0x1ad   :  { %5053 = vst [vmem:[#allocation3 + $0x1c4] sm:$0xf] %v14152_v22  ;;  %v4964_v52 = vmax.f32 %v4232_v14, %v4233_v20  ;;  %v3212_v30 = vadd.f32 %v3211_v32, %v16171_v27  ;;  %v3092_v1 = vpop.f32.mrf.mxu0  ;;  %3799 = vmatmul.mubr.bf16.gmra.mxu0 %v15254_v37  ;;  %v4256_v36 = vmax.f32 %v3210_v31, 0.0  ;;  %v14914_v20 = vld [vmem:[#allocation3 + $0x300] ss:$48 sps:$4 sm:$0xff]  }
 0x1ae   :  { %v14135_v40 = vpack.c.bf16 %v4856_v53, %v4856_v53  ;;  %v4255_v54 = vmax.f32 %v3089_v59, 0.0  ;;  %v3093_v46 = vadd.f32 %v3092_v1, %v16140_v2  ;;  %v3215_v8 = vpop.f32.mrf.mxu1  ;;  %3922 = vmatmul.mubr.bf16.gmra.mxu1 %v15254_v37  ;;  %6512 = vmatpush1.bf16.msra.mxu0 %v14902_v19  ;;  %v14917_v19 = vld [vmem:[#allocation3 + $0x308] ss:$48 sps:$4 sm:$0xff]  }
 0x1af   :  { %v14153_v38 = vpack.c.bf16 %v4964_v52, %v4964_v52  ;;  %v4257_v57 = vmax.f32 %v3212_v30, 0.0  ;;  %v3216_v55 = vadd.f32 %v3215_v8, %v16140_v2  ;;  %6645 = vmatpush1.bf16.msra.mxu1 %v14905_v5  ;;  %6513 = vmatprep.subr.bf16.mxu0 %v14910_v39  ;;  %v3094_v45 = vpop.f32.mrf.mxu0  ;;  %v15256_v52 = vld [vmem:[%s19412_s1 + $0x40] ss:$8 sps:$4 sm:$0xff]  }
 0x1b0   :  { %4946 = vst [vmem:[#allocation3 + $0x1f0] sm:$0xf] %v14135_v40  ;;  %v4857_v50 = vmax.f32 %v4254_v48, %v4255_v54  ;;  %6646 = vmatprep.subr.bf16.mxu1 %v14913_v7  ;;  %v3095_v61 = vadd.f32 %v3094_v45, %v16140_v2  ;;  %v3217_v4 = vpop.f32.mrf.mxu1  ;;  %12938 = vmatprep.mubr.msk.bf16.mxu0 %vm2478_vm0, %v15255_v11  ;;  %v4278_v15 = vmax.f32 %v3093_v46, 0.0  ;;  %v15257_v7 = vld [vmem:[%s19412_s1 + $0x54] ss:$8 sps:$4 sm:$0xff]  }
 0x1b1   :  { %5054 = vst [vmem:[#allocation3 + $0x1f4] sm:$0xf] %v14153_v38  ;;  %v4965_v21 = vmax.f32 %v4256_v36, %v4257_v57  ;;  %v3218_v26 = vadd.f32 %v3217_v4, %v16140_v2  ;;  %v3096_v28 = vpop.f32.mrf.mxu0  ;;  %12947 = vmatprep.mubr.msk.bf16.mxu1 %vm2478_vm0, %v15255_v11  ;;  %v4280_v56 = vmax.f32 %v3216_v55, 0.0 }
 0x1b2   :  { %v14136_v6 = vpack.c.bf16 %v4857_v50, %v4857_v50  ;;  %v4279_v49 = vmax.f32 %v3095_v61, 0.0  ;;  %v3097_v3 = vadd.f32 %v3096_v28, %v16154_v13  ;;  %v3219_v23 = vpop.f32.mrf.mxu1  ;;  %6514 = vmatpush1.bf16.msra.mxu0 %v14908_v47 }
 0x1b3   :  { %v14154_v34 = vpack.c.bf16 %v4965_v21, %v4965_v21  ;;  %v4281_v9 = vmax.f32 %v3218_v26, 0.0  ;;  %v3220_v18 = vadd.f32 %v3219_v23, %v16154_v13  ;;  %6647 = vmatpush1.bf16.msra.mxu1 %v14911_v60  ;;  %6529 = vmatprep.subr.bf16.mxu0 %v14916_v58  ;;  %v3098_v22 = vpop.f32.mrf.mxu0 }
 0x1b4   :  { %4947 = vst [vmem:[#allocation3 + $0x220] sm:$0xf] %v14136_v6  ;;  %v4858_v14 = vmax.f32 %v4278_v15, %v4279_v49  ;;  %6662 = vmatprep.subr.bf16.mxu1 %v14919_v43  ;;  %v3099_v31 = vadd.f32 %v3098_v22, %v16154_v13  ;;  %v3221_v33 = vpop.f32.mrf.mxu1  ;;  %v4302_v30 = vmax.f32 %v3097_v3, 0.0 }
 0x1b5   :  { %5055 = vst [vmem:[#allocation3 + $0x224] sm:$0xf] %v14154_v34  ;;  %v4966_v53 = vmax.f32 %v4280_v56, %v4281_v9  ;;  %v3222_v59 = vadd.f32 %v3221_v33, %v16154_v13  ;;  %v3102_v32 = vpop.f32.mrf.mxu0  ;;  %3809 = vmatmul.mubr.bf16.gmra.mxu0 %v15256_v52  ;;  %v4304_v48 = vmax.f32 %v3220_v18, 0.0  ;;  %v15258_v56 = vld [vmem:[%s19412_s1 + $0x50] ss:$8 sps:$4 sm:$0xff]  }
 0x1b6   :  { %v14137_v5 = vpack.c.bf16 %v4858_v14, %v4858_v14  ;;  %v4303_v1 = vmax.f32 %v3099_v31, 0.0  ;;  %v3103_v37 = vadd.f32 %v3102_v32, %v16133_v63  ;;  %v3225_v39 = vpop.f32.mrf.mxu1  ;;  %3932 = vmatmul.mubr.bf16.gmra.mxu1 %v15256_v52  ;;  %6530 = vmatpush2.bf16.msra.mxu0 %v14914_v20  ;;  %v15259_v31 = vld [vmem:[%s19412_s1 + $0x64] ss:$8 sps:$4 sm:$0xff]  }
 0x1b7   :  { %v14155_v40 = vpack.c.bf16 %v4966_v53, %v4966_v53  ;;  %v4305_v54 = vmax.f32 %v3222_v59, 0.0  ;;  %v3226_v46 = vadd.f32 %v3225_v39, %v16133_v63  ;;  %6663 = vmatpush2.bf16.msra.mxu1 %v14917_v19  ;;  %v3104_v8 = vpop.f32.mrf.mxu0  ;;  %12939 = vmatprep.mubr.msk.bf16.mxu0 %vm2478_vm0, %v15257_v7 }
 0x1b8   :  { %4948 = vst [vmem:[#allocation3 + $0x250] sm:$0xf] %v14137_v5  ;;  %v4859_v38 = vmax.f32 %v4302_v30, %v4303_v1  ;;  %v3105_v36 = vadd.f32 %v3104_v8, %v16133_v63  ;;  %v3227_v57 = vpop.f32.mrf.mxu1  ;;  %12948 = vmatprep.mubr.msk.bf16.mxu1 %vm2478_vm0, %v15257_v7  ;;  %v4326_v61 = vmax.f32 %v3103_v37, 0.0 }
 0x1b9   :  { %5056 = vst [vmem:[#allocation3 + $0x254] sm:$0xf] %v14155_v40  ;;  %v4967_v55 = vmax.f32 %v4304_v48, %v4305_v54  ;;  %v3228_v45 = vadd.f32 %v3227_v57, %v16133_v63  ;;  %v3106_v50 = vpop.f32.mrf.mxu0  ;;  %v4328_v26 = vmax.f32 %v3226_v46, 0.0 }
 0x1ba   :  { %v14138_v47 = vpack.c.bf16 %v4859_v38, %v4859_v38  ;;  %v4327_v4 = vmax.f32 %v3105_v36, 0.0  ;;  %v3107_v11 = vadd.f32 %v3106_v50, %v16148_v24  ;;  %v3229_v21 = vpop.f32.mrf.mxu1 }
 0x1bb   :  { %v14156_v60 = vpack.c.bf16 %v4967_v55, %v4967_v55  ;;  %v4329_v28 = vmax.f32 %v3228_v45, 0.0  ;;  %v3230_v58 = vadd.f32 %v3229_v21, %v16148_v24  ;;  %v3108_v6 = vpop.f32.mrf.mxu0  ;;  %v15260_v21 = vld [vmem:[%s19412_s1 + $0x60] ss:$8 sps:$4 sm:$0xff]  }
 0x1bc   :  { %4949 = vst [vmem:[#allocation3 + $0x280] sm:$0xf] %v14138_v47  ;;  %v4860_v15 = vmax.f32 %v4326_v61, %v4327_v4  ;;  %v3109_v49 = vadd.f32 %v3108_v6, %v16148_v24  ;;  %v3231_v3 = vpop.f32.mrf.mxu1  ;;  %v4350_v18 = vmax.f32 %v3107_v11, 0.0 }
 0x1bd   :  { %5057 = vst [vmem:[#allocation3 + $0x284] sm:$0xf] %v14156_v60  ;;  %v4968_v23 = vmax.f32 %v4328_v26, %v4329_v28  ;;  %v3232_v43 = vadd.f32 %v3231_v3, %v16148_v24  ;;  %v3112_v34 = vpop.f32.mrf.mxu0  ;;  %3819 = vmatmul.mubr.bf16.gmra.mxu0 %v15258_v56  ;;  %v4352_v53 = vmax.f32 %v3230_v58, 0.0 }
 0x1be   :  { %v14139_v9 = vpack.c.bf16 %v4860_v15, %v4860_v15  ;;  %v4351_v22 = vmax.f32 %v3109_v49, 0.0  ;;  %v3113_v14 = vadd.f32 %v3112_v34, %v16529_v10  ;;  %v3235_v20 = vpop.f32.mrf.mxu1  ;;  %3942 = vmatmul.mubr.bf16.gmra.mxu1 %v15258_v56  ;;  %12940 = vmatprep.mubr.msk.bf16.mxu0 %vm2478_vm0, %v15259_v31  ;;  %v15261_v15 = vld [vmem:[%s19412_s1 + $0x74] ss:$8 sps:$4 sm:$0xff]  }
 0x1bf   :  { %v14157_v33 = vpack.c.bf16 %v4968_v23, %v4968_v23  ;;  %v4353_v19 = vmax.f32 %v3232_v43, 0.0  ;;  %v3236_v59 = vadd.f32 %v3235_v20, %v16529_v10  ;;  %v3114_v32 = vpop.f32.mrf.mxu0  ;;  %12949 = vmatprep.mubr.msk.bf16.mxu1 %vm2478_vm0, %v15259_v31 }
 0x1c0   :  { %4950 = vst [vmem:[#allocation3 + $0x2b0] sm:$0xf] %v14139_v9  ;;  %v4861_v52 = vmax.f32 %v4350_v18, %v4351_v22  ;;  %v3115_v5 = vadd.f32 %v3114_v32, %v16529_v10  ;;  %v3237_v30 = vpop.f32.mrf.mxu1  ;;  %v4374_v48 = vmax.f32 %v3113_v14, 0.0 }
 0x1c1   :  { %5058 = vst [vmem:[#allocation3 + $0x2b4] sm:$0xf] %v14157_v33  ;;  %v4969_v1 = vmax.f32 %v4352_v53, %v4353_v19  ;;  %v3238_v37 = vadd.f32 %v3237_v30, %v16529_v10  ;;  %v3116_v39 = vpop.f32.mrf.mxu0  ;;  %v4376_v38 = vmax.f32 %v3236_v59, 0.0 }
 0x1c2   :  { %v14140_v40 = vpack.c.bf16 %v4861_v52, %v4861_v52  ;;  %v4375_v54 = vmax.f32 %v3115_v5, 0.0  ;;  %v3117_v46 = vadd.f32 %v3116_v39, %v19499_v62  ;;  %v3239_v8 = vpop.f32.mrf.mxu1 }
 0x1c3   :  { %v14158_v7 = vpack.c.bf16 %v4969_v1, %v4969_v1  ;;  %v4377_v36 = vmax.f32 %v3238_v37, 0.0  ;;  %v3240_v57 = vadd.f32 %v3239_v8, %v19499_v62  ;;  %v3118_v55 = vpop.f32.mrf.mxu0 }
 0x1c4   :  { %4951 = vst [vmem:[#allocation3 + $0x2e0] sm:$0xf] %v14140_v40  ;;  %v4862_v45 = vmax.f32 %v4374_v48, %v4375_v54  ;;  %v3119_v50 = vadd.f32 %v3118_v55, %v19499_v62  ;;  %v3241_v47 = vpop.f32.mrf.mxu1  ;;  %v4398_v26 = vmax.f32 %v3117_v46, 0.0 }
 0x1c5   :  { %5059 = vst [vmem:[#allocation3 + $0x2e4] sm:$0xf] %v14158_v7  ;;  %v4970_v61 = vmax.f32 %v4376_v38, %v4377_v36  ;;  %v3242_v4 = vadd.f32 %v3241_v47, %v19499_v62  ;;  %v3278_v11 = vpop.f32.mrf.mxu0  ;;  %3829 = vmatmul.mubr.bf16.gmra.mxu0 %v15260_v21  ;;  %v4400_v3 = vmax.f32 %v3240_v57, 0.0  ;;  %v15262_v7 = vld [vmem:[%s19412_s1 + $0x70] ss:$8 sps:$4 sm:$0xff]  }
 0x1c6   :  { %v14141_v60 = vpack.c.bf16 %v4862_v45, %v4862_v45  ;;  %v4399_v28 = vmax.f32 %v3119_v50, 0.0  ;;  %v3279_v58 = vadd.f32 %v3278_v11, %v16260_v17  ;;  %v3401_v6 = vpop.f32.mrf.mxu1  ;;  %3952 = vmatmul.mubr.bf16.gmra.mxu1 %v15260_v21  ;;  %12941 = vmatprep.mubr.msk.bf16.mxu0 %vm2478_vm0, %v15261_v15  ;;  %v15263_v21 = vld [vmem:[%s19412_s1 + $0x84] ss:$8 sps:$4 sm:$0xff]  }
 0x1c7   :  { %v14159_v49 = vpack.c.bf16 %v4970_v61, %v4970_v61  ;;  %v4401_v23 = vmax.f32 %v3242_v4, 0.0  ;;  %v3402_v43 = vadd.f32 %v3401_v6, %v16260_v17  ;;  %v3280_v34 = vpop.f32.mrf.mxu0  ;;  %12950 = vmatprep.mubr.msk.bf16.mxu1 %vm2478_vm0, %v15261_v15 }
 0x1c8   :  { %4952 = vst [vmem:[#allocation3 + $0x310] sm:$0xf] %v14141_v60  ;;  %v4863_v56 = vmax.f32 %v4398_v26, %v4399_v28  ;;  %v3281_v9 = vadd.f32 %v3280_v34, %v16260_v17  ;;  %v3403_v18 = vpop.f32.mrf.mxu1  ;;  %v3994_v33 = vmax.f32 %v3279_v58, 0.0 }
 0x1c9   :  { %5060 = vst [vmem:[#allocation3 + $0x314] sm:$0xf] %v14159_v49  ;;  %v4971_v22 = vmax.f32 %v4400_v3, %v4401_v23  ;;  %v3404_v14 = vadd.f32 %v3403_v18, %v16260_v17  ;;  %v3282_v20 = vpop.f32.mrf.mxu0  ;;  %v3996_v52 = vmax.f32 %v3402_v43, 0.0 }
 0x1ca   :  { %v14142_v31 = vpack.c.bf16 %v4863_v56, %v4863_v56  ;;  %v3995_v53 = vmax.f32 %v3281_v9, 0.0  ;;  %v3283_v19 = vadd.f32 %v3282_v20, %v19501_v12  ;;  %v3405_v59 = vpop.f32.mrf.mxu1  ;;  %v14923_v56 = vld [vmem:[%s19417_s3 + $0x4] ss:$8 sps:$4 sm:$0xff]  }
 0x1cb   :  { %v14160_v32 = vpack.c.bf16 %v4971_v22, %v4971_v22  ;;  %v3997_v5 = vmax.f32 %v3404_v14, 0.0  ;;  %v3406_v30 = vadd.f32 %v3405_v59, %v19501_v12  ;;  %v3284_v1 = vpop.f32.mrf.mxu0 }
 0x1cc   :  { %4953 = vst [vmem:[#allocation3 + $0x340] sm:$0xf] %v14142_v31  ;;  %v5062_v37 = vmax.f32 %v3994_v33, %v3995_v53  ;;  %v3285_v39 = vadd.f32 %v3284_v1, %v19501_v12  ;;  %v3407_v40 = vpop.f32.mrf.mxu1  ;;  %v14922_v48 = vld [vmem:[#allocation3 + $0x2b4] ss:$48 sps:$4 sm:$0xff]   ;;  %v4018_v36 = vmax.f32 %v3283_v19, 0.0 }
 0x1cd   :  { %5061 = vst [vmem:[#allocation3 + $0x344] sm:$0xf] %v14160_v32  ;;  %v5170_v54 = vmax.f32 %v3996_v52, %v3997_v5  ;;  %v3408_v46 = vadd.f32 %v3407_v40, %v19501_v12  ;;  %v3288_v8 = vpop.f32.mrf.mxu0  ;;  %3839 = vmatmul.mubr.bf16.gmra.mxu0 %v15262_v7  ;;  %6765 = vmatprep.subr.bf16.mxu0 %v14922_v48  ;;  %v4020_v47 = vmax.f32 %v3406_v30, 0.0  ;;  %v15264_v52 = vld [vmem:[%s19412_s1 + $0x80] ss:$8 sps:$4 sm:$0xff]  }
 0x1ce   :  { %v14161_v38 = vpack.c.bf16 %v5062_v37, %v5062_v37  ;;  %v4019_v57 = vmax.f32 %v3285_v39, 0.0  ;;  %v3289_v55 = vadd.f32 %v3288_v8, %v16250_v41  ;;  %v3411_v45 = vpop.f32.mrf.mxu1  ;;  %3962 = vmatmul.mubr.bf16.gmra.mxu1 %v15262_v7  ;;  %12942 = vmatprep.mubr.msk.bf16.mxu0 %vm2478_vm0, %v15263_v21 }
 0x1cf   :  { %v14179_v50 = vpack.c.bf16 %v5170_v54, %v5170_v54  ;;  %v4021_v61 = vmax.f32 %v3408_v46, 0.0  ;;  %v3412_v4 = vadd.f32 %v3411_v45, %v16250_v41  ;;  %v3290_v11 = vpop.f32.mrf.mxu0  ;;  %12951 = vmatprep.mubr.msk.bf16.mxu1 %vm2478_vm0, %v15263_v21 }
 0x1d0   :  { %5152 = vst [vmem:[#allocation3 + $0x18] sm:$0xf] %v14161_v38  ;;  %v5063_v60 = vmax.f32 %v4018_v36, %v4019_v57  ;;  %v3291_v26 = vadd.f32 %v3290_v11, %v16250_v41  ;;  %v3413_v28 = vpop.f32.mrf.mxu1  ;;  %v4042_v3 = vmax.f32 %v3289_v55, 0.0 }
 0x1d1   :  { %5260 = vst [vmem:[#allocation3 + $0x1c] sm:$0xf] %v14179_v50  ;;  %v5171_v58 = vmax.f32 %v4020_v47, %v4021_v61  ;;  %v3414_v6 = vadd.f32 %v3413_v28, %v16250_v41  ;;  %v3292_v15 = vpop.f32.mrf.mxu0  ;;  %v4044_v18 = vmax.f32 %v3412_v4, 0.0  ;;  %v14925_v50 = vld [vmem:[%s19417_s3] ss:$8 sps:$4 sm:$0xff]  }
 0x1d2   :  { %v14162_v49 = vpack.c.bf16 %v5063_v60, %v5063_v60  ;;  %v4043_v23 = vmax.f32 %v3291_v26, 0.0  ;;  %v3293_v43 = vadd.f32 %v3292_v15, %v19504_v51  ;;  %v3415_v34 = vpop.f32.mrf.mxu1  ;;  %v14932_v15 = vld [vmem:[%s19417_s3 + $0x14] ss:$8 sps:$4 sm:$0xff]  }
 0x1d3   :  { %v14180_v9 = vpack.c.bf16 %v5171_v58, %v5171_v58  ;;  %v4045_v22 = vmax.f32 %v3414_v6, 0.0  ;;  %v3416_v14 = vadd.f32 %v3415_v34, %v19504_v51  ;;  %v3294_v20 = vpop.f32.mrf.mxu0 }
 0x1d4   :  { %5153 = vst [vmem:[#allocation3 + $0x48] sm:$0xf] %v14162_v49  ;;  %v5064_v31 = vmax.f32 %v4042_v3, %v4043_v23  ;;  %v3295_v33 = vadd.f32 %v3294_v20, %v19504_v51  ;;  %v3417_v53 = vpop.f32.mrf.mxu1  ;;  %v4066_v30 = vmax.f32 %v3293_v43, 0.0  ;;  %v14920_v49 = vld [vmem:[#allocation3 + $0x2b0] ss:$48 sps:$4 sm:$0xff]  }
 0x1d5   :  { %5261 = vst [vmem:[#allocation3 + $0x4c] sm:$0xf] %v14180_v9  ;;  %v5172_v19 = vmax.f32 %v4044_v18, %v4045_v22  ;;  %v3418_v59 = vadd.f32 %v3417_v53, %v19504_v51  ;;  %v3298_v32 = vpop.f32.mrf.mxu0  ;;  %3849 = vmatmul.mubr.bf16.gmra.mxu0 %v15264_v52  ;;  %v4068_v48 = vmax.f32 %v3416_v14, 0.0  ;;  %v14928_v18 = vld [vmem:[#allocation3 + $0x254] ss:$48 sps:$4 sm:$0xff]  }
 0x1d6   :  { %v14163_v5 = vpack.c.bf16 %v5064_v31, %v5064_v31  ;;  %v4067_v1 = vmax.f32 %v3295_v33, 0.0  ;;  %v3299_v37 = vadd.f32 %v3298_v32, %v19506_v29  ;;  %v3421_v39 = vpop.f32.mrf.mxu1  ;;  %3972 = vmatmul.mubr.bf16.gmra.mxu1 %v15264_v52  ;;  %13296 = vmatprep.mubr.msk.bf16.mxu0 %vm6468_vm1, %v14923_v56 }
 0x1d7   :  { %v14181_v40 = vpack.c.bf16 %v5172_v19, %v5172_v19  ;;  %v4069_v54 = vmax.f32 %v3418_v59, 0.0  ;;  %v3422_v46 = vadd.f32 %v3421_v39, %v19506_v29  ;;  %v3300_v8 = vpop.f32.mrf.mxu0  ;;  %13306 = vmatprep.mubr.msk.bf16.mxu1 %vm6468_vm1, %v14923_v56 }
 0x1d8   :  { %5154 = vst [vmem:[#allocation3 + $0x78] sm:$0xf] %v14163_v5  ;;  %v5065_v7 = vmax.f32 %v4066_v30, %v4067_v1  ;;  %v3301_v38 = vadd.f32 %v3300_v8, %v19506_v29  ;;  %v3423_v36 = vpop.f32.mrf.mxu1  ;;  %v4090_v61 = vmax.f32 %v3299_v37, 0.0  ;;  %v14926_v30 = vld [vmem:[#allocation3 + $0x250] ss:$48 sps:$4 sm:$0xff]  }
 0x1d9   :  { %5262 = vst [vmem:[#allocation3 + $0x7c] sm:$0xf] %v14181_v40  ;;  %v5173_v57 = vmax.f32 %v4068_v48, %v4069_v54  ;;  %v3424_v55 = vadd.f32 %v3423_v36, %v19506_v29  ;;  %v3302_v45 = vpop.f32.mrf.mxu0  ;;  %v4092_v26 = vmax.f32 %v3422_v46, 0.0  ;;  %v14931_v54 = vld [vmem:[#allocation3 + $0x1f4] ss:$48 sps:$4 sm:$0xff]  }
 0x1da   :  { %v14164_v47 = vpack.c.bf16 %v5065_v7, %v5065_v7  ;;  %v4091_v4 = vmax.f32 %v3301_v38, 0.0  ;;  %v3303_v11 = vadd.f32 %v3302_v45, %v16244_v42  ;;  %v3425_v21 = vpop.f32.mrf.mxu1  ;;  %v14934_v46 = vld [vmem:[%s19417_s3 + $0x10] ss:$8 sps:$4 sm:$0xff]  }
 0x1db   :  { %v14182_v60 = vpack.c.bf16 %v5173_v57, %v5173_v57  ;;  %v4093_v28 = vmax.f32 %v3424_v55, 0.0  ;;  %v3426_v58 = vadd.f32 %v3425_v21, %v16244_v42  ;;  %v3304_v6 = vpop.f32.mrf.mxu0  ;;  %v14929_v21 = vld [vmem:[#allocation3 + $0x1f0] ss:$48 sps:$4 sm:$0xff]  }
 0x1dc   :  { %5155 = vst [vmem:[#allocation3 + $0xa8] sm:$0xf] %v14164_v47  ;;  %v5066_v3 = vmax.f32 %v4090_v61, %v4091_v4  ;;  %v3305_v23 = vadd.f32 %v3304_v6, %v16244_v42  ;;  %v3427_v43 = vpop.f32.mrf.mxu1  ;;  %v4114_v14 = vmax.f32 %v3303_v11, 0.0  ;;  %v17001_v4 = vld [vmem:[%s19417_s3 + $0x24] ss:$8 sps:$4 sm:$0xff]  }
 0x1dd   :  { %5263 = vst [vmem:[#allocation3 + $0xac] sm:$0xf] %v14182_v60  ;;  %v5174_v34 = vmax.f32 %v4092_v26, %v4093_v28  ;;  %v3428_v56 = vadd.f32 %v3427_v43, %v16244_v42  ;;  %v3308_v9 = vpop.f32.mrf.mxu0  ;;  %6532 = vmatmul.mubr.bf16.vlgmr.msra.gmra.mxu0 %v14925_v50  ;;  %v4116_v19 = vmax.f32 %v3426_v58, 0.0 }
 0x1de   :  { %v14165_v22 = vpack.c.bf16 %v5066_v3, %v5066_v3  ;;  %v4115_v20 = vmax.f32 %v3305_v23, 0.0  ;;  %v3309_v31 = vadd.f32 %v3308_v9, %v16197_v35  ;;  %v3431_v33 = vpop.f32.mrf.mxu1  ;;  %6766 = vmatpush1.bf16.msra.mxu0 %v14920_v49  ;;  %6665 = vmatmul.mubr.bf16.vlgmr.msra.gmra.mxu1 %v14925_v50 }
 0x1df   :  { %v14183_v53 = vpack.c.bf16 %v5174_v34, %v5174_v34  ;;  %v4117_v59 = vmax.f32 %v3428_v56, 0.0  ;;  %v3432_v32 = vadd.f32 %v3431_v33, %v16197_v35  ;;  %6767 = vmatprep.subr.bf16.mxu0 %v14928_v18  ;;  %v3310_v52 = vpop.f32.mrf.mxu0  ;;  %13297 = vmatprep.mubr.msk.bf16.mxu0 %vm6468_vm1, %v14932_v15 }
 0x1e0   :  { %5156 = vst [vmem:[#allocation3 + $0xd8] sm:$0xf] %v14165_v22  ;;  %v5067_v5 = vmax.f32 %v4114_v14, %v4115_v20  ;;  %v3311_v1 = vadd.f32 %v3310_v52, %v16197_v35  ;;  %v3433_v37 = vpop.f32.mrf.mxu1  ;;  %13307 = vmatprep.mubr.msk.bf16.mxu1 %vm6468_vm1, %v14932_v15  ;;  %v4138_v7 = vmax.f32 %v3309_v31, 0.0  ;;  %v14937_v15 = vld [vmem:[#allocation3 + $0x194] ss:$48 sps:$4 sm:$0xff]  }
 0x1e1   :  { %5264 = vst [vmem:[#allocation3 + $0xdc] sm:$0xf] %v14183_v53  ;;  %v5175_v39 = vmax.f32 %v4116_v19, %v4117_v59  ;;  %v3434_v40 = vadd.f32 %v3433_v37, %v16197_v35  ;;  %v3312_v48 = vpop.f32.mrf.mxu0  ;;  %v4140_v45 = vmax.f32 %v3432_v32, 0.0  ;;  %v14935_v31 = vld [vmem:[#allocation3 + $0x190] ss:$48 sps:$4 sm:$0xff]  }
 0x1e2   :  { %v14166_v8 = vpack.c.bf16 %v5067_v5, %v5067_v5  ;;  %v4139_v38 = vmax.f32 %v3311_v1, 0.0  ;;  %v3313_v36 = vadd.f32 %v3312_v48, %v16212_v44  ;;  %v3435_v57 = vpop.f32.mrf.mxu1  ;;  %6768 = vmatpush1.bf16.msra.mxu0 %v14926_v30  ;;  %v14940_v52 = vld [vmem:[#allocation3 + $0x134] ss:$48 sps:$4 sm:$0xff]   ;;  %v17016_v5 = vld [vmem:[%s19417_s3 + $0x20] ss:$8 sps:$4 sm:$0xff]  }
 0x1e3   :  { %v14184_v55 = vpack.c.bf16 %v5175_v39, %v5175_v39  ;;  %v4141_v50 = vmax.f32 %v3434_v40, 0.0  ;;  %v3436_v47 = vadd.f32 %v3435_v57, %v16212_v44  ;;  %6769 = vmatprep.subr.bf16.mxu0 %v14931_v54  ;;  %v3314_v61 = vpop.f32.mrf.mxu0  ;;  %v14938_v57 = vld [vmem:[#allocation3 + $0x130] ss:$48 sps:$4 sm:$0xff]  }
 0x1e4   :  { %5157 = vst [vmem:[#allocation3 + $0x108] sm:$0xf] %v14166_v8  ;;  %v5068_v11 = vmax.f32 %v4138_v7, %v4139_v38  ;;  %v3315_v60 = vadd.f32 %v3314_v61, %v16212_v44  ;;  %v3437_v26 = vpop.f32.mrf.mxu1  ;;  %v4162_v3 = vmax.f32 %v3313_v36, 0.0  ;;  %v17023_v38 = vld [vmem:[%s19417_s3 + $0x34] ss:$8 sps:$4 sm:$0xff]  }
 0x1e5   :  { %5265 = vst [vmem:[#allocation3 + $0x10c] sm:$0xf] %v14184_v55  ;;  %v5176_v28 = vmax.f32 %v4140_v45, %v4141_v50  ;;  %v3438_v58 = vadd.f32 %v3437_v26, %v16212_v44  ;;  %v3318_v6 = vpop.f32.mrf.mxu0  ;;  %6542 = vmatmul.mubr.bf16.gmra.mxu0 %v14934_v46  ;;  %v4164_v9 = vmax.f32 %v3436_v47, 0.0 }
 0x1e6   :  { %v14167_v49 = vpack.c.bf16 %v5068_v11, %v5068_v11  ;;  %v4163_v23 = vmax.f32 %v3315_v60, 0.0  ;;  %v3319_v43 = vadd.f32 %v3318_v6, %v16174_v16  ;;  %v3441_v34 = vpop.f32.mrf.mxu1  ;;  %6770 = vmatpush1.bf16.msra.mxu0 %v14929_v21  ;;  %6675 = vmatmul.mubr.bf16.gmra.mxu1 %v14934_v46  ;;  %v14946_v11 = vld [vmem:[#allocation3 + $0xd4] ss:$48 sps:$4 sm:$0xff]  }
 0x1e7   :  { %v14185_v56 = vpack.c.bf16 %v5176_v28, %v5176_v28  ;;  %v4165_v18 = vmax.f32 %v3438_v58, 0.0  ;;  %v3442_v22 = vadd.f32 %v3441_v34, %v16174_v16  ;;  %6771 = vmatprep.subr.bf16.mxu0 %v14937_v15  ;;  %v3320_v14 = vpop.f32.mrf.mxu0  ;;  %13298 = vmatprep.mubr.msk.bf16.mxu0 %vm6468_vm1, %v17001_v4  ;;  %v14944_v34 = vld [vmem:[#allocation3 + $0xd0] ss:$48 sps:$4 sm:$0xff]  }
 0x1e8   :  { %5158 = vst [vmem:[#allocation3 + $0x138] sm:$0xf] %v14167_v49  ;;  %v5069_v20 = vmax.f32 %v4162_v3, %v4163_v23  ;;  %v3321_v33 = vadd.f32 %v3320_v14, %v16174_v16  ;;  %v3443_v53 = vpop.f32.mrf.mxu1  ;;  %13308 = vmatprep.mubr.msk.bf16.mxu1 %vm6468_vm1, %v17001_v4  ;;  %v4186_v1 = vmax.f32 %v3319_v43, 0.0 }
 0x1e9   :  { %5266 = vst [vmem:[#allocation3 + $0x13c] sm:$0xf] %v14185_v56  ;;  %v5177_v19 = vmax.f32 %v4164_v9, %v4165_v18  ;;  %v3444_v59 = vadd.f32 %v3443_v53, %v16174_v16  ;;  %v3322_v32 = vpop.f32.mrf.mxu0  ;;  %v4188_v54 = vmax.f32 %v3442_v22, 0.0 }
 0x1ea   :  { %v14168_v30 = vpack.c.bf16 %v5069_v20, %v5069_v20  ;;  %v4187_v37 = vmax.f32 %v3321_v33, 0.0  ;;  %v3323_v39 = vadd.f32 %v3322_v32, %v16192_v0  ;;  %v3445_v40 = vpop.f32.mrf.mxu1  ;;  %6772 = vmatpush1.bf16.msra.mxu0 %v14935_v31  ;;  %v14949_v20 = vld [vmem:[#allocation3 + $0x74] ss:$48 sps:$4 sm:$0xff]   ;;  %v17040_v31 = vld [vmem:[%s19417_s3 + $0x30] ss:$8 sps:$4 sm:$0xff]  }
 0x1eb   :  { %v14186_v48 = vpack.c.bf16 %v5177_v19, %v5177_v19  ;;  %v4189_v46 = vmax.f32 %v3444_v59, 0.0  ;;  %v3446_v8 = vadd.f32 %v3445_v40, %v16192_v0  ;;  %6773 = vmatprep.subr.bf16.mxu0 %v14940_v52  ;;  %v3324_v7 = vpop.f32.mrf.mxu0  ;;  %v17047_v40 = vld [vmem:[%s19417_s3 + $0x44] ss:$8 sps:$4 sm:$0xff]  }
 0x1ec   :  { %5159 = vst [vmem:[#allocation3 + $0x168] sm:$0xf] %v14168_v30  ;;  %v5070_v36 = vmax.f32 %v4186_v1, %v4187_v37  ;;  %v3325_v55 = vadd.f32 %v3324_v7, %v16192_v0  ;;  %v3447_v45 = vpop.f32.mrf.mxu1  ;;  %v4210_v60 = vmax.f32 %v3323_v39, 0.0 }
 0x1ed   :  { %5267 = vst [vmem:[#allocation3 + $0x16c] sm:$0xf] %v14186_v48  ;;  %v5178_v50 = vmax.f32 %v4188_v54, %v4189_v46  ;;  %v3448_v47 = vadd.f32 %v3447_v45, %v16192_v0  ;;  %v3328_v61 = vpop.f32.mrf.mxu0  ;;  %6552 = vmatmul.mubr.bf16.gmra.mxu0 %v17016_v5  ;;  %v4212_v15 = vmax.f32 %v3446_v8, 0.0  ;;  %v14947_v54 = vld [vmem:[#allocation3 + $0x70] ss:$48 sps:$4 sm:$0xff]  }
 0x1ee   :  { %v14169_v21 = vpack.c.bf16 %v5070_v36, %v5070_v36  ;;  %v4211_v26 = vmax.f32 %v3325_v55, 0.0  ;;  %v3329_v28 = vadd.f32 %v3328_v61, %v16160_v25  ;;  %v3451_v58 = vpop.f32.mrf.mxu1  ;;  %6774 = vmatpush1.bf16.msra.mxu0 %v14938_v57  ;;  %6685 = vmatmul.mubr.bf16.gmra.mxu1 %v17016_v5  ;;  %v14955_v55 = vld [vmem:[#allocation3 + $0x14] ss:$48 sps:$4 sm:$0xff]  }
 0x1ef   :  { %v14187_v6 = vpack.c.bf16 %v5178_v50, %v5178_v50  ;;  %v4213_v49 = vmax.f32 %v3448_v47, 0.0  ;;  %v3452_v3 = vadd.f32 %v3451_v58, %v16160_v25  ;;  %6775 = vmatprep.subr.bf16.mxu0 %v14946_v11  ;;  %v3330_v23 = vpop.f32.mrf.mxu0  ;;  %13299 = vmatprep.mubr.msk.bf16.mxu0 %vm6468_vm1, %v17023_v38 }
 0x1f0   :  { %5160 = vst [vmem:[#allocation3 + $0x198] sm:$0xf] %v14169_v21  ;;  %v5071_v43 = vmax.f32 %v4210_v60, %v4211_v26  ;;  %v3331_v56 = vadd.f32 %v3330_v23, %v16160_v25  ;;  %v3453_v9 = vpop.f32.mrf.mxu1  ;;  %13309 = vmatprep.mubr.msk.bf16.mxu1 %vm6468_vm1, %v17023_v38  ;;  %v4234_v53 = vmax.f32 %v3329_v28, 0.0 }
 0x1f1   :  { %5268 = vst [vmem:[#allocation3 + $0x19c] sm:$0xf] %v14187_v6  ;;  %v5179_v18 = vmax.f32 %v4212_v15, %v4213_v49  ;;  %v3454_v22 = vadd.f32 %v3453_v9, %v16160_v25  ;;  %v3332_v14 = vpop.f32.mrf.mxu0  ;;  %v4236_v30 = vmax.f32 %v3452_v3, 0.0  ;;  %v14953_v15 = vld [vmem:[#allocation3 + $0x10] ss:$48 sps:$4 sm:$0xff]  }
 0x1f2   :  { %v14170_v33 = vpack.c.bf16 %v5071_v43, %v5071_v43  ;;  %v4235_v19 = vmax.f32 %v3331_v56, 0.0  ;;  %v3333_v59 = vadd.f32 %v3332_v14, %v16171_v27  ;;  %v3455_v32 = vpop.f32.mrf.mxu1  ;;  %6776 = vmatpush1.bf16.msra.mxu0 %v14944_v34  ;;  %v14958_v56 = vld [vmem:[#allocation3 + $0x314] ss:$48 sps:$4 sm:$0xff]   ;;  %v17064_v9 = vld [vmem:[%s19417_s3 + $0x40] ss:$8 sps:$4 sm:$0xff]  }
 0x1f3   :  { %v14188_v52 = vpack.c.bf16 %v5179_v18, %v5179_v18  ;;  %v4237_v1 = vmax.f32 %v3454_v22, 0.0  ;;  %v3456_v37 = vadd.f32 %v3455_v32, %v16171_v27  ;;  %6777 = vmatprep.subr.bf16.mxu0 %v14949_v20  ;;  %v3334_v39 = vpop.f32.mrf.mxu0 }
 0x1f4   :  { %5161 = vst [vmem:[#allocation3 + $0x1c8] sm:$0xf] %v14170_v33  ;;  %v5072_v48 = vmax.f32 %v4234_v53, %v4235_v19  ;;  %v3335_v46 = vadd.f32 %v3334_v39, %v16171_v27  ;;  %v3457_v8 = vpop.f32.mrf.mxu1  ;;  %v4258_v50 = vmax.f32 %v3333_v59, 0.0 }
 0x1f5   :  { %5269 = vst [vmem:[#allocation3 + $0x1cc] sm:$0xf] %v14188_v52  ;;  %v5180_v7 = vmax.f32 %v4236_v30, %v4237_v1  ;;  %v3458_v36 = vadd.f32 %v3457_v8, %v16171_v27  ;;  %v3338_v57 = vpop.f32.mrf.mxu0  ;;  %6562 = vmatmul.mubr.bf16.gmra.mxu0 %v17040_v31  ;;  %v4260_v60 = vmax.f32 %v3456_v37, 0.0  ;;  %v17071_v30 = vld [vmem:[%s19417_s3 + $0x54] ss:$8 sps:$4 sm:$0xff]  }
 0x1f6   :  { %v14171_v45 = vpack.c.bf16 %v5072_v48, %v5072_v48  ;;  %v4259_v47 = vmax.f32 %v3335_v46, 0.0  ;;  %v3339_v61 = vadd.f32 %v3338_v57, %v16140_v2  ;;  %v3461_v11 = vpop.f32.mrf.mxu1  ;;  %6778 = vmatpush1.bf16.msra.mxu0 %v14947_v54  ;;  %6695 = vmatmul.mubr.bf16.gmra.mxu1 %v17040_v31  ;;  %v14956_v37 = vld [vmem:[#allocation3 + $0x310] ss:$48 sps:$4 sm:$0xff]  }
 0x1f7   :  { %v14189_v21 = vpack.c.bf16 %v5180_v7, %v5180_v7  ;;  %v4261_v26 = vmax.f32 %v3458_v36, 0.0  ;;  %v3462_v28 = vadd.f32 %v3461_v11, %v16140_v2  ;;  %6779 = vmatprep.subr.bf16.mxu0 %v14955_v55  ;;  %v3340_v58 = vpop.f32.mrf.mxu0  ;;  %13300 = vmatprep.mubr.msk.bf16.mxu0 %vm6468_vm1, %v17047_v40 }
 0x1f8   :  { %5162 = vst [vmem:[#allocation3 + $0x1f8] sm:$0xf] %v14171_v45  ;;  %v5073_v6 = vmax.f32 %v4258_v50, %v4259_v47  ;;  %v3341_v49 = vadd.f32 %v3340_v58, %v16140_v2  ;;  %v3463_v3 = vpop.f32.mrf.mxu1  ;;  %13310 = vmatprep.mubr.msk.bf16.mxu1 %vm6468_vm1, %v17047_v40  ;;  %v4282_v22 = vmax.f32 %v3339_v61, 0.0 }
 0x1f9   :  { %5270 = vst [vmem:[#allocation3 + $0x1fc] sm:$0xf] %v14189_v21  ;;  %v5181_v23 = vmax.f32 %v4260_v60, %v4261_v26  ;;  %v3464_v43 = vadd.f32 %v3463_v3, %v16140_v2  ;;  %v3342_v34 = vpop.f32.mrf.mxu0  ;;  %v4284_v19 = vmax.f32 %v3462_v28, 0.0 }
 0x1fa   :  { %v14172_v18 = vpack.c.bf16 %v5073_v6, %v5073_v6  ;;  %v4283_v14 = vmax.f32 %v3341_v49, 0.0  ;;  %v3343_v20 = vadd.f32 %v3342_v34, %v16154_v13  ;;  %v3465_v33 = vpop.f32.mrf.mxu1  ;;  %6780 = vmatpush1.bf16.msra.mxu0 %v14953_v15  ;;  %v17088_v49 = vld [vmem:[%s19417_s3 + $0x50] ss:$8 sps:$4 sm:$0xff]  }
 0x1fb   :  { %v14190_v53 = vpack.c.bf16 %v5181_v23, %v5181_v23  ;;  %v4285_v59 = vmax.f32 %v3464_v43, 0.0  ;;  %v3466_v32 = vadd.f32 %v3465_v33, %v16154_v13  ;;  %6795 = vmatprep.subr.bf16.mxu0 %v14958_v56  ;;  %v3344_v52 = vpop.f32.mrf.mxu0 }
 0x1fc   :  { %5163 = vst [vmem:[#allocation3 + $0x228] sm:$0xf] %v14172_v18  ;;  %v5074_v1 = vmax.f32 %v4282_v22, %v4283_v14  ;;  %v3345_v39 = vadd.f32 %v3344_v52, %v16154_v13  ;;  %v3467_v48 = vpop.f32.mrf.mxu1  ;;  %v4306_v36 = vmax.f32 %v3343_v20, 0.0  ;;  %v17094_v18 = vld [vmem:[%s19417_s3 + $0x64] ss:$8 sps:$4 sm:$0xff]  }
 0x1fd   :  { %5271 = vst [vmem:[#allocation3 + $0x22c] sm:$0xf] %v14190_v53  ;;  %v5182_v54 = vmax.f32 %v4284_v19, %v4285_v59  ;;  %v3468_v46 = vadd.f32 %v3467_v48, %v16154_v13  ;;  %v3348_v8 = vpop.f32.mrf.mxu0  ;;  %6572 = vmatmul.mubr.bf16.gmra.mxu0 %v17064_v9  ;;  %v4308_v47 = vmax.f32 %v3466_v32, 0.0 }
 0x1fe   :  { %v14173_v7 = vpack.c.bf16 %v5074_v1, %v5074_v1  ;;  %v4307_v57 = vmax.f32 %v3345_v39, 0.0  ;;  %v3349_v55 = vadd.f32 %v3348_v8, %v16133_v63  ;;  %v3471_v45 = vpop.f32.mrf.mxu1  ;;  %6796 = vmatpush2.bf16.msra.mxu0 %v14956_v37  ;;  %6705 = vmatmul.mubr.bf16.gmra.mxu1 %v17064_v9 }
 0x1ff   :  { %v14191_v50 = vpack.c.bf16 %v5182_v54, %v5182_v54  ;;  %v4309_v61 = vmax.f32 %v3468_v46, 0.0  ;;  %v3472_v11 = vadd.f32 %v3471_v45, %v16133_v63  ;;  %v3350_v21 = vpop.f32.mrf.mxu0  ;;  %13301 = vmatprep.mubr.msk.bf16.mxu0 %vm6468_vm1, %v17071_v30  ;;  %13311 = vmatprep.mubr.msk.bf16.mxu1 %vm6468_vm1, %v17071_v30 }
 0x200   :  { %5164 = vst [vmem:[#allocation3 + $0x258] sm:$0xf] %v14173_v7  ;;  %v5075_v60 = vmax.f32 %v4306_v36, %v4307_v57  ;;  %v3351_v26 = vadd.f32 %v3350_v21, %v16133_v63  ;;  %v3473_v28 = vpop.f32.mrf.mxu1  ;;  %v4330_v23 = vmax.f32 %v3349_v55, 0.0 }
 0x201   :  { %5272 = vst [vmem:[#allocation3 + $0x25c] sm:$0xf] %v14191_v50  ;;  %v5183_v58 = vmax.f32 %v4308_v47, %v4309_v61  ;;  %v3474_v6 = vadd.f32 %v3473_v28, %v16133_v63  ;;  %v3352_v15 = vpop.f32.mrf.mxu0  ;;  %v4332_v14 = vmax.f32 %v3472_v11, 0.0 }
 0x202   :  { %v14174_v3 = vpack.c.bf16 %v5075_v60, %v5075_v60  ;;  %v4331_v43 = vmax.f32 %v3351_v26, 0.0  ;;  %v3353_v34 = vadd.f32 %v3352_v15, %v16148_v24  ;;  %v3475_v56 = vpop.f32.mrf.mxu1  ;;  %v17112_v26 = vld [vmem:[%s19417_s3 + $0x60] ss:$8 sps:$4 sm:$0xff]  }
 0x203   :  { %v14192_v22 = vpack.c.bf16 %v5183_v58, %v5183_v58  ;;  %v4333_v20 = vmax.f32 %v3474_v6, 0.0  ;;  %v3476_v33 = vadd.f32 %v3475_v56, %v16148_v24  ;;  %v3354_v53 = vpop.f32.mrf.mxu0 }
 0x204   :  { %5165 = vst [vmem:[#allocation3 + $0x288] sm:$0xf] %v14174_v3  ;;  %v5076_v19 = vmax.f32 %v4330_v23, %v4331_v43  ;;  %v3355_v59 = vadd.f32 %v3354_v53, %v16148_v24  ;;  %v3477_v32 = vpop.f32.mrf.mxu1  ;;  %v4354_v48 = vmax.f32 %v3353_v34, 0.0  ;;  %v17118_v23 = vld [vmem:[%s19417_s3 + $0x74] ss:$8 sps:$4 sm:$0xff]  }
 0x205   :  { %5273 = vst [vmem:[#allocation3 + $0x28c] sm:$0xf] %v14192_v22  ;;  %v5184_v52 = vmax.f32 %v4332_v14, %v4333_v20  ;;  %v3478_v1 = vadd.f32 %v3477_v32, %v16148_v24  ;;  %v3358_v37 = vpop.f32.mrf.mxu0  ;;  %6582 = vmatmul.mubr.bf16.gmra.mxu0 %v17088_v49  ;;  %v4356_v36 = vmax.f32 %v3476_v33, 0.0 }
 0x206   :  { %v14175_v39 = vpack.c.bf16 %v5076_v19, %v5076_v19  ;;  %v4355_v54 = vmax.f32 %v3355_v59, 0.0  ;;  %v3359_v46 = vadd.f32 %v3358_v37, %v16529_v10  ;;  %v3481_v8 = vpop.f32.mrf.mxu1  ;;  %6715 = vmatmul.mubr.bf16.gmra.mxu1 %v17088_v49  ;;  %13302 = vmatprep.mubr.msk.bf16.mxu0 %vm6468_vm1, %v17094_v18 }
 0x207   :  { %v14193_v7 = vpack.c.bf16 %v5184_v52, %v5184_v52  ;;  %v4357_v57 = vmax.f32 %v3478_v1, 0.0  ;;  %v3482_v55 = vadd.f32 %v3481_v8, %v16529_v10  ;;  %v3360_v45 = vpop.f32.mrf.mxu0  ;;  %13312 = vmatprep.mubr.msk.bf16.mxu1 %vm6468_vm1, %v17094_v18 }
 0x208   :  { %5166 = vst [vmem:[#allocation3 + $0x2b8] sm:$0xf] %v14175_v39  ;;  %v5077_v50 = vmax.f32 %v4354_v48, %v4355_v54  ;;  %v3361_v47 = vadd.f32 %v3360_v45, %v16529_v10  ;;  %v3483_v61 = vpop.f32.mrf.mxu1  ;;  %v4378_v58 = vmax.f32 %v3359_v46, 0.0 }
 0x209   :  { %5274 = vst [vmem:[#allocation3 + $0x2bc] sm:$0xf] %v14193_v7  ;;  %v5185_v11 = vmax.f32 %v4356_v36, %v4357_v57  ;;  %v3484_v21 = vadd.f32 %v3483_v61, %v16529_v10  ;;  %v3362_v60 = vpop.f32.mrf.mxu0  ;;  %v4380_v34 = vmax.f32 %v3482_v55, 0.0 }
 0x20a   :  { %v14176_v28 = vpack.c.bf16 %v5077_v50, %v5077_v50  ;;  %v4379_v6 = vmax.f32 %v3361_v47, 0.0  ;;  %v3363_v15 = vadd.f32 %v3362_v60, %v19499_v62  ;;  %v3485_v3 = vpop.f32.mrf.mxu1 }
 0x20b   :  { %v14194_v43 = vpack.c.bf16 %v5185_v11, %v5185_v11  ;;  %v4381_v56 = vmax.f32 %v3484_v21, 0.0  ;;  %v3486_v22 = vadd.f32 %v3485_v3, %v19499_v62  ;;  %v3364_v14 = vpop.f32.mrf.mxu0  ;;  %v17136_v11 = vld [vmem:[%s19417_s3 + $0x70] ss:$8 sps:$4 sm:$0xff]  }
 0x20c   :  { %5167 = vst [vmem:[#allocation3 + $0x2e8] sm:$0xf] %v14176_v28  ;;  %v5078_v20 = vmax.f32 %v4378_v58, %v4379_v6  ;;  %v3365_v33 = vadd.f32 %v3364_v14, %v19499_v62  ;;  %v3487_v53 = vpop.f32.mrf.mxu1  ;;  %v4402_v1 = vmax.f32 %v3363_v15, 0.0 }
 0x20d   :  { %5275 = vst [vmem:[#allocation3 + $0x2ec] sm:$0xf] %v14194_v43  ;;  %v5186_v19 = vmax.f32 %v4380_v34, %v4381_v56  ;;  %v3488_v59 = vadd.f32 %v3487_v53, %v19499_v62  ;;  %v3524_v32 = vpop.f32.mrf.mxu0  ;;  %6592 = vmatmul.mubr.bf16.gmra.mxu0 %v17112_v26  ;;  %v4404_v46 = vmax.f32 %v3486_v22, 0.0  ;;  %v17143_v22 = vld [vmem:[%s19417_s3 + $0x84] ss:$8 sps:$4 sm:$0xff]  }
 0x20e   :  { %v14177_v52 = vpack.c.bf16 %v5078_v20, %v5078_v20  ;;  %v4403_v37 = vmax.f32 %v3365_v33, 0.0  ;;  %v3525_v39 = vadd.f32 %v3524_v32, %v16260_v17  ;;  %v3647_v48 = vpop.f32.mrf.mxu1  ;;  %6725 = vmatmul.mubr.bf16.gmra.mxu1 %v17112_v26  ;;  %13303 = vmatprep.mubr.msk.bf16.mxu0 %vm6468_vm1, %v17118_v23 }
 0x20f   :  { %v14195_v54 = vpack.c.bf16 %v5186_v19, %v5186_v19  ;;  %v4405_v8 = vmax.f32 %v3488_v59, 0.0  ;;  %v3648_v7 = vadd.f32 %v3647_v48, %v16260_v17  ;;  %v3526_v36 = vpop.f32.mrf.mxu0  ;;  %13313 = vmatprep.mubr.msk.bf16.mxu1 %vm6468_vm1, %v17118_v23 }
 0x210   :  { %5168 = vst [vmem:[#allocation3 + $0x318] sm:$0xf] %v14177_v52  ;;  %v5079_v57 = vmax.f32 %v4402_v1, %v4403_v37  ;;  %v3527_v55 = vadd.f32 %v3526_v36, %v16260_v17  ;;  %v3649_v45 = vpop.f32.mrf.mxu1  ;;  %v3998_v60 = vmax.f32 %v3525_v39, 0.0 }
 0x211   :  { %5276 = vst [vmem:[#allocation3 + $0x31c] sm:$0xf] %v14195_v54  ;;  %v5187_v50 = vmax.f32 %v4404_v46, %v4405_v8  ;;  %v3650_v47 = vadd.f32 %v3649_v45, %v16260_v17  ;;  %v3528_v61 = vpop.f32.mrf.mxu0  ;;  %v4000_v3 = vmax.f32 %v3648_v7, 0.0  ;;  %v14976_v46 = vld [vmem:[#allocation3 + $0x25c] ss:$48 sps:$4 sm:$0xff]  }
 0x212   :  { %v14178_v21 = vpack.c.bf16 %v5079_v57, %v5079_v57  ;;  %v3999_v28 = vmax.f32 %v3527_v55, 0.0  ;;  %v3529_v58 = vadd.f32 %v3528_v61, %v19501_v12  ;;  %v3651_v6 = vpop.f32.mrf.mxu1 }
 0x213   :  { %v14196_v15 = vpack.c.bf16 %v5187_v50, %v5187_v50  ;;  %v4001_v43 = vmax.f32 %v3650_v47, 0.0  ;;  %v3652_v34 = vadd.f32 %v3651_v6, %v19501_v12  ;;  %v3530_v56 = vpop.f32.mrf.mxu0  ;;  %v14971_v53 = vld [vmem:[#allocation3 + $0x2b8] ss:$48 sps:$4 sm:$0xff]  }
 0x214   :  { %5169 = vst [vmem:[#allocation3 + $0x348] sm:$0xf] %v14178_v21  ;;  %v5278_v14 = vmax.f32 %v3998_v60, %v3999_v28  ;;  %v3531_v20 = vadd.f32 %v3530_v56, %v19501_v12  ;;  %v3653_v33 = vpop.f32.mrf.mxu1  ;;  %v14973_v19 = vld [vmem:[#allocation3 + $0x2bc] ss:$48 sps:$4 sm:$0xff]   ;;  %v4022_v37 = vmax.f32 %v3529_v58, 0.0 }
 0x215   :  { %5277 = vst [vmem:[#allocation3 + $0x34c] sm:$0xf] %v14196_v15  ;;  %v5386_v59 = vmax.f32 %v4000_v3, %v4001_v43  ;;  %v3654_v32 = vadd.f32 %v3653_v33, %v19501_v12  ;;  %v3534_v52 = vpop.f32.mrf.mxu0  ;;  %6602 = vmatmul.mubr.bf16.gmra.mxu0 %v17136_v11  ;;  %6898 = vmatprep.subr.bf16.mxu1 %v14973_v19  ;;  %v4024_v7 = vmax.f32 %v3652_v34, 0.0  ;;  %v14974_v60 = vld [vmem:[#allocation3 + $0x258] ss:$48 sps:$4 sm:$0xff]  }
 0x216   :  { %v14197_v1 = vpack.c.bf16 %v5278_v14, %v5278_v14  ;;  %v4023_v39 = vmax.f32 %v3531_v20, 0.0  ;;  %v3535_v48 = vadd.f32 %v3534_v52, %v16250_v41  ;;  %v3657_v54 = vpop.f32.mrf.mxu1  ;;  %6735 = vmatmul.mubr.bf16.gmra.mxu1 %v17136_v11  ;;  %13304 = vmatprep.mubr.msk.bf16.mxu0 %vm6468_vm1, %v17143_v22  ;;  %v17160_v58 = vld [vmem:[%s19417_s3 + $0x80] ss:$8 sps:$4 sm:$0xff]   ;;  %v14981_v56 = vld [vmem:[#allocation3 + $0x1fc] ss:$48 sps:$4 sm:$0xff]  }
 0x217   :  { %v14215_v8 = vpack.c.bf16 %v5386_v59, %v5386_v59  ;;  %v4025_v36 = vmax.f32 %v3654_v32, 0.0  ;;  %v3658_v57 = vadd.f32 %v3657_v54, %v16250_v41  ;;  %v3536_v55 = vpop.f32.mrf.mxu0  ;;  %6899 = vmatpush1.bf16.msra.mxu1 %v14971_v53  ;;  %13314 = vmatprep.mubr.msk.bf16.mxu1 %vm6468_vm1, %v17143_v22  ;;  %v17166_v14 = vld [vmem:[%s19417_s3 + $0x94] ss:$8 sps:$4 sm:$0xff]  }
 0x218   :  { %5368 = vst [vmem:[#allocation3 + $0x20] sm:$0xf] %v14197_v1  ;;  %v5279_v45 = vmax.f32 %v4022_v37, %v4023_v39  ;;  %v3537_v50 = vadd.f32 %v3536_v55, %v16250_v41  ;;  %v3659_v47 = vpop.f32.mrf.mxu1  ;;  %6900 = vmatprep.subr.bf16.mxu1 %v14976_v46  ;;  %v4046_v15 = vmax.f32 %v3535_v48, 0.0  ;;  %v14979_v48 = vld [vmem:[#allocation3 + $0x1f8] ss:$48 sps:$4 sm:$0xff]  }
 0x219   :  { %5476 = vst [vmem:[#allocation3 + $0x24] sm:$0xf] %v14215_v8  ;;  %v5387_v61 = vmax.f32 %v4024_v7, %v4025_v36  ;;  %v3660_v21 = vadd.f32 %v3659_v47, %v16250_v41  ;;  %v3538_v28 = vpop.f32.mrf.mxu0  ;;  %v4048_v33 = vmax.f32 %v3658_v57, 0.0  ;;  %v14985_v55 = vld [vmem:[#allocation3 + $0x19c] ss:$48 sps:$4 sm:$0xff]  }
 0x21a   :  { %v14198_v6 = vpack.c.bf16 %v5279_v45, %v5279_v45  ;;  %v4047_v3 = vmax.f32 %v3537_v50, 0.0  ;;  %v3539_v43 = vadd.f32 %v3538_v28, %v19504_v51  ;;  %v3661_v34 = vpop.f32.mrf.mxu1 }
 0x21b   :  { %v14216_v20 = vpack.c.bf16 %v5387_v61, %v5387_v61  ;;  %v4049_v53 = vmax.f32 %v3660_v21, 0.0  ;;  %v3662_v19 = vadd.f32 %v3661_v34, %v19504_v51  ;;  %v3540_v59 = vpop.f32.mrf.mxu0  ;;  %6901 = vmatpush1.bf16.msra.mxu1 %v14974_v60 }
 0x21c   :  { %5369 = vst [vmem:[#allocation3 + $0x50] sm:$0xf] %v14198_v6  ;;  %v5280_v32 = vmax.f32 %v4046_v15, %v4047_v3  ;;  %v3541_v52 = vadd.f32 %v3540_v59, %v19504_v51  ;;  %v3663_v1 = vpop.f32.mrf.mxu1  ;;  %6902 = vmatprep.subr.bf16.mxu1 %v14981_v56  ;;  %v4070_v8 = vmax.f32 %v3539_v43, 0.0  ;;  %v14983_v43 = vld [vmem:[#allocation3 + $0x198] ss:$48 sps:$4 sm:$0xff]  }
 0x21d   :  { %5477 = vst [vmem:[#allocation3 + $0x54] sm:$0xf] %v14216_v20  ;;  %v5388_v37 = vmax.f32 %v4048_v33, %v4049_v53  ;;  %v3664_v39 = vadd.f32 %v3663_v1, %v19504_v51  ;;  %v3544_v54 = vpop.f32.mrf.mxu0  ;;  %6612 = vmatmul.mubr.bf16.gmra.mxu0 %v17160_v58  ;;  %v4072_v50 = vmax.f32 %v3662_v19, 0.0  ;;  %v17184_v56 = vld [vmem:[%s19417_s3 + $0x90] ss:$8 sps:$4 sm:$0xff]  }
 0x21e   :  { %v14199_v46 = vpack.c.bf16 %v5280_v32, %v5280_v32  ;;  %v4071_v7 = vmax.f32 %v3541_v52, 0.0  ;;  %v3545_v36 = vadd.f32 %v3544_v54, %v19506_v29  ;;  %v3667_v57 = vpop.f32.mrf.mxu1  ;;  %13305 = vmatprep.mubr.msk.bf16.mxu0 %vm6468_vm1, %v17166_v14  ;;  %6745 = vmatmul.mubr.bf16.gmra.mxu1 %v17160_v58  ;;  %v14990_v32 = vld [vmem:[#allocation3 + $0x13c] ss:$48 sps:$4 sm:$0xff]  }
 0x21f   :  { %v14217_v45 = vpack.c.bf16 %v5388_v37, %v5388_v37  ;;  %v4073_v47 = vmax.f32 %v3664_v39, 0.0  ;;  %v3668_v61 = vadd.f32 %v3667_v57, %v19506_v29  ;;  %v3546_v21 = vpop.f32.mrf.mxu0  ;;  %6903 = vmatpush1.bf16.msra.mxu1 %v14979_v48  ;;  %13315 = vmatprep.mubr.msk.bf16.mxu1 %vm6468_vm1, %v17166_v14  ;;  %v14988_v57 = vld [vmem:[#allocation3 + $0x138] ss:$48 sps:$4 sm:$0xff]  }
 0x220   :  { %5370 = vst [vmem:[#allocation3 + $0x80] sm:$0xf] %v14199_v46  ;;  %v5281_v60 = vmax.f32 %v4070_v8, %v4071_v7  ;;  %v3547_v28 = vadd.f32 %v3546_v21, %v19506_v29  ;;  %v3669_v6 = vpop.f32.mrf.mxu1  ;;  %6904 = vmatprep.subr.bf16.mxu1 %v14985_v55  ;;  %v4094_v33 = vmax.f32 %v3545_v36, 0.0 }
 0x221   :  { %5478 = vst [vmem:[#allocation3 + $0x84] sm:$0xf] %v14217_v45  ;;  %v5389_v15 = vmax.f32 %v4072_v50, %v4073_v47  ;;  %v3670_v3 = vadd.f32 %v3669_v6, %v19506_v29  ;;  %v3548_v34 = vpop.f32.mrf.mxu0  ;;  %v4096_v1 = vmax.f32 %v3668_v61, 0.0 }
 0x222   :  { %v14200_v20 = vpack.c.bf16 %v5281_v60, %v5281_v60  ;;  %v4095_v53 = vmax.f32 %v3547_v28, 0.0  ;;  %v3549_v19 = vadd.f32 %v3548_v34, %v16244_v42  ;;  %v3671_v59 = vpop.f32.mrf.mxu1  ;;  %v14994_v60 = vld [vmem:[#allocation3 + $0xdc] ss:$48 sps:$4 sm:$0xff]  }
 0x223   :  { %v14218_v52 = vpack.c.bf16 %v5389_v15, %v5389_v15  ;;  %v4097_v37 = vmax.f32 %v3670_v3, 0.0  ;;  %v3672_v39 = vadd.f32 %v3671_v59, %v16244_v42  ;;  %v3550_v48 = vpop.f32.mrf.mxu0  ;;  %6905 = vmatpush1.bf16.msra.mxu1 %v14983_v43  ;;  %v17195_v28 = vld [vmem:[%s19417_s3 + $0x4] ss:$8 sps:$4 sm:$0xff]  }
 0x224   :  { %5371 = vst [vmem:[#allocation3 + $0xb0] sm:$0xf] %v14200_v20  ;;  %v5282_v54 = vmax.f32 %v4094_v33, %v4095_v53  ;;  %v3551_v46 = vadd.f32 %v3550_v48, %v16244_v42  ;;  %v3673_v8 = vpop.f32.mrf.mxu1  ;;  %6906 = vmatprep.subr.bf16.mxu1 %v14990_v32  ;;  %v4118_v50 = vmax.f32 %v3549_v19, 0.0  ;;  %v14992_v32 = vld [vmem:[#allocation3 + $0xd8] ss:$48 sps:$4 sm:$0xff]  }
 0x225   :  { %5479 = vst [vmem:[#allocation3 + $0xb4] sm:$0xf] %v14218_v52  ;;  %v5390_v7 = vmax.f32 %v4096_v1, %v4097_v37  ;;  %v3674_v36 = vadd.f32 %v3673_v8, %v16244_v42  ;;  %v3554_v55 = vpop.f32.mrf.mxu0  ;;  %6622 = vmatmul.mubr.bf16.gmra.mxu0 %v17184_v56  ;;  %v4120_v15 = vmax.f32 %v3672_v39, 0.0 }
 0x226   :  { %v14201_v45 = vpack.c.bf16 %v5282_v54, %v5282_v54  ;;  %v4119_v47 = vmax.f32 %v3551_v46, 0.0  ;;  %v3555_v61 = vadd.f32 %v3554_v55, %v16197_v35  ;;  %v3677_v21 = vpop.f32.mrf.mxu1  ;;  %13316 = vmatprep.mubr.msk.bf16.mxu0 %vm6468_vm1, %v17195_v28  ;;  %6755 = vmatmul.mubr.bf16.gmra.mxu1 %v17184_v56  ;;  %v14997_v46 = vld [vmem:[#allocation3 + $0x7c] ss:$48 sps:$4 sm:$0xff]  }
 0x227   :  { %v14219_v6 = vpack.c.bf16 %v5390_v7, %v5390_v7  ;;  %v4121_v3 = vmax.f32 %v3674_v36, 0.0  ;;  %v3678_v43 = vadd.f32 %v3677_v21, %v16197_v35  ;;  %v3556_v34 = vpop.f32.mrf.mxu0  ;;  %6907 = vmatpush1.bf16.msra.mxu1 %v14988_v57  ;;  %13326 = vmatprep.mubr.msk.bf16.mxu1 %vm6468_vm1, %v17195_v28 }
 0x228   :  { %5372 = vst [vmem:[#allocation3 + $0xe0] sm:$0xf] %v14201_v45  ;;  %v5283_v20 = vmax.f32 %v4118_v50, %v4119_v47  ;;  %v3557_v33 = vadd.f32 %v3556_v34, %v16197_v35  ;;  %v3679_v53 = vpop.f32.mrf.mxu1  ;;  %6908 = vmatprep.subr.bf16.mxu1 %v14994_v60  ;;  %v4142_v37 = vmax.f32 %v3555_v61, 0.0  ;;  %v14995_v60 = vld [vmem:[#allocation3 + $0x78] ss:$48 sps:$4 sm:$0xff]  }
 0x229   :  { %5480 = vst [vmem:[#allocation3 + $0xe4] sm:$0xf] %v14219_v6  ;;  %v5391_v19 = vmax.f32 %v4120_v15, %v4121_v3  ;;  %v3680_v59 = vadd.f32 %v3679_v53, %v16197_v35  ;;  %v3558_v52 = vpop.f32.mrf.mxu0  ;;  %v4144_v7 = vmax.f32 %v3678_v43, 0.0  ;;  %v17212_v15 = vld [vmem:[%s19417_s3] ss:$8 sps:$4 sm:$0xff]  }
 0x22a   :  { %v14202_v1 = vpack.c.bf16 %v5283_v20, %v5283_v20  ;;  %v4143_v39 = vmax.f32 %v3557_v33, 0.0  ;;  %v3559_v48 = vadd.f32 %v3558_v52, %v16212_v44  ;;  %v3681_v54 = vpop.f32.mrf.mxu1  ;;  %v15000_v53 = vld [vmem:[#allocation3 + $0x1c] ss:$48 sps:$4 sm:$0xff]  }
 0x22b   :  { %v14220_v8 = vpack.c.bf16 %v5391_v19, %v5391_v19  ;;  %v4145_v36 = vmax.f32 %v3680_v59, 0.0  ;;  %v3682_v57 = vadd.f32 %v3681_v54, %v16212_v44  ;;  %v3560_v55 = vpop.f32.mrf.mxu0  ;;  %6909 = vmatpush1.bf16.msra.mxu1 %v14992_v32  ;;  %v17219_v19 = vld [vmem:[%s19417_s3 + $0x14] ss:$8 sps:$4 sm:$0xff]  }
 0x22c   :  { %5373 = vst [vmem:[#allocation3 + $0x110] sm:$0xf] %v14202_v1  ;;  %v5284_v45 = vmax.f32 %v4142_v37, %v4143_v39  ;;  %v3561_v50 = vadd.f32 %v3560_v55, %v16212_v44  ;;  %v3683_v47 = vpop.f32.mrf.mxu1  ;;  %6910 = vmatprep.subr.bf16.mxu1 %v14997_v46  ;;  %v4166_v43 = vmax.f32 %v3559_v48, 0.0 }
 0x22d   :  { %5481 = vst [vmem:[#allocation3 + $0x114] sm:$0xf] %v14220_v8  ;;  %v5392_v61 = vmax.f32 %v4144_v7, %v4145_v36  ;;  %v3684_v21 = vadd.f32 %v3683_v47, %v16212_v44  ;;  %v3564_v6 = vpop.f32.mrf.mxu0  ;;  %6798 = vmatmul.mubr.bf16.vlgmr.msra.gmra.mxu0 %v17212_v15  ;;  %v4168_v32 = vmax.f32 %v3682_v57, 0.0  ;;  %v14998_v7 = vld [vmem:[#allocation3 + $0x18] ss:$48 sps:$4 sm:$0xff]  }
 0x22e   :  { %v14203_v3 = vpack.c.bf16 %v5284_v45, %v5284_v45  ;;  %v4167_v34 = vmax.f32 %v3561_v50, 0.0  ;;  %v3565_v20 = vadd.f32 %v3564_v6, %v16174_v16  ;;  %v3687_v33 = vpop.f32.mrf.mxu1  ;;  %13317 = vmatprep.mubr.msk.bf16.mxu0 %vm6468_vm1, %v17219_v19 }
 0x22f   :  { %v14221_v59 = vpack.c.bf16 %v5392_v61, %v5392_v61  ;;  %v4169_v52 = vmax.f32 %v3684_v21, 0.0  ;;  %v3688_v1 = vadd.f32 %v3687_v33, %v16174_v16  ;;  %v3566_v37 = vpop.f32.mrf.mxu0  ;;  %6911 = vmatpush1.bf16.msra.mxu1 %v14995_v60  ;;  %v15003_v61 = vld [vmem:[#allocation3 + $0x31c] ss:$48 sps:$4 sm:$0xff]  }
 0x230   :  { %5374 = vst [vmem:[#allocation3 + $0x140] sm:$0xf] %v14203_v3  ;;  %v5285_v39 = vmax.f32 %v4166_v43, %v4167_v34  ;;  %v3567_v48 = vadd.f32 %v3566_v37, %v16174_v16  ;;  %v3689_v54 = vpop.f32.mrf.mxu1  ;;  %6912 = vmatprep.subr.bf16.mxu1 %v15000_v53  ;;  %v4190_v45 = vmax.f32 %v3565_v20, 0.0 }
 0x231   :  { %5482 = vst [vmem:[#allocation3 + $0x144] sm:$0xf] %v14221_v59  ;;  %v5393_v46 = vmax.f32 %v4168_v32, %v4169_v52  ;;  %v3690_v8 = vadd.f32 %v3689_v54, %v16174_v16  ;;  %v3568_v36 = vpop.f32.mrf.mxu0  ;;  %v4192_v60 = vmax.f32 %v3688_v1, 0.0  ;;  %v15001_v32 = vld [vmem:[#allocation3 + $0x318] ss:$48 sps:$4 sm:$0xff]  }
 0x232   :  { %v14204_v55 = vpack.c.bf16 %v5285_v39, %v5285_v39  ;;  %v4191_v57 = vmax.f32 %v3567_v48, 0.0  ;;  %v3569_v50 = vadd.f32 %v3568_v36, %v16192_v0  ;;  %v3691_v47 = vpop.f32.mrf.mxu1  ;;  %v17233_v1 = vld [vmem:[%s19417_s3 + $0x10] ss:$8 sps:$4 sm:$0xff]  }
 0x233   :  { %v14222_v21 = vpack.c.bf16 %v5393_v46, %v5393_v46  ;;  %v4193_v6 = vmax.f32 %v3690_v8, 0.0  ;;  %v3692_v3 = vadd.f32 %v3691_v47, %v16192_v0  ;;  %v3570_v43 = vpop.f32.mrf.mxu0  ;;  %6913 = vmatpush1.bf16.msra.mxu1 %v14998_v7 }
 0x234   :  { %5375 = vst [vmem:[#allocation3 + $0x170] sm:$0xf] %v14204_v55  ;;  %v5286_v34 = vmax.f32 %v4190_v45, %v4191_v57  ;;  %v3571_v33 = vadd.f32 %v3570_v43, %v16192_v0  ;;  %v3693_v53 = vpop.f32.mrf.mxu1  ;;  %6928 = vmatprep.subr.bf16.mxu1 %v15003_v61  ;;  %v4214_v39 = vmax.f32 %v3569_v50, 0.0 }
 0x235   :  { %5483 = vst [vmem:[#allocation3 + $0x174] sm:$0xf] %v14222_v21  ;;  %v5394_v20 = vmax.f32 %v4192_v60, %v4193_v6  ;;  %v3694_v59 = vadd.f32 %v3693_v53, %v16192_v0  ;;  %v3574_v52 = vpop.f32.mrf.mxu0  ;;  %6808 = vmatmul.mubr.bf16.gmra.mxu0 %v17233_v1  ;;  %v4216_v7 = vmax.f32 %v3692_v3, 0.0 }
 0x236   :  { %v14205_v37 = vpack.c.bf16 %v5286_v34, %v5286_v34  ;;  %v4215_v48 = vmax.f32 %v3571_v33, 0.0  ;;  %v3575_v54 = vadd.f32 %v3574_v52, %v16160_v25  ;;  %v3697_v46 = vpop.f32.mrf.mxu1  ;;  %13318 = vmatprep.mubr.msk.bf16.mxu0 %vm6468_vm1, %v17001_v4 }
 0x237   :  { %v14223_v8 = vpack.c.bf16 %v5394_v20, %v5394_v20  ;;  %v4217_v36 = vmax.f32 %v3694_v59, 0.0  ;;  %v3698_v55 = vadd.f32 %v3697_v46, %v16160_v25  ;;  %v3576_v45 = vpop.f32.mrf.mxu0  ;;  %6929 = vmatpush2.bf16.msra.mxu1 %v15001_v32 }
 0x238   :  { %5376 = vst [vmem:[#allocation3 + $0x1a0] sm:$0xf] %v14205_v37  ;;  %v5287_v57 = vmax.f32 %v4214_v39, %v4215_v48  ;;  %v3577_v47 = vadd.f32 %v3576_v45, %v16160_v25  ;;  %v3699_v61 = vpop.f32.mrf.mxu1  ;;  %v4238_v43 = vmax.f32 %v3575_v54, 0.0 }
 0x239   :  { %5484 = vst [vmem:[#allocation3 + $0x1a4] sm:$0xf] %v14223_v8  ;;  %v5395_v50 = vmax.f32 %v4216_v7, %v4217_v36  ;;  %v3700_v21 = vadd.f32 %v3699_v61, %v16160_v25  ;;  %v3578_v60 = vpop.f32.mrf.mxu0  ;;  %v4240_v53 = vmax.f32 %v3698_v55, 0.0 }
 0x23a   :  { %v14206_v6 = vpack.c.bf16 %v5287_v57, %v5287_v57  ;;  %v4239_v4 = vmax.f32 %v3577_v47, 0.0  ;;  %v3579_v3 = vadd.f32 %v3578_v60, %v16171_v27  ;;  %v3701_v34 = vpop.f32.mrf.mxu1  ;;  %6931 = vmatmul.mubr.bf16.vlgmr.msra.gmra.mxu1 %v17212_v15 }
 0x23b   :  { %v14224_v33 = vpack.c.bf16 %v5395_v50, %v5395_v50  ;;  %v4241_v20 = vmax.f32 %v3700_v21, 0.0  ;;  %v3702_v59 = vadd.f32 %v3701_v34, %v16171_v27  ;;  %v3580_v32 = vpop.f32.mrf.mxu0  ;;  %13327 = vmatprep.mubr.msk.bf16.mxu1 %vm6468_vm1, %v17219_v19 }
 0x23c   :  { %5377 = vst [vmem:[#allocation3 + $0x1d0] sm:$0xf] %v14206_v6  ;;  %v5288_v52 = vmax.f32 %v4238_v43, %v4239_v4  ;;  %v3581_v37 = vadd.f32 %v3580_v32, %v16171_v27  ;;  %v3703_v39 = vpop.f32.mrf.mxu1  ;;  %v4262_v7 = vmax.f32 %v3579_v3, 0.0 }
 0x23d   :  { %5485 = vst [vmem:[#allocation3 + $0x1d4] sm:$0xf] %v14224_v33  ;;  %v5396_v48 = vmax.f32 %v4240_v53, %v4241_v20  ;;  %v3704_v54 = vadd.f32 %v3703_v39, %v16171_v27  ;;  %v3584_v46 = vpop.f32.mrf.mxu0  ;;  %6818 = vmatmul.mubr.bf16.gmra.mxu0 %v17016_v5  ;;  %v4264_v47 = vmax.f32 %v3702_v59, 0.0 }
 0x23e   :  { %v14207_v8 = vpack.c.bf16 %v5288_v52, %v5288_v52  ;;  %v4263_v36 = vmax.f32 %v3581_v37, 0.0  ;;  %v3585_v55 = vadd.f32 %v3584_v46, %v16140_v2  ;;  %v3707_v45 = vpop.f32.mrf.mxu1  ;;  %13319 = vmatprep.mubr.msk.bf16.mxu0 %vm6468_vm1, %v17023_v38 }
 0x23f   :  { %v14225_v57 = vpack.c.bf16 %v5396_v48, %v5396_v48  ;;  %v4265_v61 = vmax.f32 %v3704_v54, 0.0  ;;  %v3708_v50 = vadd.f32 %v3707_v45, %v16140_v2  ;;  %v3586_v21 = vpop.f32.mrf.mxu0  ;;  %v17262_v48 = vld [vmem:[%s19417_s3 + $0x24] ss:$8 sps:$4 sm:$0xff]  }
 0x240   :  { %5378 = vst [vmem:[#allocation3 + $0x200] sm:$0xf] %v14207_v8  ;;  %v5289_v60 = vmax.f32 %v4262_v7, %v4263_v36  ;;  %v3587_v6 = vadd.f32 %v3586_v21, %v16140_v2  ;;  %v3709_v5 = vpop.f32.mrf.mxu1  ;;  %v4286_v33 = vmax.f32 %v3585_v55, 0.0 }
 0x241   :  { %5486 = vst [vmem:[#allocation3 + $0x204] sm:$0xf] %v14225_v57  ;;  %v5397_v43 = vmax.f32 %v4264_v47, %v4265_v61  ;;  %v3710_v4 = vadd.f32 %v3709_v5, %v16140_v2  ;;  %v3588_v3 = vpop.f32.mrf.mxu0  ;;  %v4288_v32 = vmax.f32 %v3708_v50, 0.0 }
 0x242   :  { %v14208_v34 = vpack.c.bf16 %v5289_v60, %v5289_v60  ;;  %v4287_v53 = vmax.f32 %v3587_v6, 0.0  ;;  %v3589_v38 = vadd.f32 %v3588_v3, %v16154_v13  ;;  %v3711_v20 = vpop.f32.mrf.mxu1  ;;  %6941 = vmatmul.mubr.bf16.gmra.mxu1 %v17233_v1 }
 0x243   :  { %v14226_v59 = vpack.c.bf16 %v5397_v43, %v5397_v43  ;;  %v4289_v52 = vmax.f32 %v3710_v4, 0.0  ;;  %v3712_v37 = vadd.f32 %v3711_v20, %v16154_v13  ;;  %v3590_v39 = vpop.f32.mrf.mxu0  ;;  %13328 = vmatprep.mubr.msk.bf16.mxu1 %vm6468_vm1, %v17262_v48 }
 0x244   :  { %5379 = vst [vmem:[#allocation3 + $0x230] sm:$0xf] %v14208_v34  ;;  %v5290_v54 = vmax.f32 %v4286_v33, %v4287_v53  ;;  %v3591_v46 = vadd.f32 %v3590_v39, %v16154_v13  ;;  %v3713_v8 = vpop.f32.mrf.mxu1  ;;  %v4310_v57 = vmax.f32 %v3589_v38, 0.0 }
 0x245   :  { %5487 = vst [vmem:[#allocation3 + $0x234] sm:$0xf] %v14226_v59  ;;  %v5398_v7 = vmax.f32 %v4288_v32, %v4289_v52  ;;  %v3714_v36 = vadd.f32 %v3713_v8, %v16154_v13  ;;  %v3594_v55 = vpop.f32.mrf.mxu0  ;;  %6828 = vmatmul.mubr.bf16.gmra.mxu0 %v17040_v31  ;;  %v4312_v60 = vmax.f32 %v3712_v37, 0.0  ;;  %v17279_v52 = vld [vmem:[%s19417_s3 + $0x20] ss:$8 sps:$4 sm:$0xff]  }
 0x246   :  { %v14209_v45 = vpack.c.bf16 %v5290_v54, %v5290_v54  ;;  %v4311_v47 = vmax.f32 %v3591_v46, 0.0  ;;  %v3595_v61 = vadd.f32 %v3594_v55, %v16133_v63  ;;  %v3717_v50 = vpop.f32.mrf.mxu1  ;;  %13320 = vmatprep.mubr.msk.bf16.mxu0 %vm6468_vm1, %v17047_v40 }
 0x247   :  { %v14227_v21 = vpack.c.bf16 %v5398_v7, %v5398_v7  ;;  %v4313_v6 = vmax.f32 %v3714_v36, 0.0  ;;  %v3718_v5 = vadd.f32 %v3717_v50, %v16133_v63  ;;  %v3596_v43 = vpop.f32.mrf.mxu0  ;;  %v17286_v7 = vld [vmem:[%s19417_s3 + $0x34] ss:$8 sps:$4 sm:$0xff]  }
 0x248   :  { %5380 = vst [vmem:[#allocation3 + $0x260] sm:$0xf] %v14209_v45  ;;  %v5291_v4 = vmax.f32 %v4310_v57, %v4311_v47  ;;  %v3597_v3 = vadd.f32 %v3596_v43, %v16133_v63  ;;  %v3719_v31 = vpop.f32.mrf.mxu1  ;;  %v4334_v20 = vmax.f32 %v3595_v61, 0.0 }
 0x249   :  { %5488 = vst [vmem:[#allocation3 + $0x264] sm:$0xf] %v14227_v21  ;;  %v5399_v34 = vmax.f32 %v4312_v60, %v4313_v6  ;;  %v3720_v33 = vadd.f32 %v3719_v31, %v16133_v63  ;;  %v3598_v53 = vpop.f32.mrf.mxu0  ;;  %v4336_v39 = vmax.f32 %v3718_v5, 0.0 }
 0x24a   :  { %v14210_v38 = vpack.c.bf16 %v5291_v4, %v5291_v4  ;;  %v4335_v59 = vmax.f32 %v3597_v3, 0.0  ;;  %v3599_v40 = vadd.f32 %v3598_v53, %v16148_v24  ;;  %v3721_v32 = vpop.f32.mrf.mxu1  ;;  %6951 = vmatmul.mubr.bf16.gmra.mxu1 %v17279_v52 }
 0x24b   :  { %v14228_v37 = vpack.c.bf16 %v5399_v34, %v5399_v34  ;;  %v4337_v54 = vmax.f32 %v3720_v33, 0.0  ;;  %v3722_v46 = vadd.f32 %v3721_v32, %v16148_v24  ;;  %v3600_v8 = vpop.f32.mrf.mxu0  ;;  %13329 = vmatprep.mubr.msk.bf16.mxu1 %vm6468_vm1, %v17286_v7 }
 0x24c   :  { %5381 = vst [vmem:[#allocation3 + $0x290] sm:$0xf] %v14210_v38  ;;  %v5292_v36 = vmax.f32 %v4334_v20, %v4335_v59  ;;  %v3601_v55 = vadd.f32 %v3600_v8, %v16148_v24  ;;  %v3723_v45 = vpop.f32.mrf.mxu1  ;;  %v4358_v21 = vmax.f32 %v3599_v40, 0.0 }
 0x24d   :  { %5489 = vst [vmem:[#allocation3 + $0x294] sm:$0xf] %v14228_v37  ;;  %v5400_v57 = vmax.f32 %v4336_v39, %v4337_v54  ;;  %v3724_v47 = vadd.f32 %v3723_v45, %v16148_v24  ;;  %v3604_v61 = vpop.f32.mrf.mxu0  ;;  %6838 = vmatmul.mubr.bf16.gmra.mxu0 %v17064_v9  ;;  %v4360_v4 = vmax.f32 %v3722_v46, 0.0  ;;  %v17303_v54 = vld [vmem:[%s19417_s3 + $0x30] ss:$8 sps:$4 sm:$0xff]  }
 0x24e   :  { %v14211_v50 = vpack.c.bf16 %v5292_v36, %v5292_v36  ;;  %v4359_v60 = vmax.f32 %v3601_v55, 0.0  ;;  %v3605_v6 = vadd.f32 %v3604_v61, %v16529_v10  ;;  %v3727_v5 = vpop.f32.mrf.mxu1  ;;  %13321 = vmatprep.mubr.msk.bf16.mxu0 %vm6468_vm1, %v17071_v30 }
 0x24f   :  { %v14229_v43 = vpack.c.bf16 %v5400_v57, %v5400_v57  ;;  %v4361_v3 = vmax.f32 %v3724_v47, 0.0  ;;  %v3728_v31 = vadd.f32 %v3727_v5, %v16529_v10  ;;  %v3606_v34 = vpop.f32.mrf.mxu0  ;;  %v17310_v57 = vld [vmem:[%s19417_s3 + $0x44] ss:$8 sps:$4 sm:$0xff]  }
 0x250   :  { %5382 = vst [vmem:[#allocation3 + $0x2c0] sm:$0xf] %v14211_v50  ;;  %v5293_v33 = vmax.f32 %v4358_v21, %v4359_v60  ;;  %v3607_v53 = vadd.f32 %v3606_v34, %v16529_v10  ;;  %v3729_v9 = vpop.f32.mrf.mxu1  ;;  %v4382_v32 = vmax.f32 %v3605_v6, 0.0 }
 0x251   :  { %5490 = vst [vmem:[#allocation3 + $0x2c4] sm:$0xf] %v14229_v43  ;;  %v5401_v38 = vmax.f32 %v4360_v4, %v4361_v3  ;;  %v3730_v20 = vadd.f32 %v3729_v9, %v16529_v10  ;;  %v3608_v59 = vpop.f32.mrf.mxu0  ;;  %v4384_v8 = vmax.f32 %v3728_v31, 0.0 }
 0x252   :  { %v14212_v40 = vpack.c.bf16 %v5293_v33, %v5293_v33  ;;  %v4383_v37 = vmax.f32 %v3607_v53, 0.0  ;;  %v3609_v30 = vadd.f32 %v3608_v59, %v19499_v62  ;;  %v3731_v39 = vpop.f32.mrf.mxu1  ;;  %6961 = vmatmul.mubr.bf16.gmra.mxu1 %v17303_v54 }
 0x253   :  { %v14230_v46 = vpack.c.bf16 %v5401_v38, %v5401_v38  ;;  %v4385_v36 = vmax.f32 %v3730_v20, 0.0  ;;  %v3732_v55 = vadd.f32 %v3731_v39, %v19499_v62  ;;  %v3610_v45 = vpop.f32.mrf.mxu0  ;;  %13330 = vmatprep.mubr.msk.bf16.mxu1 %vm6468_vm1, %v17310_v57 }
 0x254   :  { %5383 = vst [vmem:[#allocation3 + $0x2f0] sm:$0xf] %v14212_v40  ;;  %v5294_v47 = vmax.f32 %v4382_v32, %v4383_v37  ;;  %v3611_v61 = vadd.f32 %v3610_v45, %v19499_v62  ;;  %v3733_v50 = vpop.f32.mrf.mxu1  ;;  %v4406_v43 = vmax.f32 %v3609_v30, 0.0 }
 0x255   :  { %5491 = vst [vmem:[#allocation3 + $0x2f4] sm:$0xf] %v14230_v46  ;;  %v5402_v21 = vmax.f32 %v4384_v8, %v4385_v36  ;;  %v3734_v60 = vadd.f32 %v3733_v50, %v19499_v62  ;;  %v3770_v6 = vpop.f32.mrf.mxu0  ;;  %6848 = vmatmul.mubr.bf16.gmra.mxu0 %v17088_v49  ;;  %v4408_v33 = vmax.f32 %v3732_v55, 0.0  ;;  %v17327_v36 = vld [vmem:[%s19417_s3 + $0x40] ss:$8 sps:$4 sm:$0xff]  }
 0x256   :  { %v14213_v5 = vpack.c.bf16 %v5294_v47, %v5294_v47  ;;  %v4407_v4 = vmax.f32 %v3611_v61, 0.0  ;;  %v3771_v3 = vadd.f32 %v3770_v6, %v16260_v17  ;;  %v3893_v31 = vpop.f32.mrf.mxu1  ;;  %13322 = vmatprep.mubr.msk.bf16.mxu0 %vm6468_vm1, %v17094_v18  ;;  %v17334_v50 = vld [vmem:[%s19417_s3 + $0x54] ss:$8 sps:$4 sm:$0xff]  }
 0x257   :  { %v14231_v34 = vpack.c.bf16 %v5402_v21, %v5402_v21  ;;  %v4409_v53 = vmax.f32 %v3734_v60, 0.0  ;;  %v3894_v9 = vadd.f32 %v3893_v31, %v16260_v17  ;;  %v3772_v38 = vpop.f32.mrf.mxu0 }
 0x258   :  { %5384 = vst [vmem:[#allocation3 + $0x320] sm:$0xf] %v14213_v5  ;;  %v5295_v20 = vmax.f32 %v4406_v43, %v4407_v4  ;;  %v3773_v59 = vadd.f32 %v3772_v38, %v16260_v17  ;;  %v3895_v49 = vpop.f32.mrf.mxu1  ;;  %v4002_v39 = vmax.f32 %v3771_v3, 0.0 }
 0x259   :  { %5492 = vst [vmem:[#allocation3 + $0x324] sm:$0xf] %v14231_v34  ;;  %v5403_v40 = vmax.f32 %v4408_v33, %v4409_v53  ;;  %v3896_v32 = vadd.f32 %v3895_v49, %v16260_v17  ;;  %v3774_v37 = vpop.f32.mrf.mxu0  ;;  %v4004_v45 = vmax.f32 %v3894_v9, 0.0 }
 0x25a   :  { %v14214_v30 = vpack.c.bf16 %v5295_v20, %v5295_v20  ;;  %v4003_v46 = vmax.f32 %v3773_v59, 0.0  ;;  %v3775_v18 = vadd.f32 %v3774_v37, %v19501_v12  ;;  %v3897_v8 = vpop.f32.mrf.mxu1  ;;  %6971 = vmatmul.mubr.bf16.gmra.mxu1 %v17327_v36  ;;  %v15009_v20 = vld [vmem:[#allocation3 + $0x264] ss:$48 sps:$4 sm:$0xff]  }
 0x25b   :  { %v14232_v55 = vpack.c.bf16 %v5403_v40, %v5403_v40  ;;  %v4005_v47 = vmax.f32 %v3896_v32, 0.0  ;;  %v3898_v61 = vadd.f32 %v3897_v8, %v19501_v12  ;;  %v3776_v17 = vpop.f32.mrf.mxu0  ;;  %13331 = vmatprep.mubr.msk.bf16.mxu1 %vm6468_vm1, %v17334_v50  ;;  %v15004_v5 = vld [vmem:[#allocation3 + $0x2c0] ss:$48 sps:$4 sm:$0xff]  }
 0x25c   :  { %5385 = vst [vmem:[#allocation3 + $0x350] sm:$0xf] %v14214_v30  ;;  %v5494_v21 = vmax.f32 %v4002_v39, %v4003_v46  ;;  %v3777_v60 = vadd.f32 %v3776_v17, %v19501_v12  ;;  %v3899_v6 = vpop.f32.mrf.mxu1  ;;  %v15006_v43 = vld [vmem:[#allocation3 + $0x2c4] ss:$48 sps:$4 sm:$0xff]   ;;  %v4026_v33 = vmax.f32 %v3775_v18, 0.0 }
 0x25d   :  { %5493 = vst [vmem:[#allocation3 + $0x354] sm:$0xf] %v14232_v55  ;;  %v5602_v4 = vmax.f32 %v4004_v45, %v4005_v47  ;;  %v3900_v3 = vadd.f32 %v3899_v6, %v19501_v12  ;;  %v3780_v31 = vpop.f32.mrf.mxu0  ;;  %6858 = vmatmul.mubr.bf16.gmra.mxu0 %v17112_v26  ;;  %7031 = vmatprep.subr.bf16.mxu0 %v15006_v43  ;;  %v4028_v49 = vmax.f32 %v3898_v61, 0.0  ;;  %v15007_v18 = vld [vmem:[#allocation3 + $0x260] ss:$48 sps:$4 sm:$0xff]  }
 0x25e   :  { %v14233_v34 = vpack.c.bf16 %v5494_v21, %v5494_v21  ;;  %v4027_v53 = vmax.f32 %v3777_v60, 0.0  ;;  %v3781_v9 = vadd.f32 %v3780_v31, %v16250_v41  ;;  %v3903_v38 = vpop.f32.mrf.mxu1  ;;  %13323 = vmatprep.mubr.msk.bf16.mxu0 %vm6468_vm1, %v17118_v23  ;;  %7032 = vmatpush1.bf16.msra.mxu0 %v15004_v5  ;;  %v15012_v17 = vld [vmem:[#allocation3 + $0x204] ss:$48 sps:$4 sm:$0xff]   ;;  %v17351_v21 = vld [vmem:[%s19417_s3 + $0x50] ss:$8 sps:$4 sm:$0xff]  }
 0x25f   :  { %v14251_v59 = vpack.c.bf16 %v5602_v4, %v5602_v4  ;;  %v4029_v40 = vmax.f32 %v3900_v3, 0.0  ;;  %v3904_v32 = vadd.f32 %v3903_v38, %v16250_v41  ;;  %v3782_v12 = vpop.f32.mrf.mxu0  ;;  %7033 = vmatprep.subr.bf16.mxu0 %v15009_v20  ;;  %v17358_v4 = vld [vmem:[%s19417_s3 + $0x64] ss:$8 sps:$4 sm:$0xff]  }
 0x260   :  { %5584 = vst [vmem:[#allocation3 + $0x28] sm:$0xf] %v14233_v34  ;;  %v5495_v26 = vmax.f32 %v4026_v33, %v4027_v53  ;;  %v3783_v37 = vadd.f32 %v3782_v12, %v16250_v41  ;;  %v3905_v30 = vpop.f32.mrf.mxu1  ;;  %v4050_v55 = vmax.f32 %v3781_v9, 0.0  ;;  %v15010_v9 = vld [vmem:[#allocation3 + $0x200] ss:$48 sps:$4 sm:$0xff]  }
 0x261   :  { %5692 = vst [vmem:[#allocation3 + $0x2c] sm:$0xf] %v14251_v59  ;;  %v5603_v39 = vmax.f32 %v4028_v49, %v4029_v40  ;;  %v3906_v46 = vadd.f32 %v3905_v30, %v16250_v41  ;;  %v3784_v8 = vpop.f32.mrf.mxu0  ;;  %v4052_v6 = vmax.f32 %v3904_v32, 0.0  ;;  %v15015_v12 = vld [vmem:[#allocation3 + $0x1a4] ss:$48 sps:$4 sm:$0xff]  }
 0x262   :  { %v14234_v23 = vpack.c.bf16 %v5495_v26, %v5495_v26  ;;  %v4051_v45 = vmax.f32 %v3783_v37, 0.0  ;;  %v3785_v47 = vadd.f32 %v3784_v8, %v19504_v51  ;;  %v3907_v61 = vpop.f32.mrf.mxu1  ;;  %6981 = vmatmul.mubr.bf16.gmra.mxu1 %v17351_v21  ;;  %7034 = vmatpush1.bf16.msra.mxu0 %v15007_v18 }
 0x263   :  { %v14252_v60 = vpack.c.bf16 %v5603_v39, %v5603_v39  ;;  %v4053_v5 = vmax.f32 %v3906_v46, 0.0  ;;  %v3908_v41 = vadd.f32 %v3907_v61, %v19504_v51  ;;  %v3786_v43 = vpop.f32.mrf.mxu0  ;;  %13332 = vmatprep.mubr.msk.bf16.mxu1 %vm6468_vm1, %v17358_v4  ;;  %7035 = vmatprep.subr.bf16.mxu0 %v15012_v17 }
 0x264   :  { %5585 = vst [vmem:[#allocation3 + $0x58] sm:$0xf] %v14234_v23  ;;  %v5496_v3 = vmax.f32 %v4050_v55, %v4051_v45  ;;  %v3787_v31 = vadd.f32 %v3786_v43, %v19504_v51  ;;  %v3909_v34 = vpop.f32.mrf.mxu1  ;;  %v4074_v59 = vmax.f32 %v3785_v47, 0.0  ;;  %v15013_v55 = vld [vmem:[#allocation3 + $0x1a0] ss:$48 sps:$4 sm:$0xff]  }
 0x265   :  { %5693 = vst [vmem:[#allocation3 + $0x5c] sm:$0xf] %v14252_v60  ;;  %v5604_v33 = vmax.f32 %v4052_v6, %v4053_v5  ;;  %v3910_v53 = vadd.f32 %v3909_v34, %v19504_v51  ;;  %v3790_v38 = vpop.f32.mrf.mxu0  ;;  %6868 = vmatmul.mubr.bf16.gmra.mxu0 %v17136_v11  ;;  %v4076_v37 = vmax.f32 %v3908_v41, 0.0  ;;  %v15018_v6 = vld [vmem:[#allocation3 + $0x144] ss:$48 sps:$4 sm:$0xff]  }
 0x266   :  { %v14235_v20 = vpack.c.bf16 %v5496_v3, %v5496_v3  ;;  %v4075_v49 = vmax.f32 %v3787_v31, 0.0  ;;  %v3791_v40 = vadd.f32 %v3790_v38, %v19506_v29  ;;  %v3913_v32 = vpop.f32.mrf.mxu1  ;;  %13324 = vmatprep.mubr.msk.bf16.mxu0 %vm6468_vm1, %v17143_v22  ;;  %7036 = vmatpush1.bf16.msra.mxu0 %v15010_v9  ;;  %v17375_v5 = vld [vmem:[%s19417_s3 + $0x60] ss:$8 sps:$4 sm:$0xff]   ;;  %v17382_v34 = vld [vmem:[%s19417_s3 + $0x74] ss:$8 sps:$4 sm:$0xff]  }
 0x267   :  { %v14253_v26 = vpack.c.bf16 %v5604_v33, %v5604_v33  ;;  %v4077_v30 = vmax.f32 %v3910_v53, 0.0  ;;  %v3914_v39 = vadd.f32 %v3913_v32, %v19506_v29  ;;  %v3792_v51 = vpop.f32.mrf.mxu0  ;;  %7037 = vmatprep.subr.bf16.mxu0 %v15015_v12 }
 0x268   :  { %5586 = vst [vmem:[#allocation3 + $0x88] sm:$0xf] %v14235_v20  ;;  %v5497_v46 = vmax.f32 %v4074_v59, %v4075_v49  ;;  %v3793_v11 = vadd.f32 %v3792_v51, %v19506_v29  ;;  %v3915_v18 = vpop.f32.mrf.mxu1  ;;  %v4098_v47 = vmax.f32 %v3791_v40, 0.0  ;;  %v15016_v59 = vld [vmem:[#allocation3 + $0x140] ss:$48 sps:$4 sm:$0xff]  }
 0x269   :  { %5694 = vst [vmem:[#allocation3 + $0x8c] sm:$0xf] %v14253_v26  ;;  %v5605_v8 = vmax.f32 %v4076_v37, %v4077_v30  ;;  %v3916_v23 = vadd.f32 %v3915_v18, %v19506_v29  ;;  %v3794_v45 = vpop.f32.mrf.mxu0  ;;  %v4100_v43 = vmax.f32 %v3914_v39, 0.0  ;;  %v15021_v30 = vld [vmem:[#allocation3 + $0xe4] ss:$48 sps:$4 sm:$0xff]  }
 0x26a   :  { %v14236_v22 = vpack.c.bf16 %v5497_v46, %v5497_v46  ;;  %v4099_v61 = vmax.f32 %v3793_v11, 0.0  ;;  %v3795_v17 = vadd.f32 %v3794_v45, %v16244_v42  ;;  %v3917_v60 = vpop.f32.mrf.mxu1  ;;  %6991 = vmatmul.mubr.bf16.gmra.mxu1 %v17375_v5  ;;  %7038 = vmatpush1.bf16.msra.mxu0 %v15013_v55  ;;  %v15019_v45 = vld [vmem:[#allocation3 + $0xe0] ss:$48 sps:$4 sm:$0xff]  }
 0x26b   :  { %v14254_v41 = vpack.c.bf16 %v5605_v8, %v5605_v8  ;;  %v4101_v3 = vmax.f32 %v3916_v23, 0.0  ;;  %v3918_v29 = vadd.f32 %v3917_v60, %v16244_v42  ;;  %v3796_v31 = vpop.f32.mrf.mxu0  ;;  %13333 = vmatprep.mubr.msk.bf16.mxu1 %vm6468_vm1, %v17382_v34  ;;  %7039 = vmatprep.subr.bf16.mxu0 %v15018_v6  ;;  %v15024_v6 = vld [vmem:[#allocation3 + $0x84] ss:$48 sps:$4 sm:$0xff]  }
 0x26c   :  { %5587 = vst [vmem:[#allocation3 + $0xb8] sm:$0xf] %v14236_v22  ;;  %v5498_v33 = vmax.f32 %v4098_v47, %v4099_v61  ;;  %v3797_v53 = vadd.f32 %v3796_v31, %v16244_v42  ;;  %v3919_v9 = vpop.f32.mrf.mxu1  ;;  %v4122_v32 = vmax.f32 %v3795_v17, 0.0 }
 0x26d   :  { %5695 = vst [vmem:[#allocation3 + $0xbc] sm:$0xf] %v14254_v41  ;;  %v5606_v38 = vmax.f32 %v4100_v43, %v4101_v3  ;;  %v3920_v20 = vadd.f32 %v3919_v9, %v16244_v42  ;;  %v3800_v49 = vpop.f32.mrf.mxu0  ;;  %6878 = vmatmul.mubr.bf16.gmra.mxu0 %v17160_v58  ;;  %v4124_v51 = vmax.f32 %v3918_v29, 0.0  ;;  %v17399_v41 = vld [vmem:[%s19417_s3 + $0x70] ss:$8 sps:$4 sm:$0xff]  }
 0x26e   :  { %v14237_v40 = vpack.c.bf16 %v5498_v33, %v5498_v33  ;;  %v4123_v12 = vmax.f32 %v3797_v53, 0.0  ;;  %v3801_v26 = vadd.f32 %v3800_v49, %v16197_v35  ;;  %v3923_v37 = vpop.f32.mrf.mxu1  ;;  %13325 = vmatprep.mubr.msk.bf16.mxu0 %vm6468_vm1, %v17166_v14  ;;  %7040 = vmatpush1.bf16.msra.mxu0 %v15016_v59  ;;  %v17406_v33 = vld [vmem:[%s19417_s3 + $0x84] ss:$8 sps:$4 sm:$0xff]   ;;  %v15022_v49 = vld [vmem:[#allocation3 + $0x80] ss:$48 sps:$4 sm:$0xff]  }
 0x26f   :  { %v14255_v39 = vpack.c.bf16 %v5606_v38, %v5606_v38  ;;  %v4125_v46 = vmax.f32 %v3920_v20, 0.0  ;;  %v3924_v11 = vadd.f32 %v3923_v37, %v16197_v35  ;;  %v3802_v42 = vpop.f32.mrf.mxu0  ;;  %7041 = vmatprep.subr.bf16.mxu0 %v15021_v30 }
 0x270   :  { %5588 = vst [vmem:[#allocation3 + $0xe8] sm:$0xf] %v14237_v40  ;;  %v5499_v18 = vmax.f32 %v4122_v32, %v4123_v12  ;;  %v3803_v58 = vadd.f32 %v3802_v42, %v16197_v35  ;;  %v3925_v8 = vpop.f32.mrf.mxu1  ;;  %v4146_v47 = vmax.f32 %v3801_v26, 0.0 }
 0x271   :  { %5696 = vst [vmem:[#allocation3 + $0xec] sm:$0xf] %v14255_v39  ;;  %v5607_v23 = vmax.f32 %v4124_v51, %v4125_v46  ;;  %v3926_v55 = vadd.f32 %v3925_v8, %v16197_v35  ;;  %v3804_v22 = vpop.f32.mrf.mxu0  ;;  %v4148_v3 = vmax.f32 %v3924_v11, 0.0  ;;  %v15027_v39 = vld [vmem:[#allocation3 + $0x24] ss:$48 sps:$4 sm:$0xff]  }
 0x272   :  { %v14238_v14 = vpack.c.bf16 %v5499_v18, %v5499_v18  ;;  %v4147_v61 = vmax.f32 %v3803_v58, 0.0  ;;  %v3805_v17 = vadd.f32 %v3804_v22, %v16212_v44  ;;  %v3927_v60 = vpop.f32.mrf.mxu1  ;;  %7001 = vmatmul.mubr.bf16.gmra.mxu1 %v17399_v41  ;;  %7042 = vmatpush1.bf16.msra.mxu0 %v15019_v45 }
 0x273   :  { %v14256_v43 = vpack.c.bf16 %v5607_v23, %v5607_v23  ;;  %v4149_v29 = vmax.f32 %v3926_v55, 0.0  ;;  %v3928_v35 = vadd.f32 %v3927_v60, %v16212_v44  ;;  %v3806_v31 = vpop.f32.mrf.mxu0  ;;  %13334 = vmatprep.mubr.msk.bf16.mxu1 %vm6468_vm1, %v17406_v33  ;;  %7043 = vmatprep.subr.bf16.mxu0 %v15024_v6  ;;  %v15025_v55 = vld [vmem:[#allocation3 + $0x20] ss:$48 sps:$4 sm:$0xff]  }
 0x274   :  { %5589 = vst [vmem:[#allocation3 + $0x118] sm:$0xf] %v14238_v14  ;;  %v5500_v53 = vmax.f32 %v4146_v47, %v4147_v61  ;;  %v3807_v9 = vadd.f32 %v3806_v31, %v16212_v44  ;;  %v3929_v38 = vpop.f32.mrf.mxu1  ;;  %v4170_v12 = vmax.f32 %v3805_v17, 0.0  ;;  %v15030_v17 = vld [vmem:[#allocation3 + $0x324] ss:$48 sps:$4 sm:$0xff]  }
 0x275   :  { %5697 = vst [vmem:[#allocation3 + $0x11c] sm:$0xf] %v14256_v43  ;;  %v5608_v20 = vmax.f32 %v4148_v3, %v4149_v29  ;;  %v3930_v59 = vadd.f32 %v3929_v38, %v16212_v44  ;;  %v3810_v40 = vpop.f32.mrf.mxu0  ;;  %6888 = vmatmul.mubr.bf16.gmra.mxu0 %v17184_v56  ;;  %v4172_v46 = vmax.f32 %v3928_v35, 0.0  ;;  %v17423_v60 = vld [vmem:[%s19417_s3 + $0x80] ss:$8 sps:$4 sm:$0xff]  }
 0x276   :  { %v14239_v32 = vpack.c.bf16 %v5500_v53, %v5500_v53  ;;  %v4171_v26 = vmax.f32 %v3807_v9, 0.0  ;;  %v3811_v37 = vadd.f32 %v3810_v40, %v16174_v16  ;;  %v3933_v30 = vpop.f32.mrf.mxu1  ;;  %13336 = vmatprep.mubr.msk.bf16.mxu0 %vm6468_vm1, %v17195_v28  ;;  %7044 = vmatpush1.bf16.msra.mxu0 %v15022_v49  ;;  %v17430_v35 = vld [vmem:[%s19417_s3 + $0x94] ss:$8 sps:$4 sm:$0xff]  }
 0x277   :  { %v14257_v51 = vpack.c.bf16 %v5608_v20, %v5608_v20  ;;  %v4173_v11 = vmax.f32 %v3930_v59, 0.0  ;;  %v3934_v42 = vadd.f32 %v3933_v30, %v16174_v16  ;;  %v3812_v44 = vpop.f32.mrf.mxu0  ;;  %7045 = vmatprep.subr.bf16.mxu0 %v15027_v39  ;;  %v15028_v59 = vld [vmem:[#allocation3 + $0x320] ss:$48 sps:$4 sm:$0xff]  }
 0x278   :  { %5590 = vst [vmem:[#allocation3 + $0x148] sm:$0xf] %v14239_v32  ;;  %v5501_v18 = vmax.f32 %v4170_v12, %v4171_v26  ;;  %v3813_v56 = vadd.f32 %v3812_v44, %v16174_v16  ;;  %v3935_v58 = vpop.f32.mrf.mxu1  ;;  %v4194_v22 = vmax.f32 %v3811_v37, 0.0 }
 0x279   :  { %5698 = vst [vmem:[#allocation3 + $0x14c] sm:$0xf] %v14257_v51  ;;  %v5609_v8 = vmax.f32 %v4172_v46, %v4173_v11  ;;  %v3936_v23 = vadd.f32 %v3935_v58, %v16174_v16  ;;  %v3814_v45 = vpop.f32.mrf.mxu0  ;;  %v4196_v43 = vmax.f32 %v3934_v42, 0.0 }
 0x27a   :  { %v14240_v28 = vpack.c.bf16 %v5501_v18, %v5501_v18  ;;  %v4195_v14 = vmax.f32 %v3813_v56, 0.0  ;;  %v3815_v47 = vadd.f32 %v3814_v45, %v16192_v0  ;;  %v3937_v61 = vpop.f32.mrf.mxu1  ;;  %7011 = vmatmul.mubr.bf16.gmra.mxu1 %v17423_v60  ;;  %7046 = vmatpush1.bf16.msra.mxu0 %v15025_v55 }
 0x27b   :  { %v14258_v6 = vpack.c.bf16 %v5609_v8, %v5609_v8  ;;  %v4197_v3 = vmax.f32 %v3936_v23, 0.0  ;;  %v3938_v16 = vadd.f32 %v3937_v61, %v16192_v0  ;;  %v3816_v29 = vpop.f32.mrf.mxu0  ;;  %13335 = vmatprep.mubr.msk.bf16.mxu1 %vm6468_vm1, %v17430_v35  ;;  %7061 = vmatprep.subr.bf16.mxu0 %v15030_v17 }
 0x27c   :  { %5591 = vst [vmem:[#allocation3 + $0x178] sm:$0xf] %v14240_v28  ;;  %v5502_v31 = vmax.f32 %v4194_v22, %v4195_v14  ;;  %v3817_v53 = vadd.f32 %v3816_v29, %v16192_v0  ;;  %v3939_v9 = vpop.f32.mrf.mxu1  ;;  %v4218_v32 = vmax.f32 %v3815_v47, 0.0  ;;  %v17445_v22 = vld [vmem:[%s19417_s3 + $0x90] ss:$8 sps:$4 sm:$0xff]  }
 0x27d   :  { %5699 = vst [vmem:[#allocation3 + $0x17c] sm:$0xf] %v14258_v6  ;;  %v5610_v38 = vmax.f32 %v4196_v43, %v4197_v3  ;;  %v3940_v20 = vadd.f32 %v3939_v9, %v16192_v0  ;;  %v3820_v49 = vpop.f32.mrf.mxu0  ;;  %v4220_v39 = vmax.f32 %v3938_v16, 0.0 }
 0x27e   :  { %v14241_v40 = vpack.c.bf16 %v5502_v31, %v5502_v31  ;;  %v4219_v12 = vmax.f32 %v3817_v53, 0.0  ;;  %v3821_v26 = vadd.f32 %v3820_v49, %v16160_v25  ;;  %v3943_v37 = vpop.f32.mrf.mxu1  ;;  %7062 = vmatpush2.bf16.msra.mxu0 %v15028_v59 }
 0x27f   :  { %v14259_v30 = vpack.c.bf16 %v5610_v38, %v5610_v38  ;;  %v4221_v51 = vmax.f32 %v3940_v20, 0.0  ;;  %v3944_v46 = vadd.f32 %v3943_v37, %v16160_v25  ;;  %v3822_v11 = vpop.f32.mrf.mxu0 }
 0x280   :  { %5592 = vst [vmem:[#allocation3 + $0x1a8] sm:$0xf] %v14241_v40  ;;  %v5503_v42 = vmax.f32 %v4218_v32, %v4219_v12  ;;  %v3823_v44 = vadd.f32 %v3822_v11, %v16160_v25  ;;  %v3945_v0 = vpop.f32.mrf.mxu1  ;;  %v4242_v23 = vmax.f32 %v3821_v26, 0.0 }
 0x281   :  { %5700 = vst [vmem:[#allocation3 + $0x1ac] sm:$0xf] %v14259_v30  ;;  %v5611_v18 = vmax.f32 %v4220_v39, %v4221_v51  ;;  %v3946_v56 = vadd.f32 %v3945_v0, %v16160_v25  ;;  %v3824_v58 = vpop.f32.mrf.mxu0  ;;  %7064 = vmatmul.mubr.bf16.vlgmr.msra.gmra.mxu0 %v17212_v15  ;;  %v4244_v47 = vmax.f32 %v3944_v46, 0.0  ;;  %v15285_v15 = vld [vmem:[%s19417_s3 + $0x4] ss:$8 sps:$4 sm:$0xff]  }
 0x282   :  { %v14242_v8 = vpack.c.bf16 %v5503_v42, %v5503_v42  ;;  %v4243_v55 = vmax.f32 %v3823_v44, 0.0  ;;  %v3825_v45 = vadd.f32 %v3824_v58, %v16171_v27  ;;  %v3947_v28 = vpop.f32.mrf.mxu1  ;;  %7021 = vmatmul.mubr.bf16.gmra.mxu1 %v17445_v22  ;;  %13337 = vmatprep.mubr.msk.bf16.mxu0 %vm6468_vm1, %v17219_v19 }
 0x283   :  { %v14260_v14 = vpack.c.bf16 %v5611_v18, %v5611_v18  ;;  %v4245_v61 = vmax.f32 %v3946_v56, 0.0  ;;  %v3948_v25 = vadd.f32 %v3947_v28, %v16171_v27  ;;  %v3826_v17 = vpop.f32.mrf.mxu0  ;;  %13346 = vmatprep.mubr.msk.bf16.mxu1 %vm6468_vm1, %v15285_v15 }
 0x284   :  { %5593 = vst [vmem:[#allocation3 + $0x1d8] sm:$0xf] %v14242_v8  ;;  %v5504_v6 = vmax.f32 %v4242_v23, %v4243_v55  ;;  %v3827_v43 = vadd.f32 %v3826_v17, %v16171_v27  ;;  %v3949_v3 = vpop.f32.mrf.mxu1  ;;  %v4266_v9 = vmax.f32 %v3825_v45, 0.0 }
 0x285   :  { %5701 = vst [vmem:[#allocation3 + $0x1dc] sm:$0xf] %v14260_v14  ;;  %v5612_v16 = vmax.f32 %v4244_v47, %v4245_v61  ;;  %v3950_v29 = vadd.f32 %v3949_v3, %v16171_v27  ;;  %v3830_v31 = vpop.f32.mrf.mxu0  ;;  %v4268_v49 = vmax.f32 %v3948_v25, 0.0 }
 0x286   :  { %v14243_v53 = vpack.c.bf16 %v5504_v6, %v5504_v6  ;;  %v4267_v38 = vmax.f32 %v3827_v43, 0.0  ;;  %v3831_v19 = vadd.f32 %v3830_v31, %v16140_v2  ;;  %v3953_v20 = vpop.f32.mrf.mxu1 }
 0x287   :  { %v14261_v59 = vpack.c.bf16 %v5612_v16, %v5612_v16  ;;  %v4269_v40 = vmax.f32 %v3950_v29, 0.0  ;;  %v3954_v32 = vadd.f32 %v3953_v20, %v16140_v2  ;;  %v3832_v12 = vpop.f32.mrf.mxu0 }
 0x288   :  { %5594 = vst [vmem:[#allocation3 + $0x208] sm:$0xf] %v14243_v53  ;;  %v5505_v26 = vmax.f32 %v4266_v9, %v4267_v38  ;;  %v3833_v37 = vadd.f32 %v3832_v12, %v16140_v2  ;;  %v3955_v30 = vpop.f32.mrf.mxu1  ;;  %v4290_v11 = vmax.f32 %v3831_v19, 0.0 }
 0x289   :  { %5702 = vst [vmem:[#allocation3 + $0x20c] sm:$0xf] %v14261_v59  ;;  %v5613_v27 = vmax.f32 %v4268_v49, %v4269_v40  ;;  %v3956_v39 = vadd.f32 %v3955_v30, %v16140_v2  ;;  %v3834_v51 = vpop.f32.mrf.mxu0  ;;  %7074 = vmatmul.mubr.bf16.gmra.mxu0 %v17233_v1  ;;  %v4292_v56 = vmax.f32 %v3954_v32, 0.0 }
 0x28a   :  { %v14244_v46 = vpack.c.bf16 %v5505_v26, %v5505_v26  ;;  %v4291_v42 = vmax.f32 %v3833_v37, 0.0  ;;  %v3835_v44 = vadd.f32 %v3834_v51, %v16154_v13  ;;  %v3957_v0 = vpop.f32.mrf.mxu1  ;;  %13338 = vmatprep.mubr.msk.bf16.mxu0 %vm6468_vm1, %v17262_v48 }
 0x28b   :  { %v14262_v18 = vpack.c.bf16 %v5613_v27, %v5613_v27  ;;  %v4293_v58 = vmax.f32 %v3956_v39, 0.0  ;;  %v3958_v8 = vadd.f32 %v3957_v0, %v16154_v13  ;;  %v3836_v23 = vpop.f32.mrf.mxu0 }
 0x28c   :  { %5595 = vst [vmem:[#allocation3 + $0x238] sm:$0xf] %v14244_v46  ;;  %v5506_v2 = vmax.f32 %v4290_v11, %v4291_v42  ;;  %v3837_v55 = vadd.f32 %v3836_v23, %v16154_v13  ;;  %v3959_v45 = vpop.f32.mrf.mxu1  ;;  %v4314_v61 = vmax.f32 %v3835_v44, 0.0 }
 0x28d   :  { %5703 = vst [vmem:[#allocation3 + $0x23c] sm:$0xf] %v14262_v18  ;;  %v5614_v28 = vmax.f32 %v4292_v56, %v4293_v58  ;;  %v3960_v14 = vadd.f32 %v3959_v45, %v16154_v13  ;;  %v3840_v47 = vpop.f32.mrf.mxu0  ;;  %v4316_v43 = vmax.f32 %v3958_v8, 0.0 }
 0x28e   :  { %v14245_v1 = vpack.c.bf16 %v5506_v2, %v5506_v2  ;;  %v4315_v25 = vmax.f32 %v3837_v55, 0.0  ;;  %v3841_v17 = vadd.f32 %v3840_v47, %v16133_v63  ;;  %v3963_v15 = vpop.f32.mrf.mxu1 }
 0x28f   :  { %v14263_v6 = vpack.c.bf16 %v5614_v28, %v5614_v28  ;;  %v4317_v3 = vmax.f32 %v3960_v14, 0.0  ;;  %v3964_v48 = vadd.f32 %v3963_v15, %v16133_v63  ;;  %v3842_v16 = vpop.f32.mrf.mxu0 }
 0x290   :  { %5596 = vst [vmem:[#allocation3 + $0x268] sm:$0xf] %v14245_v1  ;;  %v5507_v29 = vmax.f32 %v4314_v61, %v4315_v25  ;;  %v3843_v31 = vadd.f32 %v3842_v16, %v16133_v63  ;;  %v3965_v53 = vpop.f32.mrf.mxu1  ;;  %v4338_v20 = vmax.f32 %v3841_v17, 0.0 }
 0x291   :  { %5704 = vst [vmem:[#allocation3 + $0x26c] sm:$0xf] %v14263_v6  ;;  %v5615_v13 = vmax.f32 %v4316_v43, %v4317_v3  ;;  %v3966_v9 = vadd.f32 %v3965_v53, %v16133_v63  ;;  %v3844_v38 = vpop.f32.mrf.mxu0  ;;  %7084 = vmatmul.mubr.bf16.gmra.mxu0 %v17279_v52  ;;  %v4340_v12 = vmax.f32 %v3964_v48, 0.0 }
 0x292   :  { %v14246_v19 = vpack.c.bf16 %v5507_v29, %v5507_v29  ;;  %v4339_v59 = vmax.f32 %v3843_v31, 0.0  ;;  %v3845_v49 = vadd.f32 %v3844_v38, %v16148_v24  ;;  %v3967_v40 = vpop.f32.mrf.mxu1  ;;  %13339 = vmatprep.mubr.msk.bf16.mxu0 %vm6468_vm1, %v17286_v7 }
 0x293   :  { %v14264_v32 = vpack.c.bf16 %v5615_v13, %v5615_v13  ;;  %v4341_v26 = vmax.f32 %v3966_v9, 0.0  ;;  %v3968_v37 = vadd.f32 %v3967_v40, %v16148_v24  ;;  %v3846_v30 = vpop.f32.mrf.mxu0 }
 0x294   :  { %5597 = vst [vmem:[#allocation3 + $0x298] sm:$0xf] %v14246_v19  ;;  %v5508_v63 = vmax.f32 %v4338_v20, %v4339_v59  ;;  %v3847_v27 = vadd.f32 %v3846_v30, %v16148_v24  ;;  %v3969_v39 = vpop.f32.mrf.mxu1  ;;  %v4362_v42 = vmax.f32 %v3845_v49, 0.0 }
 0x295   :  { %5705 = vst [vmem:[#allocation3 + $0x29c] sm:$0xf] %v14264_v32  ;;  %v5616_v51 = vmax.f32 %v4340_v12, %v4341_v26  ;;  %v3970_v46 = vadd.f32 %v3969_v39, %v16148_v24  ;;  %v3850_v11 = vpop.f32.mrf.mxu0  ;;  %v4364_v58 = vmax.f32 %v3968_v37, 0.0 }
 0x296   :  { %v14247_v52 = vpack.c.bf16 %v5508_v63, %v5508_v63  ;;  %v4363_v44 = vmax.f32 %v3847_v27, 0.0  ;;  %v3851_v0 = vadd.f32 %v3850_v11, %v16529_v10  ;;  %v3973_v18 = vpop.f32.mrf.mxu1 }
 0x297   :  { %v14265_v56 = vpack.c.bf16 %v5616_v51, %v5616_v51  ;;  %v4365_v8 = vmax.f32 %v3970_v46, 0.0  ;;  %v3974_v7 = vadd.f32 %v3973_v18, %v16529_v10  ;;  %v3852_v23 = vpop.f32.mrf.mxu0  ;;  %v15039_v18 = vld [vmem:[#allocation3 + $0x20c] ss:$48 sps:$4 sm:$0xff]  }
 0x298   :  { %5598 = vst [vmem:[#allocation3 + $0x2c8] sm:$0xf] %v14247_v52  ;;  %v5509_v2 = vmax.f32 %v4362_v42, %v4363_v44  ;;  %v3853_v55 = vadd.f32 %v3852_v23, %v16529_v10  ;;  %v3975_v45 = vpop.f32.mrf.mxu1  ;;  %v4386_v1 = vmax.f32 %v3851_v0, 0.0 }
 0x299   :  { %5706 = vst [vmem:[#allocation3 + $0x2cc] sm:$0xf] %v14265_v56  ;;  %v5617_v24 = vmax.f32 %v4364_v58, %v4365_v8  ;;  %v3976_v28 = vadd.f32 %v3975_v45, %v16529_v10  ;;  %v3854_v14 = vpop.f32.mrf.mxu0  ;;  %7094 = vmatmul.mubr.bf16.gmra.mxu0 %v17303_v54  ;;  %v4388_v6 = vmax.f32 %v3974_v7, 0.0  ;;  %v15037_v8 = vld [vmem:[#allocation3 + $0x208] ss:$48 sps:$4 sm:$0xff]  }
 0x29a   :  { %v14248_v47 = vpack.c.bf16 %v5509_v2, %v5509_v2  ;;  %v4387_v61 = vmax.f32 %v3853_v55, 0.0  ;;  %v3855_v25 = vadd.f32 %v3854_v14, %v19499_v62  ;;  %v3977_v17 = vpop.f32.mrf.mxu1  ;;  %13340 = vmatprep.mubr.msk.bf16.mxu0 %vm6468_vm1, %v17310_v57  ;;  %v15042_v2 = vld [vmem:[#allocation3 + $0x1ac] ss:$48 sps:$4 sm:$0xff]  }
 0x29b   :  { %v14266_v15 = vpack.c.bf16 %v5617_v24, %v5617_v24  ;;  %v4389_v43 = vmax.f32 %v3976_v28, 0.0  ;;  %v3978_v3 = vadd.f32 %v3977_v17, %v19499_v62  ;;  %v3856_v48 = vpop.f32.mrf.mxu0  ;;  %v15034_v44 = vld [vmem:[#allocation3 + $0x268] ss:$48 sps:$4 sm:$0xff]   ;;  %v15048_v17 = vld [vmem:[#allocation3 + $0xec] ss:$48 sps:$4 sm:$0xff]  }
 0x29c   :  { %5599 = vst [vmem:[#allocation3 + $0x2f8] sm:$0xf] %v14248_v47  ;;  %v5510_v10 = vmax.f32 %v4386_v1, %v4387_v61  ;;  %v3857_v16 = vadd.f32 %v3856_v48, %v19499_v62  ;;  %v3979_v29 = vpop.f32.mrf.mxu1  ;;  %v4410_v9 = vmax.f32 %v3855_v25, 0.0  ;;  %v15036_v52 = vld [vmem:[#allocation3 + $0x26c] ss:$48 sps:$4 sm:$0xff]  }
 0x29d   :  { %5707 = vst [vmem:[#allocation3 + $0x2fc] sm:$0xf] %v14266_v15  ;;  %v5618_v31 = vmax.f32 %v4388_v6, %v4389_v43  ;;  %v3980_v53 = vadd.f32 %v3979_v29, %v19499_v62  ;;  %v17490_v13 = vpop.f32.mrf.mxu0  ;;  %v4412_v59 = vmax.f32 %v3978_v3, 0.0  ;;  %v15043_v1 = vld [vmem:[#allocation3 + $0x148] ss:$48 sps:$4 sm:$0xff]  }
 0x29e   :  { %v14249_v54 = vpack.c.bf16 %v5510_v10, %v5510_v10  ;;  %v4411_v38 = vmax.f32 %v3857_v16, 0.0  ;;  %v17492_v19 = vpop.f32.mrf.mxu1  ;;  %v15049_v16 = vld [vmem:[#allocation3 + $0x88] ss:$48 sps:$4 sm:$0xff]  }
 0x29f   :  { %v14267_v20 = vpack.c.bf16 %v5618_v31, %v5618_v31  ;;  %v4413_v49 = vmax.f32 %v3980_v53, 0.0  ;;  %v17494_v57 = vpop.f32.mrf.mxu0  ;;  %v15054_v53 = vld [vmem:[#allocation3 + $0x2c] ss:$48 sps:$4 sm:$0xff]  }
 0x2a0   :  { %5600 = vst [vmem:[#allocation3 + $0x328] sm:$0xf] %v14249_v54  ;;  %v5511_v40 = vmax.f32 %v4410_v9, %v4411_v38  ;;  %v17496_v32 = vpop.f32.mrf.mxu1  ;;  %v15052_v9 = vld [vmem:[#allocation3 + $0x28] ss:$48 sps:$4 sm:$0xff]  }
 0x2a1   :  { %5708 = vst [vmem:[#allocation3 + $0x32c] sm:$0xf] %v14267_v20  ;;  %v5619_v12 = vmax.f32 %v4412_v59, %v4413_v49  ;;  %v17498_v26 = vpop.f32.mrf.mxu0  ;;  %7104 = vmatmul.mubr.bf16.gmra.mxu0 %v17327_v36 }
 0x2a2   :  { %v14250_v62 = vpack.c.bf16 %v5511_v40, %v5511_v40  ;;  %v17500_v37 = vpop.f32.mrf.mxu1  ;;  %13341 = vmatprep.mubr.msk.bf16.mxu0 %vm6468_vm1, %v17334_v50 }
 0x2a3   :  { %v14268_v30 = vpack.c.bf16 %v5619_v12, %v5619_v12  ;;  %v17503_v63 = vpop.f32.mrf.mxu0  ;;  %v15031_v39 = vld [vmem:[#allocation3 + $0x2c8] ss:$48 sps:$4 sm:$0xff]  }
 0x2a4   :  { %5601 = vst [vmem:[#allocation3 + $0x358] sm:$0xf] %v14250_v62  ;;  %v17507_v27 = vpop.f32.mrf.mxu1  ;;  %v15033_v51 = vld [vmem:[#allocation3 + $0x2cc] ss:$48 sps:$4 sm:$0xff]  }
 0x2a5   :  { %5709 = vst [vmem:[#allocation3 + $0x35c] sm:$0xf] %v14268_v30  ;;  %v17509_v46 = vpop.f32.mrf.mxu0  ;;  %7164 = vmatprep.subr.bf16.mxu1 %v15033_v51 }
 0x2a6   :  { %v17511_v11 = vpop.f32.mrf.mxu1  ;;  %7165 = vmatpush1.bf16.msra.mxu1 %v15031_v39  ;;  %v17588_v39 = vld [vmem:[%s19418_s4 + $0x4] ss:$16 sps:$4 sm:$0xff]  }
 0x2a7   :  { %v17513_v42 = vpop.f32.mrf.mxu0  ;;  %7166 = vmatprep.subr.bf16.mxu1 %v15036_v52  ;;  %19507 = vst [vmem:[#allocation9_spill] sm:$0xff] %v17588_v39 }
 0x2a8   :  { %v17515_v36 = vpop.f32.mrf.mxu1 }
 0x2a9   :  { %v17517_v50 = vpop.f32.mrf.mxu0  ;;  %7114 = vmatmul.mubr.bf16.gmra.mxu0 %v17351_v21  ;;  %v15040_v21 = vld [vmem:[#allocation3 + $0x1a8] ss:$48 sps:$4 sm:$0xff]  }
 0x2aa   :  { %v17519_v0 = vpop.f32.mrf.mxu1  ;;  %7167 = vmatpush1.bf16.msra.mxu1 %v15034_v44  ;;  %13342 = vmatprep.mubr.msk.bf16.mxu0 %vm6468_vm1, %v17358_v4  ;;  %v15045_v4 = vld [vmem:[#allocation3 + $0x14c] ss:$48 sps:$4 sm:$0xff]  }
 0x2ab   :  { %v17522_v56 = vpop.f32.mrf.mxu0  ;;  %7168 = vmatprep.subr.bf16.mxu1 %v15039_v18  ;;  %v15055_v62 = vld [vmem:[#allocation3 + $0x328] ss:$48 sps:$4 sm:$0xff]  }
 0x2ac   :  { %v17526_v58 = vpop.f32.mrf.mxu1  ;;  %v15057_v20 = vld [vmem:[#allocation3 + $0x32c] ss:$48 sps:$4 sm:$0xff]  }
 0x2ad   :  { %v17528_v7 = vpop.f32.mrf.mxu0 }
 0x2ae   :  { %v17530_v23 = vpop.f32.mrf.mxu1  ;;  %7169 = vmatpush1.bf16.msra.mxu1 %v15037_v8 }
 0x2af   :  { %v17532_v55 = vpop.f32.mrf.mxu0  ;;  %7170 = vmatprep.subr.bf16.mxu1 %v15042_v2 }
 0x2b0   :  { %v17534_v45 = vpop.f32.mrf.mxu1 }
 0x2b1   :  { %v17536_v24 = vpop.f32.mrf.mxu0  ;;  %7124 = vmatmul.mubr.bf16.gmra.mxu0 %v17375_v5  ;;  %v15046_v5 = vld [vmem:[#allocation3 + $0xe8] ss:$48 sps:$4 sm:$0xff]  }
 0x2b2   :  { %v17538_v28 = vpop.f32.mrf.mxu1  ;;  %7171 = vmatpush1.bf16.msra.mxu1 %v15040_v21  ;;  %13343 = vmatprep.mubr.msk.bf16.mxu0 %vm6468_vm1, %v17382_v34  ;;  %v15051_v34 = vld [vmem:[#allocation3 + $0x8c] ss:$48 sps:$4 sm:$0xff]  }
 0x2b3   :  { %v17541_v14 = vpop.f32.mrf.mxu0  ;;  %7172 = vmatprep.subr.bf16.mxu1 %v15045_v4 }
 0x2b4   :  { %v17545_v47 = vpop.f32.mrf.mxu1 }
 0x2b5   :  { %v17547_v61 = vpop.f32.mrf.mxu0 }
 0x2b6   :  { %v17549_v25 = vpop.f32.mrf.mxu1  ;;  %7173 = vmatpush1.bf16.msra.mxu1 %v15043_v1  ;;  %v15286_v1 = vld [vmem:[%s19417_s3] ss:$8 sps:$4 sm:$0xff]  }
 0x2b7   :  { %v17551_v15 = vpop.f32.mrf.mxu0  ;;  %7174 = vmatprep.subr.bf16.mxu1 %v15048_v17 }
 0x2b8   :  { %v17553_v6 = vpop.f32.mrf.mxu1 }
 0x2b9   :  { %v17555_v43 = vpop.f32.mrf.mxu0  ;;  %7134 = vmatmul.mubr.bf16.gmra.mxu0 %v17399_v41 }
 0x2ba   :  { %v17557_v3 = vpop.f32.mrf.mxu1  ;;  %7175 = vmatpush1.bf16.msra.mxu1 %v15046_v5  ;;  %13344 = vmatprep.mubr.msk.bf16.mxu0 %vm6468_vm1, %v17406_v33  ;;  %v15287_v5 = vld [vmem:[%s19417_s3 + $0x14] ss:$8 sps:$4 sm:$0xff]  }
 0x2bb   :  { %v17560_v48 = vpop.f32.mrf.mxu0  ;;  %7176 = vmatprep.subr.bf16.mxu1 %v15051_v34 }
 0x2bc   :  { %v17564_v10 = vpop.f32.mrf.mxu1 }
 0x2bd   :  { %v17566_v29 = vpop.f32.mrf.mxu0 }
 0x2be   :  { %v17568_v31 = vpop.f32.mrf.mxu1  ;;  %7177 = vmatpush1.bf16.msra.mxu1 %v15049_v16 }
 0x2bf   :  { %v17570_v54 = vpop.f32.mrf.mxu0  ;;  %7178 = vmatprep.subr.bf16.mxu1 %v15054_v53 }
 0x2c0   :  { %v17572_v38 = vpop.f32.mrf.mxu1 }
 0x2c1   :  { %v17574_v59 = vpop.f32.mrf.mxu0  ;;  %7144 = vmatmul.mubr.bf16.gmra.mxu0 %v17423_v60 }
 0x2c2   :  { %v17576_v49 = vpop.f32.mrf.mxu1  ;;  %7179 = vmatpush1.bf16.msra.mxu1 %v15052_v9  ;;  %13345 = vmatprep.mubr.msk.bf16.mxu0 %vm6468_vm1, %v17430_v35 }
 0x2c3   :  { %v17579_v40 = vpop.f32.mrf.mxu0  ;;  %7194 = vmatprep.subr.bf16.mxu1 %v15057_v20 }
 0x2c4   :  { %v17583_v12 = vpop.f32.mrf.mxu1 }
 0x2c5   :  { %v6583_v30 = vpop.f32.mrf.mxu0 }
 0x2c6   :  { %v17590_v51 = vpop.f32.mrf.mxu1  ;;  %7195 = vmatpush2.bf16.msra.mxu1 %v15055_v62  ;;  %v7297_v2 = vmax.f32 %v17490_v13, %v6583_v30 }
 0x2c7   :  { %v6585_v52 = vpop.f32.mrf.mxu0 }
 0x2c8   :  { %v17592_v44 = vpop.f32.mrf.mxu1  ;;  %v7298_v13 = vmax.f32 %v17494_v57, %v6585_v52 }
 0x2c9   :  { %v6587_v8 = vpop.f32.mrf.mxu0  ;;  %7197 = vmatmul.mubr.bf16.vlgmr.msra.gmra.mxu1 %v15286_v1  ;;  %7154 = vmatmul.mubr.bf16.gmra.mxu0 %v17445_v22 }
 0x2ca   :  { %v7309_v21 = vmax.f32 %v17498_v26, %v6587_v8  ;;  %v17598_v4 = vpop.f32.mrf.mxu1  ;;  %13347 = vmatprep.mubr.msk.bf16.mxu1 %vm6468_vm1, %v15287_v5  ;;  %9613 = vmatprep.mubr.bf16.mxu0 %v17588_v39 }
 0x2cb   :  { %v6589_v17 = vpop.f32.mrf.mxu0 }
 0x2cc   :  { %v17610_v26 = vpack.c.bf16 %v7309_v21, %v7297_v2  ;;  %v7310_v34 = vmax.f32 %v17503_v63, %v6589_v17  ;;  %v17613_v16 = vpop.f32.mrf.mxu1  ;;  %v15288_v63 = vld [vmem:[%s19417_s3 + $0x10] ss:$8 sps:$4 sm:$0xff]   ;;  %v15289_v21 = vld [vmem:[%s19417_s3 + $0x24] ss:$8 sps:$4 sm:$0xff]  }
 0x2cd   :  { %v6593_v53 = vpop.f32.mrf.mxu0 }
 0x2ce   :  { %v17615_v9 = vpack.c.bf16 %v7310_v34, %v7298_v13  ;;  %v6726_v20 = vpop.f32.mrf.mxu1  ;;  %v7321_v5 = vmax.f32 %v17509_v46, %v6593_v53 }
 0x2cf   :  { %v6595_v62 = vpop.f32.mrf.mxu0 }
 0x2d0   :  { %v17617_v30 = vpop.f32.mrf.mxu1 }
 0x2d1   :  { %19508 = vst [vmem:[#allocation10_spill] sm:$0xff] %v17617_v30  ;;  %v6597_v1 = vpop.f32.mrf.mxu0  ;;  %7207 = vmatmul.mubr.bf16.gmra.mxu1 %v15288_v63  ;;  %v15290_v30 = vld [vmem:[%s19417_s3 + $0x20] ss:$8 sps:$4 sm:$0xff]  }
 0x2d2   :  { %v7333_v57 = vmax.f32 %v17517_v50, %v6597_v1  ;;  %v6730_v52 = vpop.f32.mrf.mxu1  ;;  %13348 = vmatprep.mubr.msk.bf16.mxu1 %vm6468_vm1, %v15289_v21  ;;  %v7323_v1 = vmax.f32 %v17511_v11, %v6726_v20 }
 0x2d3   :  { %v6599_v2 = vpop.f32.mrf.mxu0  ;;  %v7335_v63 = vmax.f32 %v17519_v0, %v6730_v52  ;;  %v15291_v0 = vld [vmem:[%s19417_s3 + $0x34] ss:$8 sps:$4 sm:$0xff]  }
 0x2d4   :  { %v17630_v17 = vpack.c.bf16 %v7333_v57, %v7321_v5  ;;  %v17632_v13 = vpop.f32.mrf.mxu1 }
 0x2d5   :  { %v6603_v46 = vpop.f32.mrf.mxu0  ;;  %v17657_v52 = vpack.c.bf16 %v7335_v63, %v7323_v1 }
 0x2d6   :  { %v6736_v34 = vpop.f32.mrf.mxu1  ;;  %v7345_v5 = vmax.f32 %v17528_v7, %v6603_v46  ;;  %v7334_v46 = vmax.f32 %v17522_v56, %v6599_v2 }
 0x2d7   :  { %v6605_v50 = vpop.f32.mrf.mxu0  ;;  %v7347_v8 = vmax.f32 %v17530_v23, %v6736_v34 }
 0x2d8   :  { %v17634_v53 = vpop.f32.mrf.mxu1  ;;  %v7346_v23 = vmax.f32 %v17532_v55, %v6605_v50  ;;  %v7311_v55 = vmax.f32 %v17500_v37, %v17598_v4 }
 0x2d9   :  { %v6607_v39 = vpop.f32.mrf.mxu0  ;;  %7217 = vmatmul.mubr.bf16.gmra.mxu1 %v15290_v30 }
 0x2da   :  { %v7357_v57 = vmax.f32 %v17536_v24, %v6607_v39  ;;  %v6740_v21 = vpop.f32.mrf.mxu1  ;;  %13349 = vmatprep.mubr.msk.bf16.mxu1 %vm6468_vm1, %v15291_v0  ;;  %v7299_v0 = vmax.f32 %v17492_v19, %v17590_v51  ;;  %v15292_v19 = vld [vmem:[%s19417_s3 + $0x30] ss:$8 sps:$4 sm:$0xff]  }
 0x2db   :  { %v7359_v11 = vmax.f32 %v17538_v28, %v6740_v21  ;;  %v6609_v20 = vpop.f32.mrf.mxu0 }
 0x2dc   :  { %v17652_v7 = vpack.c.bf16 %v7357_v57, %v7345_v5  ;;  %v7358_v24 = vmax.f32 %v17541_v14, %v6609_v20  ;;  %v17655_v39 = vpop.f32.mrf.mxu1  ;;  %v7322_v14 = vmax.f32 %v17513_v42, %v6595_v62  ;;  %v17678_v51 = vpack.c.bf16 %v7311_v55, %v7299_v0  ;;  %v15293_v42 = vld [vmem:[%s19417_s3 + $0x44] ss:$8 sps:$4 sm:$0xff]   ;;  %v15295_v55 = vld [vmem:[%s19417_s3 + $0x54] ss:$8 sps:$4 sm:$0xff]  }
 0x2dd   :  { %v17659_v30 = vpack.c.bf16 %v7359_v11, %v7347_v8  ;;  %v6613_v28 = vpop.f32.mrf.mxu0 }
 0x2de   :  { %v17662_v34 = vpack.c.bf16 %v7358_v24, %v7346_v23  ;;  %v6746_v21 = vpop.f32.mrf.mxu1  ;;  %v14560_v2 = vpack.c.bf16 %v7334_v46, %v7322_v14 }
 0x2df   :  { %v6615_v50 = vpop.f32.mrf.mxu0  ;;  %9581 = vmatprep.subr.bf16.mxu0 %v17659_v30  ;;  %v7371_v56 = vmax.f32 %v17549_v25, %v6746_v21 }
 0x2e0   :  { %9582 = vmatpush1.bf16.msra.mxu0 %v17662_v34  ;;  %v17671_v8 = vpop.f32.mrf.mxu1 }
 0x2e1   :  { %v6617_v1 = vpop.f32.mrf.mxu0  ;;  %9583 = vmatprep.subr.bf16.mxu0 %v17657_v52  ;;  %7227 = vmatmul.mubr.bf16.gmra.mxu1 %v15292_v19 }
 0x2e2   :  { %v6750_v37 = vpop.f32.mrf.mxu1  ;;  %13350 = vmatprep.mubr.msk.bf16.mxu1 %vm6468_vm1, %v15293_v42 }
 0x2e3   :  { %v6619_v4 = vpop.f32.mrf.mxu0  ;;  %v7383_v62 = vmax.f32 %v17557_v3, %v6750_v37  ;;  %v15294_v3 = vld [vmem:[%s19417_s3 + $0x40] ss:$8 sps:$4 sm:$0xff]  }
 0x2e4   :  { %9584 = vmatpush1.bf16.msra.mxu0 %v14560_v2  ;;  %v17685_v25 = vpop.f32.mrf.mxu1 }
 0x2e5   :  { %v6623_v63 = vpop.f32.mrf.mxu0  ;;  %9585 = vmatprep.subr.bf16.mxu0 %v17678_v51  ;;  %v17688_v5 = vpack.c.bf16 %v7383_v62, %v7371_v56  ;;  %v7382_v56 = vmax.f32 %v17560_v48, %v6619_v4  ;;  %v7370_v62 = vmax.f32 %v17551_v15, %v6615_v50  ;;  %v15296_v15 = vld [vmem:[%s19417_s3 + $0x50] ss:$8 sps:$4 sm:$0xff]   ;;  %v15297_v50 = vld [vmem:[%s19417_s3 + $0x64] ss:$8 sps:$4 sm:$0xff]  }
 0x2e6   :  { %v6756_v57 = vpop.f32.mrf.mxu1  ;;  %v7393_v37 = vmax.f32 %v17566_v29, %v6623_v63  ;;  %v15298_v63 = vld [vmem:[%s19417_s3 + $0x60] ss:$8 sps:$4 sm:$0xff]  }
 0x2e7   :  { %v6625_v11 = vpop.f32.mrf.mxu0  ;;  %v7395_v24 = vmax.f32 %v17568_v31, %v6756_v57  ;;  %v17717_v48 = vpack.c.bf16 %v7382_v56, %v7370_v62 }
 0x2e8   :  { %9586 = vmatpush1.bf16.msra.mxu0 %v17615_v9  ;;  %v17691_v20 = vpop.f32.mrf.mxu1  ;;  %v7394_v31 = vmax.f32 %v17570_v54, %v6625_v11  ;;  %v7369_v54 = vmax.f32 %v17547_v61, %v6613_v28 }
 0x2e9   :  { %v6627_v23 = vpop.f32.mrf.mxu0  ;;  %7237 = vmatmul.mubr.bf16.gmra.mxu1 %v15294_v3 }
 0x2ea   :  { %v6760_v46 = vpop.f32.mrf.mxu1  ;;  %v7405_v21 = vmax.f32 %v17574_v59, %v6627_v23  ;;  %13351 = vmatprep.mubr.msk.bf16.mxu1 %vm6468_vm1, %v15295_v55  ;;  %v7381_v23 = vmax.f32 %v17555_v43, %v6617_v1 }
 0x2eb   :  { %v6629_v0 = vpop.f32.mrf.mxu0  ;;  %v7407_v14 = vmax.f32 %v17576_v49, %v6760_v46 }
 0x2ec   :  { %v7406_v19 = vmax.f32 %v17579_v40, %v6629_v0  ;;  %v14583_v3 = vpack.c.bf16 %v7405_v21, %v7393_v37  ;;  %v14575_v43 = vpack.c.bf16 %v7381_v23, %v7369_v54  ;;  %v17738_v1 = vpop.f32.mrf.mxu1 }
 0x2ed   :  { %v17707_v42 = vpop.f32.mrf.mxu0  ;;  %v17709_v59 = vpack.c.bf16 %v7407_v14, %v7395_v24 }
 0x2ee   :  { %v17712_v57 = vpack.c.bf16 %v7406_v19, %v7394_v31 }
 0x2ef   :  { %v17715_v49 = vpop.f32.mrf.mxu0 }
 0x2f0   :  { %9587 = vmatprep.subr.bf16.mxu0 %v17712_v57 }
 0x2f1   :  { %v17721_v29 = vpop.f32.mrf.mxu0  ;;  %9588 = vmatpush1.bf16.msra.mxu0 %v14583_v3  ;;  %7247 = vmatmul.mubr.bf16.gmra.mxu1 %v15296_v15  ;;  %v17806_v15 = vld [vmem:[%s19418_s4 + $0xc] ss:$16 sps:$4 sm:$0xff]  }
 0x2f2   :  { %9589 = vmatprep.subr.bf16.mxu0 %v17717_v48  ;;  %13352 = vmatprep.mubr.msk.bf16.mxu1 %vm6468_vm1, %v15297_v50  ;;  %19516 = vst [vmem:[#allocation15_spill] sm:$0xff] %v17806_v15 }
 0x2f3   :  { %v17727_v40 = vpop.f32.mrf.mxu0 }
 0x2f5   :  { %v17733_v61 = vpop.f32.mrf.mxu0  ;;  %9590 = vmatpush1.bf16.msra.mxu0 %v14575_v43 }
 0x2f6   :  { %9591 = vmatprep.subr.bf16.mxu0 %v17662_v34  ;;  %v15299_v34 = vld [vmem:[%s19417_s3 + $0x74] ss:$8 sps:$4 sm:$0xff]  }
 0x2f7   :  { %v17736_v28 = vpop.f32.mrf.mxu0 }
 0x2f9   :  { %v17740_v4 = vpop.f32.mrf.mxu0  ;;  %9592 = vmatpush1.bf16.msra.mxu0 %v17652_v7  ;;  %7257 = vmatmul.mubr.bf16.gmra.mxu1 %v15298_v63 }
 0x2fa   :  { %9593 = vmatprep.subr.bf16.mxu0 %v14560_v2  ;;  %v17746_v11 = vpop.f32.mrf.mxu1  ;;  %13353 = vmatprep.mubr.msk.bf16.mxu1 %vm6468_vm1, %v15299_v34 }
 0x2fb   :  { %v17748_v24 = vpop.f32.mrf.mxu0 }
 0x2fc   :  { %v17754_v46 = vpop.f32.mrf.mxu1 }
 0x2fd   :  { %19509 = vst [vmem:[#allocation8_spill] sm:$0xff] %v17754_v46  ;;  %v17756_v21 = vpop.f32.mrf.mxu0  ;;  %9594 = vmatpush1.bf16.msra.mxu0 %v17630_v17 }
 0x2fe   :  { %9595 = vmatprep.subr.bf16.mxu0 %v17615_v9  ;;  %v17760_v7 = vpop.f32.mrf.mxu1 }
 0x2ff   :  { %v17762_v2 = vpop.f32.mrf.mxu0 }
 0x300   :  { %v17764_v0 = vpop.f32.mrf.mxu1 }
 0x301   :  { %19510 = vst [vmem:[#allocation11_spill] sm:$0xff] %v17764_v0  ;;  %v17766_v55 = vpop.f32.mrf.mxu0  ;;  %9596 = vmatpush1.bf16.msra.mxu0 %v17610_v26  ;;  %7267 = vmatmul.mubr.bf16.gmra.mxu1 %v17399_v41 }
 0x302   :  { %v17770_v14 = vpop.f32.mrf.mxu1  ;;  %13354 = vmatprep.mubr.msk.bf16.mxu1 %vm6468_vm1, %v17406_v33 }
 0x303   :  { %v17772_v56 = vpop.f32.mrf.mxu0 }
 0x304   :  { %v17776_v9 = vpop.f32.mrf.mxu1 }
 0x305   :  { %19511 = vst [vmem:[#allocation12_spill] sm:$0xff] %v17776_v9  ;;  %v17778_v17 = vpop.f32.mrf.mxu0  ;;  %v7396_v9 = vmax.f32 %v17572_v38, %v17691_v20  ;;  %v7384_v20 = vmax.f32 %v17564_v10, %v17685_v25 }
 0x306   :  { %v17780_v31 = vpop.f32.mrf.mxu1 }
 0x307   :  { %v17782_v19 = vpop.f32.mrf.mxu0 }
 0x308   :  { %v17784_v37 = vpop.f32.mrf.mxu1 }
 0x309   :  { %19512 = vst [vmem:[#allocation7_spill] sm:$0xff] %v17784_v37  ;;  %v17786_v26 = vpop.f32.mrf.mxu0  ;;  %7277 = vmatmul.mubr.bf16.gmra.mxu1 %v17423_v60  ;;  %v7312_v37 = vmax.f32 %v17507_v27, %v17613_v16  ;;  %v19520_v27 = vmax.f32 %v17496_v32, %v17592_v44 }
 0x30a   :  { %v17789_v41 = vpop.f32.mrf.mxu1  ;;  %13355 = vmatprep.mubr.msk.bf16.mxu1 %vm6468_vm1, %v17430_v35 }
 0x30b   :  { %19513 = vst [vmem:[#allocation13_spill] sm:$0xff] %v17789_v41  ;;  %v17791_v62 = vpop.f32.mrf.mxu0  ;;  %v17846_v16 = vpack.c.bf16 %v7312_v37, %v19520_v27 }
 0x30c   :  { %v17795_v33 = vpop.f32.mrf.mxu1 }
 0x30d   :  { %19514 = vst [vmem:[#allocation6_spill] sm:$0xff] %v17795_v33  ;;  %v17797_v23 = vpop.f32.mrf.mxu0 }
 0x30e   :  { %v17799_v3 = vpop.f32.mrf.mxu1 }
 0x30f   :  { %19515 = vst [vmem:[#allocation14_spill] sm:$0xff] %v17799_v3  ;;  %v17801_v54 = vpop.f32.mrf.mxu0  ;;  %v7408_v3 = vmax.f32 %v17583_v12, %v17738_v1  ;;  %v7372_v12 = vmax.f32 %v17553_v6, %v17671_v8  ;;  %v7360_v6 = vmax.f32 %v17545_v47, %v17655_v39  ;;  %v7336_v39 = vmax.f32 %v17526_v58, %v17632_v13  ;;  %v19522_v58 = vld [vmem:[#allocation10_spill] sm:$0xff] }
 0x310   :  { %v17808_v60 = vpop.f32.mrf.mxu1  ;;  %v19523_v13 = vmax.f32 %v17515_v36, %v19522_v58 }
 0x311   :  { %19517 = vst [vmem:[#allocation16_spill] sm:$0xff] %v17808_v60  ;;  %v17810_v43 = vpop.f32.mrf.mxu0  ;;  %7287 = vmatmul.mubr.bf16.gmra.mxu1 %v17445_v22  ;;  %v17865_v8 = vpack.c.bf16 %v7384_v20, %v7372_v12 }
 0x312   :  { %v17813_v35 = vpop.f32.mrf.mxu1  ;;  %13698 = vmatprep.mubr.msk.bf16.mxu1 %vm6468_vm1, %v17806_v15  ;;  %v17895_v20 = vpack.c.bf16 %v7336_v39, %v19523_v13 }
 0x313   :  { %19518 = vst [vmem:[#allocation17_spill] sm:$0xff] %v17813_v35  ;;  %v17815_v50 = vpop.f32.mrf.mxu0 }
 0x314   :  { %v17819_v63 = vpop.f32.mrf.mxu1 }
 0x315   :  { %v6849_v34 = vpop.f32.mrf.mxu0 }
 0x316   :  { %v17821_v18 = vpop.f32.mrf.mxu1  ;;  %v7301_v15 = vmax.f32 %v17707_v42, %v6849_v34  ;;  %v17852_v42 = vpack.c.bf16 %v7408_v3, %v7396_v9 }
 0x317   :  { %19519 = vst [vmem:[#allocation18_spill] sm:$0xff] %v17821_v18  ;;  %v17823_v0 = vpop.f32.mrf.mxu0 }
 0x318   :  { %v17825_v46 = vpop.f32.mrf.mxu1 }
 0x319   :  { %v6853_v22 = vpop.f32.mrf.mxu0 }
 0x31a   :  { %v7313_v41 = vmax.f32 %v17721_v29, %v6853_v22  ;;  %v17835_v60 = vpop.f32.mrf.mxu1 }
 0x31b   :  { %v17837_v33 = vpop.f32.mrf.mxu0 }
 0x31c   :  { %v17839_v18 = vpack.c.bf16 %v7313_v41, %v7301_v15  ;;  %v17841_v35 = vpop.f32.mrf.mxu1 }
 0x31d   :  { %v6859_v38 = vpop.f32.mrf.mxu0 }
 0x31e   :  { %9597 = vmatprep.subr.bf16.mxu0 %v17839_v18  ;;  %v17855_v29 = vpop.f32.mrf.mxu1  ;;  %v7325_v10 = vmax.f32 %v17733_v61, %v6859_v38  ;;  %v19521_v61 = vmax.f32 %v17534_v45, %v17634_v53 }
 0x31f   :  { %v17857_v1 = vpop.f32.mrf.mxu0  ;;  %9598 = vmatpush2.bf16.msra.mxu0 %v17846_v16 }
 0x320   :  { %9599 = vmatprep.subr.bf16.mxu0 %v17852_v42  ;;  %v17861_v32 = vpop.f32.mrf.mxu1 }
 0x321   :  { %v6863_v44 = vpop.f32.mrf.mxu0 }
 0x322   :  { %v7337_v25 = vmax.f32 %v17740_v4, %v6863_v44  ;;  %v6982_v9 = vpop.f32.mrf.mxu1  ;;  %v17883_v4 = vpack.c.bf16 %v7360_v6, %v19521_v61 }
 0x323   :  { %v17869_v37 = vpop.f32.mrf.mxu0  ;;  %9600 = vmatpush2.bf16.msra.mxu0 %v17709_v59  ;;  %v7303_v47 = vmax.f32 %v17746_v11, %v6982_v9 }
 0x324   :  { %v17872_v41 = vpack.c.bf16 %v7337_v25, %v7325_v10  ;;  %9601 = vmatprep.subr.bf16.mxu0 %v17865_v8  ;;  %v17875_v3 = vpop.f32.mrf.mxu1 }
 0x325   :  { %v6869_v15 = vpop.f32.mrf.mxu0 }
 0x326   :  { %v6986_v34 = vpop.f32.mrf.mxu1 }
 0x327   :  { %v6871_v22 = vpop.f32.mrf.mxu0  ;;  %9602 = vmatpush2.bf16.msra.mxu0 %v17688_v5  ;;  %v7315_v27 = vmax.f32 %v17760_v7, %v6986_v34 }
 0x328   :  { %9603 = vmatprep.subr.bf16.mxu0 %v17883_v4  ;;  %v17888_v38 = vpop.f32.mrf.mxu1 }
 0x329   :  { %v6873_v12 = vpop.f32.mrf.mxu0  ;;  %v17890_v11 = vpack.c.bf16 %v7315_v27, %v7303_v47 }
 0x32a   :  { %v6992_v45 = vpop.f32.mrf.mxu1 }
 0x32b   :  { %v6875_v53 = vpop.f32.mrf.mxu0  ;;  %9604 = vmatpush2.bf16.msra.mxu0 %v17659_v30  ;;  %v7327_v6 = vmax.f32 %v17770_v14, %v6992_v45 }
 0x32c   :  { %9605 = vmatprep.subr.bf16.mxu0 %v17895_v20  ;;  %v17899_v44 = vpop.f32.mrf.mxu1  ;;  %v7362_v14 = vmax.f32 %v17772_v56, %v6875_v53  ;;  %v7338_v56 = vmax.f32 %v17748_v24, %v17869_v37  ;;  %v17945_v24 = vld [vmem:[%s19418_s4] ss:$16 sps:$4 sm:$0xff]   ;;  %v7314_v37 = vmax.f32 %v17727_v40, %v17837_v33 }
 0x32d   :  { %v6879_v7 = vpop.f32.mrf.mxu0  ;;  %19524 = vst [vmem:[#allocation10_spill] sm:$0xff] %v17945_v24 }
 0x32e   :  { %v6996_v10 = vpop.f32.mrf.mxu1 }
 0x32f   :  { %v6881_v25 = vpop.f32.mrf.mxu0  ;;  %9606 = vmatpush2.bf16.msra.mxu0 %v17657_v52  ;;  %v7339_v9 = vmax.f32 %v17780_v31, %v6996_v10  ;;  %v7373_v31 = vmax.f32 %v17778_v17, %v6879_v7 }
 0x330   :  { %9607 = vmatprep.subr.bf16.mxu0 %v17846_v16  ;;  %v17907_v39 = vpop.f32.mrf.mxu1  ;;  %v7374_v27 = vmax.f32 %v17782_v19, %v6881_v25  ;;  %v7349_v19 = vmax.f32 %v17756_v21, %v6869_v15  ;;  %v17951_v21 = vld [vmem:[%s19418_s4 + $0x24] ss:$16 sps:$4 sm:$0xff]  }
 0x331   :  { %v6883_v36 = vpop.f32.mrf.mxu0  ;;  %v17905_v47 = vpack.c.bf16 %v7339_v9, %v7327_v6  ;;  %v7350_v6 = vmax.f32 %v17762_v2, %v6871_v22  ;;  %19525 = vst [vmem:[#allocation19_spill] sm:$0xff] %v17951_v21 }
 0x332   :  { %v7385_v61 = vmax.f32 %v17786_v26, %v6883_v36  ;;  %v17916_v45 = vpop.f32.mrf.mxu1  ;;  %v7361_v26 = vmax.f32 %v17766_v55, %v6873_v12 }
 0x333   :  { %v6885_v34 = vpop.f32.mrf.mxu0  ;;  %9608 = vmatpush2.bf16.msra.mxu0 %v17678_v51 }
 0x334   :  { %v7386_v58 = vmax.f32 %v17791_v62, %v6885_v34  ;;  %9609 = vmatprep.subr.bf16.mxu0 %v17709_v59  ;;  %v17922_v9 = vpack.c.bf16 %v7385_v61, %v7373_v31  ;;  %v17928_v62 = vpack.c.bf16 %v7362_v14, %v7350_v6  ;;  %v17935_v2 = vpop.f32.mrf.mxu1  ;;  %v17939_v55 = vpack.c.bf16 %v7361_v26, %v7349_v19  ;;  %v18009_v14 = vld [vmem:[%s19418_s4 + $0x40] ss:$16 sps:$4 sm:$0xff]  }
 0x335   :  { %v6889_v13 = vpop.f32.mrf.mxu0 }
 0x336   :  { %v17920_v10 = vpack.c.bf16 %v7386_v58, %v7374_v27  ;;  %v17959_v15 = vpop.f32.mrf.mxu1  ;;  %v18017_v58 = vld [vmem:[%s19418_s4 + $0x64] ss:$16 sps:$4 sm:$0xff]  }
 0x337   :  { %9610 = vmatpush2.bf16.msra.mxu0 %v17712_v57  ;;  %v17930_v17 = vpop.f32.mrf.mxu0  ;;  %v7326_v57 = vmax.f32 %v17736_v28, %v17857_v1 }
 0x338   :  { %9611 = vmatprep.subr.bf16.mxu0 %v17688_v5  ;;  %9694 = vmatprep.subr.bf16.mxu1 %v17920_v10  ;;  %v17972_v12 = vpop.f32.mrf.mxu1  ;;  %v7398_v19 = vmax.f32 %v17801_v54, %v17930_v17 }
 0x339   :  { %9695 = vmatpush1.bf16.msra.mxu1 %v17922_v9  ;;  %v17955_v28 = vpack.c.bf16 %v7338_v56, %v7326_v57  ;;  %v6893_v1 = vpop.f32.mrf.mxu0 }
 0x33a   :  { %9696 = vmatprep.subr.bf16.mxu1 %v17928_v62  ;;  %v7409_v33 = vmax.f32 %v17810_v43, %v6893_v1  ;;  %v17987_v43 = vld [vmem:[%s19418_s4 + $0x44] ss:$16 sps:$4 sm:$0xff]   ;;  %v7012_v25 = vpop.f32.mrf.mxu1  ;;  %v19528_v1 = vld [vmem:[#allocation17_spill] sm:$0xff] }
 0x33b   :  { %9612 = vmatpush2.bf16.msra.mxu0 %v17717_v48  ;;  %v7302_v48 = vmax.f32 %v17715_v49, %v17823_v0  ;;  %v6895_v22 = vpop.f32.mrf.mxu0  ;;  %v7397_v49 = vmax.f32 %v17797_v23, %v6889_v13  ;;  %v17979_v0 = vld [vmem:[%s19418_s4 + $0x20] ss:$16 sps:$4 sm:$0xff]   ;;  %19527 = vst [vmem:[#allocation21_spill] sm:$0xff] %v17987_v43 }
 0x33c   :  { %9807 = vmatprep.subr.bf16.mxu0 %v17939_v55  ;;  %19526 = vst [vmem:[#allocation20_spill] sm:$0xff] %v17979_v0  ;;  %v7014_v34 = vpop.f32.mrf.mxu1 }
 0x33d   :  { %9697 = vmatpush1.bf16.msra.mxu1 %v17939_v55  ;;  %v17967_v40 = vpack.c.bf16 %v7314_v37, %v7302_v48  ;;  %v17989_v7 = vpack.c.bf16 %v7409_v33, %v7397_v49  ;;  %v7376_v54 = vmax.f32 %v17819_v63, %v7014_v34  ;;  %v7375_v48 = vmax.f32 %v19528_v1, %v7012_v25  ;;  %v19529_v33 = vld [vmem:[#allocation18_spill] sm:$0xff]  ;;  %v19531_v49 = vld [vmem:[#allocation16_spill] sm:$0xff]  ;;  %v18076_v25 = vld [vmem:[%s19418_s4 + $0x8] ss:$16 sps:$4 sm:$0xff]  }
 0x33e   :  { %9614 = vmatmul.mubr.bf16.vlgmr.msra.gmra.mxu0 %v17945_v24  ;;  %9698 = vmatprep.subr.bf16.mxu1 %v17955_v28  ;;  %v7016_v13 = vpop.f32.mrf.mxu1  ;;  %v18104_v1 = vld [vmem:[%s19418_s4 + $0xa4] ss:$16 sps:$4 sm:$0xff]  }
 0x33f   :  { %9808 = vmatpush1.bf16.msra.mxu0 %v17883_v4  ;;  %9623 = vmatprep.mubr.bf16.mxu0 %v17951_v21 }
 0x340   :  { %9809 = vmatprep.subr.bf16.mxu0 %v17872_v41  ;;  %v7018_v56 = vpop.f32.mrf.mxu1 }
 0x341   :  { %9699 = vmatpush1.bf16.msra.mxu1 %v17872_v41  ;;  %v17981_v53 = vpop.f32.mrf.mxu0  ;;  %v7388_v17 = vmax.f32 %v17825_v46, %v7018_v56  ;;  %v19530_v46 = vld [vmem:[#allocation6_spill] sm:$0xff] }
 0x342   :  { %9700 = vmatprep.subr.bf16.mxu1 %v17967_v40  ;;  %v7352_v63 = vmax.f32 %v19530_v46, %v17935_v2  ;;  %v19534_v56 = vld [vmem:[#allocation14_spill] sm:$0xff] }
 0x343   :  { %9810 = vmatpush1.bf16.msra.mxu0 %v17895_v20  ;;  %v17992_v23 = vpop.f32.mrf.mxu0  ;;  %v18070_v34 = vpack.c.bf16 %v7388_v17, %v7376_v54  ;;  %v7022_v17 = vpop.f32.mrf.mxu1 }
 0x344   :  { %9811 = vmatprep.subr.bf16.mxu0 %v17839_v18 }
 0x345   :  { %9701 = vmatpush1.bf16.msra.mxu1 %v17839_v18  ;;  %v17997_v36 = vpop.f32.mrf.mxu0  ;;  %19532 = vst [vmem:[#allocation17_spill] sm:$0xff] %v18070_v34 }
 0x346   :  { %9624 = vmatmul.mubr.bf16.gmra.mxu0 %v17979_v0  ;;  %9702 = vmatprep.subr.bf16.mxu1 %v17989_v7 }
 0x347   :  { %9812 = vmatpush1.bf16.msra.mxu0 %v17846_v16  ;;  %9633 = vmatprep.mubr.bf16.mxu0 %v17987_v43  ;;  %v18002_v61 = vpop.f32.mrf.mxu0 }
 0x348   :  { %9813 = vmatprep.subr.bf16.mxu0 %v17852_v42 }
 0x349   :  { %9703 = vmatpush1.bf16.msra.mxu1 %v17852_v42  ;;  %v18011_v27 = vpop.f32.mrf.mxu0 }
 0x34a   :  { %9704 = vmatprep.subr.bf16.mxu1 %v17922_v9 }
 0x34b   :  { %9814 = vmatpush1.bf16.msra.mxu0 %v17709_v59  ;;  %v18020_v31 = vpop.f32.mrf.mxu0  ;;  %v7410_v59 = vmax.f32 %v17815_v50, %v6895_v22  ;;  %v18048_v50 = vld [vmem:[%s19418_s4 + $0x84] ss:$16 sps:$4 sm:$0xff]   ;;  %v7387_v22 = vmax.f32 %v19529_v33, %v7016_v13 }
 0x34c   :  { %9815 = vmatprep.subr.bf16.mxu0 %v17865_v8  ;;  %v19535_v33 = vld [vmem:[#allocation12_spill] sm:$0xff] }
 0x34d   :  { %9705 = vmatpush1.bf16.msra.mxu1 %v17865_v8  ;;  %v18025_v6 = vpop.f32.mrf.mxu0  ;;  %v18098_v54 = vpack.c.bf16 %v7387_v22, %v7375_v48  ;;  %v7328_v46 = vmax.f32 %v19535_v33, %v17899_v44  ;;  %v19538_v48 = vld [vmem:[#allocation8_spill] sm:$0xff] }
 0x34e   :  { %9634 = vmatmul.mubr.bf16.gmra.mxu0 %v18009_v14  ;;  %9706 = vmatprep.subr.bf16.mxu1 %v17939_v55  ;;  %v7304_v22 = vmax.f32 %v19538_v48, %v17875_v3  ;;  %v18147_v3 = vld [vmem:[%s19418_s4 + $0x4c] ss:$16 sps:$4 sm:$0xff]   ;;  %v18161_v33 = vld [vmem:[%s19418_s4 + $0xc4] ss:$16 sps:$4 sm:$0xff]  }
 0x34f   :  { %9816 = vmatpush1.bf16.msra.mxu0 %v17688_v5  ;;  %9643 = vmatprep.mubr.bf16.mxu0 %v18017_v58  ;;  %v18031_v26 = vpop.f32.mrf.mxu0  ;;  %v18040_v5 = vld [vmem:[%s19418_s4 + $0x60] ss:$16 sps:$4 sm:$0xff]   ;;  %19541 = vst [vmem:[#allocation16_spill] sm:$0xff] %v18161_v33 }
 0x350   :  { %9817 = vmatprep.subr.bf16.mxu0 %v17883_v4 }
 0x351   :  { %9707 = vmatpush1.bf16.msra.mxu1 %v17883_v4  ;;  %v18042_v57 = vpop.f32.mrf.mxu0  ;;  %v18050_v4 = vpack.c.bf16 %v7410_v59, %v7398_v19  ;;  %v7363_v19 = vmax.f32 %v19534_v56, %v17959_v15 }
 0x352   :  { %9708 = vmatprep.subr.bf16.mxu1 %v17872_v41 }
 0x353   :  { %9818 = vmatpush1.bf16.msra.mxu0 %v17659_v30  ;;  %v18055_v37 = vpop.f32.mrf.mxu0 }
 0x354   :  { %9819 = vmatprep.subr.bf16.mxu0 %v17895_v20 }
 0x355   :  { %9709 = vmatpush1.bf16.msra.mxu1 %v17895_v20  ;;  %v18060_v30 = vpop.f32.mrf.mxu0  ;;  %v7364_v20 = vmax.f32 %v19531_v49, %v17972_v12  ;;  %v19533_v12 = vld [vmem:[#allocation13_spill] sm:$0xff]  ;;  %v19536_v49 = vld [vmem:[#allocation7_spill] sm:$0xff] }
 0x356   :  { %9644 = vmatmul.mubr.bf16.gmra.mxu0 %v18040_v5  ;;  %9724 = vmatprep.subr.bf16.mxu1 %v18050_v4  ;;  %v7351_v59 = vmax.f32 %v19533_v12, %v17916_v45 }
 0x357   :  { %9820 = vmatpush1.bf16.msra.mxu0 %v17657_v52  ;;  %9653 = vmatprep.mubr.bf16.mxu0 %v18048_v50  ;;  %v18078_v13 = vpop.f32.mrf.mxu0  ;;  %v18084_v52 = vld [vmem:[%s19418_s4 + $0x2c] ss:$16 sps:$4 sm:$0xff]   ;;  %v18110_v45 = vpack.c.bf16 %v7364_v20, %v7352_v63 }
 0x358   :  { %9821 = vmatprep.subr.bf16.mxu0 %v17846_v16  ;;  %v18090_v16 = vld [vmem:[%s19418_s4 + $0x80] ss:$16 sps:$4 sm:$0xff]   ;;  %v18123_v44 = vpack.c.bf16 %v7363_v19, %v7351_v59  ;;  %v19539_v63 = vld [vmem:[#allocation11_spill] sm:$0xff] }
 0x359   :  { %9725 = vmatpush2.bf16.msra.mxu1 %v17989_v7  ;;  %v18092_v2 = vpop.f32.mrf.mxu0  ;;  %19537 = vst [vmem:[#allocation18_spill] sm:$0xff] %v18110_v45  ;;  %v7316_v20 = vmax.f32 %v19539_v63, %v17888_v38  ;;  %v18139_v59 = vld [vmem:[%s19418_s4 + $0x28] ss:$16 sps:$4 sm:$0xff]   ;;  %v18153_v38 = vld [vmem:[%s19418_s4 + $0xa0] ss:$16 sps:$4 sm:$0xff]  }
 0x35a   :  { %9920 = vmatprep.subr.bf16.mxu1 %v18070_v34  ;;  %v7340_v34 = vmax.f32 %v19536_v49, %v17907_v39  ;;  %v18125_v39 = vpop.f32.mrf.mxu1  ;;  %v7399_v49 = vmax.f32 %v17835_v60, %v7022_v17 }
 0x35b   :  { %9822 = vmatpush1.bf16.msra.mxu0 %v17678_v51  ;;  %v18114_v15 = vpop.f32.mrf.mxu0 }
 0x35c   :  { %9727 = vmatmul.mubr.bf16.vlgmr.msra.gmra.mxu1 %v18076_v25  ;;  %9823 = vmatprep.subr.bf16.mxu0 %v17890_v11  ;;  %v18133_v12 = vpack.c.bf16 %v7340_v34, %v7328_v46  ;;  %v7026_v19 = vpop.f32.mrf.mxu1  ;;  %v18163_v46 = vpack.c.bf16 %v7316_v20, %v7304_v22  ;;  %v18194_v20 = vld [vmem:[%s19418_s4 + $0x6c] ss:$16 sps:$4 sm:$0xff]  }
 0x35d   :  { %9921 = vmatpush1.bf16.msra.mxu1 %v18098_v54  ;;  %13699 = vmatprep.mubr.msk.bf16.mxu1 %vm6468_vm1, %v18084_v52  ;;  %v18121_v51 = vpop.f32.mrf.mxu0  ;;  %v7411_v48 = vmax.f32 %v17855_v29, %v7026_v19  ;;  %v18186_v29 = vld [vmem:[%s19418_s4 + $0x48] ss:$16 sps:$4 sm:$0xff]   ;;  %19545 = vst [vmem:[#allocation7_spill] sm:$0xff] %v18194_v20  ;;  %v18200_v19 = vld [vmem:[%s19418_s4 + $0xc0] ss:$16 sps:$4 sm:$0xff]  }
 0x35e   :  { %9654 = vmatmul.mubr.bf16.gmra.mxu0 %v18090_v16  ;;  %9922 = vmatprep.subr.bf16.mxu1 %v18110_v45  ;;  %19540 = vst [vmem:[#allocation6_spill] sm:$0xff] %v18133_v12  ;;  %19543 = vst [vmem:[#allocation14_spill] sm:$0xff] %v18186_v29  ;;  %v7400_v45 = vmax.f32 %v17841_v35, %v18125_v39 }
 0x35f   :  { %9824 = vmatpush2.bf16.msra.mxu0 %v17967_v40  ;;  %9663 = vmatprep.mubr.bf16.mxu0 %v18104_v1  ;;  %v18141_v56 = vpop.f32.mrf.mxu0  ;;  %v18180_v60 = vpack.c.bf16 %v7411_v48, %v7399_v49  ;;  %19546 = vst [vmem:[#allocation8_spill] sm:$0xff] %v18200_v19  ;;  %v18206_v48 = vld [vmem:[%s19418_s4 + $0xe4] ss:$16 sps:$4 sm:$0xff]  }
 0x360   :  { %9825 = vmatprep.subr.bf16.mxu0 %v18050_v4  ;;  %19547 = vst [vmem:[#allocation11_spill] sm:$0xff] %v18206_v48 }
 0x361   :  { %9923 = vmatpush1.bf16.msra.mxu1 %v18123_v44  ;;  %v18155_v34 = vpop.f32.mrf.mxu0 }
 0x362   :  { %9924 = vmatprep.subr.bf16.mxu1 %v18133_v12 }
 0x363   :  { %9826 = vmatpush2.bf16.msra.mxu0 %v17989_v7  ;;  %v18169_v63 = vpop.f32.mrf.mxu0 }
 0x364   :  { %9737 = vmatmul.mubr.bf16.gmra.mxu1 %v18139_v59  ;;  %9827 = vmatprep.subr.bf16.mxu0 %v17920_v10  ;;  %19542 = vst [vmem:[#allocation13_spill] sm:$0xff] %v18169_v63 }
 0x365   :  { %9925 = vmatpush1.bf16.msra.mxu1 %v17905_v47  ;;  %13700 = vmatprep.mubr.msk.bf16.mxu1 %vm6468_vm1, %v18147_v3  ;;  %v18176_v22 = vpop.f32.mrf.mxu0 }
 0x366   :  { %9664 = vmatmul.mubr.bf16.gmra.mxu0 %v18153_v38  ;;  %9926 = vmatprep.subr.bf16.mxu1 %v18163_v46 }
 0x367   :  { %9828 = vmatpush2.bf16.msra.mxu0 %v17922_v9  ;;  %9673 = vmatprep.mubr.bf16.mxu0 %v18161_v33  ;;  %v18188_v17 = vpop.f32.mrf.mxu0 }
 0x368   :  { %9829 = vmatprep.subr.bf16.mxu0 %v17928_v62  ;;  %19544 = vst [vmem:[#allocation12_spill] sm:$0xff] %v18188_v17 }
 0x369   :  { %9927 = vmatpush1.bf16.msra.mxu1 %v17890_v11  ;;  %v7115_v49 = vpop.f32.mrf.mxu0 }
 0x36a   :  { %9928 = vmatprep.subr.bf16.mxu1 %v18180_v60  ;;  %v7305_v17 = vmax.f32 %v17981_v53, %v7115_v49  ;;  %v18225_v53 = vld [vmem:[%s19418_s4 + $0x68] ss:$16 sps:$4 sm:$0xff]  }
 0x36b   :  { %9830 = vmatpush2.bf16.msra.mxu0 %v17939_v55  ;;  %v18210_v63 = vpop.f32.mrf.mxu0  ;;  %19548 = vst [vmem:[#allocation22_spill] sm:$0xff] %v18225_v53 }
 0x36c   :  { %9747 = vmatmul.mubr.bf16.gmra.mxu1 %v18186_v29  ;;  %9831 = vmatprep.subr.bf16.mxu0 %v17955_v28 }
 0x36d   :  { %9929 = vmatpush1.bf16.msra.mxu1 %v18050_v4  ;;  %13701 = vmatprep.mubr.msk.bf16.mxu1 %vm6468_vm1, %v18194_v20  ;;  %v7119_v12 = vpop.f32.mrf.mxu0  ;;  %v7028_v20 = vpop.f32.mrf.mxu1 }
 0x36e   :  { %9674 = vmatmul.mubr.bf16.gmra.mxu0 %v18200_v19  ;;  %9930 = vmatprep.subr.bf16.mxu1 %v18098_v54  ;;  %v7317_v29 = vmax.f32 %v17997_v36, %v7119_v12  ;;  %v18241_v36 = vld [vmem:[%s19418_s4 + $0xe0] ss:$16 sps:$4 sm:$0xff]  }
 0x36f   :  { %9832 = vmatpush2.bf16.msra.mxu0 %v17872_v41  ;;  %9683 = vmatprep.mubr.bf16.mxu0 %v18206_v48  ;;  %v18227_v49 = vpop.f32.mrf.mxu0  ;;  %v18235_v48 = vld [vmem:[%s19418_s4 + $0x8c] ss:$16 sps:$4 sm:$0xff]   ;;  %19550 = vst [vmem:[#allocation24_spill] sm:$0xff] %v18241_v36 }
 0x370   :  { %9833 = vmatprep.subr.bf16.mxu0 %v17967_v40  ;;  %v18230_v19 = vpack.c.bf16 %v7317_v29, %v7305_v17  ;;  %19549 = vst [vmem:[#allocation23_spill] sm:$0xff] %v18235_v48  ;;  %v7412_v29 = vmax.f32 %v17861_v32, %v7028_v20  ;;  %v19551_v32 = vld [vmem:[#allocation9_spill] sm:$0xff] }
 0x371   :  { %9931 = vmatpush1.bf16.msra.mxu1 %v17920_v10  ;;  %v7125_v12 = vpop.f32.mrf.mxu0 }
 0x372   :  { %9932 = vmatprep.subr.bf16.mxu1 %v18123_v44  ;;  %v7329_v33 = vmax.f32 %v18011_v27, %v7125_v12  ;;  %v18260_v20 = vpack.c.bf16 %v7412_v29, %v7400_v45  ;;  %v18266_v27 = vld [vmem:[%s19418_s4 + $0x88] ss:$16 sps:$4 sm:$0xff]  }
 0x373   :  { %9834 = vmatpush2.bf16.msra.mxu0 %v17839_v18  ;;  %v18249_v17 = vpop.f32.mrf.mxu0 }
 0x374   :  { %9757 = vmatmul.mubr.bf16.gmra.mxu1 %v18225_v53  ;;  %9835 = vmatprep.subr.bf16.mxu0 %v17989_v7 }
 0x375   :  { %9933 = vmatpush1.bf16.msra.mxu1 %v17928_v62  ;;  %13702 = vmatprep.mubr.msk.bf16.mxu1 %vm6468_vm1, %v18235_v48  ;;  %v7129_v35 = vpop.f32.mrf.mxu0 }
 0x376   :  { %9684 = vmatmul.mubr.bf16.gmra.mxu0 %v18241_v36  ;;  %9934 = vmatprep.subr.bf16.mxu1 %v17905_v47  ;;  %v7341_v39 = vmax.f32 %v18025_v6, %v7129_v35  ;;  %v18296_v35 = vld [vmem:[%s19418_s4 + $0xa8] ss:$16 sps:$4 sm:$0xff]  }
 0x377   :  { %9836 = vmatpush2.bf16.msra.mxu0 %v17852_v42  ;;  %9839 = vmatprep.mubr.bf16.mxu0 %v19551_v32  ;;  %v18268_v12 = vpop.f32.mrf.mxu0  ;;  %v18276_v42 = vld [vmem:[%s19418_s4 + $0xac] ss:$16 sps:$4 sm:$0xff]   ;;  %19553 = vst [vmem:[#allocation25_spill] sm:$0xff] %v18296_v35 }
 0x378   :  { %9837 = vmatprep.subr.bf16.mxu0 %v17922_v9  ;;  %v18271_v36 = vpack.c.bf16 %v7341_v39, %v7329_v33  ;;  %19552 = vst [vmem:[#allocation9_spill] sm:$0xff] %v18276_v42  ;;  %v18303_v39 = vld [vmem:[%s19418_s4 + $0xcc] ss:$16 sps:$4 sm:$0xff]  }
 0x379   :  { %9935 = vmatpush1.bf16.msra.mxu1 %v17955_v28  ;;  %v7135_v6 = vpop.f32.mrf.mxu0  ;;  %19554 = vst [vmem:[#allocation26_spill] sm:$0xff] %v18303_v39 }
 0x37a   :  { %9950 = vmatprep.subr.bf16.mxu1 %v18260_v20  ;;  %v7353_v33 = vmax.f32 %v18042_v57, %v7135_v6 }
 0x37b   :  { %9838 = vmatpush2.bf16.msra.mxu0 %v17865_v8  ;;  %v18282_v45 = vpop.f32.mrf.mxu0 }
 0x37c   :  { %9767 = vmatmul.mubr.bf16.gmra.mxu1 %v18266_v27  ;;  %10033 = vmatprep.subr.bf16.mxu0 %v18123_v44 }
 0x37d   :  { %9951 = vmatpush2.bf16.msra.mxu1 %v18180_v60  ;;  %13703 = vmatprep.mubr.msk.bf16.mxu1 %vm6468_vm1, %v18276_v42  ;;  %v7139_v29 = vpop.f32.mrf.mxu0 }
 0x37e   :  { %9840 = vmatmul.mubr.bf16.vlgmr.msra.gmra.mxu0 %v17945_v24  ;;  %v7365_v8 = vmax.f32 %v18060_v30, %v7139_v29  ;;  %v18317_v29 = vld [vmem:[%s19418_s4 + $0xc8] ss:$16 sps:$4 sm:$0xff]  }
 0x37f   :  { %10034 = vmatpush1.bf16.msra.mxu0 %v17928_v62  ;;  %9849 = vmatprep.mubr.bf16.mxu0 %v17951_v21  ;;  %v7141_v57 = vpop.f32.mrf.mxu0  ;;  %19555 = vst [vmem:[#allocation27_spill] sm:$0xff] %v18317_v29 }
 0x380   :  { %10035 = vmatprep.subr.bf16.mxu0 %v17905_v47  ;;  %v18298_v32 = vpack.c.bf16 %v7365_v8, %v7353_v33 }
 0x381   :  { %v7145_v6 = vpop.f32.mrf.mxu0 }
 0x383   :  { %10036 = vmatpush1.bf16.msra.mxu0 %v17955_v28  ;;  %v7147_v30 = vpop.f32.mrf.mxu0 }
 0x384   :  { %9777 = vmatmul.mubr.bf16.gmra.mxu1 %v18296_v35  ;;  %10037 = vmatprep.subr.bf16.mxu0 %v17890_v11  ;;  %v7378_v35 = vmax.f32 %v18114_v15, %v7147_v30  ;;  %v7377_v30 = vmax.f32 %v18092_v2, %v7145_v6 }
 0x385   :  { %13704 = vmatprep.mubr.msk.bf16.mxu1 %vm6468_vm1, %v18303_v39  ;;  %v7149_v33 = vpop.f32.mrf.mxu0 }
 0x386   :  { %9850 = vmatmul.mubr.bf16.gmra.mxu0 %v17979_v0  ;;  %v18324_v0 = vld [vmem:[%s19418_s4 + $0xec] ss:$16 sps:$4 sm:$0xff]  }
 0x387   :  { %10038 = vmatpush1.bf16.msra.mxu0 %v17967_v40  ;;  %9859 = vmatprep.mubr.bf16.mxu0 %v17987_v43  ;;  %v7151_v8 = vpop.f32.mrf.mxu0 }
 0x388   :  { %10039 = vmatprep.subr.bf16.mxu0 %v18050_v4  ;;  %v7390_v21 = vmax.f32 %v18141_v56, %v7151_v8  ;;  %v7389_v8 = vmax.f32 %v18121_v51, %v7149_v33 }
 0x389   :  { %v18326_v39 = vpop.f32.mrf.mxu1 }
 0x38a   :  { %v18329_v43 = vpack.c.bf16 %v7390_v21, %v7378_v35  ;;  %v19561_v35 = vld [vmem:[#allocation15_spill] sm:$0xff] }
 0x38b   :  { %10040 = vmatpush1.bf16.msra.mxu0 %v17989_v7  ;;  %v18333_v24 = vpop.f32.mrf.mxu1  ;;  %v18349_v7 = vld [vmem:[%s19418_s4 + $0xe8] ss:$16 sps:$4 sm:$0xff]  }
 0x38c   :  { %19556 = vst [vmem:[#allocation28_spill] sm:$0xff] %v18329_v43  ;;  %9787 = vmatmul.mubr.bf16.gmra.mxu1 %v18317_v29  ;;  %10041 = vmatprep.subr.bf16.mxu0 %v17920_v10  ;;  %19557 = vst [vmem:[#allocation29_spill] sm:$0xff] %v18333_v24  ;;  %v7354_v24 = vmax.f32 %v18055_v37, %v18282_v45 }
 0x38d   :  { %13705 = vmatprep.mubr.msk.bf16.mxu1 %vm6468_vm1, %v18324_v0  ;;  %10146 = vmatprep.subr.bf16.mxu1 %v18329_v43  ;;  %v18339_v15 = vpop.f32.mrf.mxu1  ;;  %19559 = vst [vmem:[#allocation31_spill] sm:$0xff] %v18349_v7  ;;  %v7155_v43 = vpop.f32.mrf.mxu0 }
 0x38e   :  { %9860 = vmatmul.mubr.bf16.gmra.mxu0 %v18009_v14 }
 0x38f   :  { %10042 = vmatpush1.bf16.msra.mxu0 %v17922_v9  ;;  %9869 = vmatprep.mubr.bf16.mxu0 %v18017_v58  ;;  %v18344_v21 = vpop.f32.mrf.mxu1 }
 0x390   :  { %10043 = vmatprep.subr.bf16.mxu0 %v17928_v62  ;;  %19558 = vst [vmem:[#allocation30_spill] sm:$0xff] %v18344_v21 }
 0x391   :  { %v18351_v56 = vpop.f32.mrf.mxu1 }
 0x393   :  { %10044 = vmatpush1.bf16.msra.mxu0 %v17939_v55  ;;  %v18356_v9 = vpop.f32.mrf.mxu1  ;;  %v7366_v55 = vmax.f32 %v18078_v13, %v7141_v57  ;;  %v18386_v13 = vpop.f32.mrf.mxu0  ;;  %v19563_v57 = vld [vmem:[#allocation17_spill] sm:$0xff] }
 0x394   :  { %9797 = vmatmul.mubr.bf16.gmra.mxu1 %v18349_v7  ;;  %10045 = vmatprep.subr.bf16.mxu0 %v17955_v28  ;;  %19560 = vst [vmem:[#allocation32_spill] sm:$0xff] %v18356_v9  ;;  %v18375_v9 = vpack.c.bf16 %v7389_v8, %v7377_v30  ;;  %v19566_v30 = vld [vmem:[#allocation14_spill] sm:$0xff] }
 0x395   :  { %13706 = vmatprep.mubr.msk.bf16.mxu1 %vm6468_vm1, %v19561_v35  ;;  %v18361_v62 = vpop.f32.mrf.mxu1  ;;  %v18380_v2 = vpack.c.bf16 %v7366_v55, %v7354_v24  ;;  %v19567_v8 = vld [vmem:[#allocation6_spill] sm:$0xff] }
 0x396   :  { %9870 = vmatmul.mubr.bf16.gmra.mxu0 %v18040_v5 }
 0x397   :  { %10046 = vmatpush1.bf16.msra.mxu0 %v17872_v41  ;;  %9879 = vmatprep.mubr.bf16.mxu0 %v18048_v50  ;;  %v18369_v28 = vpop.f32.mrf.mxu1  ;;  %v7342_v41 = vmax.f32 %v18031_v26, %v18268_v12  ;;  %v7318_v26 = vmax.f32 %v18002_v61, %v18227_v49  ;;  %v7401_v61 = vmax.f32 %v18155_v34, %v7155_v43  ;;  %v19564_v43 = vld [vmem:[#allocation16_spill] sm:$0xff] }
 0x398   :  { %10047 = vmatprep.subr.bf16.mxu0 %v17967_v40 }
 0x399   :  { %v18373_v21 = vpop.f32.mrf.mxu1 }
 0x39b   :  { %10048 = vmatpush1.bf16.msra.mxu0 %v17839_v18  ;;  %v18384_v40 = vpop.f32.mrf.mxu1  ;;  %v7330_v18 = vmax.f32 %v18020_v31, %v18249_v17  ;;  %v7159_v31 = vpop.f32.mrf.mxu0  ;;  %v7306_v17 = vmax.f32 %v17992_v23, %v18210_v63  ;;  %v19565_v63 = vld [vmem:[#allocation18_spill] sm:$0xff] }
 0x39c   :  { %9953 = vmatmul.mubr.bf16.vlgmr.msra.gmra.mxu1 %v18076_v25  ;;  %10049 = vmatprep.subr.bf16.mxu0 %v18230_v19  ;;  %v7413_v49 = vmax.f32 %v18176_v22, %v7159_v31  ;;  %v19571_v31 = vld [vmem:[#allocation11_spill] sm:$0xff] }
 0x39d   :  { %10147 = vmatpush1.bf16.msra.mxu1 %v18375_v9  ;;  %13707 = vmatprep.mubr.msk.bf16.mxu1 %vm6468_vm1, %v18084_v52  ;;  %v18395_v24 = vpop.f32.mrf.mxu1  ;;  %v18401_v37 = vpack.c.bf16 %v7342_v41, %v7330_v18  ;;  %v18413_v45 = vpack.c.bf16 %v7318_v26, %v7306_v17  ;;  %v19569_v41 = vld [vmem:[#allocation7_spill] sm:$0xff]  ;;  %v19570_v18 = vld [vmem:[#allocation8_spill] sm:$0xff] }
 0x39e   :  { %10148 = vmatprep.subr.bf16.mxu1 %v18380_v2  ;;  %9880 = vmatmul.mubr.bf16.gmra.mxu0 %v18090_v16  ;;  %v18430_v34 = vpack.c.bf16 %v7413_v49, %v7401_v61  ;;  %v7161_v61 = vpop.f32.mrf.mxu0 }
 0x39f   :  { %10050 = vmatpush2.bf16.msra.mxu0 %v18163_v46  ;;  %9889 = vmatprep.mubr.bf16.mxu0 %v18104_v1  ;;  %19562 = vst [vmem:[#allocation15_spill] sm:$0xff] %v18401_v37  ;;  %v18404_v51 = vpop.f32.mrf.mxu1 }
 0x3a0   :  { %10051 = vmatprep.subr.bf16.mxu0 %v18260_v20 }
 0x3a1   :  { %10149 = vmatpush1.bf16.msra.mxu1 %v18298_v32  ;;  %v18410_v12 = vpop.f32.mrf.mxu1 }
 0x3a2   :  { %10150 = vmatprep.subr.bf16.mxu1 %v18401_v37  ;;  %v19575_v37 = vld [vmem:[#allocation24_spill] sm:$0xff] }
 0x3a3   :  { %10052 = vmatpush2.bf16.msra.mxu0 %v18180_v60  ;;  %v18419_v6 = vpop.f32.mrf.mxu1 }
 0x3a4   :  { %9963 = vmatmul.mubr.bf16.gmra.mxu1 %v18139_v59  ;;  %10053 = vmatprep.subr.bf16.mxu0 %v19563_v57 }
 0x3a5   :  { %10151 = vmatpush1.bf16.msra.mxu1 %v18271_v36  ;;  %13708 = vmatprep.mubr.msk.bf16.mxu1 %vm6468_vm1, %v18147_v3  ;;  %v18426_v23 = vpop.f32.mrf.mxu1 }
 0x3a6   :  { %10152 = vmatprep.subr.bf16.mxu1 %v18413_v45  ;;  %9890 = vmatmul.mubr.bf16.gmra.mxu0 %v18153_v38 }
 0x3a7   :  { %10054 = vmatpush2.bf16.msra.mxu0 %v18098_v54  ;;  %9899 = vmatprep.mubr.bf16.mxu0 %v19564_v43  ;;  %v18433_v22 = vpop.f32.mrf.mxu1 }
 0x3a8   :  { %10055 = vmatprep.subr.bf16.mxu0 %v19565_v63 }
 0x3a9   :  { %10153 = vmatpush1.bf16.msra.mxu1 %v18230_v19  ;;  %v18437_v33 = vpop.f32.mrf.mxu1 }
 0x3aa   :  { %10154 = vmatprep.subr.bf16.mxu1 %v18430_v34 }
 0x3ab   :  { %10056 = vmatpush2.bf16.msra.mxu0 %v18123_v44  ;;  %v18442_v55 = vpop.f32.mrf.mxu1 }
 0x3ac   :  { %9973 = vmatmul.mubr.bf16.gmra.mxu1 %v19566_v30  ;;  %10057 = vmatprep.subr.bf16.mxu0 %v19567_v8  ;;  %19568 = vst [vmem:[#allocation17_spill] sm:$0xff] %v18442_v55  ;;  %v19573_v55 = vld [vmem:[#allocation12_spill] sm:$0xff] }
 0x3ad   :  { %10155 = vmatpush1.bf16.msra.mxu1 %v18260_v20  ;;  %13709 = vmatprep.mubr.msk.bf16.mxu1 %vm6468_vm1, %v19569_v41  ;;  %v18449_v26 = vpop.f32.mrf.mxu1 }
 0x3ae   :  { %10156 = vmatprep.subr.bf16.mxu1 %v18375_v9  ;;  %9900 = vmatmul.mubr.bf16.gmra.mxu0 %v19570_v18  ;;  %v7414_v18 = vmax.f32 %v19573_v55, %v7161_v61 }
 0x3af   :  { %10058 = vmatpush2.bf16.msra.mxu0 %v17905_v47  ;;  %9909 = vmatprep.mubr.bf16.mxu0 %v19571_v31  ;;  %v18454_v17 = vpop.f32.mrf.mxu1 }
 0x3b0   :  { %10059 = vmatprep.subr.bf16.mxu0 %v18163_v46  ;;  %19572 = vst [vmem:[#allocation16_spill] sm:$0xff] %v18454_v17  ;;  %v19574_v17 = vld [vmem:[#allocation13_spill] sm:$0xff] }
 0x3b1   :  { %10157 = vmatpush1.bf16.msra.mxu1 %v19563_v57  ;;  %v7248_v49 = vpop.f32.mrf.mxu1  ;;  %v7402_v31 = vmax.f32 %v19574_v17, %v18386_v13 }
 0x3b2   :  { %10158 = vmatprep.subr.bf16.mxu1 %v18298_v32  ;;  %v7307_v55 = vmax.f32 %v18326_v39, %v7248_v49 }
 0x3b3   :  { %10060 = vmatpush2.bf16.msra.mxu0 %v17890_v11  ;;  %v18462_v41 = vpop.f32.mrf.mxu1 }
 0x3b4   :  { %9983 = vmatmul.mubr.bf16.gmra.mxu1 %v18225_v53  ;;  %10061 = vmatprep.subr.bf16.mxu0 %v18180_v60  ;;  %v18477_v53 = vld [vmem:[%s19418_s4 + $0x4] ss:$16 sps:$4 sm:$0xff]  }
 0x3b5   :  { %10159 = vmatpush1.bf16.msra.mxu1 %v19565_v63  ;;  %13710 = vmatprep.mubr.msk.bf16.mxu1 %vm6468_vm1, %v18235_v48  ;;  %v7252_v30 = vpop.f32.mrf.mxu1  ;;  %v18480_v48 = vpack.c.bf16 %v7414_v18, %v7402_v31 }
 0x3b6   :  { %10160 = vmatprep.subr.bf16.mxu1 %v18271_v36  ;;  %9910 = vmatmul.mubr.bf16.gmra.mxu0 %v19575_v37  ;;  %v7319_v61 = vmax.f32 %v18339_v15, %v7252_v30  ;;  %v19576_v15 = vld [vmem:[#allocation10_spill] sm:$0xff] }
 0x3b7   :  { %10062 = vmatpush2.bf16.msra.mxu0 %v18050_v4  ;;  %10065 = vmatprep.mubr.bf16.mxu0 %v18477_v53  ;;  %v18483_v13 = vpop.f32.mrf.mxu1 }
 0x3b8   :  { %10063 = vmatprep.subr.bf16.mxu0 %v18098_v54  ;;  %v18485_v17 = vpack.c.bf16 %v7319_v61, %v7307_v55 }
 0x3b9   :  { %10161 = vmatpush1.bf16.msra.mxu1 %v19567_v8  ;;  %v7258_v4 = vpop.f32.mrf.mxu1 }
 0x3ba   :  { %10176 = vmatprep.subr.bf16.mxu1 %v18480_v48  ;;  %v7331_v18 = vmax.f32 %v18351_v56, %v7258_v4  ;;  %v19579_v56 = vld [vmem:[#allocation26_spill] sm:$0xff] }
 0x3bb   :  { %10064 = vmatpush2.bf16.msra.mxu0 %v17920_v10  ;;  %v18492_v39 = vpop.f32.mrf.mxu1  ;;  %v19577_v10 = vld [vmem:[#allocation19_spill] sm:$0xff] }
 0x3bc   :  { %9993 = vmatmul.mubr.bf16.gmra.mxu1 %v18266_v27  ;;  %10259 = vmatprep.subr.bf16.mxu0 %v18298_v32 }
 0x3bd   :  { %10177 = vmatpush2.bf16.msra.mxu1 %v18430_v34  ;;  %13711 = vmatprep.mubr.msk.bf16.mxu1 %vm6468_vm1, %v18276_v42  ;;  %v7262_v30 = vpop.f32.mrf.mxu1  ;;  %v19578_v42 = vld [vmem:[#allocation25_spill] sm:$0xff] }
 0x3be   :  { %10066 = vmatmul.mubr.bf16.vlgmr.msra.gmra.mxu0 %v19576_v15  ;;  %v7343_v31 = vmax.f32 %v18361_v62, %v7262_v30  ;;  %v19580_v62 = vld [vmem:[#allocation20_spill] sm:$0xff]  ;;  %v19581_v30 = vld [vmem:[#allocation21_spill] sm:$0xff] }
 0x3bf   :  { %10260 = vmatpush1.bf16.msra.mxu0 %v19565_v63  ;;  %10075 = vmatprep.mubr.bf16.mxu0 %v19577_v10  ;;  %v7264_v49 = vpop.f32.mrf.mxu1 }
 0x3c0   :  { %10261 = vmatprep.subr.bf16.mxu0 %v18271_v36  ;;  %v18503_v55 = vpack.c.bf16 %v7343_v31, %v7331_v18 }
 0x3c1   :  { %v7268_v61 = vpop.f32.mrf.mxu1 }
 0x3c3   :  { %10262 = vmatpush1.bf16.msra.mxu0 %v19567_v8  ;;  %v7270_v15 = vpop.f32.mrf.mxu1 }
 0x3c4   :  { %10003 = vmatmul.mubr.bf16.gmra.mxu1 %v19578_v42  ;;  %10263 = vmatprep.subr.bf16.mxu0 %v18230_v19 }
 0x3c5   :  { %13712 = vmatprep.mubr.msk.bf16.mxu1 %vm6468_vm1, %v19579_v56  ;;  %v7272_v4 = vpop.f32.mrf.mxu1 }
 0x3c6   :  { %10076 = vmatmul.mubr.bf16.gmra.mxu0 %v19580_v62 }
 0x3c7   :  { %10264 = vmatpush1.bf16.msra.mxu0 %v18163_v46  ;;  %10085 = vmatprep.mubr.bf16.mxu0 %v19581_v30  ;;  %v7274_v18 = vpop.f32.mrf.mxu1 }
 0x3c8   :  { %10265 = vmatprep.subr.bf16.mxu0 %v18260_v20 }
 0x3c9   :  { %v7278_v31 = vpop.f32.mrf.mxu1 }
 0x3cb   :  { %10266 = vmatpush1.bf16.msra.mxu0 %v18180_v60  ;;  %v7280_v42 = vpop.f32.mrf.mxu1 }
 0x3cc   :  { %10013 = vmatmul.mubr.bf16.gmra.mxu1 %v18317_v29  ;;  %10267 = vmatprep.subr.bf16.mxu0 %v19563_v57  ;;  %v7380_v60 = vmax.f32 %v18419_v6, %v7280_v42  ;;  %v7368_v42 = vmax.f32 %v18404_v51, %v7274_v18  ;;  %v7356_v6 = vmax.f32 %v18384_v40, %v7270_v15  ;;  %v19582_v40 = vld [vmem:[#allocation32_spill] sm:$0xff] }
 0x3cd   :  { %13713 = vmatprep.mubr.msk.bf16.mxu1 %vm6468_vm1, %v18324_v0  ;;  %v7282_v62 = vpop.f32.mrf.mxu1 }
 0x3ce   :  { %10086 = vmatmul.mubr.bf16.gmra.mxu0 %v18009_v14 }
 0x3cf   :  { %10268 = vmatpush1.bf16.msra.mxu0 %v18098_v54  ;;  %10095 = vmatprep.mubr.bf16.mxu0 %v18017_v58  ;;  %v7284_v30 = vpop.f32.mrf.mxu1  ;;  %v7391_v54 = vmax.f32 %v18426_v23, %v7282_v62  ;;  %v7344_v23 = vmax.f32 %v18369_v28, %v7264_v49  ;;  %v19583_v28 = vld [vmem:[#allocation30_spill] sm:$0xff]  ;;  %v19589_v62 = vld [vmem:[#allocation8_spill] sm:$0xff] }
 0x3d0   :  { %10269 = vmatprep.subr.bf16.mxu0 %v19565_v63  ;;  %v7392_v29 = vmax.f32 %v18433_v22, %v7284_v30  ;;  %v7367_v63 = vmax.f32 %v18395_v24, %v7272_v4  ;;  %v14656_v22 = vpack.c.bf16 %v7368_v42, %v7356_v6  ;;  %v7332_v24 = vmax.f32 %v19582_v40, %v18492_v39  ;;  %v19590_v4 = vld [vmem:[#allocation11_spill] sm:$0xff]  ;;  %v18582_v30 = vpop.permute.xlu1 %8402  ;;  %v19598_v6 = vld [vmem:[#allocation25_spill] sm:$0xff] }
 0x3d1   :  { %v7320_v51 = vmax.f32 %v19583_v28, %v18483_v13  ;;  %19591 = vst [vmem:[#allocation18_spill] sm:$0xff] %v18582_v30  ;;  %v19602_v28 = vld [vmem:[#allocation27_spill] sm:$0xff] }
 0x3d2   :  { %v14658_v56 = vpack.c.bf16 %v7392_v29, %v7380_v60  ;;  %v7288_v29 = vpop.f32.mrf.mxu1  ;;  %v19595_v60 = vld [vmem:[#allocation17_spill] sm:$0xff] }
 0x3d3   :  { %10270 = vmatpush1.bf16.msra.mxu0 %v18123_v44  ;;  %v7379_v44 = vmax.f32 %v18410_v12, %v7278_v31  ;;  %v7403_v13 = vmax.f32 %v18437_v33, %v7288_v29  ;;  %v19588_v33 = vld [vmem:[#allocation7_spill] sm:$0xff]  ;;  %v19593_v31 = vld [vmem:[#allocation22_spill] sm:$0xff] }
 0x3d4   :  { %10023 = vmatmul.mubr.bf16.gmra.mxu1 %v18349_v7  ;;  %10271 = vmatprep.subr.bf16.mxu0 %v19567_v8  ;;  %v19584_v8 = vld [vmem:[#allocation29_spill] sm:$0xff] }
 0x3d5   :  { %10372 = vmatprep.subr.bf16.mxu1 %v14658_v56  ;;  %13714 = vmatprep.mubr.msk.bf16.mxu1 %vm6468_vm1, %v19561_v35  ;;  %v14648_v35 = vpack.c.bf16 %v7391_v54, %v7379_v44  ;;  %v7308_v15 = vmax.f32 %v19584_v8, %v18462_v41  ;;  %v19587_v56 = vld [vmem:[#allocation15_spill] sm:$0xff] }
 0x3d6   :  { %10096 = vmatmul.mubr.bf16.gmra.mxu0 %v18040_v5 }
 0x3d7   :  { %10272 = vmatpush1.bf16.msra.mxu0 %v17905_v47  ;;  %10105 = vmatprep.mubr.bf16.mxu0 %v18048_v50  ;;  %v7355_v47 = vmax.f32 %v18373_v21, %v7268_v61  ;;  %v14654_v21 = vpack.c.bf16 %v7344_v23, %v7332_v24  ;;  %v14652_v39 = vpack.c.bf16 %v7320_v51, %v7308_v15  ;;  %v19585_v61 = vld [vmem:[#allocation28_spill] sm:$0xff] }
 0x3d8   :  { %10273 = vmatprep.subr.bf16.mxu0 %v18163_v46  ;;  %v7290_v46 = vpop.f32.mrf.mxu1 }
 0x3d9   :  { %v7404_v54 = vmax.f32 %v19595_v60, %v7290_v46 }
 0x3da   :  { %v7292_v12 = vpop.f32.mrf.mxu1 }
 0x3db   :  { %10274 = vmatpush1.bf16.msra.mxu0 %v17890_v11  ;;  %v14646_v11 = vpack.c.bf16 %v7367_v63, %v7355_v47  ;;  %v7415_v49 = vmax.f32 %v18449_v26, %v7292_v12  ;;  %v19586_v26 = vld [vmem:[#allocation14_spill] sm:$0xff]  ;;  %v19601_v47 = vld [vmem:[#allocation21_spill] sm:$0xff] }
 0x3dc   :  { %10179 = vmatmul.mubr.bf16.vlgmr.msra.gmra.mxu1 %v18076_v25  ;;  %10275 = vmatprep.subr.bf16.mxu0 %v18485_v17 }
 0x3dd   :  { %10373 = vmatpush1.bf16.msra.mxu1 %v14648_v35  ;;  %13715 = vmatprep.mubr.msk.bf16.mxu1 %vm6468_vm1, %v18084_v52  ;;  %v14650_v41 = vpack.c.bf16 %v7415_v49, %v7403_v13 }
 0x3de   :  { %10374 = vmatprep.subr.bf16.mxu1 %v14656_v22  ;;  %10106 = vmatmul.mubr.bf16.gmra.mxu0 %v18090_v16  ;;  %v19600_v22 = vld [vmem:[#allocation20_spill] sm:$0xff] }
 0x3df   :  { %10276 = vmatpush2.bf16.msra.mxu0 %v18413_v45  ;;  %10115 = vmatprep.mubr.bf16.mxu0 %v18104_v1 }
 0x3e0   :  { %10277 = vmatprep.subr.bf16.mxu0 %v18480_v48 }
 0x3e1   :  { %10375 = vmatpush1.bf16.msra.mxu1 %v14646_v11 }
 0x3e2   :  { %10376 = vmatprep.subr.bf16.mxu1 %v14654_v21 }
 0x3e3   :  { %10278 = vmatpush2.bf16.msra.mxu0 %v18430_v34 }
 0x3e4   :  { %10189 = vmatmul.mubr.bf16.gmra.mxu1 %v18139_v59  ;;  %10279 = vmatprep.subr.bf16.mxu0 %v19585_v61 }
 0x3e5   :  { %10377 = vmatpush1.bf16.msra.mxu1 %v18503_v55  ;;  %13716 = vmatprep.mubr.msk.bf16.mxu1 %vm6468_vm1, %v18147_v3 }
 0x3e6   :  { %10378 = vmatprep.subr.bf16.mxu1 %v14652_v39  ;;  %10116 = vmatmul.mubr.bf16.gmra.mxu0 %v18153_v38 }
 0x3e7   :  { %10280 = vmatpush2.bf16.msra.mxu0 %v18375_v9  ;;  %10125 = vmatprep.mubr.bf16.mxu0 %v19564_v43 }
 0x3e8   :  { %10281 = vmatprep.subr.bf16.mxu0 %v18380_v2 }
 0x3e9   :  { %10379 = vmatpush1.bf16.msra.mxu1 %v18485_v17  ;;  %v18578_v17 = vpop.permute.xlu0 %8397 }
 0x3ea   :  { %10380 = vmatprep.subr.bf16.mxu1 %v14650_v41 }
 0x3eb   :  { %10282 = vmatpush2.bf16.msra.mxu0 %v18298_v32  ;;  %v7294_v32 = vpop.f32.mrf.mxu1 }
 0x3ec   :  { %10199 = vmatmul.mubr.bf16.gmra.mxu1 %v19586_v26  ;;  %10283 = vmatprep.subr.bf16.mxu0 %v19587_v56 }
 0x3ed   :  { %10381 = vmatpush1.bf16.msra.mxu1 %v18480_v48  ;;  %13717 = vmatprep.mubr.msk.bf16.mxu1 %vm6468_vm1, %v19588_v33  ;;  %v19592_v48 = vld [vmem:[#allocation16_spill] sm:$0xff] }
 0x3ee   :  { %10382 = vmatprep.subr.bf16.mxu1 %v14648_v35  ;;  %10126 = vmatmul.mubr.bf16.gmra.mxu0 %v19589_v62  ;;  %v7416_v18 = vmax.f32 %v19592_v48, %v7294_v32  ;;  %v19599_v35 = vld [vmem:[#allocation26_spill] sm:$0xff] }
 0x3ef   :  { %10284 = vmatpush2.bf16.msra.mxu0 %v18271_v36  ;;  %10135 = vmatprep.mubr.bf16.mxu0 %v19590_v4  ;;  %v19594_v36 = vld [vmem:[#allocation23_spill] sm:$0xff] }
 0x3f0   :  { %10285 = vmatprep.subr.bf16.mxu0 %v18413_v45  ;;  %v18591_v45 = vpop.permute.xlu0 %8387 }
 0x3f1   :  { %10383 = vmatpush1.bf16.msra.mxu1 %v19585_v61  ;;  %v15301_v61 = vld [vmem:[%s19418_s4 + $0xc] ss:$16 sps:$4 sm:$0xff]  }
 0x3f2   :  { %10384 = vmatprep.subr.bf16.mxu1 %v14646_v11 }
 0x3f3   :  { %10286 = vmatpush2.bf16.msra.mxu0 %v18230_v19  ;;  %v14660_v19 = vpack.c.bf16 %v7416_v18, %v7404_v54 }
 0x3f4   :  { %10209 = vmatmul.mubr.bf16.gmra.mxu1 %v19593_v31  ;;  %10287 = vmatprep.subr.bf16.mxu0 %v18430_v34  ;;  %v18599_v34 = vpop.permute.xlu1 %8392 }
 0x3f5   :  { %10385 = vmatpush1.bf16.msra.mxu1 %v18380_v2  ;;  %13718 = vmatprep.mubr.msk.bf16.mxu1 %vm6468_vm1, %v19594_v36  ;;  %v18603_v2 = vpop.permute.xlu0 %8377 }
 0x3f6   :  { %10386 = vmatprep.subr.bf16.mxu1 %v18503_v55  ;;  %10136 = vmatmul.mubr.bf16.gmra.mxu0 %v19575_v37  ;;  %v19596_v55 = vld [vmem:[#allocation9_spill] sm:$0xff] }
 0x3f7   :  { %10288 = vmatpush2.bf16.msra.mxu0 %v18260_v20  ;;  %10291 = vmatprep.mubr.bf16.mxu0 %v18477_v53  ;;  %v19597_v53 = vld [vmem:[#allocation10_spill] sm:$0xff] }
 0x3f8   :  { %10289 = vmatprep.subr.bf16.mxu0 %v18375_v9  ;;  %v18609_v42 = vpop.permute.xlu1 %8382 }
 0x3f9   :  { %10387 = vmatpush1.bf16.msra.mxu1 %v19587_v56  ;;  %v18612_v44 = vpop.permute.xlu0 %8367 }
 0x3fa   :  { %10402 = vmatprep.subr.bf16.mxu1 %v14660_v19 }
 0x3fb   :  { %10290 = vmatpush2.bf16.msra.mxu0 %v19563_v57 }
 0x3fc   :  { %10219 = vmatmul.mubr.bf16.gmra.mxu1 %v18266_v27  ;;  %v18615_v63 = vpop.permute.xlu1 %8372 }
 0x3fd   :  { %10403 = vmatpush2.bf16.msra.mxu1 %v14650_v41  ;;  %13719 = vmatprep.mubr.msk.bf16.mxu1 %vm6468_vm1, %v19596_v55  ;;  %v18621_v46 = vpop.permute.xlu0 %8357 }
 0x3fe   :  { %v9615_v20 = vpop.f32.mrf.mxu0  ;;  %10292 = vmatmul.mubr.bf16.vlgmr.msra.gmra.mxu0 %v19597_v53 }
 0x3ff   :  { %10301 = vmatprep.mubr.bf16.mxu0 %v19577_v10 }
 0x400   :  { %v9617_v9 = vpop.f32.mrf.mxu0  ;;  %v18623_v24 = vpop.permute.xlu1 %8362 }
 0x401   :  { %v18630_v51 = vpop.permute.xlu0 %8347 }
 0x402   :  { %v9619_v29 = vpop.f32.mrf.mxu0 }
 0x404   :  { %v9621_v57 = vpop.f32.mrf.mxu0  ;;  %10229 = vmatmul.mubr.bf16.gmra.mxu1 %v19598_v6  ;;  %v18638_v8 = vpop.permute.xlu1 %8352 }
 0x405   :  { %13720 = vmatprep.mubr.msk.bf16.mxu1 %vm6468_vm1, %v19599_v35  ;;  %v18642_v39 = vpop.permute.xlu0 %8337 }
 0x406   :  { %v9625_v23 = vpop.f32.mrf.mxu0  ;;  %10302 = vmatmul.mubr.bf16.gmra.mxu0 %v19600_v22 }
 0x407   :  { %10311 = vmatprep.mubr.bf16.mxu0 %v19601_v47 }
 0x408   :  { %v9627_v10 = vpop.f32.mrf.mxu0 }
 0x409   :  { %v18659_v41 = vpop.permute.xlu0 %8327 }
 0x40a   :  { %v9629_v40 = vpop.f32.mrf.mxu0  ;;  %19603 = vst [vmem:[#allocation6_spill] sm:$0xff] %v18659_v41  ;;  %v9616_v32 = vadd.f32 %v9615_v20, %v18659_v41 }
 0x40c   :  { %v18625_v11 = vpop.f32.mrf.mxu0  ;;  %10239 = vmatmul.mubr.bf16.gmra.mxu1 %v19602_v28 }
 0x40d   :  { %13721 = vmatprep.mubr.msk.bf16.mxu1 %vm6468_vm1, %v18324_v0 }
 0x40e   :  { %v18632_v21 = vpop.f32.mrf.mxu0  ;;  %10312 = vmatmul.mubr.bf16.gmra.mxu0 %v18009_v14 }
 0x40f   :  { %10321 = vmatprep.mubr.bf16.mxu0 %v18017_v58  ;;  %v18654_v58 = vpop.permute.xlu1 %8342 }
 0x410   :  { %v18636_v12 = vpop.f32.mrf.mxu0 }
 0x412   :  { %v18640_v15 = vpop.f32.mrf.mxu0 }
 0x413   :  { %v18667_v60 = vpop.permute.xlu1 %8332 }
 0x414   :  { %v18644_v49 = vpop.f32.mrf.mxu0  ;;  %10249 = vmatmul.mubr.bf16.gmra.mxu1 %v18349_v7  ;;  %v9620_v20 = vadd.f32 %v9619_v29, %v18667_v60  ;;  %v9622_v47 = vadd.f32 %v9621_v57, %v18667_v60  ;;  %v9628_v29 = vadd.f32 %v9627_v10, %v18642_v39 }
 0x415   :  { %13722 = vmatprep.mubr.msk.bf16.mxu1 %vm6468_vm1, %v15301_v61 }
 0x416   :  { %v18651_v14 = vpop.f32.mrf.mxu0  ;;  %10322 = vmatmul.mubr.bf16.gmra.mxu0 %v18040_v5  ;;  %v9618_v5 = vadd.f32 %v9617_v9, %v18659_v41  ;;  %v9626_v41 = vadd.f32 %v9625_v23, %v18642_v39  ;;  %v9630_v23 = vadd.f32 %v9629_v40, %v18654_v58  ;;  %v9636_v40 = vadd.f32 %v18632_v21, %v18630_v51 }
 0x417   :  { %10331 = vmatprep.mubr.bf16.mxu0 %v18048_v50 }
 0x418   :  { %v18657_v13 = vpop.f32.mrf.mxu0 }
 0x41a   :  { %v18661_v56 = vpop.f32.mrf.mxu0 }
 0x41c   :  { %v18664_v48 = vpop.f32.mrf.mxu0  ;;  %v9728_v18 = vpop.f32.mrf.mxu1  ;;  %10405 = vmatmul.mubr.bf16.vlgmr.msra.gmra.mxu1 %v18076_v25 }
 0x41d   :  { %v9729_v54 = vadd.f32 %v9728_v18, %v9616_v32  ;;  %13723 = vmatprep.mubr.msk.bf16.mxu1 %vm6468_vm1, %v18084_v52 }
 0x41e   :  { %v18672_v50 = vpop.f32.mrf.mxu0  ;;  %v9730_v19 = vpop.f32.mrf.mxu1  ;;  %10332 = vmatmul.mubr.bf16.gmra.mxu0 %v18090_v16 }
 0x41f   :  { %v9731_v53 = vadd.f32 %v9730_v19, %v9618_v5  ;;  %10341 = vmatprep.mubr.bf16.mxu0 %v18104_v1  ;;  %v10485_v9 = vmax.f32 %v9729_v54, 0.0 }
 0x420   :  { %v18677_v22 = vpop.f32.mrf.mxu0  ;;  %v9732_v25 = vpop.f32.mrf.mxu1 }
 0x421   :  { %v10486_v61 = vmax.f32 %v9731_v53, 0.0  ;;  %v9733_v32 = vadd.f32 %v9732_v25, %v9620_v20 }
 0x422   :  { %v18680_v18 = vpop.f32.mrf.mxu0  ;;  %v9734_v52 = vpop.f32.mrf.mxu1 }
 0x423   :  { %v10613_v30 = vmax.f32 %v10485_v9, %v10486_v61  ;;  %v9735_v16 = vadd.f32 %v9734_v52, %v9622_v47  ;;  %v10493_v7 = vmax.f32 %v9733_v32, 0.0 }
 0x424   :  { %v18684_v5 = vpop.f32.mrf.mxu0  ;;  %v9738_v1 = vpop.f32.mrf.mxu1  ;;  %10415 = vmatmul.mubr.bf16.gmra.mxu1 %v18139_v59  ;;  %v9632_v59 = vadd.f32 %v18625_v11, %v18654_v58 }
 0x425   :  { %v14379_v19 = vpack.c.bf16 %v10613_v30, %v10613_v30  ;;  %v10494_v57 = vmax.f32 %v9735_v16, 0.0  ;;  %v9739_v54 = vadd.f32 %v9738_v1, %v9626_v41  ;;  %13724 = vmatprep.mubr.msk.bf16.mxu1 %vm6468_vm1, %v18147_v3 }
 0x426   :  { %v18689_v20 = vpop.f32.mrf.mxu0  ;;  %v9740_v53 = vpop.f32.mrf.mxu1  ;;  %10342 = vmatmul.mubr.bf16.gmra.mxu0 %v18153_v38 }
 0x427   :  { %10693 = vst [vmem:[#allocation5] sm:$0xf] %v14379_v19  ;;  %v10614_v10 = vmax.f32 %v10493_v7, %v10494_v57  ;;  %v9741_v25 = vadd.f32 %v9740_v53, %v9628_v29  ;;  %10351 = vmatprep.mubr.bf16.mxu0 %v19564_v43  ;;  %v10501_v3 = vmax.f32 %v9739_v54, 0.0  ;;  %v9638_v43 = vadd.f32 %v18636_v12, %v18630_v51 }
 0x428   :  { %v18696_v30 = vpop.f32.mrf.mxu0  ;;  %v9742_v41 = vpop.f32.mrf.mxu1  ;;  %v9640_v12 = vadd.f32 %v18640_v15, %v18638_v8  ;;  %v9646_v15 = vadd.f32 %v18651_v14, %v18621_v46 }
 0x429   :  { %v14380_v47 = vpack.c.bf16 %v10614_v10, %v10614_v10  ;;  %v10502_v9 = vmax.f32 %v9741_v25, 0.0  ;;  %v9743_v61 = vadd.f32 %v9742_v41, %v9630_v23 }
 0x42a   :  { %v18698_v32 = vpop.f32.mrf.mxu0  ;;  %v9744_v38 = vpop.f32.mrf.mxu1 }
 0x42b   :  { %10694 = vst [vmem:[#allocation5 + $0x10] sm:$0xf] %v14380_v47  ;;  %v10615_v7 = vmax.f32 %v10501_v3, %v10502_v9  ;;  %v9745_v52 = vadd.f32 %v9744_v38, %v9632_v59  ;;  %v10509_v1 = vmax.f32 %v9743_v61, 0.0 }
 0x42c   :  { %v18704_v11 = vpop.f32.mrf.mxu0  ;;  %v9748_v16 = vpop.f32.mrf.mxu1  ;;  %10425 = vmatmul.mubr.bf16.gmra.mxu1 %v19586_v26  ;;  %v9642_v26 = vadd.f32 %v18644_v49, %v18638_v8 }
 0x42d   :  { %v14381_v29 = vpack.c.bf16 %v10615_v7, %v10615_v7  ;;  %v10510_v19 = vmax.f32 %v9745_v52, 0.0  ;;  %v9749_v57 = vadd.f32 %v9748_v16, %v9636_v40  ;;  %13725 = vmatprep.mubr.msk.bf16.mxu1 %vm6468_vm1, %v19588_v33 }
 0x42e   :  { %v18709_v54 = vpop.f32.mrf.mxu0  ;;  %v9750_v21 = vpop.f32.mrf.mxu1  ;;  %10352 = vmatmul.mubr.bf16.gmra.mxu0 %v19589_v62 }
 0x42f   :  { %10695 = vst [vmem:[#allocation5 + $0x20] sm:$0xf] %v14381_v29  ;;  %v10616_v53 = vmax.f32 %v10509_v1, %v10510_v19  ;;  %v9751_v23 = vadd.f32 %v9750_v21, %v9638_v43  ;;  %10361 = vmatprep.mubr.bf16.mxu0 %v19590_v4  ;;  %v10517_v59 = vmax.f32 %v9749_v57, 0.0  ;;  %v9648_v4 = vadd.f32 %v18657_v13, %v18621_v46 }
 0x430   :  { %v18717_v10 = vpop.f32.mrf.mxu0  ;;  %v9752_v25 = vpop.f32.mrf.mxu1  ;;  %v9650_v13 = vadd.f32 %v18661_v56, %v18623_v24  ;;  %v19604_v19 = vmov 0   ;;  %v9656_v56 = vadd.f32 %v18672_v50, %v18612_v44 }
 0x431   :  { %v14382_v33 = vpack.c.bf16 %v10616_v53, %v10616_v53  ;;  %v10518_v41 = vmax.f32 %v9751_v23, 0.0  ;;  %v9753_v47 = vadd.f32 %v9752_v25, %v9640_v12 }
 0x432   :  { %v18719_v3 = vpop.f32.mrf.mxu0  ;;  %v9754_v62 = vpop.f32.mrf.mxu1 }
 0x433   :  { %10696 = vst [vmem:[#allocation5 + $0x30] sm:$0xf] %v14382_v33  ;;  %v10617_v9 = vmax.f32 %v10517_v59, %v10518_v41  ;;  %v9755_v61 = vadd.f32 %v9754_v62, %v9642_v26  ;;  %v10525_v7 = vmax.f32 %v9753_v47, 0.0  ;;  %v9658_v59 = vadd.f32 %v18677_v22, %v18612_v44 }
 0x434   :  { %v18725_v49 = vpop.f32.mrf.mxu0  ;;  %v9758_v38 = vpop.f32.mrf.mxu1  ;;  %10435 = vmatmul.mubr.bf16.gmra.mxu1 %v19593_v31  ;;  %v9652_v31 = vadd.f32 %v18664_v48, %v18623_v24 }
 0x435   :  { %v14383_v40 = vpack.c.bf16 %v10617_v9, %v10617_v9  ;;  %v10526_v52 = vmax.f32 %v9755_v61, 0.0  ;;  %v9759_v43 = vadd.f32 %v9758_v38, %v9646_v15  ;;  %13726 = vmatprep.mubr.msk.bf16.mxu1 %vm6468_vm1, %v19594_v36 }
 0x436   :  { %v18730_v16 = vpop.f32.mrf.mxu0  ;;  %v9760_v14 = vpop.f32.mrf.mxu1  ;;  %10362 = vmatmul.mubr.bf16.gmra.mxu0 %v19575_v37 }
 0x437   :  { %10697 = vst [vmem:[#allocation5 + $0x40] sm:$0xf] %v14383_v40  ;;  %v10618_v29 = vmax.f32 %v10525_v7, %v10526_v52  ;;  %v9761_v1 = vadd.f32 %v9760_v14, %v9648_v4  ;;  %11285 = vmatprep.mubr.bf16.mxu0 %v19604_v19  ;;  %v10533_v12 = vmax.f32 %v9759_v43, 0.0  ;;  %v9660_v4 = vadd.f32 %v18680_v18, %v18615_v63 }
 0x438   :  { %v18738_v57 = vpop.f32.mrf.mxu0  ;;  %v9762_v21 = vpop.f32.mrf.mxu1  ;;  %v9662_v40 = vadd.f32 %v18684_v5, %v18615_v63 }
 0x439   :  { %v14384_v36 = vpack.c.bf16 %v10618_v29, %v10618_v29  ;;  %v10534_v53 = vmax.f32 %v9761_v1, 0.0  ;;  %v9763_v23 = vadd.f32 %v9762_v21, %v9650_v13  ;;  %v9666_v1 = vadd.f32 %v18689_v20, %v18603_v2 }
 0x43a   :  { %v18740_v26 = vpop.f32.mrf.mxu0  ;;  %v9764_v37 = vpop.f32.mrf.mxu1  ;;  %v9668_v21 = vadd.f32 %v18696_v30, %v18603_v2 }
 0x43b   :  { %10698 = vst [vmem:[#allocation5 + $0x50] sm:$0xf] %v14384_v36  ;;  %v10619_v25 = vmax.f32 %v10533_v12, %v10534_v53  ;;  %v9765_v33 = vadd.f32 %v9764_v37, %v9652_v31  ;;  %v10541_v62 = vmax.f32 %v9763_v23, 0.0 }
 0x43c   :  { %v18746_v48 = vpop.f32.mrf.mxu0  ;;  %v9768_v41 = vpop.f32.mrf.mxu1  ;;  %10445 = vmatmul.mubr.bf16.gmra.mxu1 %v18266_v27 }
 0x43d   :  { %v14385_v47 = vpack.c.bf16 %v10619_v25, %v10619_v25  ;;  %v10542_v15 = vmax.f32 %v9765_v33, 0.0  ;;  %v9769_v9 = vadd.f32 %v9768_v41, %v9656_v56  ;;  %13727 = vmatprep.mubr.msk.bf16.mxu1 %vm6468_vm1, %v19596_v55  ;;  %v9670_v25 = vadd.f32 %v18698_v32, %v18609_v42 }
 0x43e   :  { %v9770_v61 = vpop.f32.mrf.mxu1  ;;  %v18751_v50 = vpop.f32.mrf.mxu0 }
 0x43f   :  { %10699 = vst [vmem:[#allocation5 + $0x60] sm:$0xf] %v14385_v47  ;;  %v10620_v22 = vmax.f32 %v10541_v62, %v10542_v15  ;;  %v9771_v38 = vadd.f32 %v9770_v61, %v9658_v59  ;;  %v10549_v43 = vmax.f32 %v9769_v9, 0.0  ;;  %v9672_v59 = vadd.f32 %v18704_v11, %v18609_v42 }
 0x440   :  { %v9772_v27 = vpop.f32.mrf.mxu1  ;;  %v18757_v7 = vpop.f32.mrf.mxu0 }
 0x441   :  { %v14386_v52 = vpack.c.bf16 %v10620_v22, %v10620_v22  ;;  %v10550_v14 = vmax.f32 %v9771_v38, 0.0  ;;  %v9773_v13 = vadd.f32 %v9772_v27, %v9660_v4  ;;  %v9676_v4 = vadd.f32 %v18709_v54, %v18591_v45 }
 0x442   :  { %v9774_v55 = vpop.f32.mrf.mxu1  ;;  %v18759_v29 = vpop.f32.mrf.mxu0  ;;  %v9678_v38 = vadd.f32 %v18717_v10, %v18591_v45 }
 0x443   :  { %10700 = vst [vmem:[#allocation5 + $0x70] sm:$0xf] %v14386_v52  ;;  %v10621_v18 = vmax.f32 %v10549_v43, %v10550_v14  ;;  %v9775_v31 = vadd.f32 %v9774_v55, %v9662_v40  ;;  %v10557_v53 = vmax.f32 %v9773_v13, 0.0  ;;  %v9680_v55 = vadd.f32 %v18719_v3, %v18599_v34 }
 0x444   :  { %v9778_v5 = vpop.f32.mrf.mxu1  ;;  %v18765_v36 = vpop.f32.mrf.mxu0  ;;  %10455 = vmatmul.mubr.bf16.gmra.mxu1 %v19598_v6 }
 0x445   :  { %v14387_v12 = vpack.c.bf16 %v10621_v18, %v10621_v18  ;;  %v10558_v23 = vmax.f32 %v9775_v31, 0.0  ;;  %v9779_v37 = vadd.f32 %v9778_v5, %v9666_v1  ;;  %13728 = vmatprep.mubr.msk.bf16.mxu1 %vm6468_vm1, %v19599_v35  ;;  %v9682_v18 = vadd.f32 %v18725_v49, %v18599_v34 }
 0x446   :  { %v9780_v56 = vpop.f32.mrf.mxu1  ;;  %v18770_v20 = vpop.f32.mrf.mxu0 }
 0x447   :  { %10701 = vst [vmem:[#allocation5 + $0x80] sm:$0xf] %v14387_v12  ;;  %v10622_v30 = vmax.f32 %v10557_v53, %v10558_v23  ;;  %v9781_v33 = vadd.f32 %v9780_v56, %v9668_v21  ;;  %v10565_v62 = vmax.f32 %v9779_v37, 0.0  ;;  %v9686_v37 = vadd.f32 %v18730_v16, %v18578_v17  ;;  %v19606_v16 = vld [vmem:[#allocation18_spill] sm:$0xff] }
 0x448   :  { %v9782_v6 = vpop.f32.mrf.mxu1  ;;  %v18776_v41 = vpop.f32.mrf.mxu0 }
 0x449   :  { %v14388_v47 = vpack.c.bf16 %v10622_v30, %v10622_v30  ;;  %v10566_v15 = vmax.f32 %v9781_v33, 0.0  ;;  %v9783_v9 = vadd.f32 %v9782_v6, %v9670_v25  ;;  %v9688_v25 = vadd.f32 %v18738_v57, %v18578_v17  ;;  %v19605_v33 = vld [vmem:[#allocation31_spill] sm:$0xff] }
 0x44a   :  { %v9784_v35 = vpop.f32.mrf.mxu1  ;;  %v18778_v61 = vpop.f32.mrf.mxu0 }
 0x44b   :  { %10702 = vst [vmem:[#allocation5 + $0x90] sm:$0xf] %v14388_v47  ;;  %v10623_v32 = vmax.f32 %v10565_v62, %v10566_v15  ;;  %v9785_v22 = vadd.f32 %v9784_v35, %v9672_v59  ;;  %v10573_v52 = vmax.f32 %v9783_v9, 0.0  ;;  %v9690_v35 = vadd.f32 %v18740_v26, %v19606_v16 }
 0x44c   :  { %v9788_v11 = vpop.f32.mrf.mxu1  ;;  %v18784_v40 = vpop.f32.mrf.mxu0  ;;  %10465 = vmatmul.mubr.bf16.gmra.mxu1 %v19602_v28 }
 0x44d   :  { %v14389_v27 = vpack.c.bf16 %v10623_v32, %v10623_v32  ;;  %v10574_v43 = vmax.f32 %v9785_v22, 0.0  ;;  %v9789_v14 = vadd.f32 %v9788_v11, %v9676_v4  ;;  %13729 = vmatprep.mubr.msk.bf16.mxu1 %vm6468_vm1, %v18324_v0  ;;  %v9692_v32 = vadd.f32 %v18746_v48, %v19606_v16 }
 0x44e   :  { %v9790_v13 = vpop.f32.mrf.mxu1  ;;  %v18789_v54 = vpop.f32.mrf.mxu0 }
 0x44f   :  { %10703 = vst [vmem:[#allocation5 + $0xa0] sm:$0xf] %v14389_v27  ;;  %v10624_v10 = vmax.f32 %v10573_v52, %v10574_v43  ;;  %v9791_v1 = vadd.f32 %v9790_v13, %v9678_v38  ;;  %v10581_v5 = vmax.f32 %v9789_v14, 0.0 }
 0x450   :  { %v9792_v28 = vpop.f32.mrf.mxu1  ;;  %v18795_v31 = vpop.f32.mrf.mxu0 }
 0x451   :  { %v14390_v21 = vpack.c.bf16 %v10624_v10, %v10624_v10  ;;  %v10582_v12 = vmax.f32 %v9791_v1, 0.0  ;;  %v9793_v53 = vadd.f32 %v9792_v28, %v9680_v55  ;;  %v19607_v55 = vld [vmem:[#allocation6_spill] sm:$0xff] }
 0x452   :  { %v9794_v0 = vpop.f32.mrf.mxu1  ;;  %v18797_v23 = vpop.f32.mrf.mxu0  ;;  %v9842_v10 = vadd.f32 %v18751_v50, %v19607_v55 }
 0x453   :  { %10704 = vst [vmem:[#allocation5 + $0xb0] sm:$0xf] %v14390_v21  ;;  %v10625_v3 = vmax.f32 %v10581_v5, %v10582_v12  ;;  %v9795_v56 = vadd.f32 %v9794_v0, %v9682_v18  ;;  %v10589_v6 = vmax.f32 %v9793_v53, 0.0  ;;  %v9844_v18 = vadd.f32 %v18757_v7, %v19607_v55 }
 0x454   :  { %v9798_v49 = vpop.f32.mrf.mxu1  ;;  %v18803_v30 = vpop.f32.mrf.mxu0  ;;  %10475 = vmatmul.mubr.bf16.gmra.mxu1 %v19605_v33 }
 0x455   :  { %v14391_v59 = vpack.c.bf16 %v10625_v3, %v10625_v3  ;;  %v10590_v47 = vmax.f32 %v9795_v56, 0.0  ;;  %v9799_v62 = vadd.f32 %v9798_v49, %v9686_v37  ;;  %11398 = vmatprep.mubr.bf16.mxu1 %v19604_v19  ;;  %v9846_v3 = vadd.f32 %v18759_v29, %v18667_v60 }
 0x456   :  { %v9800_v15 = vpop.f32.mrf.mxu1  ;;  %v18807_v9 = vpop.f32.mrf.mxu0 }
 0x457   :  { %10705 = vst [vmem:[#allocation5 + $0xc0] sm:$0xf] %v14391_v59  ;;  %v10626_v4 = vmax.f32 %v10589_v6, %v10590_v47  ;;  %v9801_v57 = vadd.f32 %v9800_v15, %v9688_v25  ;;  %v10597_v27 = vmax.f32 %v9799_v62, 0.0  ;;  %v9848_v25 = vadd.f32 %v18765_v36, %v18667_v60 }
 0x458   :  { %v9802_v22 = vpop.f32.mrf.mxu1  ;;  %v18813_v38 = vpop.f32.mrf.mxu0 }
 0x459   :  { %v14392_v11 = vpack.c.bf16 %v10626_v4, %v10626_v4  ;;  %v10598_v52 = vmax.f32 %v9801_v57, 0.0  ;;  %v9803_v43 = vadd.f32 %v9802_v22, %v9690_v35  ;;  %v9852_v35 = vadd.f32 %v18770_v20, %v18642_v39 }
 0x45a   :  { %v9804_v14 = vpop.f32.mrf.mxu1  ;;  %v18815_v13 = vpop.f32.mrf.mxu0  ;;  %v9854_v57 = vadd.f32 %v18776_v41, %v18642_v39 }
 0x45b   :  { %10706 = vst [vmem:[#allocation5 + $0xd0] sm:$0xf] %v14392_v11  ;;  %v10627_v26 = vmax.f32 %v10597_v27, %v10598_v52  ;;  %v9805_v1 = vadd.f32 %v9804_v14, %v9692_v32  ;;  %v10605_v5 = vmax.f32 %v9803_v43, 0.0 }
 0x45c   :  { %v18821_v48 = vpop.f32.mrf.mxu0  ;;  %v9954_v28 = vpop.f32.mrf.mxu1 }
 0x45d   :  { %v14393_v21 = vpack.c.bf16 %v10627_v26, %v10627_v26  ;;  %v10606_v12 = vmax.f32 %v9805_v1, 0.0  ;;  %v9955_v53 = vadd.f32 %v9954_v28, %v9842_v10  ;;  %v9856_v10 = vadd.f32 %v18778_v61, %v18654_v58 }
 0x45e   :  { %v18823_v0 = vpop.f32.mrf.mxu0  ;;  %v9956_v37 = vpop.f32.mrf.mxu1  ;;  %v9858_v1 = vadd.f32 %v18784_v40, %v18654_v58 }
 0x45f   :  { %10707 = vst [vmem:[#allocation5 + $0xe0] sm:$0xf] %v14393_v21  ;;  %v10628_v50 = vmax.f32 %v10605_v5, %v10606_v12  ;;  %v9957_v56 = vadd.f32 %v9956_v37, %v9844_v18  ;;  %v10487_v59 = vmax.f32 %v9955_v53, 0.0 }
 0x460   :  { %v18829_v7 = vpop.f32.mrf.mxu0  ;;  %v9958_v49 = vpop.f32.mrf.mxu1 }
 0x461   :  { %v14394_v33 = vpack.c.bf16 %v10628_v50, %v10628_v50  ;;  %v10488_v6 = vmax.f32 %v9957_v56, 0.0  ;;  %v9959_v47 = vadd.f32 %v9958_v49, %v9846_v3  ;;  %v9862_v3 = vadd.f32 %v18789_v54, %v18630_v51 }
 0x462   :  { %v18831_v62 = vpop.f32.mrf.mxu0  ;;  %v9960_v15 = vpop.f32.mrf.mxu1  ;;  %v9864_v56 = vadd.f32 %v18795_v31, %v18630_v51 }
 0x463   :  { %10708 = vst [vmem:[#allocation5 + $0xf0] sm:$0xf] %v14394_v33  ;;  %v10709_v29 = vmax.f32 %v10487_v59, %v10488_v6  ;;  %v9961_v4 = vadd.f32 %v9960_v15, %v9848_v25  ;;  %v10495_v11 = vmax.f32 %v9959_v47, 0.0 }
 0x464   :  { %v18837_v36 = vpop.f32.mrf.mxu0  ;;  %v9964_v32 = vpop.f32.mrf.mxu1 }
 0x465   :  { %v14395_v22 = vpack.c.bf16 %v10709_v29, %v10709_v29  ;;  %v10496_v27 = vmax.f32 %v9961_v4, 0.0  ;;  %v9965_v52 = vadd.f32 %v9964_v32, %v9852_v35  ;;  %v9866_v35 = vadd.f32 %v18797_v23, %v18638_v8 }
 0x466   :  { %v18839_v43 = vpop.f32.mrf.mxu0  ;;  %v9966_v14 = vpop.f32.mrf.mxu1  ;;  %v9868_v4 = vadd.f32 %v18803_v30, %v18638_v8 }
 0x467   :  { %10789 = vst [vmem:[#allocation5 + $0x4] sm:$0xf] %v14395_v22  ;;  %v10710_v20 = vmax.f32 %v10495_v11, %v10496_v27  ;;  %v9967_v26 = vadd.f32 %v9966_v14, %v9854_v57  ;;  %v10503_v21 = vmax.f32 %v9965_v52, 0.0 }
 0x468   :  { %v18845_v41 = vpop.f32.mrf.mxu0  ;;  %v9968_v18 = vpop.f32.mrf.mxu1 }
 0x469   :  { %v14396_v28 = vpack.c.bf16 %v10710_v20, %v10710_v20  ;;  %v10504_v5 = vmax.f32 %v9967_v26, 0.0  ;;  %v9969_v12 = vadd.f32 %v9968_v18, %v9856_v10  ;;  %v9872_v10 = vadd.f32 %v18807_v9, %v18621_v46 }
 0x46a   :  { %v18847_v53 = vpop.f32.mrf.mxu0  ;;  %v9970_v37 = vpop.f32.mrf.mxu1  ;;  %v9874_v26 = vadd.f32 %v18813_v38, %v18621_v46 }
 0x46b   :  { %10790 = vst [vmem:[#allocation5 + $0x14] sm:$0xf] %v14396_v28  ;;  %v10711_v61 = vmax.f32 %v10503_v21, %v10504_v5  ;;  %v9971_v50 = vadd.f32 %v9970_v37, %v9858_v1  ;;  %v10511_v33 = vmax.f32 %v9969_v12, 0.0 }
 0x46c   :  { %v18853_v40 = vpop.f32.mrf.mxu0  ;;  %v9974_v25 = vpop.f32.mrf.mxu1 }
 0x46d   :  { %v14397_v49 = vpack.c.bf16 %v10711_v61, %v10711_v61  ;;  %v10512_v59 = vmax.f32 %v9971_v50, 0.0  ;;  %v9975_v6 = vadd.f32 %v9974_v25, %v9862_v3  ;;  %v9876_v3 = vadd.f32 %v18815_v13, %v18623_v24 }
 0x46e   :  { %v18855_v47 = vpop.f32.mrf.mxu0  ;;  %v9976_v15 = vpop.f32.mrf.mxu1  ;;  %v9878_v50 = vadd.f32 %v18821_v48, %v18623_v24 }
 0x46f   :  { %10791 = vst [vmem:[#allocation5 + $0x24] sm:$0xf] %v14397_v49  ;;  %v10712_v54 = vmax.f32 %v10511_v33, %v10512_v59  ;;  %v9977_v29 = vadd.f32 %v9976_v15, %v9864_v56  ;;  %v10519_v22 = vmax.f32 %v9975_v6, 0.0 }
 0x470   :  { %v18861_v31 = vpop.f32.mrf.mxu0  ;;  %v9978_v57 = vpop.f32.mrf.mxu1 }
 0x471   :  { %v14398_v32 = vpack.c.bf16 %v10712_v54, %v10712_v54  ;;  %v10520_v11 = vmax.f32 %v9977_v29, 0.0  ;;  %v9979_v27 = vadd.f32 %v9978_v57, %v9866_v35  ;;  %v9882_v35 = vadd.f32 %v18823_v0, %v18612_v44 }
 0x472   :  { %v18863_v52 = vpop.f32.mrf.mxu0  ;;  %v9980_v14 = vpop.f32.mrf.mxu1  ;;  %v9884_v29 = vadd.f32 %v18829_v7, %v18612_v44 }
 0x473   :  { %10792 = vst [vmem:[#allocation5 + $0x34] sm:$0xf] %v14398_v32  ;;  %v10713_v23 = vmax.f32 %v10519_v22, %v10520_v11  ;;  %v9981_v20 = vadd.f32 %v9980_v14, %v9868_v4  ;;  %v10527_v28 = vmax.f32 %v9979_v27, 0.0 }
 0x474   :  { %v18869_v30 = vpop.f32.mrf.mxu0  ;;  %v9984_v1 = vpop.f32.mrf.mxu1 }
 0x475   :  { %v14399_v18 = vpack.c.bf16 %v10713_v23, %v10713_v23  ;;  %v10528_v21 = vmax.f32 %v9981_v20, 0.0  ;;  %v9985_v5 = vadd.f32 %v9984_v1, %v9872_v10  ;;  %v9886_v10 = vadd.f32 %v18831_v62, %v18615_v63 }
 0x476   :  { %v18871_v12 = vpop.f32.mrf.mxu0  ;;  %v9986_v37 = vpop.f32.mrf.mxu1  ;;  %v9888_v20 = vadd.f32 %v18837_v36, %v18615_v63 }
 0x477   :  { %10793 = vst [vmem:[#allocation5 + $0x44] sm:$0xf] %v14399_v18  ;;  %v10714_v9 = vmax.f32 %v10527_v28, %v10528_v21  ;;  %v9987_v61 = vadd.f32 %v9986_v37, %v9874_v26  ;;  %v10535_v49 = vmax.f32 %v9985_v5, 0.0 }
 0x478   :  { %v18877_v38 = vpop.f32.mrf.mxu0  ;;  %v9988_v56 = vpop.f32.mrf.mxu1 }
 0x479   :  { %v14400_v25 = vpack.c.bf16 %v10714_v9, %v10714_v9  ;;  %v10536_v33 = vmax.f32 %v9987_v61, 0.0  ;;  %v9989_v59 = vadd.f32 %v9988_v56, %v9876_v3  ;;  %v9892_v3 = vadd.f32 %v18839_v43, %v18603_v2 }
 0x47a   :  { %v18879_v6 = vpop.f32.mrf.mxu0  ;;  %v9990_v15 = vpop.f32.mrf.mxu1  ;;  %v9894_v61 = vadd.f32 %v18845_v41, %v18603_v2 }
 0x47b   :  { %10794 = vst [vmem:[#allocation5 + $0x54] sm:$0xf] %v14400_v25  ;;  %v10715_v13 = vmax.f32 %v10535_v49, %v10536_v33  ;;  %v9991_v54 = vadd.f32 %v9990_v15, %v9878_v50  ;;  %v10543_v32 = vmax.f32 %v9989_v59, 0.0 }
 0x47c   :  { %v18885_v48 = vpop.f32.mrf.mxu0  ;;  %v9994_v4 = vpop.f32.mrf.mxu1 }
 0x47d   :  { %v14401_v57 = vpack.c.bf16 %v10715_v13, %v10715_v13  ;;  %v10544_v22 = vmax.f32 %v9991_v54, 0.0  ;;  %v9995_v11 = vadd.f32 %v9994_v4, %v9882_v35  ;;  %v9896_v35 = vadd.f32 %v18847_v53, %v18609_v42 }
 0x47e   :  { %v9996_v27 = vpop.f32.mrf.mxu1  ;;  %v18887_v14 = vpop.f32.mrf.mxu0  ;;  %v9898_v54 = vadd.f32 %v18853_v40, %v18609_v42 }
 0x47f   :  { %10795 = vst [vmem:[#allocation5 + $0x64] sm:$0xf] %v14401_v57  ;;  %v10716_v0 = vmax.f32 %v10543_v32, %v10544_v22  ;;  %v9997_v23 = vadd.f32 %v9996_v27, %v9884_v29  ;;  %v10551_v18 = vmax.f32 %v9995_v11, 0.0 }
 0x480   :  { %v9998_v7 = vpop.f32.mrf.mxu1  ;;  %v18893_v26 = vpop.f32.mrf.mxu0 }
 0x481   :  { %v14402_v1 = vpack.c.bf16 %v10716_v0, %v10716_v0  ;;  %v10552_v28 = vmax.f32 %v9997_v23, 0.0  ;;  %v9999_v21 = vadd.f32 %v9998_v7, %v9886_v10  ;;  %v9902_v10 = vadd.f32 %v18855_v47, %v18591_v45 }
 0x482   :  { %v10000_v5 = vpop.f32.mrf.mxu1  ;;  %v18895_v37 = vpop.f32.mrf.mxu0  ;;  %v9904_v23 = vadd.f32 %v18861_v31, %v18591_v45 }
 0x483   :  { %10796 = vst [vmem:[#allocation5 + $0x74] sm:$0xf] %v14402_v1  ;;  %v10717_v62 = vmax.f32 %v10551_v18, %v10552_v28  ;;  %v10001_v9 = vadd.f32 %v10000_v5, %v9888_v20  ;;  %v10559_v25 = vmax.f32 %v9999_v21, 0.0 }
 0x484   :  { %v10004_v36 = vpop.f32.mrf.mxu1  ;;  %v18901_v50 = vpop.f32.mrf.mxu0 }
 0x485   :  { %v14403_v56 = vpack.c.bf16 %v10717_v62, %v10717_v62  ;;  %v10560_v49 = vmax.f32 %v10001_v9, 0.0  ;;  %v10005_v33 = vadd.f32 %v10004_v36, %v9892_v3  ;;  %v9906_v3 = vadd.f32 %v18863_v52, %v18599_v34 }
 0x486   :  { %v10006_v59 = vpop.f32.mrf.mxu1  ;;  %v18903_v15 = vpop.f32.mrf.mxu0  ;;  %v9908_v9 = vadd.f32 %v18869_v30, %v18599_v34 }
 0x487   :  { %10797 = vst [vmem:[#allocation5 + $0x84] sm:$0xf] %v14403_v56  ;;  %v10718_v43 = vmax.f32 %v10559_v25, %v10560_v49  ;;  %v10007_v13 = vadd.f32 %v10006_v59, %v9894_v61  ;;  %v10567_v57 = vmax.f32 %v10005_v33, 0.0 }
 0x488   :  { %v10008_v41 = vpop.f32.mrf.mxu1  ;;  %v18909_v29 = vpop.f32.mrf.mxu0 }
 0x489   :  { %v14404_v4 = vpack.c.bf16 %v10718_v43, %v10718_v43  ;;  %v10568_v32 = vmax.f32 %v10007_v13, 0.0  ;;  %v10009_v22 = vadd.f32 %v10008_v41, %v9896_v35  ;;  %v9912_v35 = vadd.f32 %v18871_v12, %v18578_v17 }
 0x48a   :  { %v10010_v11 = vpop.f32.mrf.mxu1  ;;  %v18911_v27 = vpop.f32.mrf.mxu0  ;;  %v9914_v13 = vadd.f32 %v18877_v38, %v18578_v17 }
 0x48b   :  { %10798 = vst [vmem:[#allocation5 + $0x94] sm:$0xf] %v14404_v4  ;;  %v10719_v53 = vmax.f32 %v10567_v57, %v10568_v32  ;;  %v10011_v0 = vadd.f32 %v10010_v11, %v9898_v54  ;;  %v10575_v1 = vmax.f32 %v10009_v22, 0.0 }
 0x48c   :  { %v10014_v40 = vpop.f32.mrf.mxu1  ;;  %v18917_v20 = vpop.f32.mrf.mxu0 }
 0x48d   :  { %v14405_v7 = vpack.c.bf16 %v10719_v53, %v10719_v53  ;;  %v10576_v18 = vmax.f32 %v10011_v0, 0.0  ;;  %v10015_v28 = vadd.f32 %v10014_v40, %v9902_v10  ;;  %v9916_v10 = vadd.f32 %v18879_v6, %v19606_v16 }
 0x48e   :  { %v10016_v21 = vpop.f32.mrf.mxu1  ;;  %v18919_v5 = vpop.f32.mrf.mxu0  ;;  %v9918_v0 = vadd.f32 %v18885_v48, %v19606_v16 }
 0x48f   :  { %10799 = vst [vmem:[#allocation5 + $0xa4] sm:$0xf] %v14405_v7  ;;  %v10720_v47 = vmax.f32 %v10575_v1, %v10576_v18  ;;  %v10017_v62 = vadd.f32 %v10016_v21, %v9904_v23  ;;  %v10583_v56 = vmax.f32 %v10015_v28, 0.0 }
 0x490   :  { %v10018_v31 = vpop.f32.mrf.mxu1  ;;  %v18925_v61 = vpop.f32.mrf.mxu0 }
 0x491   :  { %v14406_v36 = vpack.c.bf16 %v10720_v47, %v10720_v47  ;;  %v10584_v25 = vmax.f32 %v10017_v62, 0.0  ;;  %v10019_v49 = vadd.f32 %v10018_v31, %v9906_v3  ;;  %v10068_v3 = vadd.f32 %v18887_v14, %v19607_v55 }
 0x492   :  { %v10020_v33 = vpop.f32.mrf.mxu1  ;;  %v18927_v59 = vpop.f32.mrf.mxu0  ;;  %v10070_v62 = vadd.f32 %v18893_v26, %v19607_v55 }
 0x493   :  { %10800 = vst [vmem:[#allocation5 + $0xb4] sm:$0xf] %v14406_v36  ;;  %v10721_v52 = vmax.f32 %v10583_v56, %v10584_v25  ;;  %v10021_v43 = vadd.f32 %v10020_v33, %v9908_v9  ;;  %v10591_v4 = vmax.f32 %v10019_v49, 0.0 }
 0x494   :  { %v10024_v30 = vpop.f32.mrf.mxu1  ;;  %v18933_v54 = vpop.f32.mrf.mxu0 }
 0x495   :  { %v14407_v41 = vpack.c.bf16 %v10721_v52, %v10721_v52  ;;  %v10592_v57 = vmax.f32 %v10021_v43, 0.0  ;;  %v10025_v32 = vadd.f32 %v10024_v30, %v9912_v35  ;;  %v10072_v35 = vadd.f32 %v18895_v37, %v18667_v60 }
 0x496   :  { %v10026_v22 = vpop.f32.mrf.mxu1  ;;  %v18935_v11 = vpop.f32.mrf.mxu0  ;;  %v10074_v43 = vadd.f32 %v18901_v50, %v18667_v60 }
 0x497   :  { %10801 = vst [vmem:[#allocation5 + $0xc4] sm:$0xf] %v14407_v41  ;;  %v10722_v12 = vmax.f32 %v10591_v4, %v10592_v57  ;;  %v10027_v53 = vadd.f32 %v10026_v22, %v9914_v13  ;;  %v10599_v7 = vmax.f32 %v10025_v32, 0.0 }
 0x498   :  { %v10028_v38 = vpop.f32.mrf.mxu1  ;;  %v18941_v23 = vpop.f32.mrf.mxu0 }
 0x499   :  { %v14408_v40 = vpack.c.bf16 %v10722_v12, %v10722_v12  ;;  %v10600_v1 = vmax.f32 %v10027_v53, 0.0  ;;  %v10029_v18 = vadd.f32 %v10028_v38, %v9916_v10  ;;  %v10078_v10 = vadd.f32 %v18903_v15, %v18642_v39 }
 0x49a   :  { %v10030_v28 = vpop.f32.mrf.mxu1  ;;  %v18943_v21 = vpop.f32.mrf.mxu0  ;;  %v10080_v53 = vadd.f32 %v18909_v29, %v18642_v39 }
 0x49b   :  { %10802 = vst [vmem:[#allocation5 + $0xd4] sm:$0xf] %v14408_v40  ;;  %v10723_v6 = vmax.f32 %v10599_v7, %v10600_v1  ;;  %v10031_v47 = vadd.f32 %v10030_v28, %v9918_v0  ;;  %v10607_v36 = vmax.f32 %v10029_v18, 0.0 }
 0x49c   :  { %v18949_v48 = vpop.f32.mrf.mxu0  ;;  %v10180_v9 = vpop.f32.mrf.mxu1 }
 0x49d   :  { %v14409_v31 = vpack.c.bf16 %v10723_v6, %v10723_v6  ;;  %v10608_v56 = vmax.f32 %v10031_v47, 0.0  ;;  %v10181_v25 = vadd.f32 %v10180_v9, %v10068_v3  ;;  %v10082_v3 = vadd.f32 %v18911_v27, %v18654_v58 }
 0x49e   :  { %v18951_v49 = vpop.f32.mrf.mxu0  ;;  %v10182_v33 = vpop.f32.mrf.mxu1  ;;  %v10084_v47 = vadd.f32 %v18917_v20, %v18654_v58  ;;  %v10088_v27 = vadd.f32 %v18919_v5, %v18630_v51  ;;  %v10090_v20 = vadd.f32 %v18925_v61, %v18630_v51  ;;  %v10092_v5 = vadd.f32 %v18927_v59, %v18638_v8 }
 0x49f   :  { %10803 = vst [vmem:[#allocation5 + $0xe4] sm:$0xf] %v14409_v31  ;;  %v10724_v14 = vmax.f32 %v10607_v36, %v10608_v56  ;;  %v10183_v52 = vadd.f32 %v10182_v33, %v10070_v62  ;;  %v10489_v41 = vmax.f32 %v10181_v25, 0.0  ;;  %v10098_v59 = vadd.f32 %v18935_v11, %v18621_v46 }
 0x4a0   :  { %v18957_v26 = vpop.f32.mrf.mxu0  ;;  %v10184_v13 = vpop.f32.mrf.mxu1  ;;  %v10102_v11 = vadd.f32 %v18943_v21, %v18623_v24  ;;  %v10108_v21 = vadd.f32 %v18951_v49, %v18612_v44 }
 0x4a1   :  { %v14410_v30 = vpack.c.bf16 %v10724_v14, %v10724_v14  ;;  %v10490_v4 = vmax.f32 %v10183_v52, 0.0  ;;  %v10185_v57 = vadd.f32 %v10184_v13, %v10072_v35  ;;  %v15106_v35 = vld [vmem:[#allocation5 + $0xe0] ss:$16 sps:$4 sm:$0xff]  }
 0x4a2   :  { %v18959_v32 = vpop.f32.mrf.mxu0  ;;  %v10186_v22 = vpop.f32.mrf.mxu1 }
 0x4a3   :  { %10804 = vst [vmem:[#allocation5 + $0xf4] sm:$0xf] %v14410_v30  ;;  %v10805_v37 = vmax.f32 %v10489_v41, %v10490_v4  ;;  %v10187_v12 = vadd.f32 %v10186_v22, %v10074_v43  ;;  %v10497_v40 = vmax.f32 %v10185_v57, 0.0  ;;  %v15111_v41 = vld [vmem:[#allocation5 + $0xc4] ss:$16 sps:$4 sm:$0xff]   ;;  %v10112_v49 = vadd.f32 %v18959_v32, %v18615_v63 }
 0x4a4   :  { %v18965_v50 = vpop.f32.mrf.mxu0  ;;  %v10190_v0 = vpop.f32.mrf.mxu1 }
 0x4a5   :  { %v14411_v38 = vpack.c.bf16 %v10805_v37, %v10805_v37  ;;  %v10498_v7 = vmax.f32 %v10187_v12, 0.0  ;;  %v10191_v1 = vadd.f32 %v10190_v0, %v10078_v10  ;;  %v15109_v0 = vld [vmem:[#allocation5 + $0xc0] ss:$16 sps:$4 sm:$0xff]  }
 0x4a6   :  { %v18967_v18 = vpop.f32.mrf.mxu0  ;;  %v10192_v28 = vpop.f32.mrf.mxu1 }
 0x4a7   :  { %10885 = vst [vmem:[#allocation5 + $0x8] sm:$0xf] %v14411_v38  ;;  %v10806_v15 = vmax.f32 %v10497_v40, %v10498_v7  ;;  %v10193_v6 = vadd.f32 %v10192_v28, %v10080_v53  ;;  %v10505_v31 = vmax.f32 %v10191_v1, 0.0  ;;  %v10094_v38 = vadd.f32 %v18933_v54, %v18638_v8  ;;  %v15114_v1 = vld [vmem:[#allocation5 + $0xa4] ss:$16 sps:$4 sm:$0xff]  }
 0x4a8   :  { %v18973_v29 = vpop.f32.mrf.mxu0  ;;  %v10194_v62 = vpop.f32.mrf.mxu1  ;;  %v15112_v54 = vld [vmem:[#allocation5 + $0xa0] ss:$16 sps:$4 sm:$0xff]   ;;  %v10118_v32 = vadd.f32 %v18967_v18, %v18603_v2 }
 0x4a9   :  { %v14412_v9 = vpack.c.bf16 %v10806_v15, %v10806_v15  ;;  %v10506_v36 = vmax.f32 %v10193_v6, 0.0  ;;  %v10195_v56 = vadd.f32 %v10194_v62, %v10082_v3 }
 0x4aa   :  { %v18975_v25 = vpop.f32.mrf.mxu0  ;;  %v10196_v33 = vpop.f32.mrf.mxu1  ;;  %v15108_v14 = vld [vmem:[#allocation5 + $0xe4] ss:$16 sps:$4 sm:$0xff]  }
 0x4ab   :  { %10886 = vst [vmem:[#allocation5 + $0x18] sm:$0xf] %v14412_v9  ;;  %v10807_v52 = vmax.f32 %v10505_v31, %v10506_v36  ;;  %v10197_v43 = vadd.f32 %v10196_v33, %v10084_v47  ;;  %11253 = vmatprep.subr.bf16.mxu0 %v15108_v14  ;;  %v10513_v57 = vmax.f32 %v10195_v56, 0.0  ;;  %v10100_v36 = vadd.f32 %v18941_v23, %v18621_v46  ;;  %v15115_v23 = vld [vmem:[#allocation5 + $0x80] ss:$16 sps:$4 sm:$0xff]  }
 0x4ac   :  { %v18981_v13 = vpop.f32.mrf.mxu0  ;;  %v10200_v30 = vpop.f32.mrf.mxu1  ;;  %11254 = vmatpush1.bf16.msra.mxu0 %v15106_v35  ;;  %v15117_v35 = vld [vmem:[#allocation5 + $0x84] ss:$16 sps:$4 sm:$0xff]   ;;  %v10122_v18 = vadd.f32 %v18975_v25, %v18609_v42 }
 0x4ad   :  { %v14413_v4 = vpack.c.bf16 %v10807_v52, %v10807_v52  ;;  %v10514_v22 = vmax.f32 %v10197_v43, 0.0  ;;  %v10201_v10 = vadd.f32 %v10200_v30, %v10088_v27  ;;  %11255 = vmatprep.subr.bf16.mxu0 %v15111_v41 }
 0x4ae   :  { %v18983_v37 = vpop.f32.mrf.mxu0  ;;  %v10202_v12 = vpop.f32.mrf.mxu1 }
 0x4af   :  { %10887 = vst [vmem:[#allocation5 + $0x28] sm:$0xf] %v14413_v4  ;;  %v10808_v53 = vmax.f32 %v10513_v57, %v10514_v22  ;;  %v10203_v61 = vadd.f32 %v10202_v12, %v10090_v20  ;;  %v10521_v3 = vmax.f32 %v10201_v10, 0.0  ;;  %v10104_v57 = vadd.f32 %v18949_v48, %v18623_v24  ;;  %v15120_v12 = vld [vmem:[#allocation5 + $0x64] ss:$16 sps:$4 sm:$0xff]  }
 0x4b0   :  { %v18989_v40 = vpop.f32.mrf.mxu0  ;;  %v10204_v7 = vpop.f32.mrf.mxu1  ;;  %11256 = vmatpush1.bf16.msra.mxu0 %v15109_v0  ;;  %v15118_v48 = vld [vmem:[#allocation5 + $0x60] ss:$16 sps:$4 sm:$0xff]  }
 0x4b1   :  { %v14414_v28 = vpack.c.bf16 %v10808_v53, %v10808_v53  ;;  %v10522_v15 = vmax.f32 %v10203_v61, 0.0  ;;  %v10205_v6 = vadd.f32 %v10204_v7, %v10092_v5  ;;  %11257 = vmatprep.subr.bf16.mxu0 %v15114_v1 }
 0x4b2   :  { %v18991_v47 = vpop.f32.mrf.mxu0  ;;  %v10206_v62 = vpop.f32.mrf.mxu1 }
 0x4b3   :  { %10888 = vst [vmem:[#allocation5 + $0x38] sm:$0xf] %v14414_v28  ;;  %v10809_v9 = vmax.f32 %v10521_v3, %v10522_v15  ;;  %v10207_v31 = vadd.f32 %v10206_v62, %v10094_v38  ;;  %v10529_v27 = vmax.f32 %v10205_v6, 0.0  ;;  %v10110_v3 = vadd.f32 %v18957_v26, %v18612_v44  ;;  %v15123_v62 = vld [vmem:[#allocation5 + $0x44] ss:$16 sps:$4 sm:$0xff]  }
 0x4b4   :  { %v18997_v56 = vpop.f32.mrf.mxu0  ;;  %v10210_v33 = vpop.f32.mrf.mxu1  ;;  %11258 = vmatpush1.bf16.msra.mxu0 %v15112_v54  ;;  %v15121_v26 = vld [vmem:[#allocation5 + $0x40] ss:$16 sps:$4 sm:$0xff]  }
 0x4b5   :  { %v14415_v14 = vpack.c.bf16 %v10809_v9, %v10809_v9  ;;  %v10530_v52 = vmax.f32 %v10207_v31, 0.0  ;;  %v10211_v43 = vadd.f32 %v10210_v33, %v10098_v59  ;;  %11259 = vmatprep.subr.bf16.mxu0 %v15117_v35 }
 0x4b6   :  { %v18999_v20 = vpop.f32.mrf.mxu0  ;;  %v10212_v30 = vpop.f32.mrf.mxu1 }
 0x4b7   :  { %10889 = vst [vmem:[#allocation5 + $0x48] sm:$0xf] %v14415_v14  ;;  %v10810_v41 = vmax.f32 %v10529_v27, %v10530_v52  ;;  %v10213_v4 = vadd.f32 %v10212_v30, %v10100_v36  ;;  %v10537_v53 = vmax.f32 %v10211_v43, 0.0  ;;  %v10114_v27 = vadd.f32 %v18965_v50, %v18615_v63  ;;  %v15126_v30 = vld [vmem:[#allocation5 + $0x24] ss:$16 sps:$4 sm:$0xff]  }
 0x4b8   :  { %v19005_v22 = vpop.f32.mrf.mxu0  ;;  %v10214_v10 = vpop.f32.mrf.mxu1  ;;  %11260 = vmatpush1.bf16.msra.mxu0 %v15115_v23  ;;  %v15124_v50 = vld [vmem:[#allocation5 + $0x20] ss:$16 sps:$4 sm:$0xff]  }
 0x4b9   :  { %v14416_v5 = vpack.c.bf16 %v10810_v41, %v10810_v41  ;;  %v10538_v61 = vmax.f32 %v10213_v4, 0.0  ;;  %v10215_v0 = vadd.f32 %v10214_v10, %v10102_v11  ;;  %11261 = vmatprep.subr.bf16.mxu0 %v15120_v12 }
 0x4ba   :  { %v19007_v38 = vpop.f32.mrf.mxu0  ;;  %v10216_v7 = vpop.f32.mrf.mxu1 }
 0x4bb   :  { %10890 = vst [vmem:[#allocation5 + $0x58] sm:$0xf] %v14416_v5  ;;  %v10811_v1 = vmax.f32 %v10537_v53, %v10538_v61  ;;  %v10217_v28 = vadd.f32 %v10216_v7, %v10104_v57  ;;  %v10545_v9 = vmax.f32 %v10215_v0, 0.0  ;;  %v10120_v53 = vadd.f32 %v18973_v29, %v18603_v2  ;;  %v15129_v7 = vld [vmem:[#allocation5 + $0x4] ss:$16 sps:$4 sm:$0xff]  }
 0x4bc   :  { %v19013_v15 = vpop.f32.mrf.mxu0  ;;  %v10220_v6 = vpop.f32.mrf.mxu1  ;;  %11262 = vmatpush1.bf16.msra.mxu0 %v15118_v48  ;;  %v15127_v29 = vld [vmem:[#allocation5] ss:$16 sps:$4 sm:$0xff]  }
 0x4bd   :  { %v14417_v59 = vpack.c.bf16 %v10811_v1, %v10811_v1  ;;  %v10546_v31 = vmax.f32 %v10217_v28, 0.0  ;;  %v10221_v54 = vadd.f32 %v10220_v6, %v10108_v21  ;;  %11263 = vmatprep.subr.bf16.mxu0 %v15123_v62 }
 0x4be   :  { %v10222_v36 = vpop.f32.mrf.mxu1  ;;  %v19015_v33 = vpop.f32.mrf.mxu0 }
 0x4bf   :  { %10891 = vst [vmem:[#allocation5 + $0x68] sm:$0xf] %v14417_v59  ;;  %v10812_v35 = vmax.f32 %v10545_v9, %v10546_v31  ;;  %v10223_v14 = vadd.f32 %v10222_v36, %v10110_v3  ;;  %v10553_v41 = vmax.f32 %v10221_v54, 0.0  ;;  %v10124_v9 = vadd.f32 %v18981_v13, %v18609_v42  ;;  %v19042_v36 = vld [vmem:[%s19419_s6] sm:$0xff]  }
 0x4c0   :  { %v10224_v52 = vpop.f32.mrf.mxu1  ;;  %v19021_v43 = vpop.f32.mrf.mxu0  ;;  %11264 = vmatpush1.bf16.msra.mxu0 %v15121_v26 }
 0x4c1   :  { %v14418_v11 = vpack.c.bf16 %v10812_v35, %v10812_v35  ;;  %v10554_v4 = vmax.f32 %v10223_v14, 0.0  ;;  %v10225_v23 = vadd.f32 %v10224_v52, %v10112_v49  ;;  %11265 = vmatprep.subr.bf16.mxu0 %v15126_v30  ;;  %v10128_v52 = vadd.f32 %v18983_v37, %v18591_v45 }
 0x4c2   :  { %v10226_v57 = vpop.f32.mrf.mxu1  ;;  %v19023_v10 = vpop.f32.mrf.mxu0  ;;  %v10132_v37 = vadd.f32 %v18991_v47, %v18599_v34 }
 0x4c3   :  { %10892 = vst [vmem:[#allocation5 + $0x78] sm:$0xf] %v14418_v11  ;;  %v10813_v12 = vmax.f32 %v10553_v41, %v10554_v4  ;;  %v10227_v5 = vadd.f32 %v10226_v57, %v10114_v27  ;;  %v10561_v1 = vmax.f32 %v10225_v23, 0.0  ;;  %v10130_v11 = vadd.f32 %v18989_v40, %v18591_v45 }
 0x4c4   :  { %v10230_v61 = vpop.f32.mrf.mxu1  ;;  %v19029_v0 = vpop.f32.mrf.mxu0  ;;  %11266 = vmatpush1.bf16.msra.mxu0 %v15124_v50 }
 0x4c5   :  { %v14419_v21 = vpack.c.bf16 %v10813_v12, %v10813_v12  ;;  %v10562_v28 = vmax.f32 %v10227_v5, 0.0  ;;  %v10231_v48 = vadd.f32 %v10230_v61, %v10118_v32  ;;  %11267 = vmatprep.subr.bf16.mxu0 %v15129_v7  ;;  %v10134_v61 = vadd.f32 %v18997_v56, %v18599_v34 }
 0x4c6   :  { %v10232_v3 = vpop.f32.mrf.mxu1  ;;  %v19031_v6 = vpop.f32.mrf.mxu0 }
 0x4c7   :  { %10893 = vst [vmem:[#allocation5 + $0x88] sm:$0xf] %v14419_v21  ;;  %v10814_v62 = vmax.f32 %v10561_v1, %v10562_v28  ;;  %v10233_v59 = vadd.f32 %v10232_v3, %v10120_v53  ;;  %v10569_v35 = vmax.f32 %v10231_v48, 0.0  ;;  %v19065_v1 = vld [vmem:[%s19419_s6 + $0x8] sm:$0xff]  }
 0x4c8   :  { %v10234_v31 = vpop.f32.mrf.mxu1  ;;  %v19037_v54 = vpop.f32.mrf.mxu0  ;;  %11268 = vmatpush1.bf16.msra.mxu0 %v15127_v29 }
 0x4c9   :  { %v14420_v49 = vpack.c.bf16 %v10814_v62, %v10814_v62  ;;  %v10570_v14 = vmax.f32 %v10233_v59, 0.0  ;;  %v10235_v26 = vadd.f32 %v10234_v31, %v10122_v18  ;;  %v10138_v59 = vadd.f32 %v18999_v20, %v18578_v17 }
 0x4ca   :  { %v10236_v25 = vpop.f32.mrf.mxu1  ;;  %v19044_v27 = vpop.f32.mrf.mxu0  ;;  %v10142_v20 = vadd.f32 %v19007_v38, %v19606_v16 }
 0x4cb   :  { %10894 = vst [vmem:[#allocation5 + $0x98] sm:$0xf] %v14420_v49  ;;  %v10815_v13 = vmax.f32 %v10569_v35, %v10570_v14  ;;  %v10237_v30 = vadd.f32 %v10236_v25, %v10124_v9  ;;  %11286 = vmatmul.mubr.bf16.vlgmr.msra.gmra.mxu0 %v19042_v36  ;;  %v10577_v57 = vmax.f32 %v10235_v26, 0.0  ;;  %v10140_v9 = vadd.f32 %v19005_v22, %v18578_v17 }
 0x4cc   :  { %v10240_v41 = vpop.f32.mrf.mxu1  ;;  %v19050_v4 = vpop.f32.mrf.mxu0  ;;  %11295 = vmatprep.mubr.bf16.mxu0 %v19604_v19 }
 0x4cd   :  { %v14421_v23 = vpack.c.bf16 %v10815_v13, %v10815_v13  ;;  %v10578_v32 = vmax.f32 %v10237_v30, 0.0  ;;  %v10241_v12 = vadd.f32 %v10240_v41, %v10128_v52 }
 0x4ce   :  { %v10242_v5 = vpop.f32.mrf.mxu1  ;;  %v19054_v50 = vpop.f32.mrf.mxu0 }
 0x4cf   :  { %10895 = vst [vmem:[#allocation5 + $0xa8] sm:$0xf] %v14421_v23  ;;  %v10816_v53 = vmax.f32 %v10577_v57, %v10578_v32  ;;  %v10243_v40 = vadd.f32 %v10242_v5, %v10130_v11  ;;  %v10585_v48 = vmax.f32 %v10241_v12, 0.0  ;;  %v10144_v11 = vadd.f32 %v19013_v15, %v19606_v16  ;;  %v19088_v57 = vld [vmem:[%s19419_s6 + $0x10] sm:$0xff]  }
 0x4d0   :  { %v10244_v7 = vpop.f32.mrf.mxu1  ;;  %v19060_v21 = vpop.f32.mrf.mxu0 }
 0x4d1   :  { %v14422_v28 = vpack.c.bf16 %v10816_v53, %v10816_v53  ;;  %v10586_v3 = vmax.f32 %v10243_v40, 0.0  ;;  %v10245_v18 = vadd.f32 %v10244_v7, %v10132_v37  ;;  %v10294_v40 = vadd.f32 %v19015_v33, %v19607_v55 }
 0x4d2   :  { %v10246_v62 = vpop.f32.mrf.mxu1  ;;  %v19067_v47 = vpop.f32.mrf.mxu0  ;;  %v10296_v7 = vadd.f32 %v19021_v43, %v19607_v55  ;;  %v10300_v43 = vadd.f32 %v19029_v0, %v18667_v60 }
 0x4d3   :  { %10896 = vst [vmem:[#allocation5 + $0xb8] sm:$0xf] %v14422_v28  ;;  %v10817_v56 = vmax.f32 %v10585_v48, %v10586_v3  ;;  %v10247_v29 = vadd.f32 %v10246_v62, %v10134_v61  ;;  %11296 = vmatmul.mubr.bf16.gmra.mxu0 %v19065_v1  ;;  %v10593_v14 = vmax.f32 %v10245_v18, 0.0 }
 0x4d4   :  { %v10250_v31 = vpop.f32.mrf.mxu1  ;;  %v19073_v49 = vpop.f32.mrf.mxu0  ;;  %11305 = vmatprep.mubr.bf16.mxu0 %v19604_v19 }
 0x4d5   :  { %v14423_v35 = vpack.c.bf16 %v10817_v56, %v10817_v56  ;;  %v10594_v26 = vmax.f32 %v10247_v29, 0.0  ;;  %v10251_v25 = vadd.f32 %v10250_v31, %v10138_v59  ;;  %v10298_v29 = vadd.f32 %v19023_v10, %v18667_v60 }
 0x4d6   :  { %v10252_v52 = vpop.f32.mrf.mxu1  ;;  %v19077_v13 = vpop.f32.mrf.mxu0 }
 0x4d7   :  { %10897 = vst [vmem:[#allocation5 + $0xc8] sm:$0xf] %v14423_v35  ;;  %v10818_v30 = vmax.f32 %v10593_v14, %v10594_v26  ;;  %v10253_v22 = vadd.f32 %v10252_v52, %v10140_v9  ;;  %v10601_v12 = vmax.f32 %v10251_v25, 0.0  ;;  %v19111_v14 = vld [vmem:[%s19419_s6 + $0x18] sm:$0xff]  }
 0x4d8   :  { %v10254_v41 = vpop.f32.mrf.mxu1  ;;  %v19083_v23 = vpop.f32.mrf.mxu0 }
 0x4d9   :  { %v14424_v32 = vpack.c.bf16 %v10818_v30, %v10818_v30  ;;  %v10602_v5 = vmax.f32 %v10253_v22, 0.0  ;;  %v10255_v37 = vadd.f32 %v10254_v41, %v10142_v20  ;;  %v10304_v22 = vadd.f32 %v19031_v6, %v18642_v39 }
 0x4da   :  { %v10256_v53 = vpop.f32.mrf.mxu1  ;;  %v19090_v38 = vpop.f32.mrf.mxu0  ;;  %v10308_v6 = vadd.f32 %v19044_v27, %v18654_v58  ;;  %v10314_v27 = vadd.f32 %v19054_v50, %v18630_v51  ;;  %v10318_v50 = vadd.f32 %v19067_v47, %v18638_v8  ;;  %v10324_v47 = vadd.f32 %v19077_v13, %v18621_v46 }
 0x4db   :  { %10898 = vst [vmem:[#allocation5 + $0xd8] sm:$0xf] %v14424_v32  ;;  %v10819_v15 = vmax.f32 %v10601_v12, %v10602_v5  ;;  %v10257_v61 = vadd.f32 %v10256_v53, %v10144_v11  ;;  %11306 = vmatmul.mubr.bf16.gmra.mxu0 %v19088_v57  ;;  %v10609_v18 = vmax.f32 %v10255_v37, 0.0  ;;  %v10306_v11 = vadd.f32 %v19037_v54, %v18642_v39 }
 0x4dc   :  { %v19096_v28 = vpop.f32.mrf.mxu0  ;;  %v10406_v48 = vpop.f32.mrf.mxu1  ;;  %11315 = vmatprep.mubr.bf16.mxu0 %v19604_v19  ;;  %v10310_v39 = vadd.f32 %v19050_v4, %v18654_v58  ;;  %v10316_v58 = vadd.f32 %v19060_v21, %v18630_v51  ;;  %v10320_v51 = vadd.f32 %v19073_v49, %v18638_v8  ;;  %v10326_v8 = vadd.f32 %v19083_v23, %v18621_v46 }
 0x4dd   :  { %v14425_v3 = vpack.c.bf16 %v10819_v15, %v10819_v15  ;;  %v10610_v62 = vmax.f32 %v10257_v61, 0.0  ;;  %v10407_v59 = vadd.f32 %v10406_v48, %v10294_v40  ;;  %v10328_v13 = vadd.f32 %v19090_v38, %v18623_v24 }
 0x4de   :  { %v19100_v56 = vpop.f32.mrf.mxu0  ;;  %v10408_v33 = vpop.f32.mrf.mxu1  ;;  %v10330_v46 = vadd.f32 %v19096_v28, %v18623_v24 }
 0x4df   :  { %10899 = vst [vmem:[#allocation5 + $0xe8] sm:$0xf] %v14425_v3  ;;  %v10820_v9 = vmax.f32 %v10609_v18, %v10610_v62  ;;  %v10409_v55 = vadd.f32 %v10408_v33, %v10296_v7  ;;  %v10491_v25 = vmax.f32 %v10407_v59, 0.0  ;;  %v19130_v7 = vld [vmem:[%s19419_s6 + $0x20] sm:$0xff]   ;;  %v10334_v38 = vadd.f32 %v19100_v56, %v18612_v44 }
 0x4e0   :  { %v19106_v31 = vpop.f32.mrf.mxu0  ;;  %v10410_v35 = vpop.f32.mrf.mxu1 }
 0x4e1   :  { %v14426_v26 = vpack.c.bf16 %v10820_v9, %v10820_v9  ;;  %v10492_v52 = vmax.f32 %v10409_v55, 0.0  ;;  %v10411_v20 = vadd.f32 %v10410_v35, %v10298_v29  ;;  %v10336_v24 = vadd.f32 %v19106_v31, %v18612_v44 }
 0x4e2   :  { %v19113_v30 = vpop.f32.mrf.mxu0  ;;  %v10412_v10 = vpop.f32.mrf.mxu1 }
 0x4e3   :  { %10900 = vst [vmem:[#allocation5 + $0xf8] sm:$0xf] %v14426_v26  ;;  %v10901_v60 = vmax.f32 %v10491_v25, %v10492_v52  ;;  %v10413_v0 = vadd.f32 %v10412_v10, %v10300_v43  ;;  %11316 = vmatmul.mubr.bf16.gmra.mxu0 %v19111_v14  ;;  %v10499_v12 = vmax.f32 %v10411_v20, 0.0  ;;  %v10338_v56 = vadd.f32 %v19113_v30, %v18615_v63 }
 0x4e4   :  { %v10416_v41 = vpop.f32.mrf.mxu1  ;;  %v19120_v37 = vpop.f32.mrf.mxu0  ;;  %11325 = vmatprep.mubr.bf16.mxu0 %v19604_v19 }
 0x4e5   :  { %v14427_v32 = vpack.c.bf16 %v10901_v60, %v10901_v60  ;;  %v10500_v5 = vmax.f32 %v10413_v0, 0.0  ;;  %v10417_v53 = vadd.f32 %v10416_v41, %v10304_v22  ;;  %v19149_v22 = vld [vmem:[%s19419_s6 + $0x28] sm:$0xff]   ;;  %v10340_v44 = vadd.f32 %v19120_v37, %v18615_v63 }
 0x4e6   :  { %v10418_v40 = vpop.f32.mrf.mxu1  ;;  %v19132_v18 = vpop.f32.mrf.mxu0 }
 0x4e7   :  { %10981 = vst [vmem:[#allocation5 + $0xc] sm:$0xf] %v14427_v32  ;;  %v10902_v15 = vmax.f32 %v10499_v12, %v10500_v5  ;;  %v10419_v61 = vadd.f32 %v10418_v40, %v10306_v11  ;;  %v10507_v3 = vmax.f32 %v10417_v53, 0.0  ;;  %v10344_v30 = vadd.f32 %v19132_v18, %v18603_v2 }
 0x4e8   :  { %v10420_v54 = vpop.f32.mrf.mxu1  ;;  %v19139_v43 = vpop.f32.mrf.mxu0 }
 0x4e9   :  { %v14428_v48 = vpack.c.bf16 %v10902_v15, %v10902_v15  ;;  %v10508_v62 = vmax.f32 %v10419_v61, 0.0  ;;  %v10421_v59 = vadd.f32 %v10420_v54, %v10308_v6  ;;  %v10346_v63 = vadd.f32 %v19139_v43, %v18603_v2 }
 0x4ea   :  { %v10422_v33 = vpop.f32.mrf.mxu1  ;;  %v19151_v60 = vpop.f32.mrf.mxu0 }
 0x4eb   :  { %10982 = vst [vmem:[#allocation5 + $0x1c] sm:$0xf] %v14428_v48  ;;  %v10903_v29 = vmax.f32 %v10507_v3, %v10508_v62  ;;  %v10423_v9 = vadd.f32 %v10422_v33, %v10310_v39  ;;  %11326 = vmatmul.mubr.bf16.gmra.mxu0 %v19130_v7  ;;  %v10515_v35 = vmax.f32 %v10421_v59, 0.0  ;;  %v19168_v62 = vld [vmem:[%s19419_s6 + $0x30] sm:$0xff]  }
 0x4ec   :  { %v10426_v4 = vpop.f32.mrf.mxu1  ;;  %11335 = vmatprep.mubr.bf16.mxu0 %v19604_v19  ;;  %v19158_v40 = vpop.f32.mrf.mxu0 }
 0x4ed   :  { %v14429_v55 = vpack.c.bf16 %v10903_v29, %v10903_v29  ;;  %v10516_v26 = vmax.f32 %v10423_v9, 0.0  ;;  %v10427_v25 = vadd.f32 %v10426_v4, %v10314_v27 }
 0x4ee   :  { %v10428_v52 = vpop.f32.mrf.mxu1  ;;  %v10353_v59 = vpop.f32.mrf.mxu0 }
 0x4ef   :  { %10983 = vst [vmem:[#allocation5 + $0x2c] sm:$0xf] %v14429_v55  ;;  %v10904_v20 = vmax.f32 %v10515_v35, %v10516_v26  ;;  %v10429_v10 = vadd.f32 %v10428_v52, %v10316_v58  ;;  %v10523_v11 = vmax.f32 %v10427_v25, 0.0 }
 0x4f0   :  { %v10430_v21 = vpop.f32.mrf.mxu1  ;;  %v10355_v35 = vpop.f32.mrf.mxu0 }
 0x4f1   :  { %v14430_v0 = vpack.c.bf16 %v10904_v20, %v10904_v20  ;;  %v10524_v41 = vmax.f32 %v10429_v10, 0.0  ;;  %v10431_v32 = vadd.f32 %v10430_v21, %v10318_v50  ;;  %v19183_v21 = vld [vmem:[%s19419_s6 + $0x38] sm:$0xff]  }
 0x4f2   :  { %v10432_v12 = vpop.f32.mrf.mxu1 }
 0x4f3   :  { %10984 = vst [vmem:[#allocation5 + $0x3c] sm:$0xf] %v14430_v0  ;;  %v10905_v5 = vmax.f32 %v10523_v11, %v10524_v41  ;;  %v10433_v53 = vadd.f32 %v10432_v12, %v10320_v51  ;;  %11336 = vmatmul.mubr.bf16.gmra.mxu0 %v19149_v22  ;;  %v10531_v15 = vmax.f32 %v10431_v32, 0.0  ;;  %v10357_v0 = vpop.f32.mrf.mxu0 }
 0x4f4   :  { %v10436_v49 = vpop.f32.mrf.mxu1  ;;  %11345 = vmatprep.mubr.bf16.mxu0 %v19604_v19 }
 0x4f5   :  { %v14431_v6 = vpack.c.bf16 %v10905_v5, %v10905_v5  ;;  %v10532_v61 = vmax.f32 %v10433_v53, 0.0  ;;  %v10437_v39 = vadd.f32 %v10436_v49, %v10324_v47 }
 0x4f6   :  { %v10438_v54 = vpop.f32.mrf.mxu1 }
 0x4f7   :  { %10985 = vst [vmem:[#allocation5 + $0x4c] sm:$0xf] %v14431_v6  ;;  %v10906_v48 = vmax.f32 %v10531_v15, %v10532_v61  ;;  %v10439_v3 = vadd.f32 %v10438_v54, %v10326_v8  ;;  %v10539_v27 = vmax.f32 %v10437_v39, 0.0  ;;  %v10359_v8 = vpop.f32.mrf.mxu0  ;;  %v10348_v54 = vadd.f32 %v19151_v60, %v18609_v42 }
 0x4f8   :  { %v10440_v23 = vpop.f32.mrf.mxu1  ;;  %v10356_v60 = vadd.f32 %v10355_v35, %v18591_v45 }
 0x4f9   :  { %v14432_v33 = vpack.c.bf16 %v10906_v48, %v10906_v48  ;;  %v10540_v29 = vmax.f32 %v10439_v3, 0.0  ;;  %v10441_v9 = vadd.f32 %v10440_v23, %v10328_v13  ;;  %v10350_v48 = vadd.f32 %v19158_v40, %v18609_v42  ;;  %v10363_v2 = vpop.f32.mrf.mxu0 }
 0x4fa   :  { %v10442_v58 = vpop.f32.mrf.mxu1 }
 0x4fb   :  { %10986 = vst [vmem:[#allocation5 + $0x5c] sm:$0xf] %v14432_v33  ;;  %v10907_v4 = vmax.f32 %v10539_v27, %v10540_v29  ;;  %v10443_v55 = vadd.f32 %v10442_v58, %v10330_v46  ;;  %11346 = vmatmul.mubr.bf16.gmra.mxu0 %v19168_v62  ;;  %v10547_v25 = vmax.f32 %v10441_v9, 0.0  ;;  %v10354_v29 = vadd.f32 %v10353_v59, %v18591_v45 }
 0x4fc   :  { %v10446_v28 = vpop.f32.mrf.mxu1  ;;  %11355 = vmatprep.mubr.bf16.mxu0 %v19604_v19 }
 0x4fd   :  { %v14433_v26 = vpack.c.bf16 %v10907_v4, %v10907_v4  ;;  %v10548_v52 = vmax.f32 %v10443_v55, 0.0  ;;  %v10447_v50 = vadd.f32 %v10446_v28, %v10334_v38  ;;  %v10365_v4 = vpop.f32.mrf.mxu0 }
 0x4fe   :  { %v10448_v20 = vpop.f32.mrf.mxu1 }
 0x4ff   :  { %10987 = vst [vmem:[#allocation5 + $0x6c] sm:$0xf] %v14433_v26  ;;  %v10908_v10 = vmax.f32 %v10547_v25, %v10548_v52  ;;  %v10449_v51 = vadd.f32 %v10448_v20, %v10336_v24  ;;  %v10555_v41 = vmax.f32 %v10447_v50, 0.0  ;;  %v10358_v26 = vadd.f32 %v10357_v0, %v18599_v34  ;;  %v10367_v20 = vpop.f32.mrf.mxu0 }
 0x500   :  { %v10450_v31 = vpop.f32.mrf.mxu1  ;;  %v10360_v50 = vadd.f32 %v10359_v8, %v18599_v34 }
 0x501   :  { %v14434_v11 = vpack.c.bf16 %v10908_v10, %v10908_v10  ;;  %v10556_v32 = vmax.f32 %v10449_v51, 0.0  ;;  %v10451_v12 = vadd.f32 %v10450_v31, %v10338_v56 }
 0x502   :  { %v10452_v47 = vpop.f32.mrf.mxu1 }
 0x503   :  { %10988 = vst [vmem:[#allocation5 + $0x7c] sm:$0xf] %v14434_v11  ;;  %v10909_v5 = vmax.f32 %v10555_v41, %v10556_v32  ;;  %v10453_v53 = vadd.f32 %v10452_v47, %v10340_v44  ;;  %11356 = vmatmul.mubr.bf16.gmra.mxu0 %v19183_v21  ;;  %v10563_v6 = vmax.f32 %v10451_v12, 0.0  ;;  %v10364_v44 = vadd.f32 %v10363_v2, %v18578_v17  ;;  %v10369_v32 = vpop.f32.mrf.mxu0 }
 0x504   :  { %v10456_v37 = vpop.f32.mrf.mxu1  ;;  %v10366_v41 = vadd.f32 %v10365_v4, %v18578_v17  ;;  %v10370_v8 = vadd.f32 %v10369_v32, %v19606_v16  ;;  %v15155_v4 = vld [vmem:[#allocation5 + $0x4c] ss:$16 sps:$4 sm:$0xff]  }
 0x505   :  { %v14435_v49 = vpack.c.bf16 %v10909_v5, %v10909_v5  ;;  %v10564_v15 = vmax.f32 %v10453_v53, 0.0  ;;  %v10457_v61 = vadd.f32 %v10456_v37, %v10344_v30  ;;  %v10368_v53 = vadd.f32 %v10367_v20, %v19606_v16 }
 0x506   :  { %v10458_v39 = vpop.f32.mrf.mxu1 }
 0x507   :  { %10989 = vst [vmem:[#allocation5 + $0x8c] sm:$0xf] %v14435_v49  ;;  %v10910_v18 = vmax.f32 %v10563_v6, %v10564_v15  ;;  %v10459_v13 = vadd.f32 %v10458_v39, %v10346_v63  ;;  %v10571_v46 = vmax.f32 %v10457_v61, 0.0 }
 0x508   :  { %v10460_v3 = vpop.f32.mrf.mxu1 }
 0x509   :  { %v14436_v43 = vpack.c.bf16 %v10910_v18, %v10910_v18  ;;  %v10572_v23 = vmax.f32 %v10459_v13, 0.0  ;;  %v10461_v33 = vadd.f32 %v10460_v3, %v10348_v54 }
 0x50a   :  { %v10462_v27 = vpop.f32.mrf.mxu1 }
 0x50b   :  { %10990 = vst [vmem:[#allocation5 + $0x9c] sm:$0xf] %v14436_v43  ;;  %v10911_v9 = vmax.f32 %v10571_v46, %v10572_v23  ;;  %v10463_v58 = vadd.f32 %v10462_v27, %v10350_v48  ;;  %v10579_v24 = vmax.f32 %v10461_v33, 0.0  ;;  %v15138_v46 = vld [vmem:[#allocation5 + $0xe8] ss:$16 sps:$4 sm:$0xff]  }
 0x50c   :  { %v10466_v38 = vpop.f32.mrf.mxu1  ;;  %v15141_v33 = vld [vmem:[#allocation5 + $0xc8] ss:$16 sps:$4 sm:$0xff]  }
 0x50d   :  { %v14437_v55 = vpack.c.bf16 %v10911_v9, %v10911_v9  ;;  %v10580_v28 = vmax.f32 %v10463_v58, 0.0  ;;  %v10467_v42 = vadd.f32 %v10466_v38, %v10354_v29  ;;  %v15144_v29 = vld [vmem:[#allocation5 + $0xa8] ss:$16 sps:$4 sm:$0xff]  }
 0x50e   :  { %v10468_v40 = vpop.f32.mrf.mxu1  ;;  %v15147_v58 = vld [vmem:[#allocation5 + $0x88] ss:$16 sps:$4 sm:$0xff]  }
 0x50f   :  { %10991 = vst [vmem:[#allocation5 + $0xac] sm:$0xf] %v14437_v55  ;;  %v10912_v25 = vmax.f32 %v10579_v24, %v10580_v28  ;;  %v10469_v52 = vadd.f32 %v10468_v40, %v10356_v60  ;;  %v10587_v10 = vmax.f32 %v10467_v42, 0.0  ;;  %v15152_v60 = vld [vmem:[#allocation5 + $0x6c] ss:$16 sps:$4 sm:$0xff]  }
 0x510   :  { %v10470_v59 = vpop.f32.mrf.mxu1  ;;  %v15150_v38 = vld [vmem:[#allocation5 + $0x68] ss:$16 sps:$4 sm:$0xff]   ;;  %v15158_v24 = vld [vmem:[#allocation5 + $0x2c] ss:$16 sps:$4 sm:$0xff]  }
 0x511   :  { %v14438_v56 = vpack.c.bf16 %v10912_v25, %v10912_v25  ;;  %v10588_v51 = vmax.f32 %v10469_v52, 0.0  ;;  %v10471_v45 = vadd.f32 %v10470_v59, %v10358_v26  ;;  %v15153_v55 = vld [vmem:[#allocation5 + $0x48] ss:$16 sps:$4 sm:$0xff]   ;;  %v15161_v42 = vld [vmem:[#allocation5 + $0xc] ss:$16 sps:$4 sm:$0xff]   ;;  %v15162_v26 = vld [vmem:[%s19420_s7] sm:$0xff]  }
 0x512   :  { %v10472_v35 = vpop.f32.mrf.mxu1  ;;  %v15149_v9 = vld [vmem:[#allocation5 + $0x8c] ss:$16 sps:$4 sm:$0xff]   ;;  %v15156_v28 = vld [vmem:[#allocation5 + $0x28] ss:$16 sps:$4 sm:$0xff]   ;;  %14726 = vmatprep.mubr.msk.bf16.mxu0 %vm11595_vm2, %v15162_v26 }
 0x513   :  { %10992 = vst [vmem:[#allocation5 + $0xbc] sm:$0xf] %v14438_v56  ;;  %v10913_v31 = vmax.f32 %v10587_v10, %v10588_v51  ;;  %v10473_v11 = vadd.f32 %v10472_v35, %v10360_v50  ;;  %v10595_v47 = vmax.f32 %v10471_v45, 0.0  ;;  %v15159_v40 = vld [vmem:[#allocation5 + $0x8] ss:$16 sps:$4 sm:$0xff]  }
 0x514   :  { %v10476_v0 = vpop.f32.mrf.mxu1  ;;  %v15169_v26 = vld [vmem:[%s19420_s7 + $0x54] sm:$0xff]  }
 0x515   :  { %v14439_v12 = vpack.c.bf16 %v10913_v31, %v10913_v31  ;;  %v10596_v30 = vmax.f32 %v10473_v11, 0.0  ;;  %v10477_v34 = vadd.f32 %v10476_v0, %v10364_v44 }
 0x516   :  { %v10478_v5 = vpop.f32.mrf.mxu1 }
 0x517   :  { %10993 = vst [vmem:[#allocation5 + $0xcc] sm:$0xf] %v14439_v12  ;;  %v10914_v63 = vmax.f32 %v10595_v47, %v10596_v30  ;;  %v10479_v37 = vadd.f32 %v10478_v5, %v10366_v41  ;;  %v10603_v15 = vmax.f32 %v10477_v34, 0.0 }
 0x518   :  { %v10480_v49 = vpop.f32.mrf.mxu1 }
 0x519   :  { %v14440_v6 = vpack.c.bf16 %v10914_v63, %v10914_v63  ;;  %v10604_v61 = vmax.f32 %v10479_v37, 0.0  ;;  %v10481_v39 = vadd.f32 %v10480_v49, %v10368_v53 }
 0x51a   :  { %v10482_v17 = vpop.f32.mrf.mxu1  ;;  %v15146_v27 = vld [vmem:[#allocation5 + $0xac] ss:$16 sps:$4 sm:$0xff]  }
 0x51b   :  { %10994 = vst [vmem:[#allocation5 + $0xdc] sm:$0xf] %v14440_v6  ;;  %v10915_v54 = vmax.f32 %v10603_v15, %v10604_v61  ;;  %v10483_v18 = vadd.f32 %v10482_v17, %v10370_v8  ;;  %v10611_v48 = vmax.f32 %v10481_v39, 0.0 }
 0x51d   :  { %v14441_v13 = vpack.c.bf16 %v10915_v54, %v10915_v54  ;;  %v10612_v3 = vmax.f32 %v10483_v18, 0.0 }
 0x51f   :  { %10995 = vst [vmem:[#allocation5 + $0xec] sm:$0xf] %v14441_v13  ;;  %v10916_v2 = vmax.f32 %v10611_v48, %v10612_v3 }
 0x521   :  { %v14442_v43 = vpack.c.bf16 %v10916_v2, %v10916_v2 }
 0x522   :  { %v15143_v16 = vld [vmem:[#allocation5 + $0xcc] ss:$16 sps:$4 sm:$0xff]  }
 0x523   :  { %10996 = vst [vmem:[#allocation5 + $0xfc] sm:$0xf] %v14442_v43 }
 0x52a   :  { %v15140_v23 = vld [vmem:[#allocation5 + $0xec] ss:$16 sps:$4 sm:$0xff]  }
 0x52b   :  { %11366 = vmatprep.subr.bf16.mxu1 %v15140_v23 }
 0x52c   :  { %11367 = vmatpush1.bf16.msra.mxu1 %v15138_v46 }
 0x52d   :  { %11368 = vmatprep.subr.bf16.mxu1 %v15143_v16 }
 0x530   :  { %11369 = vmatpush1.bf16.msra.mxu1 %v15141_v33 }
 0x531   :  { %11370 = vmatprep.subr.bf16.mxu1 %v15146_v27 }
 0x534   :  { %11371 = vmatpush1.bf16.msra.mxu1 %v15144_v29 }
 0x535   :  { %11372 = vmatprep.subr.bf16.mxu1 %v15149_v9 }
 0x538   :  { %11373 = vmatpush1.bf16.msra.mxu1 %v15147_v58 }
 0x539   :  { %11374 = vmatprep.subr.bf16.mxu1 %v15152_v60 }
 0x53c   :  { %11375 = vmatpush1.bf16.msra.mxu1 %v15150_v38 }
 0x53d   :  { %11376 = vmatprep.subr.bf16.mxu1 %v15155_v4  ;;  %v15163_v4 = vld [vmem:[%s19420_s7 + $0x8] sm:$0xff]  }
 0x540   :  { %11377 = vmatpush1.bf16.msra.mxu1 %v15153_v55  ;;  %v15166_v55 = vld [vmem:[%s19420_s7 + $0x10] sm:$0xff]  }
 0x541   :  { %11378 = vmatprep.subr.bf16.mxu1 %v15158_v24  ;;  %v15165_v24 = vld [vmem:[%s19420_s7 + $0x44] sm:$0xff]  }
 0x544   :  { %11379 = vmatpush1.bf16.msra.mxu1 %v15156_v28  ;;  %v15168_v28 = vld [vmem:[%s19420_s7 + $0x4c] sm:$0xff]  }
 0x545   :  { %11380 = vmatprep.subr.bf16.mxu1 %v15161_v42  ;;  %v15167_v42 = vld [vmem:[%s19420_s7 + $0x18] sm:$0xff]  }
 0x548   :  { %11381 = vmatpush1.bf16.msra.mxu1 %v15159_v40  ;;  %v15170_v40 = vld [vmem:[%s19420_s7 + $0x20] sm:$0xff]  }
 0x54b   :  { %11399 = vmatmul.mubr.bf16.vlgmr.msra.gmra.mxu1 %v19042_v36  ;;  %v15164_v36 = vld [vmem:[%s19420_s7 + $0x3c] sm:$0xff]  }
 0x54c   :  { %11408 = vmatprep.mubr.bf16.mxu1 %v19604_v19 }
 0x553   :  { %11409 = vmatmul.mubr.bf16.gmra.mxu1 %v19065_v1 }
 0x554   :  { %11418 = vmatprep.mubr.bf16.mxu1 %v19604_v19 }
 0x55b   :  { %11419 = vmatmul.mubr.bf16.gmra.mxu1 %v19088_v57 }
 0x55c   :  { %11428 = vmatprep.mubr.bf16.mxu1 %v19604_v19 }
 0x563   :  { %11429 = vmatmul.mubr.bf16.gmra.mxu1 %v19111_v14 }
 0x564   :  { %11438 = vmatprep.mubr.bf16.mxu1 %v19604_v19 }
 0x56b   :  { %11439 = vmatmul.mubr.bf16.gmra.mxu1 %v19130_v7 }
 0x56c   :  { %11448 = vmatprep.mubr.bf16.mxu1 %v19604_v19 }
 0x573   :  { %11449 = vmatmul.mubr.bf16.gmra.mxu1 %v19149_v22 }
 0x574   :  { %11458 = vmatprep.mubr.bf16.mxu1 %v19604_v19 }
 0x57b   :  { %11459 = vmatmul.mubr.bf16.gmra.mxu1 %v19168_v62 }
 0x57c   :  { %11468 = vmatprep.mubr.bf16.mxu1 %v19604_v19 }
 0x583   :  { %11469 = vmatmul.mubr.bf16.gmra.mxu1 %v19183_v21 }
 0x584   :  { %14750 = vmatprep.mubr.msk.bf16.mxu1 %vm11595_vm2, %v15164_v36  ;;  %v15172_v36 = vld [vmem:[%s19420_s7 + $0x5c] sm:$0xff]  }
 0x58b   :  { %v11287_v1 = vpop.f32.mrf.mxu0 }
 0x58d   :  { %v11289_v57 = vpop.f32.mrf.mxu0 }
 0x58f   :  { %v11291_v14 = vpop.f32.mrf.mxu0 }
 0x591   :  { %v11293_v7 = vpop.f32.mrf.mxu0 }
 0x593   :  { %v11297_v25 = vpop.f32.mrf.mxu0 }
 0x595   :  { %v11299_v22 = vpop.f32.mrf.mxu0 }
 0x597   :  { %v11301_v52 = vpop.f32.mrf.mxu0 }
 0x599   :  { %v11303_v50 = vpop.f32.mrf.mxu0 }
 0x59b   :  { %v11307_v59 = vpop.f32.mrf.mxu0 }
 0x59d   :  { %v11309_v62 = vpop.f32.mrf.mxu0 }
 0x59f   :  { %v11311_v20 = vpop.f32.mrf.mxu0 }
 0x5a1   :  { %v11313_v19 = vpop.f32.mrf.mxu0 }
 0x5a3   :  { %v11317_v56 = vpop.f32.mrf.mxu0 }
 0x5a5   :  { %v11319_v10 = vpop.f32.mrf.mxu0 }
 0x5a7   :  { %v11321_v51 = vpop.f32.mrf.mxu0 }
 0x5a9   :  { %v11323_v45 = vpop.f32.mrf.mxu0 }
 0x5ab   :  { %v11327_v35 = vpop.f32.mrf.mxu0 }
 0x5ac   :  { %v11479_v44 = vmax.f32 %v11287_v1, %v11327_v35  ;;  %v15171_v1 = vld [vmem:[%s19420_s7 + $0x28] sm:$0xff]  }
 0x5ad   :  { %v11329_v21 = vpop.f32.mrf.mxu0 }
 0x5ae   :  { %v11480_v11 = vmax.f32 %v11289_v57, %v11329_v21  ;;  %v15174_v57 = vld [vmem:[%s19420_s7 + $0x30] sm:$0xff]  }
 0x5af   :  { %v11331_v31 = vpop.f32.mrf.mxu0 }
 0x5b0   :  { %v11483_v41 = vmax.f32 %v11291_v14, %v11331_v31  ;;  %v15173_v14 = vld [vmem:[%s19420_s7 + $0x64] sm:$0xff]  }
 0x5b1   :  { %v11333_v0 = vpop.f32.mrf.mxu0 }
 0x5b2   :  { %v11511_v32 = vpack.c.bf16 %v11483_v41, %v11479_v44  ;;  %v11484_v12 = vmax.f32 %v11293_v7, %v11333_v0  ;;  %v15176_v7 = vld [vmem:[%s19420_s7 + $0x6c] sm:$0xff]  }
 0x5b3   :  { %v11337_v47 = vpop.f32.mrf.mxu0 }
 0x5b4   :  { %v11512_v30 = vpack.c.bf16 %v11484_v12, %v11480_v11  ;;  %v11487_v2 = vmax.f32 %v11297_v25, %v11337_v47  ;;  %v15175_v25 = vld [vmem:[%s19420_s7 + $0x38] ss:$0 sps:$4 sm:$0xff]  }
 0x5b5   :  { %v11339_v34 = vpop.f32.mrf.mxu0 }
 0x5b6   :  { %v11488_v27 = vmax.f32 %v11299_v22, %v11339_v34  ;;  %v15178_v22 = vld [vmem:[%s19420_s7 + $0x78] sm:$0xff]  }
 0x5b7   :  { %v11341_v5 = vpop.f32.mrf.mxu0 }
 0x5b8   :  { %v11491_v46 = vmax.f32 %v11301_v52, %v11341_v5  ;;  %v15177_v52 = vld [vmem:[%s19420_s7 + $0x74] ss:$0 sps:$4 sm:$0xff]  }
 0x5b9   :  { %v11343_v53 = vpop.f32.mrf.mxu0 }
 0x5ba   :  { %v11492_v29 = vmax.f32 %v11303_v50, %v11343_v53  ;;  %v11515_v60 = vpack.c.bf16 %v11491_v46, %v11487_v2  ;;  %v15180_v50 = vld [vmem:[%s19420_s7 + $0xb4] sm:$0xff]  }
 0x5bb   :  { %v11347_v63 = vpop.f32.mrf.mxu0 }
 0x5bc   :  { %v11495_v61 = vmax.f32 %v11307_v59, %v11347_v63  ;;  %v11516_v38 = vpack.c.bf16 %v11492_v29, %v11488_v27 }
 0x5bd   :  { %v11349_v37 = vpop.f32.mrf.mxu0 }
 0x5be   :  { %v11496_v18 = vmax.f32 %v11309_v62, %v11349_v37 }
 0x5bf   :  { %v11351_v8 = vpop.f32.mrf.mxu0 }
 0x5c0   :  { %v11499_v39 = vmax.f32 %v11311_v20, %v11351_v8 }
 0x5c1   :  { %v11353_v49 = vpop.f32.mrf.mxu0 }
 0x5c2   :  { %v11500_v13 = vmax.f32 %v11313_v19, %v11353_v49  ;;  %v11519_v23 = vpack.c.bf16 %v11499_v39, %v11495_v61 }
 0x5c3   :  { %v11357_v6 = vpop.f32.mrf.mxu0 }
 0x5c4   :  { %v11503_v17 = vmax.f32 %v11317_v56, %v11357_v6  ;;  %v11520_v9 = vpack.c.bf16 %v11500_v13, %v11496_v18 }
 0x5c5   :  { %v11359_v15 = vpop.f32.mrf.mxu0 }
 0x5c6   :  { %v11504_v48 = vmax.f32 %v11319_v10, %v11359_v15 }
 0x5c7   :  { %v11361_v54 = vpop.f32.mrf.mxu0 }
 0x5c8   :  { %v11507_v3 = vmax.f32 %v11321_v51, %v11361_v54 }
 0x5c9   :  { %v11363_v43 = vpop.f32.mrf.mxu0 }
 0x5ca   :  { %v11523_v16 = vpack.c.bf16 %v11507_v3, %v11503_v17  ;;  %v11508_v33 = vmax.f32 %v11323_v45, %v11363_v43 }
 0x5cc   :  { %v11524_v58 = vpack.c.bf16 %v11508_v33, %v11504_v48  ;;  %14718 = vmatprep.subr.bf16.mxu0 %v11523_v16 }
 0x5cd   :  { %14719 = vmatpush3.bf16.msra.mxu0 %v11523_v16 }
 0x5ce   :  { %14742 = vmatprep.subr.bf16.mxu1 %v11524_v58  ;;  %14720 = vmatprep.subr.bf16.mxu0 %v11519_v23 }
 0x5cf   :  { %14743 = vmatpush3.bf16.msra.mxu1 %v11524_v58 }
 0x5d0   :  { %14744 = vmatprep.subr.bf16.mxu1 %v11520_v9 }
 0x5d1   :  { %14721 = vmatpush3.bf16.msra.mxu0 %v11519_v23 }
 0x5d2   :  { %14722 = vmatprep.subr.bf16.mxu0 %v11515_v60 }
 0x5d3   :  { %14745 = vmatpush3.bf16.msra.mxu1 %v11520_v9 }
 0x5d4   :  { %14746 = vmatprep.subr.bf16.mxu1 %v11516_v38 }
 0x5d5   :  { %14723 = vmatpush3.bf16.msra.mxu0 %v11515_v60 }
 0x5d6   :  { %14724 = vmatprep.subr.bf16.mxu0 %v11511_v32 }
 0x5d7   :  { %14747 = vmatpush3.bf16.msra.mxu1 %v11516_v38 }
 0x5d8   :  { %14748 = vmatprep.subr.bf16.mxu1 %v11512_v30 }
 0x5d9   :  { %14725 = vmatpush3.bf16.msra.mxu0 %v11511_v32 }
 0x5db   :  { %14749 = vmatpush3.bf16.msra.mxu1 %v11512_v30 }
 0x5dc   :  { %14727 = vmatmul.mubr.msk.bf16.vlgmr.msra.gmra.mxu0 %vm11595_vm2, %v15163_v4 }
 0x5dd   :  { %14730 = vmatprep.mubr.msk.bf16.mxu0 %vm11595_vm2, %v15166_v55 }
 0x5de   :  { %14751 = vmatmul.mubr.msk.bf16.vlgmr.msra.gmra.mxu1 %vm11595_vm2, %v15165_v24 }
 0x5df   :  { %14754 = vmatprep.mubr.msk.bf16.mxu1 %vm11595_vm2, %v15168_v28 }
 0x5e4   :  { %14731 = vmatmul.mubr.msk.bf16.gmra.mxu0 %vm11595_vm2, %v15167_v42 }
 0x5e5   :  { %14734 = vmatprep.mubr.msk.bf16.mxu0 %vm11595_vm2, %v15170_v40 }
 0x5e6   :  { %14755 = vmatmul.mubr.msk.bf16.gmra.mxu1 %vm11595_vm2, %v15169_v26 }
 0x5e7   :  { %14758 = vmatprep.mubr.msk.bf16.mxu1 %vm11595_vm2, %v15172_v36 }
 0x5ec   :  { %14735 = vmatmul.mubr.msk.bf16.gmra.mxu0 %vm11595_vm2, %v15171_v1  ;;  %v15179_v1 = vld [vmem:[%s19420_s7 + $0x80] sm:$0xff]  }
 0x5ed   :  { %14738 = vmatprep.mubr.msk.bf16.mxu0 %vm11595_vm2, %v15174_v57  ;;  %v15182_v57 = vld [vmem:[%s19420_s7 + $0x88] sm:$0xff]  }
 0x5ee   :  { %14759 = vmatmul.mubr.msk.bf16.gmra.mxu1 %vm11595_vm2, %v15173_v14  ;;  %v15181_v14 = vld [vmem:[%s19420_s7 + $0xbc] sm:$0xff]  }
 0x5ef   :  { %14762 = vmatprep.mubr.msk.bf16.mxu1 %vm11595_vm2, %v15176_v7  ;;  %v15184_v7 = vld [vmem:[%s19420_s7 + $0xc4] sm:$0xff]  }
 0x5f4   :  { %14739 = vmatmul.mubr.msk.bf16.gmra.mxu0 %vm11595_vm2, %v15175_v25  ;;  %v15183_v25 = vld [vmem:[%s19420_s7 + $0x90] sm:$0xff]  }
 0x5f5   :  { %14774 = vmatprep.mubr.msk.bf16.mxu0 %vm11595_vm2, %v15178_v22  ;;  %v15186_v22 = vld [vmem:[%s19420_s7 + $0x98] sm:$0xff]  }
 0x5f6   :  { %14763 = vmatmul.mubr.msk.bf16.gmra.mxu1 %vm11595_vm2, %v15177_v52  ;;  %v15185_v52 = vld [vmem:[%s19420_s7 + $0xcc] sm:$0xff]  }
 0x5f7   :  { %14798 = vmatprep.mubr.msk.bf16.mxu1 %vm11595_vm2, %v15180_v50  ;;  %v15188_v50 = vld [vmem:[%s19420_s7 + $0xd4] sm:$0xff]  }
 0x60b   :  { %v11400_v59 = vpop.f32.mrf.mxu1 }
 0x60d   :  { %v11402_v62 = vpop.f32.mrf.mxu1 }
 0x60f   :  { %v11404_v20 = vpop.f32.mrf.mxu1 }
 0x611   :  { %v11406_v19 = vpop.f32.mrf.mxu1 }
 0x613   :  { %v11410_v56 = vpop.f32.mrf.mxu1 }
 0x615   :  { %v11412_v10 = vpop.f32.mrf.mxu1 }
 0x617   :  { %v11414_v51 = vpop.f32.mrf.mxu1 }
 0x619   :  { %v11416_v45 = vpop.f32.mrf.mxu1 }
 0x61b   :  { %v11420_v35 = vpop.f32.mrf.mxu1 }
 0x61d   :  { %v11422_v21 = vpop.f32.mrf.mxu1 }
 0x61f   :  { %v11424_v44 = vpop.f32.mrf.mxu1 }
 0x621   :  { %v11426_v31 = vpop.f32.mrf.mxu1 }
 0x623   :  { %v11430_v11 = vpop.f32.mrf.mxu1 }
 0x625   :  { %v11432_v41 = vpop.f32.mrf.mxu1 }
 0x627   :  { %v11434_v0 = vpop.f32.mrf.mxu1 }
 0x629   :  { %v11436_v32 = vpop.f32.mrf.mxu1 }
 0x62b   :  { %v11440_v12 = vpop.f32.mrf.mxu1 }
 0x62c   :  { %v11481_v34 = vmax.f32 %v11400_v59, %v11440_v12  ;;  %v15187_v59 = vld [vmem:[%s19420_s7 + $0xa0] sm:$0xff]  }
 0x62d   :  { %v11442_v47 = vpop.f32.mrf.mxu1 }
 0x62e   :  { %v11482_v63 = vmax.f32 %v11402_v62, %v11442_v47  ;;  %v15190_v62 = vld [vmem:[%s19420_s7 + $0xa8] sm:$0xff]  }
 0x62f   :  { %v11444_v30 = vpop.f32.mrf.mxu1 }
 0x630   :  { %v11485_v5 = vmax.f32 %v11404_v20, %v11444_v30  ;;  %v15189_v20 = vld [vmem:[%s19420_s7 + $0xdc] sm:$0xff]  }
 0x631   :  { %v11446_v53 = vpop.f32.mrf.mxu1 }
 0x632   :  { %v11513_v37 = vpack.c.bf16 %v11485_v5, %v11481_v34  ;;  %v11486_v8 = vmax.f32 %v11406_v19, %v11446_v53  ;;  %v15192_v19 = vld [vmem:[%s19420_s7 + $0xe4] sm:$0xff]  }
 0x633   :  { %v11450_v49 = vpop.f32.mrf.mxu1 }
 0x634   :  { %v11514_v6 = vpack.c.bf16 %v11486_v8, %v11482_v63  ;;  %v11489_v24 = vmax.f32 %v11410_v56, %v11450_v49  ;;  %v15191_v56 = vld [vmem:[%s19420_s7 + $0xb0] ss:$0 sps:$4 sm:$0xff]  }
 0x635   :  { %v11452_v15 = vpop.f32.mrf.mxu1 }
 0x636   :  { %v11490_v40 = vmax.f32 %v11412_v10, %v11452_v15  ;;  %v15193_v10 = vld [vmem:[%s19420_s7 + $0xec] ss:$0 sps:$4 sm:$0xff]  }
 0x637   :  { %v11454_v61 = vpop.f32.mrf.mxu1 }
 0x638   :  { %v11493_v60 = vmax.f32 %v11414_v51, %v11454_v61  ;;  %v19345_v51 = vpop.permute.xlu0 %11788 }
 0x639   :  { %v11456_v39 = vpop.f32.mrf.mxu1 }
 0x63a   :  { %v11494_v28 = vmax.f32 %v11416_v45, %v11456_v39  ;;  %v11517_v26 = vpack.c.bf16 %v11493_v60, %v11489_v24  ;;  %v19347_v45 = vpop.permute.xlu1 %11778 }
 0x63b   :  { %v11460_v17 = vpop.f32.mrf.mxu1 }
 0x63c   :  { %v11497_v16 = vmax.f32 %v11420_v35, %v11460_v17  ;;  %v11518_v36 = vpack.c.bf16 %v11494_v28, %v11490_v40  ;;  %v19349_v35 = vpop.permute.xlu0 %11783 }
 0x63d   :  { %v11462_v54 = vpop.f32.mrf.mxu1 }
 0x63e   :  { %v11498_v38 = vmax.f32 %v11422_v21, %v11462_v54  ;;  %v11769_v21 = vpop.permute.xlu1 %11768 }
 0x63f   :  { %v11464_v18 = vpop.f32.mrf.mxu1 }
 0x640   :  { %v11501_v43 = vmax.f32 %v11424_v44, %v11464_v18  ;;  %v11774_v44 = vpop.permute.xlu0 %11773 }
 0x641   :  { %v11466_v13 = vpop.f32.mrf.mxu1 }
 0x642   :  { %v11502_v27 = vmax.f32 %v11426_v31, %v11466_v13  ;;  %v11521_v4 = vpack.c.bf16 %v11501_v43, %v11497_v16  ;;  %v11759_v31 = vpop.permute.xlu1 %11758 }
 0x643   :  { %v11470_v48 = vpop.f32.mrf.mxu1 }
 0x644   :  { %v11505_v46 = vmax.f32 %v11430_v11, %v11470_v48  ;;  %v11522_v42 = vpack.c.bf16 %v11502_v27, %v11498_v38  ;;  %v11764_v11 = vpop.permute.xlu0 %11763 }
 0x645   :  { %v11472_v3 = vpop.f32.mrf.mxu1 }
 0x646   :  { %v11506_v29 = vmax.f32 %v11432_v41, %v11472_v3  ;;  %v11749_v41 = vpop.permute.xlu1 %11748 }
 0x647   :  { %v11474_v2 = vpop.f32.mrf.mxu1 }
 0x648   :  { %v11509_v23 = vmax.f32 %v11434_v0, %v11474_v2  ;;  %v11754_v0 = vpop.permute.xlu0 %11753 }
 0x649   :  { %v11476_v33 = vpop.f32.mrf.mxu1 }
 0x64a   :  { %v11525_v9 = vpack.c.bf16 %v11509_v23, %v11505_v46  ;;  %v11510_v58 = vmax.f32 %v11436_v32, %v11476_v33  ;;  %v11739_v32 = vpop.permute.xlu1 %11738 }
 0x64c   :  { %v11526_v55 = vpack.c.bf16 %v11510_v58, %v11506_v29  ;;  %14766 = vmatprep.subr.bf16.mxu0 %v11525_v9  ;;  %v11744_v12 = vpop.permute.xlu0 %11743 }
 0x64d   :  { %14767 = vmatpush3.bf16.msra.mxu0 %v11525_v9 }
 0x64e   :  { %14768 = vmatprep.subr.bf16.mxu0 %v11521_v4  ;;  %14790 = vmatprep.subr.bf16.mxu1 %v11526_v55  ;;  %v11729_v47 = vpop.permute.xlu1 %11728 }
 0x64f   :  { %14791 = vmatpush3.bf16.msra.mxu1 %v11526_v55 }
 0x650   :  { %14792 = vmatprep.subr.bf16.mxu1 %v11522_v42  ;;  %v11734_v30 = vpop.permute.xlu0 %11733 }
 0x651   :  { %14769 = vmatpush3.bf16.msra.mxu0 %v11521_v4 }
 0x652   :  { %14770 = vmatprep.subr.bf16.mxu0 %v11517_v26  ;;  %v11719_v5 = vpop.permute.xlu1 %11718 }
 0x653   :  { %14793 = vmatpush3.bf16.msra.mxu1 %v11522_v42 }
 0x654   :  { %14794 = vmatprep.subr.bf16.mxu1 %v11518_v36  ;;  %v11724_v61 = vpop.permute.xlu0 %11723 }
 0x655   :  { %14771 = vmatpush3.bf16.msra.mxu0 %v11517_v26 }
 0x656   :  { %14772 = vmatprep.subr.bf16.mxu0 %v11513_v37 }
 0x657   :  { %14795 = vmatpush3.bf16.msra.mxu1 %v11518_v36 }
 0x658   :  { %14796 = vmatprep.subr.bf16.mxu1 %v11514_v6 }
 0x659   :  { %14773 = vmatpush3.bf16.msra.mxu0 %v11513_v37 }
 0x65b   :  { %14797 = vmatpush3.bf16.msra.mxu1 %v11514_v6 }
 0x65c   :  { %14775 = vmatmul.mubr.msk.bf16.vlgmr.msra.gmra.mxu0 %vm11595_vm2, %v15179_v1 }
 0x65d   :  { %14778 = vmatprep.mubr.msk.bf16.mxu0 %vm11595_vm2, %v15182_v57 }
 0x65e   :  { %14799 = vmatmul.mubr.msk.bf16.vlgmr.msra.gmra.mxu1 %vm11595_vm2, %v15181_v14 }
 0x65f   :  { %14802 = vmatprep.mubr.msk.bf16.mxu1 %vm11595_vm2, %v15184_v7 }
 0x664   :  { %14779 = vmatmul.mubr.msk.bf16.gmra.mxu0 %vm11595_vm2, %v15183_v25 }
 0x665   :  { %14782 = vmatprep.mubr.msk.bf16.mxu0 %vm11595_vm2, %v15186_v22 }
 0x666   :  { %14803 = vmatmul.mubr.msk.bf16.gmra.mxu1 %vm11595_vm2, %v15185_v52 }
 0x667   :  { %14806 = vmatprep.mubr.msk.bf16.mxu1 %vm11595_vm2, %v15188_v50 }
 0x66c   :  { %14783 = vmatmul.mubr.msk.bf16.gmra.mxu0 %vm11595_vm2, %v15187_v59 }
 0x66d   :  { %14786 = vmatprep.mubr.msk.bf16.mxu0 %vm11595_vm2, %v15190_v62 }
 0x66e   :  { %14807 = vmatmul.mubr.msk.bf16.gmra.mxu1 %vm11595_vm2, %v15189_v20 }
 0x66f   :  { %14810 = vmatprep.mubr.msk.bf16.mxu1 %vm11595_vm2, %v15192_v19 }
 0x674   :  { %14787 = vmatmul.mubr.msk.bf16.gmra.mxu0 %vm11595_vm2, %v15191_v56 }
 0x676   :  { %14811 = vmatmul.mubr.msk.bf16.gmra.mxu1 %vm11595_vm2, %v15193_v10 }
 0x69c   :  { %v14728_v34 = vpop.f32.mrf.mxu0 }
 0x69d   :  { %v11793_v53 = vadd.f32 %v14728_v34, %v11729_v47 }
 0x69e   :  { %v11654_v63 = vpop.f32.mrf.mxu0  ;;  %v14752_v37 = vpop.f32.mrf.mxu1 }
 0x69f   :  { %v11791_v8 = vadd.f32 %v11719_v5, %v11654_v63  ;;  %v11982_v49 = vadd.f32 %v14752_v37, %v11793_v53 }
 0x6a0   :  { %v14729_v6 = vpop.f32.mrf.mxu0  ;;  %v11918_v15 = vpop.f32.mrf.mxu1 }
 0x6a1   :  { %v11794_v39 = vadd.f32 %v14729_v6, %v11734_v30  ;;  %v11980_v17 = vadd.f32 %v11918_v15, %v11791_v8 }
 0x6a2   :  { %v11657_v54 = vpop.f32.mrf.mxu0  ;;  %v14753_v18 = vpop.f32.mrf.mxu1 }
 0x6a3   :  { %v11792_v13 = vadd.f32 %v11724_v61, %v11657_v54  ;;  %v11983_v48 = vadd.f32 %v14753_v18, %v11794_v39 }
 0x6a4   :  { %v14732_v3 = vpop.f32.mrf.mxu0  ;;  %v11921_v2 = vpop.f32.mrf.mxu1 }
 0x6a5   :  { %v11797_v43 = vadd.f32 %v14732_v3, %v11749_v41  ;;  %v11981_v46 = vadd.f32 %v11921_v2, %v11792_v13 }
 0x6a6   :  { %v11670_v23 = vpop.f32.mrf.mxu0  ;;  %v14756_v16 = vpop.f32.mrf.mxu1 }
 0x6a7   :  { %v11795_v33 = vadd.f32 %v11739_v32, %v11670_v23  ;;  %v11986_v27 = vadd.f32 %v14756_v16, %v11797_v43 }
 0x6a8   :  { %v14733_v29 = vpop.f32.mrf.mxu0  ;;  %v11934_v9 = vpop.f32.mrf.mxu1 }
 0x6a9   :  { %v11798_v58 = vadd.f32 %v14733_v29, %v11754_v0  ;;  %v19351_v60 = vadd.f32 %v11934_v9, %v11795_v33 }
 0x6aa   :  { %v11673_v38 = vpop.f32.mrf.mxu0  ;;  %v14757_v4 = vpop.f32.mrf.mxu1 }
 0x6ab   :  { %v11796_v55 = vadd.f32 %v11744_v12, %v11673_v38  ;;  %v19353_v24 = vadd.f32 %v14757_v4, %v11798_v58 }
 0x6ac   :  { %v14736_v28 = vpop.f32.mrf.mxu0  ;;  %v11937_v42 = vpop.f32.mrf.mxu1 }
 0x6ad   :  { %v11801_v40 = vadd.f32 %v14736_v28, %v11769_v21  ;;  %v19355_v26 = vadd.f32 %v11937_v42, %v11796_v55 }
 0x6ae   :  { %v11686_v36 = vpop.f32.mrf.mxu0  ;;  %v14760_v1 = vpop.f32.mrf.mxu1 }
 0x6af   :  { %v11799_v57 = vadd.f32 %v11759_v31, %v11686_v36  ;;  %v19357_v14 = vadd.f32 %v14760_v1, %v11801_v40 }
 0x6b0   :  { %v14737_v7 = vpop.f32.mrf.mxu0  ;;  %v11950_v25 = vpop.f32.mrf.mxu1 }
 0x6b1   :  { %v11802_v22 = vadd.f32 %v14737_v7, %v11774_v44  ;;  %v19359_v52 = vadd.f32 %v11950_v25, %v11799_v57 }
 0x6b2   :  { %v11689_v50 = vpop.f32.mrf.mxu0  ;;  %v14761_v59 = vpop.f32.mrf.mxu1 }
 0x6b3   :  { %v11800_v62 = vadd.f32 %v11764_v11, %v11689_v50  ;;  %v19361_v20 = vadd.f32 %v14761_v59, %v11802_v22  ;;  %v15303_v11 = vmov 0.0  }
 0x6b4   :  { %v14740_v19 = vpop.f32.mrf.mxu0  ;;  %v11953_v56 = vpop.f32.mrf.mxu1  ;;  %14814 = vmatprep.subr.bf16.mxu0 %v15303_v11  ;;  %14830 = vmatprep.mubr.msk.bf16.mxu0 %vm15304_vm3, %v15303_v11 }
 0x6b5   :  { %v11805_v10 = vadd.f32 %v14740_v19, %v19345_v51  ;;  %v19364_v21 = vadd.f32 %v11953_v56, %v11800_v62 }
 0x6b6   :  { %v11702_v41 = vpop.f32.mrf.mxu0  ;;  %v14764_v31 = vpop.f32.mrf.mxu1 }
 0x6b7   :  { %v11803_v0 = vadd.f32 %v19347_v45, %v11702_v41  ;;  %v19367_v32 = vadd.f32 %v14764_v31, %v11805_v10 }
 0x6b8   :  { %v14741_v44 = vpop.f32.mrf.mxu0  ;;  %v11966_v12 = vpop.f32.mrf.mxu1 }
 0x6b9   :  { %v19369_v47 = vadd.f32 %v11966_v12, %v11803_v0 }
 0x6ba   :  { %v14765_v30 = vpop.f32.mrf.mxu1  ;;  %v11705_v51 = vpop.f32.mrf.mxu0 }
 0x6bb   :  { %v11804_v31 = vadd.f32 %v19349_v35, %v11705_v51 }
 0x6bc   :  { %v19373_v34 = vpop.f32.mrf.mxu1 }
 0x6bd   :  { %v11993_v35 = vadd.f32 %v19373_v34, %v11804_v31 }
 0x71c   :  { %v14776_v5 = vpop.f32.mrf.mxu0 }
 0x71d   :  { %v12171_v53 = vadd.f32 %v14776_v5, %v11982_v49 }
 0x71e   :  { %v12107_v63 = vpop.f32.mrf.mxu0  ;;  %v14800_v45 = vpop.f32.mrf.mxu1 }
 0x71f   :  { %v12169_v37 = vadd.f32 %v12107_v63, %v11980_v17  ;;  %v12360_v8 = vadd.f32 %v14800_v45, %v12171_v53 }
 0x720   :  { %v14777_v6 = vpop.f32.mrf.mxu0  ;;  %v12296_v15 = vpop.f32.mrf.mxu1 }
 0x721   :  { %v12172_v61 = vadd.f32 %v14777_v6, %v11983_v48  ;;  %v12358_v39 = vadd.f32 %v12296_v15, %v12169_v37  ;;  %15195 = vtanh.f32 %v12360_v8 }
 0x722   :  { %v12110_v54 = vpop.f32.mrf.mxu0  ;;  %v14801_v18 = vpop.f32.mrf.mxu1 }
 0x723   :  { %v12170_v13 = vadd.f32 %v12110_v54, %v11981_v46  ;;  %v12361_v3 = vadd.f32 %v14801_v18, %v12172_v61 }
 0x724   :  { %v14780_v2 = vpop.f32.mrf.mxu0  ;;  %v12299_v43 = vpop.f32.mrf.mxu1 }
 0x725   :  { %15197 = vtanh.f32 %v12361_v3  ;;  %v12175_v23 = vadd.f32 %v14780_v2, %v11986_v27  ;;  %v12359_v16 = vadd.f32 %v12299_v43, %v12170_v13 }
 0x726   :  { %15199 = vtanh.f32 %v12358_v39  ;;  %v12123_v49 = vpop.f32.mrf.mxu0  ;;  %v14804_v33 = vpop.f32.mrf.mxu1 }
 0x727   :  { %15201 = vtanh.f32 %v12359_v16  ;;  %v12173_v17 = vadd.f32 %v12123_v49, %v19351_v60  ;;  %v12364_v29 = vadd.f32 %v14804_v33, %v12175_v23 }
 0x728   :  { %v14781_v9 = vpop.f32.mrf.mxu0  ;;  %v12312_v48 = vpop.f32.mrf.mxu1 }
 0x729   :  { %v12176_v58 = vadd.f32 %v14781_v9, %v19353_v24  ;;  %v12362_v38 = vadd.f32 %v12312_v48, %v12173_v17  ;;  %15203 = vtanh.f32 %v12364_v29 }
 0x72a   :  { %v12126_v46 = vpop.f32.mrf.mxu0  ;;  %v14805_v4 = vpop.f32.mrf.mxu1 }
 0x72b   :  { %v12174_v55 = vadd.f32 %v12126_v46, %v19355_v26  ;;  %v12365_v28 = vadd.f32 %v14805_v4, %v12176_v58  ;;  %v12403_v46 = vpop.permute.xlu1 %12402 }
 0x72c   :  { %v14784_v27 = vpop.f32.mrf.mxu0  ;;  %v12315_v42 = vpop.f32.mrf.mxu1 }
 0x72d   :  { %15205 = vtanh.f32 %v12365_v28  ;;  %v12179_v40 = vadd.f32 %v14784_v27, %v19357_v14  ;;  %v12363_v36 = vadd.f32 %v12315_v42, %v12174_v55  ;;  %v12408_v42 = vpop.permute.xlu0 %12407 }
 0x72e   :  { %15207 = vtanh.f32 %v12362_v38  ;;  %v12139_v60 = vpop.f32.mrf.mxu0  ;;  %v14808_v1 = vpop.f32.mrf.mxu1  ;;  %v15194_v38 = vld [vmem:[%s19421_s9] sm:$0x1f]  }
 0x72f   :  { %15209 = vtanh.f32 %v12363_v36  ;;  %v12177_v57 = vadd.f32 %v12139_v60, %v19359_v52  ;;  %v12368_v24 = vadd.f32 %v14808_v1, %v12179_v40  ;;  %v19380_v22 = vpop.eup %15195 }
 0x730   :  { %v14785_v7 = vpop.f32.mrf.mxu0  ;;  %v12328_v25 = vpop.f32.mrf.mxu1 }
 0x731   :  { %v12180_v26 = vadd.f32 %v14785_v7, %v19361_v20  ;;  %v12366_v59 = vadd.f32 %v12328_v25, %v12177_v57  ;;  %15211 = vtanh.f32 %v12368_v24 }
 0x732   :  { %v19383_v50 = vpop.eup %15197  ;;  %v12142_v62 = vpop.f32.mrf.mxu0 }
 0x733   :  { %v14809_v19 = vpop.f32.mrf.mxu1  ;;  %v19385_v14 = vpop.eup %15199  ;;  %v12178_v56 = vadd.f32 %v12142_v62, %v19364_v21  ;;  %v12389_v52 = vpack.c.bf16 %v19383_v50, %v19380_v22 }
 0x734   :  { %v12369_v10 = vadd.f32 %v14809_v19, %v12180_v26  ;;  %v15202_v41 = vpop.eup %15201  ;;  %v14788_v0 = vpop.f32.mrf.mxu0 }
 0x735   :  { %v12331_v44 = vpop.f32.mrf.mxu1  ;;  %v12183_v20 = vadd.f32 %v14788_v0, %v19367_v32  ;;  %v12388_v30 = vpack.c.bf16 %v15202_v41, %v19385_v14 }
 0x736   :  { %15213 = vtanh.f32 %v12369_v10  ;;  %v12367_v12 = vadd.f32 %v12331_v44, %v12178_v56  ;;  %v12155_v5 = vpop.f32.mrf.mxu0  ;;  %v15204_v8 = vpop.eup %15203 }
 0x737   :  { %15215 = vtanh.f32 %v12366_v59  ;;  %v14812_v53 = vpop.f32.mrf.mxu1  ;;  %v12181_v21 = vadd.f32 %v12155_v5, %v19369_v47 }
 0x738   :  { %15217 = vtanh.f32 %v12367_v12  ;;  %v12372_v63 = vadd.f32 %v14812_v53, %v12183_v20  ;;  %v14789_v45 = vpop.f32.mrf.mxu0 }
 0x739   :  { %v12344_v37 = vpop.f32.mrf.mxu1 }
 0x73a   :  { %15219 = vtanh.f32 %v12372_v63  ;;  %v15206_v51 = vpop.eup %15205  ;;  %v12370_v6 = vadd.f32 %v12344_v37, %v12181_v21  ;;  %v12158_v15 = vpop.f32.mrf.mxu0 }
 0x73b   :  { %v14813_v32 = vpop.f32.mrf.mxu1  ;;  %v15208_v61 = vpop.eup %15207  ;;  %v12182_v39 = vadd.f32 %v12158_v15, %v11993_v35  ;;  %v12391_v54 = vpack.c.bf16 %v15206_v51, %v15204_v8 }
 0x73c   :  { %v15210_v18 = vpop.eup %15209  ;;  %15221 = vtanh.f32 %v12370_v6 }
 0x73d   :  { %v12347_v13 = vpop.f32.mrf.mxu1  ;;  %v12390_v2 = vpack.c.bf16 %v15210_v18, %v15208_v61 }
 0x73e   :  { %v12371_v3 = vadd.f32 %v12347_v13, %v12182_v39  ;;  %v15212_v47 = vpop.eup %15211 }
 0x740   :  { %15223 = vtanh.f32 %v12371_v3 }
 0x743   :  { %v15214_v43 = vpop.eup %15213 }
 0x744   :  { %v15216_v23 = vpop.eup %15215  ;;  %v12393_v16 = vpack.c.bf16 %v15214_v43, %v15212_v47 }
 0x745   :  { %v15218_v49 = vpop.eup %15217 }
 0x746   :  { %v12392_v34 = vpack.c.bf16 %v15218_v49, %v15216_v23 }
 0x747   :  { %v15220_v33 = vpop.eup %15219 }
 0x748   :  { %v12395_v17 = vpack.c.bf16 %v15220_v33, %v15220_v33 }
 0x749   :  { %v15222_v9 = vpop.eup %15221 }
 0x74a   :  { %v12421_v29 = vsel %vm12419_vm4, %v12395_v17, 0 }
 0x74b   :  { %14815 = vmatpush3.bf16.msra.mxu0 %v12421_v29 }
 0x74c   :  { %14816 = vmatprep.subr.bf16.mxu0 %v15303_v11 }
 0x74d   :  { %v15224_v48 = vpop.eup %15223 }
 0x74e   :  { %v12394_v58 = vpack.c.bf16 %v15224_v48, %v15222_v9 }
 0x750   :  { %14817 = vmatpush3.bf16.msra.mxu0 %v12394_v58 }
 0x751   :  { %14818 = vmatprep.subr.bf16.mxu0 %v15303_v11 }
 0x754   :  { %14819 = vmatpush3.bf16.msra.mxu0 %v12393_v16 }
 0x755   :  { %14820 = vmatprep.subr.bf16.mxu0 %v15303_v11 }
 0x758   :  { %14821 = vmatpush3.bf16.msra.mxu0 %v12392_v34 }
 0x759   :  { %14822 = vmatprep.subr.bf16.mxu0 %v15303_v11 }
 0x75c   :  { %14823 = vmatpush3.bf16.msra.mxu0 %v12391_v54 }
 0x75d   :  { %14824 = vmatprep.subr.bf16.mxu0 %v15303_v11 }
 0x760   :  { %14825 = vmatpush3.bf16.msra.mxu0 %v12390_v2 }
 0x761   :  { %14826 = vmatprep.subr.bf16.mxu0 %v15303_v11 }
 0x764   :  { %14827 = vmatpush3.bf16.msra.mxu0 %v12389_v52 }
 0x765   :  { %14828 = vmatprep.subr.bf16.mxu0 %v15303_v11 }
 0x768   :  { %14829 = vmatpush3.bf16.msra.mxu0 %v12388_v30 }
 0x76b   :  { %14831 = vmatmul.mubr.msk.bf16.vlgmr.msra.gmra.mxu0 %vm12415_vm5, %v15194_v38 }
 0x82b   :  { %v12457_v4 = vpop.f32.mrf.mxu0 }
 0x82c   :  { %v12458_v55 = vadd.f32 %v12457_v4, %v12403_v46 }
 0x82d   :  { %v14832_v28 = vpop.f32.mrf.mxu0 }
 0x82e   :  { %v12464_v27 = vmul.f32 0.5, %v12458_v55 }
 0x82f   :  { %v12460_v40 = vpop.f32.mrf.mxu0 }
 0x830   :  { %15225 = vtanh.f32 %v12464_v27  ;;  %v12461_v36 = vadd.f32 %v12460_v40, %v12408_v42 }
 0x831   :  { %v14833_v60 = vpop.f32.mrf.mxu0 }
 0x832   :  { %v12465_v1 = vmul.f32 0.5, %v12461_v36 }
 0x834   :  { %15227 = vtanh.f32 %v12465_v1 }
 0x83d   :  { %v15226_v11 = vpop.eup %15225 }
 0x83e   :  { %v12468_v57 = vadd.f32 1.0, %v15226_v11 }
 0x840   :  { %v12470_v24 = vmul.f32 0.5, %v12468_v57 }
 0x841   :  { %v15228_v7 = vpop.eup %15227 }
 0x842   :  { %12472 = vst [vmem:[%s19422_s11] sm:$0xff] %v12470_v24  ;;  %v12469_v25 = vadd.f32 1.0, %v15228_v7 }
 0x844   :  { %v12471_v22 = vmul.f32 0.5, %v12469_v25 }
 0x846   :  { %12473 = vst [vmem:[%s19422_s11 + $0x8] sm:$0x3] %v12471_v22 }

</bundles_post_ra>
